<compile_context>
chip_gen: v7x
topology: tpu7x:2x2x1
jax: 0.10.0
libtpu: 0.0.40
codegen_flags: <defaults>
</compile_context>

<pallas_src>
import functools
import math

import jax
import jax.numpy as jnp
from jax.experimental import pallas as pl
from jax.experimental.pallas import tpu as pltpu

# Module defaults: 10 layers, hidden 5, fs 128.
NUM_LAYERS = 10
HIDDEN_MODEL = 5     # true model hidden size (nn.LSTM hidden_dim)
HIDDEN_PAD = 8       # padded hidden size used inside the kernel (multiple of 8)
FS = 128             # feature size
SEQ = 8              # timesteps per sequence
BATCH = 8            # sequences per group (sublane axis)
GROUPS = 2           # grid points ("parallel" axis; feeds both v7x TCs)


def _offsets(FS_, H, L):
    """Static row offsets of the packed weight slab (shared by packer & kernel)."""
    off_whh0 = FS_
    off_fused = FS_ + H
    off_bias = off_fused + (L - 1) * 2 * H
    bias_pad = ((L + 7) // 8) * 8
    off_wout = off_bias + bias_pad
    off_bout = off_wout + H
    total = ((off_bout + 1 + 7) // 8) * 8
    return off_whh0, off_fused, off_bias, off_wout, off_bout, total


def rezipnet_kernel(x_ref, slab_ref, y_ref, htop_ref, *, T, B, L, H):
    """One group of B sequences, all T steps, all L layers.

    x_ref    : (T*B, FS)   inputs, row index = t*B + b
    slab_ref : (R, 4H)     packed weights/biases (see pack_params)
    y_ref    : (T*B, 1)    sigmoid(hidden2prob(h_top))
    htop_ref : (T*B, H)    VMEM scratch for the top-layer hidden states
    """
    FSdim = x_ref.shape[1]
    off_whh0, off_fused, off_bias, off_wout, off_bout, _ = _offsets(FSdim, H, L)

    # ---- hoisted, loop-invariant slices (all static) ------------------------
    wih0 = slab_ref[0:FSdim, :]                                    # (FS, 4H)
    whh0 = slab_ref[off_whh0:off_whh0 + H, :]                      # (H, 4H)
    wfused = [slab_ref[off_fused + (l - 1) * 2 * H:
                       off_fused + l * 2 * H, :] for l in range(1, L)]  # (2H,4H)
    b_all = slab_ref[off_bias:off_bias + L, :]                     # (L, 4H)
    bias = [b_all[l:l + 1, :] for l in range(L)]                   # (1, 4H) each
    wout = slab_ref[off_wout:off_wout + H, 0:1]                    # (H, 1)
    bout = slab_ref[off_bout:off_bout + 1, 0:1]                    # (1, 1)

    # ---- batched layer-0 input projection over all (t, b) pairs -------------
    x0 = jnp.dot(x_ref[...], wih0, preferred_element_type=jnp.float32) + bias[0]

    def cell(pre, c_prev):
        # i/f/o columns of `pre` were pre-scaled by 0.5 at pack time, so one
        # tanh pass gives tanh(z) on g lanes and tanh(z/2) on i/f/o lanes;
        # sigmoid(z) = 0.5*tanh(z/2) + 0.5 is a VPU fix-up (free slot).
        t_all = jnp.tanh(pre)                 # single EUP pass over (B, 4H)
        s_all = 0.5 * t_all + 0.5
        i_g = s_all[:, 0:H]
        f_g = s_all[:, H:2 * H]
        g_g = t_all[:, 2 * H:3 * H]
        o_g = s_all[:, 3 * H:4 * H]
        c = f_g * c_prev + i_g * g_g
        h = o_g * jnp.tanh(c)
        return h, c

    h = [jnp.zeros((B, H), jnp.float32) for _ in range(L)]
    c = [jnp.zeros((B, H), jnp.float32) for _ in range(L)]

    # Fully unrolled T x L recurrence (static, small); one fused dot per cell.
    for t in range(T):
        pre0 = x0[t * B:(t + 1) * B, :] + jnp.dot(
            h[0], whh0, preferred_element_type=jnp.float32)
        h[0], c[0] = cell(pre0, c[0])
        inp = h[0]
        for l in range(1, L):
            hin = jnp.concatenate([inp, h[l]], axis=1)             # (B, 2H)
            pre = jnp.dot(hin, wfused[l - 1],
                          preferred_element_type=jnp.float32) + bias[l]
            h[l], c[l] = cell(pre, c[l])
            inp = h[l]
        htop_ref[t * B:(t + 1) * B, :] = inp      # vst slot, off critical chain

    # ---- batched output head + single store ---------------------------------
    hT = htop_ref[...]                                             # (T*B, H)
    y = jax.nn.sigmoid(
        jnp.dot(hT, wout, preferred_element_type=jnp.float32) + bout)
    y_ref[...] = y


def rezipnet_forward(x, slab, *, layers=NUM_LAYERS, hidden=HIDDEN_PAD,
                     batch_per_group=BATCH):
    """x: (N, T, FS) independent sequences -> (N, T) probabilities."""
    N, T, FSdim = x.shape
    B = batch_per_group
    assert N % B == 0, "number of sequences must be a multiple of batch_per_group"
    G = N // B
    # (N, T, FS) -> (G, T*B, FS) with row index = t*B + b inside a group.
    xg = x.reshape(G, B, T, FSdim).transpose(0, 2, 1, 3).reshape(G, T * B, FSdim)

    kernel = functools.partial(rezipnet_kernel, T=T, B=B, L=layers, H=hidden)
    out = pl.pallas_call(
        kernel,
        out_shape=jax.ShapeDtypeStruct((G, T * B, 1), jnp.float32),
        grid_spec=pltpu.PrefetchScalarGridSpec(
            num_scalar_prefetch=0,
            grid=(G,),
            in_specs=[
                pl.BlockSpec((None, T * B, FSdim), lambda g: (g, 0, 0)),
                pl.BlockSpec(slab.shape, lambda g: (0, 0)),
            ],
            out_specs=pl.BlockSpec((None, T * B, 1), lambda g: (g, 0, 0)),
            scratch_shapes=[pltpu.VMEM((T * B, hidden), jnp.float32)],
        ),
        compiler_params=pltpu.CompilerParams(
            dimension_semantics=("parallel",)),
    )(xg, slab)

    # (G, T*B, 1) -> (N, T)
    return out[:, :, 0].reshape(G, T, B).transpose(0, 2, 1).reshape(N, T)


# -------------------- parameter generation / packing -------------------------

def init_params(key, L, Hm, FSdim):
    """PyTorch-layout params: weight_ih_l{k} (4Hm, in), weight_hh_l{k} (4Hm, Hm),
    biases (4Hm,), gate order (i, f, g, o); hidden2prob (1, Hm) + (1,)."""
    k = 1.0 / math.sqrt(Hm)
    keys = jax.random.split(key, 4 * L + 2)
    w_ih, w_hh, b_ih, b_hh = [], [], [], []
    idx = 0
    for l in range(L):
        in_dim = FSdim if l == 0 else Hm
        w_ih.append(jax.random.uniform(keys[idx], (4 * Hm, in_dim), jnp.float32, -k, k)); idx += 1
        w_hh.append(jax.random.uniform(keys[idx], (4 * Hm, Hm), jnp.float32, -k, k)); idx += 1
        b_ih.append(jax.random.uniform(keys[idx], (4 * Hm,), jnp.float32, -k, k)); idx += 1
        b_hh.append(jax.random.uniform(keys[idx], (4 * Hm,), jnp.float32, -k, k)); idx += 1
    w_out = jax.random.uniform(keys[idx], (1, Hm), jnp.float32, -k, k); idx += 1
    b_out = jax.random.uniform(keys[idx], (1,), jnp.float32, -k, k)
    return w_ih, w_hh, b_ih, b_hh, w_out, b_out


def pack_params(params, H):
    """Convert PyTorch-layout params into one lane-aligned f32 slab.

    Per layer the 4 gates (i,f,g,o) are concatenated on the lane axis, each
    zero-padded Hm -> H; W_ih/W_hh of layers 1..L-1 are stacked into (2H, 4H)
    fused slabs; i/f/o columns of weights AND biases are pre-scaled by 0.5
    (sigmoid-via-tanh trick).  One-time cost, done outside the kernel.
    """
    w_ih, w_hh, b_ih, b_hh, w_out, b_out = params
    L = len(w_ih)
    Hm = w_hh[0].shape[1]
    FSdim = w_ih[0].shape[1]
    H4 = 4 * H

    gate_scale = jnp.concatenate([
        jnp.full((H,), 0.5), jnp.full((H,), 0.5),
        jnp.ones((H,)), jnp.full((H,), 0.5)]).astype(jnp.float32)

    def pack_gates(w):            # (4Hm, in) -> (in, 4H)
        wt = w.T
        cols = [jnp.pad(wt[:, g * Hm:(g + 1) * Hm], ((0, 0), (0, H - Hm)))
                for g in range(4)]
        return jnp.concatenate(cols, axis=1)

    def pack_bias(bi, bh):        # -> (1, 4H)
        b = bi + bh
        cols = [jnp.pad(b[g * Hm:(g + 1) * Hm], (0, H - Hm)) for g in range(4)]
        return jnp.concatenate(cols)[None, :]

    def pad_rows(m, rows):
        return jnp.pad(m, ((0, rows - m.shape[0]), (0, 0)))

    wih0 = pack_gates(w_ih[0]) * gate_scale                        # (FS, 4H)
    whh0 = pad_rows(pack_gates(w_hh[0]), H) * gate_scale           # (H, 4H)
    fused = []
    for l in range(1, L):
        wi = pad_rows(pack_gates(w_ih[l]), H)
        wh = pad_rows(pack_gates(w_hh[l]), H)
        fused.append(jnp.concatenate([wi, wh], axis=0) * gate_scale)  # (2H, 4H)
    bias = jnp.concatenate([pack_bias(b_ih[l], b_hh[l]) for l in range(L)],
                           axis=0) * gate_scale                    # (L, 4H)

    off_whh0, off_fused, off_bias, off_wout, off_bout, total = _offsets(FSdim, H, L)
    slab = jnp.zeros((total, H4), jnp.float32)
    slab = slab.at[0:FSdim, :].set(wih0)
    slab = slab.at[off_whh0:off_whh0 + H, :].set(whh0)
    for i, f in enumerate(fused):
        slab = slab.at[off_fused + i * 2 * H:off_fused + (i + 1) * 2 * H, :].set(f)
    slab = slab.at[off_bias:off_bias + L, :].set(bias)
    slab = slab.at[off_wout:off_wout + H, 0].set(jnp.pad(w_out[0], (0, H - Hm)))
    slab = slab.at[off_bout, 0].set(b_out[0])
    return slab


# -------------------------- pure-JAX reference -------------------------------

def rezipnet_reference(x, params):
    """Standard nn.LSTM / nn.Linear math on PyTorch-layout params. x: (N,T,FS)."""
    w_ih, w_hh, b_ih, b_hh, w_out, b_out = params
    L = len(w_ih)
    Hm = w_hh[0].shape[1]
    N, T, _ = x.shape
    h = [jnp.zeros((N, Hm), jnp.float32) for _ in range(L)]
    c = [jnp.zeros((N, Hm), jnp.float32) for _ in range(L)]
    ys = []
    for t in range(T):
        inp = x[:, t, :]
        for l in range(L):
            gates = inp @ w_ih[l].T + b_ih[l] + h[l] @ w_hh[l].T + b_hh[l]
            i_g = jax.nn.sigmoid(gates[:, 0:Hm])
            f_g = jax.nn.sigmoid(gates[:, Hm:2 * Hm])
            g_g = jnp.tanh(gates[:, 2 * Hm:3 * Hm])
            o_g = jax.nn.sigmoid(gates[:, 3 * Hm:4 * Hm])
            c[l] = f_g * c[l] + i_g * g_g
            h[l] = o_g * jnp.tanh(c[l])
            inp = h[l]
        ys.append(jax.nn.sigmoid(inp @ w_out.T + b_out)[:, 0])
    return jnp.stack(ys, axis=1)   # (N, T)


if __name__ == "__main__":
    key = jax.random.PRNGKey(0)
    pkey, xkey = jax.random.split(key)

    params = init_params(pkey, NUM_LAYERS, HIDDEN_MODEL, FS)
    slab = pack_params(params, HIDDEN_PAD)

    N = GROUPS * BATCH                                  # 16 independent sequences
    x = jax.random.normal(xkey, (N, SEQ, FS), jnp.float32)

    y = rezipnet_forward(x, slab)                       # (N, T)
    y = jax.block_until_ready(y)

    y_ref = jax.jit(rezipnet_reference)(x, params)
    y_ref = jax.block_until_ready(y_ref)

    assert y.shape == (N, SEQ)
    assert jnp.allclose(y, y_ref, atol=2e-4, rtol=1e-4), (y, y_ref)
    print("KERNEL_OK")
</pallas_src>

<mosaic_0001>
module attributes {stable_mosaic.version = 11 : i64} {
  func.func @rezipnet_kernel(%arg0: i32, %arg1: memref<1x64x128xf32, #tpu.memory_space<vmem>>, %arg2: memref<312x32xf32, #tpu.memory_space<vmem>>, %arg3: memref<1x64x1xf32, #tpu.memory_space<vmem>>, %arg4: memref<64x8xf32, #tpu.memory_space<vmem>>) attributes {dimension_semantics = [#tpu.dimension_semantics<parallel>], iteration_bounds = array<i64: 2>, scalar_prefetch = 0 : i64, scratch_operands = 1 : i64, tpu.core_type = #tpu.core_type<tc>, window_params = [{transform_indices = @transform_0, window_bounds = array<i64: 1, 64, 128>}, {pipeline_mode = #tpu.pipeline_mode<synchronous>, transform_indices = @transform_1, window_bounds = array<i64: 312, 32>}, {transform_indices = @transform_2, window_bounds = array<i64: 1, 64, 1>}]} {
    %c0 = arith.constant 0 : index
    %c0_0 = arith.constant 0 : index
    %0 = vector.load %arg2[%c0, %c0_0] : memref<312x32xf32, #tpu.memory_space<vmem>>, vector<128x32xf32>
    %c128 = arith.constant 128 : index
    %c0_1 = arith.constant 0 : index
    %1 = vector.load %arg2[%c128, %c0_1] : memref<312x32xf32, #tpu.memory_space<vmem>>, vector<8x32xf32>
    %c136 = arith.constant 136 : index
    %c0_2 = arith.constant 0 : index
    %2 = vector.load %arg2[%c136, %c0_2] : memref<312x32xf32, #tpu.memory_space<vmem>>, vector<16x32xf32>
    %c152 = arith.constant 152 : index
    %c0_3 = arith.constant 0 : index
    %3 = vector.load %arg2[%c152, %c0_3] : memref<312x32xf32, #tpu.memory_space<vmem>>, vector<16x32xf32>
    %c168 = arith.constant 168 : index
    %c0_4 = arith.constant 0 : index
    %4 = vector.load %arg2[%c168, %c0_4] : memref<312x32xf32, #tpu.memory_space<vmem>>, vector<16x32xf32>
    %c184 = arith.constant 184 : index
    %c0_5 = arith.constant 0 : index
    %5 = vector.load %arg2[%c184, %c0_5] : memref<312x32xf32, #tpu.memory_space<vmem>>, vector<16x32xf32>
    %c200 = arith.constant 200 : index
    %c0_6 = arith.constant 0 : index
    %6 = vector.load %arg2[%c200, %c0_6] : memref<312x32xf32, #tpu.memory_space<vmem>>, vector<16x32xf32>
    %c216 = arith.constant 216 : index
    %c0_7 = arith.constant 0 : index
    %7 = vector.load %arg2[%c216, %c0_7] : memref<312x32xf32, #tpu.memory_space<vmem>>, vector<16x32xf32>
    %c232 = arith.constant 232 : index
    %c0_8 = arith.constant 0 : index
    %8 = vector.load %arg2[%c232, %c0_8] : memref<312x32xf32, #tpu.memory_space<vmem>>, vector<16x32xf32>
    %c248 = arith.constant 248 : index
    %c0_9 = arith.constant 0 : index
    %9 = vector.load %arg2[%c248, %c0_9] : memref<312x32xf32, #tpu.memory_space<vmem>>, vector<16x32xf32>
    %c264 = arith.constant 264 : index
    %c0_10 = arith.constant 0 : index
    %10 = vector.load %arg2[%c264, %c0_10] : memref<312x32xf32, #tpu.memory_space<vmem>>, vector<16x32xf32>
    %c280 = arith.constant 280 : index
    %c0_11 = arith.constant 0 : index
    %11 = vector.load %arg2[%c280, %c0_11] : memref<312x32xf32, #tpu.memory_space<vmem>>, vector<10x32xf32>
    %12 = vector.extract_strided_slice %11 {offsets = [0, 0], sizes = [1, 32], strides = [1, 1]} : vector<10x32xf32> to vector<1x32xf32>
    %13 = vector.extract_strided_slice %11 {offsets = [1, 0], sizes = [1, 32], strides = [1, 1]} : vector<10x32xf32> to vector<1x32xf32>
    %14 = vector.extract_strided_slice %11 {offsets = [2, 0], sizes = [1, 32], strides = [1, 1]} : vector<10x32xf32> to vector<1x32xf32>
    %15 = vector.extract_strided_slice %11 {offsets = [3, 0], sizes = [1, 32], strides = [1, 1]} : vector<10x32xf32> to vector<1x32xf32>
    %16 = vector.extract_strided_slice %11 {offsets = [4, 0], sizes = [1, 32], strides = [1, 1]} : vector<10x32xf32> to vector<1x32xf32>
    %17 = vector.extract_strided_slice %11 {offsets = [5, 0], sizes = [1, 32], strides = [1, 1]} : vector<10x32xf32> to vector<1x32xf32>
    %18 = vector.extract_strided_slice %11 {offsets = [6, 0], sizes = [1, 32], strides = [1, 1]} : vector<10x32xf32> to vector<1x32xf32>
    %19 = vector.extract_strided_slice %11 {offsets = [7, 0], sizes = [1, 32], strides = [1, 1]} : vector<10x32xf32> to vector<1x32xf32>
    %20 = vector.extract_strided_slice %11 {offsets = [8, 0], sizes = [1, 32], strides = [1, 1]} : vector<10x32xf32> to vector<1x32xf32>
    %21 = vector.extract_strided_slice %11 {offsets = [9, 0], sizes = [1, 32], strides = [1, 1]} : vector<10x32xf32> to vector<1x32xf32>
    %c296 = arith.constant 296 : index
    %c0_12 = arith.constant 0 : index
    %22 = vector.load %arg2[%c296, %c0_12] : memref<312x32xf32, #tpu.memory_space<vmem>>, vector<8x1xf32>
    %c304 = arith.constant 304 : index
    %c0_13 = arith.constant 0 : index
    %23 = vector.load %arg2[%c304, %c0_13] : memref<312x32xf32, #tpu.memory_space<vmem>>, vector<1x1xf32>
    %c0_14 = arith.constant 0 : index
    %c0_15 = arith.constant 0 : index
    %c0_16 = arith.constant 0 : index
    %24 = vector.load %arg1[%c0_14, %c0_15, %c0_16] : memref<1x64x128xf32, #tpu.memory_space<vmem>>, vector<1x64x128xf32>
    %25 = vector.shape_cast %24 : vector<1x64x128xf32> to vector<64x128xf32>
    %cst = arith.constant dense<0.000000e+00> : vector<64x32xf32>
    %26 = tpu.matmul %25, %0, %cst {dimension_numbers = #tpu.dot_dimension_numbers<[1], [0], [0], [1], [0, 0, 1, 1], [], []>} : vector<64x128xf32>, vector<128x32xf32>, vector<64x32xf32> -> vector<64x32xf32>
    %27 = vector.broadcast %12 : vector<1x32xf32> to vector<64x32xf32>
    %28 = arith.addf %26, %27 : vector<64x32xf32>
    %cst_17 = arith.constant 0.000000e+00 : f32
    %29 = vector.broadcast %cst_17 : f32 to vector<8x8xf32>
    %cst_18 = arith.constant 0.000000e+00 : f32
    %30 = vector.broadcast %cst_18 : f32 to vector<8x8xf32>
    %cst_19 = arith.constant 0.000000e+00 : f32
    %31 = vector.broadcast %cst_19 : f32 to vector<8x8xf32>
    %cst_20 = arith.constant 0.000000e+00 : f32
    %32 = vector.broadcast %cst_20 : f32 to vector<8x8xf32>
    %cst_21 = arith.constant 0.000000e+00 : f32
    %33 = vector.broadcast %cst_21 : f32 to vector<8x8xf32>
    %cst_22 = arith.constant 0.000000e+00 : f32
    %34 = vector.broadcast %cst_22 : f32 to vector<8x8xf32>
    %cst_23 = arith.constant 0.000000e+00 : f32
    %35 = vector.broadcast %cst_23 : f32 to vector<8x8xf32>
    %cst_24 = arith.constant 0.000000e+00 : f32
    %36 = vector.broadcast %cst_24 : f32 to vector<8x8xf32>
    %cst_25 = arith.constant 0.000000e+00 : f32
    %37 = vector.broadcast %cst_25 : f32 to vector<8x8xf32>
    %cst_26 = arith.constant 0.000000e+00 : f32
    %38 = vector.broadcast %cst_26 : f32 to vector<8x8xf32>
    %cst_27 = arith.constant 0.000000e+00 : f32
    %39 = vector.broadcast %cst_27 : f32 to vector<8x8xf32>
    %cst_28 = arith.constant 0.000000e+00 : f32
    %40 = vector.broadcast %cst_28 : f32 to vector<8x8xf32>
    %cst_29 = arith.constant 0.000000e+00 : f32
    %41 = vector.broadcast %cst_29 : f32 to vector<8x8xf32>
    %cst_30 = arith.constant 0.000000e+00 : f32
    %42 = vector.broadcast %cst_30 : f32 to vector<8x8xf32>
    %cst_31 = arith.constant 0.000000e+00 : f32
    %43 = vector.broadcast %cst_31 : f32 to vector<8x8xf32>
    %cst_32 = arith.constant 0.000000e+00 : f32
    %44 = vector.broadcast %cst_32 : f32 to vector<8x8xf32>
    %cst_33 = arith.constant 0.000000e+00 : f32
    %45 = vector.broadcast %cst_33 : f32 to vector<8x8xf32>
    %cst_34 = arith.constant 0.000000e+00 : f32
    %46 = vector.broadcast %cst_34 : f32 to vector<8x8xf32>
    %cst_35 = arith.constant 0.000000e+00 : f32
    %47 = vector.broadcast %cst_35 : f32 to vector<8x8xf32>
    %cst_36 = arith.constant 0.000000e+00 : f32
    %48 = vector.broadcast %cst_36 : f32 to vector<8x8xf32>
    %49 = vector.extract_strided_slice %28 {offsets = [0, 0], sizes = [8, 32], strides = [1, 1]} : vector<64x32xf32> to vector<8x32xf32>
    %cst_37 = arith.constant dense<0.000000e+00> : vector<8x32xf32>
    %50 = tpu.matmul %29, %1, %cst_37 {dimension_numbers = #tpu.dot_dimension_numbers<[1], [0], [0], [1], [0, 0, 1, 1], [], []>} : vector<8x8xf32>, vector<8x32xf32>, vector<8x32xf32> -> vector<8x32xf32>
    %51 = arith.addf %49, %50 : vector<8x32xf32>
    %52 = math.tanh %51 : vector<8x32xf32>
    %cst_38 = arith.constant 5.000000e-01 : f32
    %53 = vector.broadcast %cst_38 : f32 to vector<8x32xf32>
    %54 = arith.mulf %53, %52 : vector<8x32xf32>
    %cst_39 = arith.constant 5.000000e-01 : f32
    %55 = vector.broadcast %cst_39 : f32 to vector<8x32xf32>
    %56 = arith.addf %54, %55 : vector<8x32xf32>
    %57 = vector.extract_strided_slice %56 {offsets = [0, 0], sizes = [8, 8], strides = [1, 1]} : vector<8x32xf32> to vector<8x8xf32>
    %58 = vector.extract_strided_slice %56 {offsets = [0, 8], sizes = [8, 8], strides = [1, 1]} : vector<8x32xf32> to vector<8x8xf32>
    %59 = vector.extract_strided_slice %52 {offsets = [0, 16], sizes = [8, 8], strides = [1, 1]} : vector<8x32xf32> to vector<8x8xf32>
    %60 = vector.extract_strided_slice %56 {offsets = [0, 24], sizes = [8, 8], strides = [1, 1]} : vector<8x32xf32> to vector<8x8xf32>
    %61 = arith.mulf %58, %39 : vector<8x8xf32>
    %62 = arith.mulf %57, %59 : vector<8x8xf32>
    %63 = arith.addf %61, %62 : vector<8x8xf32>
    %64 = math.tanh %63 : vector<8x8xf32>
    %65 = arith.mulf %60, %64 : vector<8x8xf32>
    %66 = tpu.concatenate %65, %30 in 1 : vector<8x8xf32>, vector<8x8xf32> -> vector<8x16xf32>
    %cst_40 = arith.constant dense<0.000000e+00> : vector<8x32xf32>
    %67 = tpu.matmul %66, %2, %cst_40 {dimension_numbers = #tpu.dot_dimension_numbers<[1], [0], [0], [1], [0, 0, 1, 1], [], []>} : vector<8x16xf32>, vector<16x32xf32>, vector<8x32xf32> -> vector<8x32xf32>
    %68 = vector.broadcast %13 : vector<1x32xf32> to vector<8x32xf32>
    %69 = arith.addf %67, %68 : vector<8x32xf32>
    %70 = math.tanh %69 : vector<8x32xf32>
    %cst_41 = arith.constant 5.000000e-01 : f32
    %71 = vector.broadcast %cst_41 : f32 to vector<8x32xf32>
    %72 = arith.mulf %71, %70 : vector<8x32xf32>
    %cst_42 = arith.constant 5.000000e-01 : f32
    %73 = vector.broadcast %cst_42 : f32 to vector<8x32xf32>
    %74 = arith.addf %72, %73 : vector<8x32xf32>
    %75 = vector.extract_strided_slice %74 {offsets = [0, 0], sizes = [8, 8], strides = [1, 1]} : vector<8x32xf32> to vector<8x8xf32>
    %76 = vector.extract_strided_slice %74 {offsets = [0, 8], sizes = [8, 8], strides = [1, 1]} : vector<8x32xf32> to vector<8x8xf32>
    %77 = vector.extract_strided_slice %70 {offsets = [0, 16], sizes = [8, 8], strides = [1, 1]} : vector<8x32xf32> to vector<8x8xf32>
    %78 = vector.extract_strided_slice %74 {offsets = [0, 24], sizes = [8, 8], strides = [1, 1]} : vector<8x32xf32> to vector<8x8xf32>
    %79 = arith.mulf %76, %40 : vector<8x8xf32>
    %80 = arith.mulf %75, %77 : vector<8x8xf32>
    %81 = arith.addf %79, %80 : vector<8x8xf32>
    %82 = math.tanh %81 : vector<8x8xf32>
    %83 = arith.mulf %78, %82 : vector<8x8xf32>
    %84 = tpu.concatenate %83, %31 in 1 : vector<8x8xf32>, vector<8x8xf32> -> vector<8x16xf32>
    %cst_43 = arith.constant dense<0.000000e+00> : vector<8x32xf32>
    %85 = tpu.matmul %84, %3, %cst_43 {dimension_numbers = #tpu.dot_dimension_numbers<[1], [0], [0], [1], [0, 0, 1, 1], [], []>} : vector<8x16xf32>, vector<16x32xf32>, vector<8x32xf32> -> vector<8x32xf32>
    %86 = vector.broadcast %14 : vector<1x32xf32> to vector<8x32xf32>
    %87 = arith.addf %85, %86 : vector<8x32xf32>
    %88 = math.tanh %87 : vector<8x32xf32>
    %cst_44 = arith.constant 5.000000e-01 : f32
    %89 = vector.broadcast %cst_44 : f32 to vector<8x32xf32>
    %90 = arith.mulf %89, %88 : vector<8x32xf32>
    %cst_45 = arith.constant 5.000000e-01 : f32
    %91 = vector.broadcast %cst_45 : f32 to vector<8x32xf32>
    %92 = arith.addf %90, %91 : vector<8x32xf32>
    %93 = vector.extract_strided_slice %92 {offsets = [0, 0], sizes = [8, 8], strides = [1, 1]} : vector<8x32xf32> to vector<8x8xf32>
    %94 = vector.extract_strided_slice %92 {offsets = [0, 8], sizes = [8, 8], strides = [1, 1]} : vector<8x32xf32> to vector<8x8xf32>
    %95 = vector.extract_strided_slice %88 {offsets = [0, 16], sizes = [8, 8], strides = [1, 1]} : vector<8x32xf32> to vector<8x8xf32>
    %96 = vector.extract_strided_slice %92 {offsets = [0, 24], sizes = [8, 8], strides = [1, 1]} : vector<8x32xf32> to vector<8x8xf32>
    %97 = arith.mulf %94, %41 : vector<8x8xf32>
    %98 = arith.mulf %93, %95 : vector<8x8xf32>
    %99 = arith.addf %97, %98 : vector<8x8xf32>
    %100 = math.tanh %99 : vector<8x8xf32>
    %101 = arith.mulf %96, %100 : vector<8x8xf32>
    %102 = tpu.concatenate %101, %32 in 1 : vector<8x8xf32>, vector<8x8xf32> -> vector<8x16xf32>
    %cst_46 = arith.constant dense<0.000000e+00> : vector<8x32xf32>
    %103 = tpu.matmul %102, %4, %cst_46 {dimension_numbers = #tpu.dot_dimension_numbers<[1], [0], [0], [1], [0, 0, 1, 1], [], []>} : vector<8x16xf32>, vector<16x32xf32>, vector<8x32xf32> -> vector<8x32xf32>
    %104 = vector.broadcast %15 : vector<1x32xf32> to vector<8x32xf32>
    %105 = arith.addf %103, %104 : vector<8x32xf32>
    %106 = math.tanh %105 : vector<8x32xf32>
    %cst_47 = arith.constant 5.000000e-01 : f32
    %107 = vector.broadcast %cst_47 : f32 to vector<8x32xf32>
    %108 = arith.mulf %107, %106 : vector<8x32xf32>
    %cst_48 = arith.constant 5.000000e-01 : f32
    %109 = vector.broadcast %cst_48 : f32 to vector<8x32xf32>
    %110 = arith.addf %108, %109 : vector<8x32xf32>
    %111 = vector.extract_strided_slice %110 {offsets = [0, 0], sizes = [8, 8], strides = [1, 1]} : vector<8x32xf32> to vector<8x8xf32>
    %112 = vector.extract_strided_slice %110 {offsets = [0, 8], sizes = [8, 8], strides = [1, 1]} : vector<8x32xf32> to vector<8x8xf32>
    %113 = vector.extract_strided_slice %106 {offsets = [0, 16], sizes = [8, 8], strides = [1, 1]} : vector<8x32xf32> to vector<8x8xf32>
    %114 = vector.extract_strided_slice %110 {offsets = [0, 24], sizes = [8, 8], strides = [1, 1]} : vector<8x32xf32> to vector<8x8xf32>
    %115 = arith.mulf %112, %42 : vector<8x8xf32>
    %116 = arith.mulf %111, %113 : vector<8x8xf32>
    %117 = arith.addf %115, %116 : vector<8x8xf32>
    %118 = math.tanh %117 : vector<8x8xf32>
    %119 = arith.mulf %114, %118 : vector<8x8xf32>
    %120 = tpu.concatenate %119, %33 in 1 : vector<8x8xf32>, vector<8x8xf32> -> vector<8x16xf32>
    %cst_49 = arith.constant dense<0.000000e+00> : vector<8x32xf32>
    %121 = tpu.matmul %120, %5, %cst_49 {dimension_numbers = #tpu.dot_dimension_numbers<[1], [0], [0], [1], [0, 0, 1, 1], [], []>} : vector<8x16xf32>, vector<16x32xf32>, vector<8x32xf32> -> vector<8x32xf32>
    %122 = vector.broadcast %16 : vector<1x32xf32> to vector<8x32xf32>
    %123 = arith.addf %121, %122 : vector<8x32xf32>
    %124 = math.tanh %123 : vector<8x32xf32>
    %cst_50 = arith.constant 5.000000e-01 : f32
    %125 = vector.broadcast %cst_50 : f32 to vector<8x32xf32>
    %126 = arith.mulf %125, %124 : vector<8x32xf32>
    %cst_51 = arith.constant 5.000000e-01 : f32
    %127 = vector.broadcast %cst_51 : f32 to vector<8x32xf32>
    %128 = arith.addf %126, %127 : vector<8x32xf32>
    %129 = vector.extract_strided_slice %128 {offsets = [0, 0], sizes = [8, 8], strides = [1, 1]} : vector<8x32xf32> to vector<8x8xf32>
    %130 = vector.extract_strided_slice %128 {offsets = [0, 8], sizes = [8, 8], strides = [1, 1]} : vector<8x32xf32> to vector<8x8xf32>
    %131 = vector.extract_strided_slice %124 {offsets = [0, 16], sizes = [8, 8], strides = [1, 1]} : vector<8x32xf32> to vector<8x8xf32>
    %132 = vector.extract_strided_slice %128 {offsets = [0, 24], sizes = [8, 8], strides = [1, 1]} : vector<8x32xf32> to vector<8x8xf32>
    %133 = arith.mulf %130, %43 : vector<8x8xf32>
    %134 = arith.mulf %129, %131 : vector<8x8xf32>
    %135 = arith.addf %133, %134 : vector<8x8xf32>
    %136 = math.tanh %135 : vector<8x8xf32>
    %137 = arith.mulf %132, %136 : vector<8x8xf32>
    %138 = tpu.concatenate %137, %34 in 1 : vector<8x8xf32>, vector<8x8xf32> -> vector<8x16xf32>
    %cst_52 = arith.constant dense<0.000000e+00> : vector<8x32xf32>
    %139 = tpu.matmul %138, %6, %cst_52 {dimension_numbers = #tpu.dot_dimension_numbers<[1], [0], [0], [1], [0, 0, 1, 1], [], []>} : vector<8x16xf32>, vector<16x32xf32>, vector<8x32xf32> -> vector<8x32xf32>
    %140 = vector.broadcast %17 : vector<1x32xf32> to vector<8x32xf32>
    %141 = arith.addf %139, %140 : vector<8x32xf32>
    %142 = math.tanh %141 : vector<8x32xf32>
    %cst_53 = arith.constant 5.000000e-01 : f32
    %143 = vector.broadcast %cst_53 : f32 to vector<8x32xf32>
    %144 = arith.mulf %143, %142 : vector<8x32xf32>
    %cst_54 = arith.constant 5.000000e-01 : f32
    %145 = vector.broadcast %cst_54 : f32 to vector<8x32xf32>
    %146 = arith.addf %144, %145 : vector<8x32xf32>
    %147 = vector.extract_strided_slice %146 {offsets = [0, 0], sizes = [8, 8], strides = [1, 1]} : vector<8x32xf32> to vector<8x8xf32>
    %148 = vector.extract_strided_slice %146 {offsets = [0, 8], sizes = [8, 8], strides = [1, 1]} : vector<8x32xf32> to vector<8x8xf32>
    %149 = vector.extract_strided_slice %142 {offsets = [0, 16], sizes = [8, 8], strides = [1, 1]} : vector<8x32xf32> to vector<8x8xf32>
    %150 = vector.extract_strided_slice %146 {offsets = [0, 24], sizes = [8, 8], strides = [1, 1]} : vector<8x32xf32> to vector<8x8xf32>
    %151 = arith.mulf %148, %44 : vector<8x8xf32>
    %152 = arith.mulf %147, %149 : vector<8x8xf32>
    %153 = arith.addf %151, %152 : vector<8x8xf32>
    %154 = math.tanh %153 : vector<8x8xf32>
    %155 = arith.mulf %150, %154 : vector<8x8xf32>
    %156 = tpu.concatenate %155, %35 in 1 : vector<8x8xf32>, vector<8x8xf32> -> vector<8x16xf32>
    %cst_55 = arith.constant dense<0.000000e+00> : vector<8x32xf32>
    %157 = tpu.matmul %156, %7, %cst_55 {dimension_numbers = #tpu.dot_dimension_numbers<[1], [0], [0], [1], [0, 0, 1, 1], [], []>} : vector<8x16xf32>, vector<16x32xf32>, vector<8x32xf32> -> vector<8x32xf32>
    %158 = vector.broadcast %18 : vector<1x32xf32> to vector<8x32xf32>
    %159 = arith.addf %157, %158 : vector<8x32xf32>
    %160 = math.tanh %159 : vector<8x32xf32>
    %cst_56 = arith.constant 5.000000e-01 : f32
    %161 = vector.broadcast %cst_56 : f32 to vector<8x32xf32>
    %162 = arith.mulf %161, %160 : vector<8x32xf32>
    %cst_57 = arith.constant 5.000000e-01 : f32
    %163 = vector.broadcast %cst_57 : f32 to vector<8x32xf32>
    %164 = arith.addf %162, %163 : vector<8x32xf32>
    %165 = vector.extract_strided_slice %164 {offsets = [0, 0], sizes = [8, 8], strides = [1, 1]} : vector<8x32xf32> to vector<8x8xf32>
    %166 = vector.extract_strided_slice %164 {offsets = [0, 8], sizes = [8, 8], strides = [1, 1]} : vector<8x32xf32> to vector<8x8xf32>
    %167 = vector.extract_strided_slice %160 {offsets = [0, 16], sizes = [8, 8], strides = [1, 1]} : vector<8x32xf32> to vector<8x8xf32>
    %168 = vector.extract_strided_slice %164 {offsets = [0, 24], sizes = [8, 8], strides = [1, 1]} : vector<8x32xf32> to vector<8x8xf32>
    %169 = arith.mulf %166, %45 : vector<8x8xf32>
    %170 = arith.mulf %165, %167 : vector<8x8xf32>
    %171 = arith.addf %169, %170 : vector<8x8xf32>
    %172 = math.tanh %171 : vector<8x8xf32>
    %173 = arith.mulf %168, %172 : vector<8x8xf32>
    %174 = tpu.concatenate %173, %36 in 1 : vector<8x8xf32>, vector<8x8xf32> -> vector<8x16xf32>
    %cst_58 = arith.constant dense<0.000000e+00> : vector<8x32xf32>
    %175 = tpu.matmul %174, %8, %cst_58 {dimension_numbers = #tpu.dot_dimension_numbers<[1], [0], [0], [1], [0, 0, 1, 1], [], []>} : vector<8x16xf32>, vector<16x32xf32>, vector<8x32xf32> -> vector<8x32xf32>
    %176 = vector.broadcast %19 : vector<1x32xf32> to vector<8x32xf32>
    %177 = arith.addf %175, %176 : vector<8x32xf32>
    %178 = math.tanh %177 : vector<8x32xf32>
    %cst_59 = arith.constant 5.000000e-01 : f32
    %179 = vector.broadcast %cst_59 : f32 to vector<8x32xf32>
    %180 = arith.mulf %179, %178 : vector<8x32xf32>
    %cst_60 = arith.constant 5.000000e-01 : f32
    %181 = vector.broadcast %cst_60 : f32 to vector<8x32xf32>
    %182 = arith.addf %180, %181 : vector<8x32xf32>
    %183 = vector.extract_strided_slice %182 {offsets = [0, 0], sizes = [8, 8], strides = [1, 1]} : vector<8x32xf32> to vector<8x8xf32>
    %184 = vector.extract_strided_slice %182 {offsets = [0, 8], sizes = [8, 8], strides = [1, 1]} : vector<8x32xf32> to vector<8x8xf32>
    %185 = vector.extract_strided_slice %178 {offsets = [0, 16], sizes = [8, 8], strides = [1, 1]} : vector<8x32xf32> to vector<8x8xf32>
    %186 = vector.extract_strided_slice %182 {offsets = [0, 24], sizes = [8, 8], strides = [1, 1]} : vector<8x32xf32> to vector<8x8xf32>
    %187 = arith.mulf %184, %46 : vector<8x8xf32>
    %188 = arith.mulf %183, %185 : vector<8x8xf32>
    %189 = arith.addf %187, %188 : vector<8x8xf32>
    %190 = math.tanh %189 : vector<8x8xf32>
    %191 = arith.mulf %186, %190 : vector<8x8xf32>
    %192 = tpu.concatenate %191, %37 in 1 : vector<8x8xf32>, vector<8x8xf32> -> vector<8x16xf32>
    %cst_61 = arith.constant dense<0.000000e+00> : vector<8x32xf32>
    %193 = tpu.matmul %192, %9, %cst_61 {dimension_numbers = #tpu.dot_dimension_numbers<[1], [0], [0], [1], [0, 0, 1, 1], [], []>} : vector<8x16xf32>, vector<16x32xf32>, vector<8x32xf32> -> vector<8x32xf32>
    %194 = vector.broadcast %20 : vector<1x32xf32> to vector<8x32xf32>
    %195 = arith.addf %193, %194 : vector<8x32xf32>
    %196 = math.tanh %195 : vector<8x32xf32>
    %cst_62 = arith.constant 5.000000e-01 : f32
    %197 = vector.broadcast %cst_62 : f32 to vector<8x32xf32>
    %198 = arith.mulf %197, %196 : vector<8x32xf32>
    %cst_63 = arith.constant 5.000000e-01 : f32
    %199 = vector.broadcast %cst_63 : f32 to vector<8x32xf32>
    %200 = arith.addf %198, %199 : vector<8x32xf32>
    %201 = vector.extract_strided_slice %200 {offsets = [0, 0], sizes = [8, 8], strides = [1, 1]} : vector<8x32xf32> to vector<8x8xf32>
    %202 = vector.extract_strided_slice %200 {offsets = [0, 8], sizes = [8, 8], strides = [1, 1]} : vector<8x32xf32> to vector<8x8xf32>
    %203 = vector.extract_strided_slice %196 {offsets = [0, 16], sizes = [8, 8], strides = [1, 1]} : vector<8x32xf32> to vector<8x8xf32>
    %204 = vector.extract_strided_slice %200 {offsets = [0, 24], sizes = [8, 8], strides = [1, 1]} : vector<8x32xf32> to vector<8x8xf32>
    %205 = arith.mulf %202, %47 : vector<8x8xf32>
    %206 = arith.mulf %201, %203 : vector<8x8xf32>
    %207 = arith.addf %205, %206 : vector<8x8xf32>
    %208 = math.tanh %207 : vector<8x8xf32>
    %209 = arith.mulf %204, %208 : vector<8x8xf32>
    %210 = tpu.concatenate %209, %38 in 1 : vector<8x8xf32>, vector<8x8xf32> -> vector<8x16xf32>
    %cst_64 = arith.constant dense<0.000000e+00> : vector<8x32xf32>
    %211 = tpu.matmul %210, %10, %cst_64 {dimension_numbers = #tpu.dot_dimension_numbers<[1], [0], [0], [1], [0, 0, 1, 1], [], []>} : vector<8x16xf32>, vector<16x32xf32>, vector<8x32xf32> -> vector<8x32xf32>
    %212 = vector.broadcast %21 : vector<1x32xf32> to vector<8x32xf32>
    %213 = arith.addf %211, %212 : vector<8x32xf32>
    %214 = math.tanh %213 : vector<8x32xf32>
    %cst_65 = arith.constant 5.000000e-01 : f32
    %215 = vector.broadcast %cst_65 : f32 to vector<8x32xf32>
    %216 = arith.mulf %215, %214 : vector<8x32xf32>
    %cst_66 = arith.constant 5.000000e-01 : f32
    %217 = vector.broadcast %cst_66 : f32 to vector<8x32xf32>
    %218 = arith.addf %216, %217 : vector<8x32xf32>
    %219 = vector.extract_strided_slice %218 {offsets = [0, 0], sizes = [8, 8], strides = [1, 1]} : vector<8x32xf32> to vector<8x8xf32>
    %220 = vector.extract_strided_slice %218 {offsets = [0, 8], sizes = [8, 8], strides = [1, 1]} : vector<8x32xf32> to vector<8x8xf32>
    %221 = vector.extract_strided_slice %214 {offsets = [0, 16], sizes = [8, 8], strides = [1, 1]} : vector<8x32xf32> to vector<8x8xf32>
    %222 = vector.extract_strided_slice %218 {offsets = [0, 24], sizes = [8, 8], strides = [1, 1]} : vector<8x32xf32> to vector<8x8xf32>
    %223 = arith.mulf %220, %48 : vector<8x8xf32>
    %224 = arith.mulf %219, %221 : vector<8x8xf32>
    %225 = arith.addf %223, %224 : vector<8x8xf32>
    %226 = math.tanh %225 : vector<8x8xf32>
    %227 = arith.mulf %222, %226 : vector<8x8xf32>
    %c0_67 = arith.constant 0 : index
    %c0_68 = arith.constant 0 : index
    %228 = vector.load %arg4[%c0_67, %c0_68] : memref<64x8xf32, #tpu.memory_space<vmem>>, vector<8x8xf32>
    tpu.vector_store %arg4[%c0_67, %c0_68], %227 {strides = array<i32>} : memref<64x8xf32, #tpu.memory_space<vmem>>, vector<8x8xf32>,
    %229 = vector.extract_strided_slice %28 {offsets = [8, 0], sizes = [8, 32], strides = [1, 1]} : vector<64x32xf32> to vector<8x32xf32>
    %cst_69 = arith.constant dense<0.000000e+00> : vector<8x32xf32>
    %230 = tpu.matmul %65, %1, %cst_69 {dimension_numbers = #tpu.dot_dimension_numbers<[1], [0], [0], [1], [0, 0, 1, 1], [], []>} : vector<8x8xf32>, vector<8x32xf32>, vector<8x32xf32> -> vector<8x32xf32>
    %231 = arith.addf %229, %230 : vector<8x32xf32>
    %232 = math.tanh %231 : vector<8x32xf32>
    %cst_70 = arith.constant 5.000000e-01 : f32
    %233 = vector.broadcast %cst_70 : f32 to vector<8x32xf32>
    %234 = arith.mulf %233, %232 : vector<8x32xf32>
    %cst_71 = arith.constant 5.000000e-01 : f32
    %235 = vector.broadcast %cst_71 : f32 to vector<8x32xf32>
    %236 = arith.addf %234, %235 : vector<8x32xf32>
    %237 = vector.extract_strided_slice %236 {offsets = [0, 0], sizes = [8, 8], strides = [1, 1]} : vector<8x32xf32> to vector<8x8xf32>
    %238 = vector.extract_strided_slice %236 {offsets = [0, 8], sizes = [8, 8], strides = [1, 1]} : vector<8x32xf32> to vector<8x8xf32>
    %239 = vector.extract_strided_slice %232 {offsets = [0, 16], sizes = [8, 8], strides = [1, 1]} : vector<8x32xf32> to vector<8x8xf32>
    %240 = vector.extract_strided_slice %236 {offsets = [0, 24], sizes = [8, 8], strides = [1, 1]} : vector<8x32xf32> to vector<8x8xf32>
    %241 = arith.mulf %238, %63 : vector<8x8xf32>
    %242 = arith.mulf %237, %239 : vector<8x8xf32>
    %243 = arith.addf %241, %242 : vector<8x8xf32>
    %244 = math.tanh %243 : vector<8x8xf32>
    %245 = arith.mulf %240, %244 : vector<8x8xf32>
    %246 = tpu.concatenate %245, %83 in 1 : vector<8x8xf32>, vector<8x8xf32> -> vector<8x16xf32>
    %cst_72 = arith.constant dense<0.000000e+00> : vector<8x32xf32>
    %247 = tpu.matmul %246, %2, %cst_72 {dimension_numbers = #tpu.dot_dimension_numbers<[1], [0], [0], [1], [0, 0, 1, 1], [], []>} : vector<8x16xf32>, vector<16x32xf32>, vector<8x32xf32> -> vector<8x32xf32>
    %248 = vector.broadcast %13 : vector<1x32xf32> to vector<8x32xf32>
    %249 = arith.addf %247, %248 : vector<8x32xf32>
    %250 = math.tanh %249 : vector<8x32xf32>
    %cst_73 = arith.constant 5.000000e-01 : f32
    %251 = vector.broadcast %cst_73 : f32 to vector<8x32xf32>
    %252 = arith.mulf %251, %250 : vector<8x32xf32>
    %cst_74 = arith.constant 5.000000e-01 : f32
    %253 = vector.broadcast %cst_74 : f32 to vector<8x32xf32>
    %254 = arith.addf %252, %253 : vector<8x32xf32>
    %255 = vector.extract_strided_slice %254 {offsets = [0, 0], sizes = [8, 8], strides = [1, 1]} : vector<8x32xf32> to vector<8x8xf32>
    %256 = vector.extract_strided_slice %254 {offsets = [0, 8], sizes = [8, 8], strides = [1, 1]} : vector<8x32xf32> to vector<8x8xf32>
    %257 = vector.extract_strided_slice %250 {offsets = [0, 16], sizes = [8, 8], strides = [1, 1]} : vector<8x32xf32> to vector<8x8xf32>
    %258 = vector.extract_strided_slice %254 {offsets = [0, 24], sizes = [8, 8], strides = [1, 1]} : vector<8x32xf32> to vector<8x8xf32>
    %259 = arith.mulf %256, %81 : vector<8x8xf32>
    %260 = arith.mulf %255, %257 : vector<8x8xf32>
    %261 = arith.addf %259, %260 : vector<8x8xf32>
    %262 = math.tanh %261 : vector<8x8xf32>
    %263 = arith.mulf %258, %262 : vector<8x8xf32>
    %264 = tpu.concatenate %263, %101 in 1 : vector<8x8xf32>, vector<8x8xf32> -> vector<8x16xf32>
    %cst_75 = arith.constant dense<0.000000e+00> : vector<8x32xf32>
    %265 = tpu.matmul %264, %3, %cst_75 {dimension_numbers = #tpu.dot_dimension_numbers<[1], [0], [0], [1], [0, 0, 1, 1], [], []>} : vector<8x16xf32>, vector<16x32xf32>, vector<8x32xf32> -> vector<8x32xf32>
    %266 = vector.broadcast %14 : vector<1x32xf32> to vector<8x32xf32>
    %267 = arith.addf %265, %266 : vector<8x32xf32>
    %268 = math.tanh %267 : vector<8x32xf32>
    %cst_76 = arith.constant 5.000000e-01 : f32
    %269 = vector.broadcast %cst_76 : f32 to vector<8x32xf32>
    %270 = arith.mulf %269, %268 : vector<8x32xf32>
    %cst_77 = arith.constant 5.000000e-01 : f32
    %271 = vector.broadcast %cst_77 : f32 to vector<8x32xf32>
    %272 = arith.addf %270, %271 : vector<8x32xf32>
    %273 = vector.extract_strided_slice %272 {offsets = [0, 0], sizes = [8, 8], strides = [1, 1]} : vector<8x32xf32> to vector<8x8xf32>
    %274 = vector.extract_strided_slice %272 {offsets = [0, 8], sizes = [8, 8], strides = [1, 1]} : vector<8x32xf32> to vector<8x8xf32>
    %275 = vector.extract_strided_slice %268 {offsets = [0, 16], sizes = [8, 8], strides = [1, 1]} : vector<8x32xf32> to vector<8x8xf32>
    %276 = vector.extract_strided_slice %272 {offsets = [0, 24], sizes = [8, 8], strides = [1, 1]} : vector<8x32xf32> to vector<8x8xf32>
    %277 = arith.mulf %274, %99 : vector<8x8xf32>
    %278 = arith.mulf %273, %275 : vector<8x8xf32>
    %279 = arith.addf %277, %278 : vector<8x8xf32>
    %280 = math.tanh %279 : vector<8x8xf32>
    %281 = arith.mulf %276, %280 : vector<8x8xf32>
    %282 = tpu.concatenate %281, %119 in 1 : vector<8x8xf32>, vector<8x8xf32> -> vector<8x16xf32>
    %cst_78 = arith.constant dense<0.000000e+00> : vector<8x32xf32>
    %283 = tpu.matmul %282, %4, %cst_78 {dimension_numbers = #tpu.dot_dimension_numbers<[1], [0], [0], [1], [0, 0, 1, 1], [], []>} : vector<8x16xf32>, vector<16x32xf32>, vector<8x32xf32> -> vector<8x32xf32>
    %284 = vector.broadcast %15 : vector<1x32xf32> to vector<8x32xf32>
    %285 = arith.addf %283, %284 : vector<8x32xf32>
    %286 = math.tanh %285 : vector<8x32xf32>
    %cst_79 = arith.constant 5.000000e-01 : f32
    %287 = vector.broadcast %cst_79 : f32 to vector<8x32xf32>
    %288 = arith.mulf %287, %286 : vector<8x32xf32>
    %cst_80 = arith.constant 5.000000e-01 : f32
    %289 = vector.broadcast %cst_80 : f32 to vector<8x32xf32>
    %290 = arith.addf %288, %289 : vector<8x32xf32>
    %291 = vector.extract_strided_slice %290 {offsets = [0, 0], sizes = [8, 8], strides = [1, 1]} : vector<8x32xf32> to vector<8x8xf32>
    %292 = vector.extract_strided_slice %290 {offsets = [0, 8], sizes = [8, 8], strides = [1, 1]} : vector<8x32xf32> to vector<8x8xf32>
    %293 = vector.extract_strided_slice %286 {offsets = [0, 16], sizes = [8, 8], strides = [1, 1]} : vector<8x32xf32> to vector<8x8xf32>
    %294 = vector.extract_strided_slice %290 {offsets = [0, 24], sizes = [8, 8], strides = [1, 1]} : vector<8x32xf32> to vector<8x8xf32>
    %295 = arith.mulf %292, %117 : vector<8x8xf32>
    %296 = arith.mulf %291, %293 : vector<8x8xf32>
    %297 = arith.addf %295, %296 : vector<8x8xf32>
    %298 = math.tanh %297 : vector<8x8xf32>
    %299 = arith.mulf %294, %298 : vector<8x8xf32>
    %300 = tpu.concatenate %299, %137 in 1 : vector<8x8xf32>, vector<8x8xf32> -> vector<8x16xf32>
    %cst_81 = arith.constant dense<0.000000e+00> : vector<8x32xf32>
    %301 = tpu.matmul %300, %5, %cst_81 {dimension_numbers = #tpu.dot_dimension_numbers<[1], [0], [0], [1], [0, 0, 1, 1], [], []>} : vector<8x16xf32>, vector<16x32xf32>, vector<8x32xf32> -> vector<8x32xf32>
    %302 = vector.broadcast %16 : vector<1x32xf32> to vector<8x32xf32>
    %303 = arith.addf %301, %302 : vector<8x32xf32>
    %304 = math.tanh %303 : vector<8x32xf32>
    %cst_82 = arith.constant 5.000000e-01 : f32
    %305 = vector.broadcast %cst_82 : f32 to vector<8x32xf32>
    %306 = arith.mulf %305, %304 : vector<8x32xf32>
    %cst_83 = arith.constant 5.000000e-01 : f32
    %307 = vector.broadcast %cst_83 : f32 to vector<8x32xf32>
    %308 = arith.addf %306, %307 : vector<8x32xf32>
    %309 = vector.extract_strided_slice %308 {offsets = [0, 0], sizes = [8, 8], strides = [1, 1]} : vector<8x32xf32> to vector<8x8xf32>
    %310 = vector.extract_strided_slice %308 {offsets = [0, 8], sizes = [8, 8], strides = [1, 1]} : vector<8x32xf32> to vector<8x8xf32>
    %311 = vector.extract_strided_slice %304 {offsets = [0, 16], sizes = [8, 8], strides = [1, 1]} : vector<8x32xf32> to vector<8x8xf32>
    %312 = vector.extract_strided_slice %308 {offsets = [0, 24], sizes = [8, 8], strides = [1, 1]} : vector<8x32xf32> to vector<8x8xf32>
    %313 = arith.mulf %310, %135 : vector<8x8xf32>
    %314 = arith.mulf %309, %311 : vector<8x8xf32>
    %315 = arith.addf %313, %314 : vector<8x8xf32>
    %316 = math.tanh %315 : vector<8x8xf32>
    %317 = arith.mulf %312, %316 : vector<8x8xf32>
    %318 = tpu.concatenate %317, %155 in 1 : vector<8x8xf32>, vector<8x8xf32> -> vector<8x16xf32>
    %cst_84 = arith.constant dense<0.000000e+00> : vector<8x32xf32>
    %319 = tpu.matmul %318, %6, %cst_84 {dimension_numbers = #tpu.dot_dimension_numbers<[1], [0], [0], [1], [0, 0, 1, 1], [], []>} : vector<8x16xf32>, vector<16x32xf32>, vector<8x32xf32> -> vector<8x32xf32>
    %320 = vector.broadcast %17 : vector<1x32xf32> to vector<8x32xf32>
    %321 = arith.addf %319, %320 : vector<8x32xf32>
    %322 = math.tanh %321 : vector<8x32xf32>
    %cst_85 = arith.constant 5.000000e-01 : f32
    %323 = vector.broadcast %cst_85 : f32 to vector<8x32xf32>
    %324 = arith.mulf %323, %322 : vector<8x32xf32>
    %cst_86 = arith.constant 5.000000e-01 : f32
    %325 = vector.broadcast %cst_86 : f32 to vector<8x32xf32>
    %326 = arith.addf %324, %325 : vector<8x32xf32>
    %327 = vector.extract_strided_slice %326 {offsets = [0, 0], sizes = [8, 8], strides = [1, 1]} : vector<8x32xf32> to vector<8x8xf32>
    %328 = vector.extract_strided_slice %326 {offsets = [0, 8], sizes = [8, 8], strides = [1, 1]} : vector<8x32xf32> to vector<8x8xf32>
    %329 = vector.extract_strided_slice %322 {offsets = [0, 16], sizes = [8, 8], strides = [1, 1]} : vector<8x32xf32> to vector<8x8xf32>
    %330 = vector.extract_strided_slice %326 {offsets = [0, 24], sizes = [8, 8], strides = [1, 1]} : vector<8x32xf32> to vector<8x8xf32>
    %331 = arith.mulf %328, %153 : vector<8x8xf32>
    %332 = arith.mulf %327, %329 : vector<8x8xf32>
    %333 = arith.addf %331, %332 : vector<8x8xf32>
    %334 = math.tanh %333 : vector<8x8xf32>
    %335 = arith.mulf %330, %334 : vector<8x8xf32>
    %336 = tpu.concatenate %335, %173 in 1 : vector<8x8xf32>, vector<8x8xf32> -> vector<8x16xf32>
    %cst_87 = arith.constant dense<0.000000e+00> : vector<8x32xf32>
    %337 = tpu.matmul %336, %7, %cst_87 {dimension_numbers = #tpu.dot_dimension_numbers<[1], [0], [0], [1], [0, 0, 1, 1], [], []>} : vector<8x16xf32>, vector<16x32xf32>, vector<8x32xf32> -> vector<8x32xf32>
    %338 = vector.broadcast %18 : vector<1x32xf32> to vector<8x32xf32>
    %339 = arith.addf %337, %338 : vector<8x32xf32>
    %340 = math.tanh %339 : vector<8x32xf32>
    %cst_88 = arith.constant 5.000000e-01 : f32
    %341 = vector.broadcast %cst_88 : f32 to vector<8x32xf32>
    %342 = arith.mulf %341, %340 : vector<8x32xf32>
    %cst_89 = arith.constant 5.000000e-01 : f32
    %343 = vector.broadcast %cst_89 : f32 to vector<8x32xf32>
    %344 = arith.addf %342, %343 : vector<8x32xf32>
    %345 = vector.extract_strided_slice %344 {offsets = [0, 0], sizes = [8, 8], strides = [1, 1]} : vector<8x32xf32> to vector<8x8xf32>
    %346 = vector.extract_strided_slice %344 {offsets = [0, 8], sizes = [8, 8], strides = [1, 1]} : vector<8x32xf32> to vector<8x8xf32>
    %347 = vector.extract_strided_slice %340 {offsets = [0, 16], sizes = [8, 8], strides = [1, 1]} : vector<8x32xf32> to vector<8x8xf32>
    %348 = vector.extract_strided_slice %344 {offsets = [0, 24], sizes = [8, 8], strides = [1, 1]} : vector<8x32xf32> to vector<8x8xf32>
    %349 = arith.mulf %346, %171 : vector<8x8xf32>
    %350 = arith.mulf %345, %347 : vector<8x8xf32>
    %351 = arith.addf %349, %350 : vector<8x8xf32>
    %352 = math.tanh %351 : vector<8x8xf32>
    %353 = arith.mulf %348, %352 : vector<8x8xf32>
    %354 = tpu.concatenate %353, %191 in 1 : vector<8x8xf32>, vector<8x8xf32> -> vector<8x16xf32>
    %cst_90 = arith.constant dense<0.000000e+00> : vector<8x32xf32>
    %355 = tpu.matmul %354, %8, %cst_90 {dimension_numbers = #tpu.dot_dimension_numbers<[1], [0], [0], [1], [0, 0, 1, 1], [], []>} : vector<8x16xf32>, vector<16x32xf32>, vector<8x32xf32> -> vector<8x32xf32>
    %356 = vector.broadcast %19 : vector<1x32xf32> to vector<8x32xf32>
    %357 = arith.addf %355, %356 : vector<8x32xf32>
    %358 = math.tanh %357 : vector<8x32xf32>
    %cst_91 = arith.constant 5.000000e-01 : f32
    %359 = vector.broadcast %cst_91 : f32 to vector<8x32xf32>
    %360 = arith.mulf %359, %358 : vector<8x32xf32>
    %cst_92 = arith.constant 5.000000e-01 : f32
    %361 = vector.broadcast %cst_92 : f32 to vector<8x32xf32>
    %362 = arith.addf %360, %361 : vector<8x32xf32>
    %363 = vector.extract_strided_slice %362 {offsets = [0, 0], sizes = [8, 8], strides = [1, 1]} : vector<8x32xf32> to vector<8x8xf32>
    %364 = vector.extract_strided_slice %362 {offsets = [0, 8], sizes = [8, 8], strides = [1, 1]} : vector<8x32xf32> to vector<8x8xf32>
    %365 = vector.extract_strided_slice %358 {offsets = [0, 16], sizes = [8, 8], strides = [1, 1]} : vector<8x32xf32> to vector<8x8xf32>
    %366 = vector.extract_strided_slice %362 {offsets = [0, 24], sizes = [8, 8], strides = [1, 1]} : vector<8x32xf32> to vector<8x8xf32>
    %367 = arith.mulf %364, %189 : vector<8x8xf32>
    %368 = arith.mulf %363, %365 : vector<8x8xf32>
    %369 = arith.addf %367, %368 : vector<8x8xf32>
    %370 = math.tanh %369 : vector<8x8xf32>
    %371 = arith.mulf %366, %370 : vector<8x8xf32>
    %372 = tpu.concatenate %371, %209 in 1 : vector<8x8xf32>, vector<8x8xf32> -> vector<8x16xf32>
    %cst_93 = arith.constant dense<0.000000e+00> : vector<8x32xf32>
    %373 = tpu.matmul %372, %9, %cst_93 {dimension_numbers = #tpu.dot_dimension_numbers<[1], [0], [0], [1], [0, 0, 1, 1], [], []>} : vector<8x16xf32>, vector<16x32xf32>, vector<8x32xf32> -> vector<8x32xf32>
    %374 = vector.broadcast %20 : vector<1x32xf32> to vector<8x32xf32>
    %375 = arith.addf %373, %374 : vector<8x32xf32>
    %376 = math.tanh %375 : vector<8x32xf32>
    %cst_94 = arith.constant 5.000000e-01 : f32
    %377 = vector.broadcast %cst_94 : f32 to vector<8x32xf32>
    %378 = arith.mulf %377, %376 : vector<8x32xf32>
    %cst_95 = arith.constant 5.000000e-01 : f32
    %379 = vector.broadcast %cst_95 : f32 to vector<8x32xf32>
    %380 = arith.addf %378, %379 : vector<8x32xf32>
    %381 = vector.extract_strided_slice %380 {offsets = [0, 0], sizes = [8, 8], strides = [1, 1]} : vector<8x32xf32> to vector<8x8xf32>
    %382 = vector.extract_strided_slice %380 {offsets = [0, 8], sizes = [8, 8], strides = [1, 1]} : vector<8x32xf32> to vector<8x8xf32>
    %383 = vector.extract_strided_slice %376 {offsets = [0, 16], sizes = [8, 8], strides = [1, 1]} : vector<8x32xf32> to vector<8x8xf32>
    %384 = vector.extract_strided_slice %380 {offsets = [0, 24], sizes = [8, 8], strides = [1, 1]} : vector<8x32xf32> to vector<8x8xf32>
    %385 = arith.mulf %382, %207 : vector<8x8xf32>
    %386 = arith.mulf %381, %383 : vector<8x8xf32>
    %387 = arith.addf %385, %386 : vector<8x8xf32>
    %388 = math.tanh %387 : vector<8x8xf32>
    %389 = arith.mulf %384, %388 : vector<8x8xf32>
    %390 = tpu.concatenate %389, %227 in 1 : vector<8x8xf32>, vector<8x8xf32> -> vector<8x16xf32>
    %cst_96 = arith.constant dense<0.000000e+00> : vector<8x32xf32>
    %391 = tpu.matmul %390, %10, %cst_96 {dimension_numbers = #tpu.dot_dimension_numbers<[1], [0], [0], [1], [0, 0, 1, 1], [], []>} : vector<8x16xf32>, vector<16x32xf32>, vector<8x32xf32> -> vector<8x32xf32>
    %392 = vector.broadcast %21 : vector<1x32xf32> to vector<8x32xf32>
    %393 = arith.addf %391, %392 : vector<8x32xf32>
    %394 = math.tanh %393 : vector<8x32xf32>
    %cst_97 = arith.constant 5.000000e-01 : f32
    %395 = vector.broadcast %cst_97 : f32 to vector<8x32xf32>
    %396 = arith.mulf %395, %394 : vector<8x32xf32>
    %cst_98 = arith.constant 5.000000e-01 : f32
    %397 = vector.broadcast %cst_98 : f32 to vector<8x32xf32>
    %398 = arith.addf %396, %397 : vector<8x32xf32>
    %399 = vector.extract_strided_slice %398 {offsets = [0, 0], sizes = [8, 8], strides = [1, 1]} : vector<8x32xf32> to vector<8x8xf32>
    %400 = vector.extract_strided_slice %398 {offsets = [0, 8], sizes = [8, 8], strides = [1, 1]} : vector<8x32xf32> to vector<8x8xf32>
    %401 = vector.extract_strided_slice %394 {offsets = [0, 16], sizes = [8, 8], strides = [1, 1]} : vector<8x32xf32> to vector<8x8xf32>
    %402 = vector.extract_strided_slice %398 {offsets = [0, 24], sizes = [8, 8], strides = [1, 1]} : vector<8x32xf32> to vector<8x8xf32>
    %403 = arith.mulf %400, %225 : vector<8x8xf32>
    %404 = arith.mulf %399, %401 : vector<8x8xf32>
    %405 = arith.addf %403, %404 : vector<8x8xf32>
    %406 = math.tanh %405 : vector<8x8xf32>
    %407 = arith.mulf %402, %406 : vector<8x8xf32>
    %c8 = arith.constant 8 : index
    %c0_99 = arith.constant 0 : index
    %408 = vector.load %arg4[%c8, %c0_99] : memref<64x8xf32, #tpu.memory_space<vmem>>, vector<8x8xf32>
    tpu.vector_store %arg4[%c8, %c0_99], %407 {strides = array<i32>} : memref<64x8xf32, #tpu.memory_space<vmem>>, vector<8x8xf32>,
    %409 = vector.extract_strided_slice %28 {offsets = [16, 0], sizes = [8, 32], strides = [1, 1]} : vector<64x32xf32> to vector<8x32xf32>
    %cst_100 = arith.constant dense<0.000000e+00> : vector<8x32xf32>
    %410 = tpu.matmul %245, %1, %cst_100 {dimension_numbers = #tpu.dot_dimension_numbers<[1], [0], [0], [1], [0, 0, 1, 1], [], []>} : vector<8x8xf32>, vector<8x32xf32>, vector<8x32xf32> -> vector<8x32xf32>
    %411 = arith.addf %409, %410 : vector<8x32xf32>
    %412 = math.tanh %411 : vector<8x32xf32>
    %cst_101 = arith.constant 5.000000e-01 : f32
    %413 = vector.broadcast %cst_101 : f32 to vector<8x32xf32>
    %414 = arith.mulf %413, %412 : vector<8x32xf32>
    %cst_102 = arith.constant 5.000000e-01 : f32
    %415 = vector.broadcast %cst_102 : f32 to vector<8x32xf32>
    %416 = arith.addf %414, %415 : vector<8x32xf32>
    %417 = vector.extract_strided_slice %416 {offsets = [0, 0], sizes = [8, 8], strides = [1, 1]} : vector<8x32xf32> to vector<8x8xf32>
    %418 = vector.extract_strided_slice %416 {offsets = [0, 8], sizes = [8, 8], strides = [1, 1]} : vector<8x32xf32> to vector<8x8xf32>
    %419 = vector.extract_strided_slice %412 {offsets = [0, 16], sizes = [8, 8], strides = [1, 1]} : vector<8x32xf32> to vector<8x8xf32>
    %420 = vector.extract_strided_slice %416 {offsets = [0, 24], sizes = [8, 8], strides = [1, 1]} : vector<8x32xf32> to vector<8x8xf32>
    %421 = arith.mulf %418, %243 : vector<8x8xf32>
    %422 = arith.mulf %417, %419 : vector<8x8xf32>
    %423 = arith.addf %421, %422 : vector<8x8xf32>
    %424 = math.tanh %423 : vector<8x8xf32>
    %425 = arith.mulf %420, %424 : vector<8x8xf32>
    %426 = tpu.concatenate %425, %263 in 1 : vector<8x8xf32>, vector<8x8xf32> -> vector<8x16xf32>
    %cst_103 = arith.constant dense<0.000000e+00> : vector<8x32xf32>
    %427 = tpu.matmul %426, %2, %cst_103 {dimension_numbers = #tpu.dot_dimension_numbers<[1], [0], [0], [1], [0, 0, 1, 1], [], []>} : vector<8x16xf32>, vector<16x32xf32>, vector<8x32xf32> -> vector<8x32xf32>
    %428 = vector.broadcast %13 : vector<1x32xf32> to vector<8x32xf32>
    %429 = arith.addf %427, %428 : vector<8x32xf32>
    %430 = math.tanh %429 : vector<8x32xf32>
    %cst_104 = arith.constant 5.000000e-01 : f32
    %431 = vector.broadcast %cst_104 : f32 to vector<8x32xf32>
    %432 = arith.mulf %431, %430 : vector<8x32xf32>
    %cst_105 = arith.constant 5.000000e-01 : f32
    %433 = vector.broadcast %cst_105 : f32 to vector<8x32xf32>
    %434 = arith.addf %432, %433 : vector<8x32xf32>
    %435 = vector.extract_strided_slice %434 {offsets = [0, 0], sizes = [8, 8], strides = [1, 1]} : vector<8x32xf32> to vector<8x8xf32>
    %436 = vector.extract_strided_slice %434 {offsets = [0, 8], sizes = [8, 8], strides = [1, 1]} : vector<8x32xf32> to vector<8x8xf32>
    %437 = vector.extract_strided_slice %430 {offsets = [0, 16], sizes = [8, 8], strides = [1, 1]} : vector<8x32xf32> to vector<8x8xf32>
    %438 = vector.extract_strided_slice %434 {offsets = [0, 24], sizes = [8, 8], strides = [1, 1]} : vector<8x32xf32> to vector<8x8xf32>
    %439 = arith.mulf %436, %261 : vector<8x8xf32>
    %440 = arith.mulf %435, %437 : vector<8x8xf32>
    %441 = arith.addf %439, %440 : vector<8x8xf32>
    %442 = math.tanh %441 : vector<8x8xf32>
    %443 = arith.mulf %438, %442 : vector<8x8xf32>
    %444 = tpu.concatenate %443, %281 in 1 : vector<8x8xf32>, vector<8x8xf32> -> vector<8x16xf32>
    %cst_106 = arith.constant dense<0.000000e+00> : vector<8x32xf32>
    %445 = tpu.matmul %444, %3, %cst_106 {dimension_numbers = #tpu.dot_dimension_numbers<[1], [0], [0], [1], [0, 0, 1, 1], [], []>} : vector<8x16xf32>, vector<16x32xf32>, vector<8x32xf32> -> vector<8x32xf32>
    %446 = vector.broadcast %14 : vector<1x32xf32> to vector<8x32xf32>
    %447 = arith.addf %445, %446 : vector<8x32xf32>
    %448 = math.tanh %447 : vector<8x32xf32>
    %cst_107 = arith.constant 5.000000e-01 : f32
    %449 = vector.broadcast %cst_107 : f32 to vector<8x32xf32>
    %450 = arith.mulf %449, %448 : vector<8x32xf32>
    %cst_108 = arith.constant 5.000000e-01 : f32
    %451 = vector.broadcast %cst_108 : f32 to vector<8x32xf32>
    %452 = arith.addf %450, %451 : vector<8x32xf32>
    %453 = vector.extract_strided_slice %452 {offsets = [0, 0], sizes = [8, 8], strides = [1, 1]} : vector<8x32xf32> to vector<8x8xf32>
    %454 = vector.extract_strided_slice %452 {offsets = [0, 8], sizes = [8, 8], strides = [1, 1]} : vector<8x32xf32> to vector<8x8xf32>
    %455 = vector.extract_strided_slice %448 {offsets = [0, 16], sizes = [8, 8], strides = [1, 1]} : vector<8x32xf32> to vector<8x8xf32>
    %456 = vector.extract_strided_slice %452 {offsets = [0, 24], sizes = [8, 8], strides = [1, 1]} : vector<8x32xf32> to vector<8x8xf32>
    %457 = arith.mulf %454, %279 : vector<8x8xf32>
    %458 = arith.mulf %453, %455 : vector<8x8xf32>
    %459 = arith.addf %457, %458 : vector<8x8xf32>
    %460 = math.tanh %459 : vector<8x8xf32>
    %461 = arith.mulf %456, %460 : vector<8x8xf32>
    %462 = tpu.concatenate %461, %299 in 1 : vector<8x8xf32>, vector<8x8xf32> -> vector<8x16xf32>
    %cst_109 = arith.constant dense<0.000000e+00> : vector<8x32xf32>
    %463 = tpu.matmul %462, %4, %cst_109 {dimension_numbers = #tpu.dot_dimension_numbers<[1], [0], [0], [1], [0, 0, 1, 1], [], []>} : vector<8x16xf32>, vector<16x32xf32>, vector<8x32xf32> -> vector<8x32xf32>
    %464 = vector.broadcast %15 : vector<1x32xf32> to vector<8x32xf32>
    %465 = arith.addf %463, %464 : vector<8x32xf32>
    %466 = math.tanh %465 : vector<8x32xf32>
    %cst_110 = arith.constant 5.000000e-01 : f32
    %467 = vector.broadcast %cst_110 : f32 to vector<8x32xf32>
    %468 = arith.mulf %467, %466 : vector<8x32xf32>
    %cst_111 = arith.constant 5.000000e-01 : f32
    %469 = vector.broadcast %cst_111 : f32 to vector<8x32xf32>
    %470 = arith.addf %468, %469 : vector<8x32xf32>
    %471 = vector.extract_strided_slice %470 {offsets = [0, 0], sizes = [8, 8], strides = [1, 1]} : vector<8x32xf32> to vector<8x8xf32>
    %472 = vector.extract_strided_slice %470 {offsets = [0, 8], sizes = [8, 8], strides = [1, 1]} : vector<8x32xf32> to vector<8x8xf32>
    %473 = vector.extract_strided_slice %466 {offsets = [0, 16], sizes = [8, 8], strides = [1, 1]} : vector<8x32xf32> to vector<8x8xf32>
    %474 = vector.extract_strided_slice %470 {offsets = [0, 24], sizes = [8, 8], strides = [1, 1]} : vector<8x32xf32> to vector<8x8xf32>
    %475 = arith.mulf %472, %297 : vector<8x8xf32>
    %476 = arith.mulf %471, %473 : vector<8x8xf32>
    %477 = arith.addf %475, %476 : vector<8x8xf32>
    %478 = math.tanh %477 : vector<8x8xf32>
    %479 = arith.mulf %474, %478 : vector<8x8xf32>
    %480 = tpu.concatenate %479, %317 in 1 : vector<8x8xf32>, vector<8x8xf32> -> vector<8x16xf32>
    %cst_112 = arith.constant dense<0.000000e+00> : vector<8x32xf32>
    %481 = tpu.matmul %480, %5, %cst_112 {dimension_numbers = #tpu.dot_dimension_numbers<[1], [0], [0], [1], [0, 0, 1, 1], [], []>} : vector<8x16xf32>, vector<16x32xf32>, vector<8x32xf32> -> vector<8x32xf32>
    %482 = vector.broadcast %16 : vector<1x32xf32> to vector<8x32xf32>
    %483 = arith.addf %481, %482 : vector<8x32xf32>
    %484 = math.tanh %483 : vector<8x32xf32>
    %cst_113 = arith.constant 5.000000e-01 : f32
    %485 = vector.broadcast %cst_113 : f32 to vector<8x32xf32>
    %486 = arith.mulf %485, %484 : vector<8x32xf32>
    %cst_114 = arith.constant 5.000000e-01 : f32
    %487 = vector.broadcast %cst_114 : f32 to vector<8x32xf32>
    %488 = arith.addf %486, %487 : vector<8x32xf32>
    %489 = vector.extract_strided_slice %488 {offsets = [0, 0], sizes = [8, 8], strides = [1, 1]} : vector<8x32xf32> to vector<8x8xf32>
    %490 = vector.extract_strided_slice %488 {offsets = [0, 8], sizes = [8, 8], strides = [1, 1]} : vector<8x32xf32> to vector<8x8xf32>
    %491 = vector.extract_strided_slice %484 {offsets = [0, 16], sizes = [8, 8], strides = [1, 1]} : vector<8x32xf32> to vector<8x8xf32>
    %492 = vector.extract_strided_slice %488 {offsets = [0, 24], sizes = [8, 8], strides = [1, 1]} : vector<8x32xf32> to vector<8x8xf32>
    %493 = arith.mulf %490, %315 : vector<8x8xf32>
    %494 = arith.mulf %489, %491 : vector<8x8xf32>
    %495 = arith.addf %493, %494 : vector<8x8xf32>
    %496 = math.tanh %495 : vector<8x8xf32>
    %497 = arith.mulf %492, %496 : vector<8x8xf32>
    %498 = tpu.concatenate %497, %335 in 1 : vector<8x8xf32>, vector<8x8xf32> -> vector<8x16xf32>
    %cst_115 = arith.constant dense<0.000000e+00> : vector<8x32xf32>
    %499 = tpu.matmul %498, %6, %cst_115 {dimension_numbers = #tpu.dot_dimension_numbers<[1], [0], [0], [1], [0, 0, 1, 1], [], []>} : vector<8x16xf32>, vector<16x32xf32>, vector<8x32xf32> -> vector<8x32xf32>
    %500 = vector.broadcast %17 : vector<1x32xf32> to vector<8x32xf32>
    %501 = arith.addf %499, %500 : vector<8x32xf32>
    %502 = math.tanh %501 : vector<8x32xf32>
    %cst_116 = arith.constant 5.000000e-01 : f32
    %503 = vector.broadcast %cst_116 : f32 to vector<8x32xf32>
    %504 = arith.mulf %503, %502 : vector<8x32xf32>
    %cst_117 = arith.constant 5.000000e-01 : f32
    %505 = vector.broadcast %cst_117 : f32 to vector<8x32xf32>
    %506 = arith.addf %504, %505 : vector<8x32xf32>
    %507 = vector.extract_strided_slice %506 {offsets = [0, 0], sizes = [8, 8], strides = [1, 1]} : vector<8x32xf32> to vector<8x8xf32>
    %508 = vector.extract_strided_slice %506 {offsets = [0, 8], sizes = [8, 8], strides = [1, 1]} : vector<8x32xf32> to vector<8x8xf32>
    %509 = vector.extract_strided_slice %502 {offsets = [0, 16], sizes = [8, 8], strides = [1, 1]} : vector<8x32xf32> to vector<8x8xf32>
    %510 = vector.extract_strided_slice %506 {offsets = [0, 24], sizes = [8, 8], strides = [1, 1]} : vector<8x32xf32> to vector<8x8xf32>
    %511 = arith.mulf %508, %333 : vector<8x8xf32>
    %512 = arith.mulf %507, %509 : vector<8x8xf32>
    %513 = arith.addf %511, %512 : vector<8x8xf32>
    %514 = math.tanh %513 : vector<8x8xf32>
    %515 = arith.mulf %510, %514 : vector<8x8xf32>
    %516 = tpu.concatenate %515, %353 in 1 : vector<8x8xf32>, vector<8x8xf32> -> vector<8x16xf32>
    %cst_118 = arith.constant dense<0.000000e+00> : vector<8x32xf32>
    %517 = tpu.matmul %516, %7, %cst_118 {dimension_numbers = #tpu.dot_dimension_numbers<[1], [0], [0], [1], [0, 0, 1, 1], [], []>} : vector<8x16xf32>, vector<16x32xf32>, vector<8x32xf32> -> vector<8x32xf32>
    %518 = vector.broadcast %18 : vector<1x32xf32> to vector<8x32xf32>
    %519 = arith.addf %517, %518 : vector<8x32xf32>
    %520 = math.tanh %519 : vector<8x32xf32>
    %cst_119 = arith.constant 5.000000e-01 : f32
    %521 = vector.broadcast %cst_119 : f32 to vector<8x32xf32>
    %522 = arith.mulf %521, %520 : vector<8x32xf32>
    %cst_120 = arith.constant 5.000000e-01 : f32
    %523 = vector.broadcast %cst_120 : f32 to vector<8x32xf32>
    %524 = arith.addf %522, %523 : vector<8x32xf32>
    %525 = vector.extract_strided_slice %524 {offsets = [0, 0], sizes = [8, 8], strides = [1, 1]} : vector<8x32xf32> to vector<8x8xf32>
    %526 = vector.extract_strided_slice %524 {offsets = [0, 8], sizes = [8, 8], strides = [1, 1]} : vector<8x32xf32> to vector<8x8xf32>
    %527 = vector.extract_strided_slice %520 {offsets = [0, 16], sizes = [8, 8], strides = [1, 1]} : vector<8x32xf32> to vector<8x8xf32>
    %528 = vector.extract_strided_slice %524 {offsets = [0, 24], sizes = [8, 8], strides = [1, 1]} : vector<8x32xf32> to vector<8x8xf32>
    %529 = arith.mulf %526, %351 : vector<8x8xf32>
    %530 = arith.mulf %525, %527 : vector<8x8xf32>
    %531 = arith.addf %529, %530 : vector<8x8xf32>
    %532 = math.tanh %531 : vector<8x8xf32>
    %533 = arith.mulf %528, %532 : vector<8x8xf32>
    %534 = tpu.concatenate %533, %371 in 1 : vector<8x8xf32>, vector<8x8xf32> -> vector<8x16xf32>
    %cst_121 = arith.constant dense<0.000000e+00> : vector<8x32xf32>
    %535 = tpu.matmul %534, %8, %cst_121 {dimension_numbers = #tpu.dot_dimension_numbers<[1], [0], [0], [1], [0, 0, 1, 1], [], []>} : vector<8x16xf32>, vector<16x32xf32>, vector<8x32xf32> -> vector<8x32xf32>
    %536 = vector.broadcast %19 : vector<1x32xf32> to vector<8x32xf32>
    %537 = arith.addf %535, %536 : vector<8x32xf32>
    %538 = math.tanh %537 : vector<8x32xf32>
    %cst_122 = arith.constant 5.000000e-01 : f32
    %539 = vector.broadcast %cst_122 : f32 to vector<8x32xf32>
    %540 = arith.mulf %539, %538 : vector<8x32xf32>
    %cst_123 = arith.constant 5.000000e-01 : f32
    %541 = vector.broadcast %cst_123 : f32 to vector<8x32xf32>
    %542 = arith.addf %540, %541 : vector<8x32xf32>
    %543 = vector.extract_strided_slice %542 {offsets = [0, 0], sizes = [8, 8], strides = [1, 1]} : vector<8x32xf32> to vector<8x8xf32>
    %544 = vector.extract_strided_slice %542 {offsets = [0, 8], sizes = [8, 8], strides = [1, 1]} : vector<8x32xf32> to vector<8x8xf32>
    %545 = vector.extract_strided_slice %538 {offsets = [0, 16], sizes = [8, 8], strides = [1, 1]} : vector<8x32xf32> to vector<8x8xf32>
    %546 = vector.extract_strided_slice %542 {offsets = [0, 24], sizes = [8, 8], strides = [1, 1]} : vector<8x32xf32> to vector<8x8xf32>
    %547 = arith.mulf %544, %369 : vector<8x8xf32>
    %548 = arith.mulf %543, %545 : vector<8x8xf32>
    %549 = arith.addf %547, %548 : vector<8x8xf32>
    %550 = math.tanh %549 : vector<8x8xf32>
    %551 = arith.mulf %546, %550 : vector<8x8xf32>
    %552 = tpu.concatenate %551, %389 in 1 : vector<8x8xf32>, vector<8x8xf32> -> vector<8x16xf32>
    %cst_124 = arith.constant dense<0.000000e+00> : vector<8x32xf32>
    %553 = tpu.matmul %552, %9, %cst_124 {dimension_numbers = #tpu.dot_dimension_numbers<[1], [0], [0], [1], [0, 0, 1, 1], [], []>} : vector<8x16xf32>, vector<16x32xf32>, vector<8x32xf32> -> vector<8x32xf32>
    %554 = vector.broadcast %20 : vector<1x32xf32> to vector<8x32xf32>
    %555 = arith.addf %553, %554 : vector<8x32xf32>
    %556 = math.tanh %555 : vector<8x32xf32>
    %cst_125 = arith.constant 5.000000e-01 : f32
    %557 = vector.broadcast %cst_125 : f32 to vector<8x32xf32>
    %558 = arith.mulf %557, %556 : vector<8x32xf32>
    %cst_126 = arith.constant 5.000000e-01 : f32
    %559 = vector.broadcast %cst_126 : f32 to vector<8x32xf32>
    %560 = arith.addf %558, %559 : vector<8x32xf32>
    %561 = vector.extract_strided_slice %560 {offsets = [0, 0], sizes = [8, 8], strides = [1, 1]} : vector<8x32xf32> to vector<8x8xf32>
    %562 = vector.extract_strided_slice %560 {offsets = [0, 8], sizes = [8, 8], strides = [1, 1]} : vector<8x32xf32> to vector<8x8xf32>
    %563 = vector.extract_strided_slice %556 {offsets = [0, 16], sizes = [8, 8], strides = [1, 1]} : vector<8x32xf32> to vector<8x8xf32>
    %564 = vector.extract_strided_slice %560 {offsets = [0, 24], sizes = [8, 8], strides = [1, 1]} : vector<8x32xf32> to vector<8x8xf32>
    %565 = arith.mulf %562, %387 : vector<8x8xf32>
    %566 = arith.mulf %561, %563 : vector<8x8xf32>
    %567 = arith.addf %565, %566 : vector<8x8xf32>
    %568 = math.tanh %567 : vector<8x8xf32>
    %569 = arith.mulf %564, %568 : vector<8x8xf32>
    %570 = tpu.concatenate %569, %407 in 1 : vector<8x8xf32>, vector<8x8xf32> -> vector<8x16xf32>
    %cst_127 = arith.constant dense<0.000000e+00> : vector<8x32xf32>
    %571 = tpu.matmul %570, %10, %cst_127 {dimension_numbers = #tpu.dot_dimension_numbers<[1], [0], [0], [1], [0, 0, 1, 1], [], []>} : vector<8x16xf32>, vector<16x32xf32>, vector<8x32xf32> -> vector<8x32xf32>
    %572 = vector.broadcast %21 : vector<1x32xf32> to vector<8x32xf32>
    %573 = arith.addf %571, %572 : vector<8x32xf32>
    %574 = math.tanh %573 : vector<8x32xf32>
    %cst_128 = arith.constant 5.000000e-01 : f32
    %575 = vector.broadcast %cst_128 : f32 to vector<8x32xf32>
    %576 = arith.mulf %575, %574 : vector<8x32xf32>
    %cst_129 = arith.constant 5.000000e-01 : f32
    %577 = vector.broadcast %cst_129 : f32 to vector<8x32xf32>
    %578 = arith.addf %576, %577 : vector<8x32xf32>
    %579 = vector.extract_strided_slice %578 {offsets = [0, 0], sizes = [8, 8], strides = [1, 1]} : vector<8x32xf32> to vector<8x8xf32>
    %580 = vector.extract_strided_slice %578 {offsets = [0, 8], sizes = [8, 8], strides = [1, 1]} : vector<8x32xf32> to vector<8x8xf32>
    %581 = vector.extract_strided_slice %574 {offsets = [0, 16], sizes = [8, 8], strides = [1, 1]} : vector<8x32xf32> to vector<8x8xf32>
    %582 = vector.extract_strided_slice %578 {offsets = [0, 24], sizes = [8, 8], strides = [1, 1]} : vector<8x32xf32> to vector<8x8xf32>
    %583 = arith.mulf %580, %405 : vector<8x8xf32>
    %584 = arith.mulf %579, %581 : vector<8x8xf32>
    %585 = arith.addf %583, %584 : vector<8x8xf32>
    %586 = math.tanh %585 : vector<8x8xf32>
    %587 = arith.mulf %582, %586 : vector<8x8xf32>
    %c16 = arith.constant 16 : index
    %c0_130 = arith.constant 0 : index
    %588 = vector.load %arg4[%c16, %c0_130] : memref<64x8xf32, #tpu.memory_space<vmem>>, vector<8x8xf32>
    tpu.vector_store %arg4[%c16, %c0_130], %587 {strides = array<i32>} : memref<64x8xf32, #tpu.memory_space<vmem>>, vector<8x8xf32>,
    %589 = vector.extract_strided_slice %28 {offsets = [24, 0], sizes = [8, 32], strides = [1, 1]} : vector<64x32xf32> to vector<8x32xf32>
    %cst_131 = arith.constant dense<0.000000e+00> : vector<8x32xf32>
    %590 = tpu.matmul %425, %1, %cst_131 {dimension_numbers = #tpu.dot_dimension_numbers<[1], [0], [0], [1], [0, 0, 1, 1], [], []>} : vector<8x8xf32>, vector<8x32xf32>, vector<8x32xf32> -> vector<8x32xf32>
    %591 = arith.addf %589, %590 : vector<8x32xf32>
    %592 = math.tanh %591 : vector<8x32xf32>
    %cst_132 = arith.constant 5.000000e-01 : f32
    %593 = vector.broadcast %cst_132 : f32 to vector<8x32xf32>
    %594 = arith.mulf %593, %592 : vector<8x32xf32>
    %cst_133 = arith.constant 5.000000e-01 : f32
    %595 = vector.broadcast %cst_133 : f32 to vector<8x32xf32>
    %596 = arith.addf %594, %595 : vector<8x32xf32>
    %597 = vector.extract_strided_slice %596 {offsets = [0, 0], sizes = [8, 8], strides = [1, 1]} : vector<8x32xf32> to vector<8x8xf32>
    %598 = vector.extract_strided_slice %596 {offsets = [0, 8], sizes = [8, 8], strides = [1, 1]} : vector<8x32xf32> to vector<8x8xf32>
    %599 = vector.extract_strided_slice %592 {offsets = [0, 16], sizes = [8, 8], strides = [1, 1]} : vector<8x32xf32> to vector<8x8xf32>
    %600 = vector.extract_strided_slice %596 {offsets = [0, 24], sizes = [8, 8], strides = [1, 1]} : vector<8x32xf32> to vector<8x8xf32>
    %601 = arith.mulf %598, %423 : vector<8x8xf32>
    %602 = arith.mulf %597, %599 : vector<8x8xf32>
    %603 = arith.addf %601, %602 : vector<8x8xf32>
    %604 = math.tanh %603 : vector<8x8xf32>
    %605 = arith.mulf %600, %604 : vector<8x8xf32>
    %606 = tpu.concatenate %605, %443 in 1 : vector<8x8xf32>, vector<8x8xf32> -> vector<8x16xf32>
    %cst_134 = arith.constant dense<0.000000e+00> : vector<8x32xf32>
    %607 = tpu.matmul %606, %2, %cst_134 {dimension_numbers = #tpu.dot_dimension_numbers<[1], [0], [0], [1], [0, 0, 1, 1], [], []>} : vector<8x16xf32>, vector<16x32xf32>, vector<8x32xf32> -> vector<8x32xf32>
    %608 = vector.broadcast %13 : vector<1x32xf32> to vector<8x32xf32>
    %609 = arith.addf %607, %608 : vector<8x32xf32>
    %610 = math.tanh %609 : vector<8x32xf32>
    %cst_135 = arith.constant 5.000000e-01 : f32
    %611 = vector.broadcast %cst_135 : f32 to vector<8x32xf32>
    %612 = arith.mulf %611, %610 : vector<8x32xf32>
    %cst_136 = arith.constant 5.000000e-01 : f32
    %613 = vector.broadcast %cst_136 : f32 to vector<8x32xf32>
    %614 = arith.addf %612, %613 : vector<8x32xf32>
    %615 = vector.extract_strided_slice %614 {offsets = [0, 0], sizes = [8, 8], strides = [1, 1]} : vector<8x32xf32> to vector<8x8xf32>
    %616 = vector.extract_strided_slice %614 {offsets = [0, 8], sizes = [8, 8], strides = [1, 1]} : vector<8x32xf32> to vector<8x8xf32>
    %617 = vector.extract_strided_slice %610 {offsets = [0, 16], sizes = [8, 8], strides = [1, 1]} : vector<8x32xf32> to vector<8x8xf32>
    %618 = vector.extract_strided_slice %614 {offsets = [0, 24], sizes = [8, 8], strides = [1, 1]} : vector<8x32xf32> to vector<8x8xf32>
    %619 = arith.mulf %616, %441 : vector<8x8xf32>
    %620 = arith.mulf %615, %617 : vector<8x8xf32>
    %621 = arith.addf %619, %620 : vector<8x8xf32>
    %622 = math.tanh %621 : vector<8x8xf32>
    %623 = arith.mulf %618, %622 : vector<8x8xf32>
    %624 = tpu.concatenate %623, %461 in 1 : vector<8x8xf32>, vector<8x8xf32> -> vector<8x16xf32>
    %cst_137 = arith.constant dense<0.000000e+00> : vector<8x32xf32>
    %625 = tpu.matmul %624, %3, %cst_137 {dimension_numbers = #tpu.dot_dimension_numbers<[1], [0], [0], [1], [0, 0, 1, 1], [], []>} : vector<8x16xf32>, vector<16x32xf32>, vector<8x32xf32> -> vector<8x32xf32>
    %626 = vector.broadcast %14 : vector<1x32xf32> to vector<8x32xf32>
    %627 = arith.addf %625, %626 : vector<8x32xf32>
    %628 = math.tanh %627 : vector<8x32xf32>
    %cst_138 = arith.constant 5.000000e-01 : f32
    %629 = vector.broadcast %cst_138 : f32 to vector<8x32xf32>
    %630 = arith.mulf %629, %628 : vector<8x32xf32>
    %cst_139 = arith.constant 5.000000e-01 : f32
    %631 = vector.broadcast %cst_139 : f32 to vector<8x32xf32>
    %632 = arith.addf %630, %631 : vector<8x32xf32>
    %633 = vector.extract_strided_slice %632 {offsets = [0, 0], sizes = [8, 8], strides = [1, 1]} : vector<8x32xf32> to vector<8x8xf32>
    %634 = vector.extract_strided_slice %632 {offsets = [0, 8], sizes = [8, 8], strides = [1, 1]} : vector<8x32xf32> to vector<8x8xf32>
    %635 = vector.extract_strided_slice %628 {offsets = [0, 16], sizes = [8, 8], strides = [1, 1]} : vector<8x32xf32> to vector<8x8xf32>
    %636 = vector.extract_strided_slice %632 {offsets = [0, 24], sizes = [8, 8], strides = [1, 1]} : vector<8x32xf32> to vector<8x8xf32>
    %637 = arith.mulf %634, %459 : vector<8x8xf32>
    %638 = arith.mulf %633, %635 : vector<8x8xf32>
    %639 = arith.addf %637, %638 : vector<8x8xf32>
    %640 = math.tanh %639 : vector<8x8xf32>
    %641 = arith.mulf %636, %640 : vector<8x8xf32>
    %642 = tpu.concatenate %641, %479 in 1 : vector<8x8xf32>, vector<8x8xf32> -> vector<8x16xf32>
    %cst_140 = arith.constant dense<0.000000e+00> : vector<8x32xf32>
    %643 = tpu.matmul %642, %4, %cst_140 {dimension_numbers = #tpu.dot_dimension_numbers<[1], [0], [0], [1], [0, 0, 1, 1], [], []>} : vector<8x16xf32>, vector<16x32xf32>, vector<8x32xf32> -> vector<8x32xf32>
    %644 = vector.broadcast %15 : vector<1x32xf32> to vector<8x32xf32>
    %645 = arith.addf %643, %644 : vector<8x32xf32>
    %646 = math.tanh %645 : vector<8x32xf32>
    %cst_141 = arith.constant 5.000000e-01 : f32
    %647 = vector.broadcast %cst_141 : f32 to vector<8x32xf32>
    %648 = arith.mulf %647, %646 : vector<8x32xf32>
    %cst_142 = arith.constant 5.000000e-01 : f32
    %649 = vector.broadcast %cst_142 : f32 to vector<8x32xf32>
    %650 = arith.addf %648, %649 : vector<8x32xf32>
    %651 = vector.extract_strided_slice %650 {offsets = [0, 0], sizes = [8, 8], strides = [1, 1]} : vector<8x32xf32> to vector<8x8xf32>
    %652 = vector.extract_strided_slice %650 {offsets = [0, 8], sizes = [8, 8], strides = [1, 1]} : vector<8x32xf32> to vector<8x8xf32>
    %653 = vector.extract_strided_slice %646 {offsets = [0, 16], sizes = [8, 8], strides = [1, 1]} : vector<8x32xf32> to vector<8x8xf32>
    %654 = vector.extract_strided_slice %650 {offsets = [0, 24], sizes = [8, 8], strides = [1, 1]} : vector<8x32xf32> to vector<8x8xf32>
    %655 = arith.mulf %652, %477 : vector<8x8xf32>
    %656 = arith.mulf %651, %653 : vector<8x8xf32>
    %657 = arith.addf %655, %656 : vector<8x8xf32>
    %658 = math.tanh %657 : vector<8x8xf32>
    %659 = arith.mulf %654, %658 : vector<8x8xf32>
    %660 = tpu.concatenate %659, %497 in 1 : vector<8x8xf32>, vector<8x8xf32> -> vector<8x16xf32>
    %cst_143 = arith.constant dense<0.000000e+00> : vector<8x32xf32>
    %661 = tpu.matmul %660, %5, %cst_143 {dimension_numbers = #tpu.dot_dimension_numbers<[1], [0], [0], [1], [0, 0, 1, 1], [], []>} : vector<8x16xf32>, vector<16x32xf32>, vector<8x32xf32> -> vector<8x32xf32>
    %662 = vector.broadcast %16 : vector<1x32xf32> to vector<8x32xf32>
    %663 = arith.addf %661, %662 : vector<8x32xf32>
    %664 = math.tanh %663 : vector<8x32xf32>
    %cst_144 = arith.constant 5.000000e-01 : f32
    %665 = vector.broadcast %cst_144 : f32 to vector<8x32xf32>
    %666 = arith.mulf %665, %664 : vector<8x32xf32>
    %cst_145 = arith.constant 5.000000e-01 : f32
    %667 = vector.broadcast %cst_145 : f32 to vector<8x32xf32>
    %668 = arith.addf %666, %667 : vector<8x32xf32>
    %669 = vector.extract_strided_slice %668 {offsets = [0, 0], sizes = [8, 8], strides = [1, 1]} : vector<8x32xf32> to vector<8x8xf32>
    %670 = vector.extract_strided_slice %668 {offsets = [0, 8], sizes = [8, 8], strides = [1, 1]} : vector<8x32xf32> to vector<8x8xf32>
    %671 = vector.extract_strided_slice %664 {offsets = [0, 16], sizes = [8, 8], strides = [1, 1]} : vector<8x32xf32> to vector<8x8xf32>
    %672 = vector.extract_strided_slice %668 {offsets = [0, 24], sizes = [8, 8], strides = [1, 1]} : vector<8x32xf32> to vector<8x8xf32>
    %673 = arith.mulf %670, %495 : vector<8x8xf32>
    %674 = arith.mulf %669, %671 : vector<8x8xf32>
    %675 = arith.addf %673, %674 : vector<8x8xf32>
    %676 = math.tanh %675 : vector<8x8xf32>
    %677 = arith.mulf %672, %676 : vector<8x8xf32>
    %678 = tpu.concatenate %677, %515 in 1 : vector<8x8xf32>, vector<8x8xf32> -> vector<8x16xf32>
    %cst_146 = arith.constant dense<0.000000e+00> : vector<8x32xf32>
    %679 = tpu.matmul %678, %6, %cst_146 {dimension_numbers = #tpu.dot_dimension_numbers<[1], [0], [0], [1], [0, 0, 1, 1], [], []>} : vector<8x16xf32>, vector<16x32xf32>, vector<8x32xf32> -> vector<8x32xf32>
    %680 = vector.broadcast %17 : vector<1x32xf32> to vector<8x32xf32>
    %681 = arith.addf %679, %680 : vector<8x32xf32>
    %682 = math.tanh %681 : vector<8x32xf32>
    %cst_147 = arith.constant 5.000000e-01 : f32
    %683 = vector.broadcast %cst_147 : f32 to vector<8x32xf32>
    %684 = arith.mulf %683, %682 : vector<8x32xf32>
    %cst_148 = arith.constant 5.000000e-01 : f32
    %685 = vector.broadcast %cst_148 : f32 to vector<8x32xf32>
    %686 = arith.addf %684, %685 : vector<8x32xf32>
    %687 = vector.extract_strided_slice %686 {offsets = [0, 0], sizes = [8, 8], strides = [1, 1]} : vector<8x32xf32> to vector<8x8xf32>
    %688 = vector.extract_strided_slice %686 {offsets = [0, 8], sizes = [8, 8], strides = [1, 1]} : vector<8x32xf32> to vector<8x8xf32>
    %689 = vector.extract_strided_slice %682 {offsets = [0, 16], sizes = [8, 8], strides = [1, 1]} : vector<8x32xf32> to vector<8x8xf32>
    %690 = vector.extract_strided_slice %686 {offsets = [0, 24], sizes = [8, 8], strides = [1, 1]} : vector<8x32xf32> to vector<8x8xf32>
    %691 = arith.mulf %688, %513 : vector<8x8xf32>
    %692 = arith.mulf %687, %689 : vector<8x8xf32>
    %693 = arith.addf %691, %692 : vector<8x8xf32>
    %694 = math.tanh %693 : vector<8x8xf32>
    %695 = arith.mulf %690, %694 : vector<8x8xf32>
    %696 = tpu.concatenate %695, %533 in 1 : vector<8x8xf32>, vector<8x8xf32> -> vector<8x16xf32>
    %cst_149 = arith.constant dense<0.000000e+00> : vector<8x32xf32>
    %697 = tpu.matmul %696, %7, %cst_149 {dimension_numbers = #tpu.dot_dimension_numbers<[1], [0], [0], [1], [0, 0, 1, 1], [], []>} : vector<8x16xf32>, vector<16x32xf32>, vector<8x32xf32> -> vector<8x32xf32>
    %698 = vector.broadcast %18 : vector<1x32xf32> to vector<8x32xf32>
    %699 = arith.addf %697, %698 : vector<8x32xf32>
    %700 = math.tanh %699 : vector<8x32xf32>
    %cst_150 = arith.constant 5.000000e-01 : f32
    %701 = vector.broadcast %cst_150 : f32 to vector<8x32xf32>
    %702 = arith.mulf %701, %700 : vector<8x32xf32>
    %cst_151 = arith.constant 5.000000e-01 : f32
    %703 = vector.broadcast %cst_151 : f32 to vector<8x32xf32>
    %704 = arith.addf %702, %703 : vector<8x32xf32>
    %705 = vector.extract_strided_slice %704 {offsets = [0, 0], sizes = [8, 8], strides = [1, 1]} : vector<8x32xf32> to vector<8x8xf32>
    %706 = vector.extract_strided_slice %704 {offsets = [0, 8], sizes = [8, 8], strides = [1, 1]} : vector<8x32xf32> to vector<8x8xf32>
    %707 = vector.extract_strided_slice %700 {offsets = [0, 16], sizes = [8, 8], strides = [1, 1]} : vector<8x32xf32> to vector<8x8xf32>
    %708 = vector.extract_strided_slice %704 {offsets = [0, 24], sizes = [8, 8], strides = [1, 1]} : vector<8x32xf32> to vector<8x8xf32>
    %709 = arith.mulf %706, %531 : vector<8x8xf32>
    %710 = arith.mulf %705, %707 : vector<8x8xf32>
    %711 = arith.addf %709, %710 : vector<8x8xf32>
    %712 = math.tanh %711 : vector<8x8xf32>
    %713 = arith.mulf %708, %712 : vector<8x8xf32>
    %714 = tpu.concatenate %713, %551 in 1 : vector<8x8xf32>, vector<8x8xf32> -> vector<8x16xf32>
    %cst_152 = arith.constant dense<0.000000e+00> : vector<8x32xf32>
    %715 = tpu.matmul %714, %8, %cst_152 {dimension_numbers = #tpu.dot_dimension_numbers<[1], [0], [0], [1], [0, 0, 1, 1], [], []>} : vector<8x16xf32>, vector<16x32xf32>, vector<8x32xf32> -> vector<8x32xf32>
    %716 = vector.broadcast %19 : vector<1x32xf32> to vector<8x32xf32>
    %717 = arith.addf %715, %716 : vector<8x32xf32>
    %718 = math.tanh %717 : vector<8x32xf32>
    %cst_153 = arith.constant 5.000000e-01 : f32
    %719 = vector.broadcast %cst_153 : f32 to vector<8x32xf32>
    %720 = arith.mulf %719, %718 : vector<8x32xf32>
    %cst_154 = arith.constant 5.000000e-01 : f32
    %721 = vector.broadcast %cst_154 : f32 to vector<8x32xf32>
    %722 = arith.addf %720, %721 : vector<8x32xf32>
    %723 = vector.extract_strided_slice %722 {offsets = [0, 0], sizes = [8, 8], strides = [1, 1]} : vector<8x32xf32> to vector<8x8xf32>
    %724 = vector.extract_strided_slice %722 {offsets = [0, 8], sizes = [8, 8], strides = [1, 1]} : vector<8x32xf32> to vector<8x8xf32>
    %725 = vector.extract_strided_slice %718 {offsets = [0, 16], sizes = [8, 8], strides = [1, 1]} : vector<8x32xf32> to vector<8x8xf32>
    %726 = vector.extract_strided_slice %722 {offsets = [0, 24], sizes = [8, 8], strides = [1, 1]} : vector<8x32xf32> to vector<8x8xf32>
    %727 = arith.mulf %724, %549 : vector<8x8xf32>
    %728 = arith.mulf %723, %725 : vector<8x8xf32>
    %729 = arith.addf %727, %728 : vector<8x8xf32>
    %730 = math.tanh %729 : vector<8x8xf32>
    %731 = arith.mulf %726, %730 : vector<8x8xf32>
    %732 = tpu.concatenate %731, %569 in 1 : vector<8x8xf32>, vector<8x8xf32> -> vector<8x16xf32>
    %cst_155 = arith.constant dense<0.000000e+00> : vector<8x32xf32>
    %733 = tpu.matmul %732, %9, %cst_155 {dimension_numbers = #tpu.dot_dimension_numbers<[1], [0], [0], [1], [0, 0, 1, 1], [], []>} : vector<8x16xf32>, vector<16x32xf32>, vector<8x32xf32> -> vector<8x32xf32>
    %734 = vector.broadcast %20 : vector<1x32xf32> to vector<8x32xf32>
    %735 = arith.addf %733, %734 : vector<8x32xf32>
    %736 = math.tanh %735 : vector<8x32xf32>
    %cst_156 = arith.constant 5.000000e-01 : f32
    %737 = vector.broadcast %cst_156 : f32 to vector<8x32xf32>
    %738 = arith.mulf %737, %736 : vector<8x32xf32>
    %cst_157 = arith.constant 5.000000e-01 : f32
    %739 = vector.broadcast %cst_157 : f32 to vector<8x32xf32>
    %740 = arith.addf %738, %739 : vector<8x32xf32>
    %741 = vector.extract_strided_slice %740 {offsets = [0, 0], sizes = [8, 8], strides = [1, 1]} : vector<8x32xf32> to vector<8x8xf32>
    %742 = vector.extract_strided_slice %740 {offsets = [0, 8], sizes = [8, 8], strides = [1, 1]} : vector<8x32xf32> to vector<8x8xf32>
    %743 = vector.extract_strided_slice %736 {offsets = [0, 16], sizes = [8, 8], strides = [1, 1]} : vector<8x32xf32> to vector<8x8xf32>
    %744 = vector.extract_strided_slice %740 {offsets = [0, 24], sizes = [8, 8], strides = [1, 1]} : vector<8x32xf32> to vector<8x8xf32>
    %745 = arith.mulf %742, %567 : vector<8x8xf32>
    %746 = arith.mulf %741, %743 : vector<8x8xf32>
    %747 = arith.addf %745, %746 : vector<8x8xf32>
    %748 = math.tanh %747 : vector<8x8xf32>
    %749 = arith.mulf %744, %748 : vector<8x8xf32>
    %750 = tpu.concatenate %749, %587 in 1 : vector<8x8xf32>, vector<8x8xf32> -> vector<8x16xf32>
    %cst_158 = arith.constant dense<0.000000e+00> : vector<8x32xf32>
    %751 = tpu.matmul %750, %10, %cst_158 {dimension_numbers = #tpu.dot_dimension_numbers<[1], [0], [0], [1], [0, 0, 1, 1], [], []>} : vector<8x16xf32>, vector<16x32xf32>, vector<8x32xf32> -> vector<8x32xf32>
    %752 = vector.broadcast %21 : vector<1x32xf32> to vector<8x32xf32>
    %753 = arith.addf %751, %752 : vector<8x32xf32>
    %754 = math.tanh %753 : vector<8x32xf32>
    %cst_159 = arith.constant 5.000000e-01 : f32
    %755 = vector.broadcast %cst_159 : f32 to vector<8x32xf32>
    %756 = arith.mulf %755, %754 : vector<8x32xf32>
    %cst_160 = arith.constant 5.000000e-01 : f32
    %757 = vector.broadcast %cst_160 : f32 to vector<8x32xf32>
    %758 = arith.addf %756, %757 : vector<8x32xf32>
    %759 = vector.extract_strided_slice %758 {offsets = [0, 0], sizes = [8, 8], strides = [1, 1]} : vector<8x32xf32> to vector<8x8xf32>
    %760 = vector.extract_strided_slice %758 {offsets = [0, 8], sizes = [8, 8], strides = [1, 1]} : vector<8x32xf32> to vector<8x8xf32>
    %761 = vector.extract_strided_slice %754 {offsets = [0, 16], sizes = [8, 8], strides = [1, 1]} : vector<8x32xf32> to vector<8x8xf32>
    %762 = vector.extract_strided_slice %758 {offsets = [0, 24], sizes = [8, 8], strides = [1, 1]} : vector<8x32xf32> to vector<8x8xf32>
    %763 = arith.mulf %760, %585 : vector<8x8xf32>
    %764 = arith.mulf %759, %761 : vector<8x8xf32>
    %765 = arith.addf %763, %764 : vector<8x8xf32>
    %766 = math.tanh %765 : vector<8x8xf32>
    %767 = arith.mulf %762, %766 : vector<8x8xf32>
    %c24 = arith.constant 24 : index
    %c0_161 = arith.constant 0 : index
    %768 = vector.load %arg4[%c24, %c0_161] : memref<64x8xf32, #tpu.memory_space<vmem>>, vector<8x8xf32>
    tpu.vector_store %arg4[%c24, %c0_161], %767 {strides = array<i32>} : memref<64x8xf32, #tpu.memory_space<vmem>>, vector<8x8xf32>,
    %769 = vector.extract_strided_slice %28 {offsets = [32, 0], sizes = [8, 32], strides = [1, 1]} : vector<64x32xf32> to vector<8x32xf32>
    %cst_162 = arith.constant dense<0.000000e+00> : vector<8x32xf32>
    %770 = tpu.matmul %605, %1, %cst_162 {dimension_numbers = #tpu.dot_dimension_numbers<[1], [0], [0], [1], [0, 0, 1, 1], [], []>} : vector<8x8xf32>, vector<8x32xf32>, vector<8x32xf32> -> vector<8x32xf32>
    %771 = arith.addf %769, %770 : vector<8x32xf32>
    %772 = math.tanh %771 : vector<8x32xf32>
    %cst_163 = arith.constant 5.000000e-01 : f32
    %773 = vector.broadcast %cst_163 : f32 to vector<8x32xf32>
    %774 = arith.mulf %773, %772 : vector<8x32xf32>
    %cst_164 = arith.constant 5.000000e-01 : f32
    %775 = vector.broadcast %cst_164 : f32 to vector<8x32xf32>
    %776 = arith.addf %774, %775 : vector<8x32xf32>
    %777 = vector.extract_strided_slice %776 {offsets = [0, 0], sizes = [8, 8], strides = [1, 1]} : vector<8x32xf32> to vector<8x8xf32>
    %778 = vector.extract_strided_slice %776 {offsets = [0, 8], sizes = [8, 8], strides = [1, 1]} : vector<8x32xf32> to vector<8x8xf32>
    %779 = vector.extract_strided_slice %772 {offsets = [0, 16], sizes = [8, 8], strides = [1, 1]} : vector<8x32xf32> to vector<8x8xf32>
    %780 = vector.extract_strided_slice %776 {offsets = [0, 24], sizes = [8, 8], strides = [1, 1]} : vector<8x32xf32> to vector<8x8xf32>
    %781 = arith.mulf %778, %603 : vector<8x8xf32>
    %782 = arith.mulf %777, %779 : vector<8x8xf32>
    %783 = arith.addf %781, %782 : vector<8x8xf32>
    %784 = math.tanh %783 : vector<8x8xf32>
    %785 = arith.mulf %780, %784 : vector<8x8xf32>
    %786 = tpu.concatenate %785, %623 in 1 : vector<8x8xf32>, vector<8x8xf32> -> vector<8x16xf32>
    %cst_165 = arith.constant dense<0.000000e+00> : vector<8x32xf32>
    %787 = tpu.matmul %786, %2, %cst_165 {dimension_numbers = #tpu.dot_dimension_numbers<[1], [0], [0], [1], [0, 0, 1, 1], [], []>} : vector<8x16xf32>, vector<16x32xf32>, vector<8x32xf32> -> vector<8x32xf32>
    %788 = vector.broadcast %13 : vector<1x32xf32> to vector<8x32xf32>
    %789 = arith.addf %787, %788 : vector<8x32xf32>
    %790 = math.tanh %789 : vector<8x32xf32>
    %cst_166 = arith.constant 5.000000e-01 : f32
    %791 = vector.broadcast %cst_166 : f32 to vector<8x32xf32>
    %792 = arith.mulf %791, %790 : vector<8x32xf32>
    %cst_167 = arith.constant 5.000000e-01 : f32
    %793 = vector.broadcast %cst_167 : f32 to vector<8x32xf32>
    %794 = arith.addf %792, %793 : vector<8x32xf32>
    %795 = vector.extract_strided_slice %794 {offsets = [0, 0], sizes = [8, 8], strides = [1, 1]} : vector<8x32xf32> to vector<8x8xf32>
    %796 = vector.extract_strided_slice %794 {offsets = [0, 8], sizes = [8, 8], strides = [1, 1]} : vector<8x32xf32> to vector<8x8xf32>
    %797 = vector.extract_strided_slice %790 {offsets = [0, 16], sizes = [8, 8], strides = [1, 1]} : vector<8x32xf32> to vector<8x8xf32>
    %798 = vector.extract_strided_slice %794 {offsets = [0, 24], sizes = [8, 8], strides = [1, 1]} : vector<8x32xf32> to vector<8x8xf32>
    %799 = arith.mulf %796, %621 : vector<8x8xf32>
    %800 = arith.mulf %795, %797 : vector<8x8xf32>
    %801 = arith.addf %799, %800 : vector<8x8xf32>
    %802 = math.tanh %801 : vector<8x8xf32>
    %803 = arith.mulf %798, %802 : vector<8x8xf32>
    %804 = tpu.concatenate %803, %641 in 1 : vector<8x8xf32>, vector<8x8xf32> -> vector<8x16xf32>
    %cst_168 = arith.constant dense<0.000000e+00> : vector<8x32xf32>
    %805 = tpu.matmul %804, %3, %cst_168 {dimension_numbers = #tpu.dot_dimension_numbers<[1], [0], [0], [1], [0, 0, 1, 1], [], []>} : vector<8x16xf32>, vector<16x32xf32>, vector<8x32xf32> -> vector<8x32xf32>
    %806 = vector.broadcast %14 : vector<1x32xf32> to vector<8x32xf32>
    %807 = arith.addf %805, %806 : vector<8x32xf32>
    %808 = math.tanh %807 : vector<8x32xf32>
    %cst_169 = arith.constant 5.000000e-01 : f32
    %809 = vector.broadcast %cst_169 : f32 to vector<8x32xf32>
    %810 = arith.mulf %809, %808 : vector<8x32xf32>
    %cst_170 = arith.constant 5.000000e-01 : f32
    %811 = vector.broadcast %cst_170 : f32 to vector<8x32xf32>
    %812 = arith.addf %810, %811 : vector<8x32xf32>
    %813 = vector.extract_strided_slice %812 {offsets = [0, 0], sizes = [8, 8], strides = [1, 1]} : vector<8x32xf32> to vector<8x8xf32>
    %814 = vector.extract_strided_slice %812 {offsets = [0, 8], sizes = [8, 8], strides = [1, 1]} : vector<8x32xf32> to vector<8x8xf32>
    %815 = vector.extract_strided_slice %808 {offsets = [0, 16], sizes = [8, 8], strides = [1, 1]} : vector<8x32xf32> to vector<8x8xf32>
    %816 = vector.extract_strided_slice %812 {offsets = [0, 24], sizes = [8, 8], strides = [1, 1]} : vector<8x32xf32> to vector<8x8xf32>
    %817 = arith.mulf %814, %639 : vector<8x8xf32>
    %818 = arith.mulf %813, %815 : vector<8x8xf32>
    %819 = arith.addf %817, %818 : vector<8x8xf32>
    %820 = math.tanh %819 : vector<8x8xf32>
    %821 = arith.mulf %816, %820 : vector<8x8xf32>
    %822 = tpu.concatenate %821, %659 in 1 : vector<8x8xf32>, vector<8x8xf32> -> vector<8x16xf32>
    %cst_171 = arith.constant dense<0.000000e+00> : vector<8x32xf32>
    %823 = tpu.matmul %822, %4, %cst_171 {dimension_numbers = #tpu.dot_dimension_numbers<[1], [0], [0], [1], [0, 0, 1, 1], [], []>} : vector<8x16xf32>, vector<16x32xf32>, vector<8x32xf32> -> vector<8x32xf32>
    %824 = vector.broadcast %15 : vector<1x32xf32> to vector<8x32xf32>
    %825 = arith.addf %823, %824 : vector<8x32xf32>
    %826 = math.tanh %825 : vector<8x32xf32>
    %cst_172 = arith.constant 5.000000e-01 : f32
    %827 = vector.broadcast %cst_172 : f32 to vector<8x32xf32>
    %828 = arith.mulf %827, %826 : vector<8x32xf32>
    %cst_173 = arith.constant 5.000000e-01 : f32
    %829 = vector.broadcast %cst_173 : f32 to vector<8x32xf32>
    %830 = arith.addf %828, %829 : vector<8x32xf32>
    %831 = vector.extract_strided_slice %830 {offsets = [0, 0], sizes = [8, 8], strides = [1, 1]} : vector<8x32xf32> to vector<8x8xf32>
    %832 = vector.extract_strided_slice %830 {offsets = [0, 8], sizes = [8, 8], strides = [1, 1]} : vector<8x32xf32> to vector<8x8xf32>
    %833 = vector.extract_strided_slice %826 {offsets = [0, 16], sizes = [8, 8], strides = [1, 1]} : vector<8x32xf32> to vector<8x8xf32>
    %834 = vector.extract_strided_slice %830 {offsets = [0, 24], sizes = [8, 8], strides = [1, 1]} : vector<8x32xf32> to vector<8x8xf32>
    %835 = arith.mulf %832, %657 : vector<8x8xf32>
    %836 = arith.mulf %831, %833 : vector<8x8xf32>
    %837 = arith.addf %835, %836 : vector<8x8xf32>
    %838 = math.tanh %837 : vector<8x8xf32>
    %839 = arith.mulf %834, %838 : vector<8x8xf32>
    %840 = tpu.concatenate %839, %677 in 1 : vector<8x8xf32>, vector<8x8xf32> -> vector<8x16xf32>
    %cst_174 = arith.constant dense<0.000000e+00> : vector<8x32xf32>
    %841 = tpu.matmul %840, %5, %cst_174 {dimension_numbers = #tpu.dot_dimension_numbers<[1], [0], [0], [1], [0, 0, 1, 1], [], []>} : vector<8x16xf32>, vector<16x32xf32>, vector<8x32xf32> -> vector<8x32xf32>
    %842 = vector.broadcast %16 : vector<1x32xf32> to vector<8x32xf32>
    %843 = arith.addf %841, %842 : vector<8x32xf32>
    %844 = math.tanh %843 : vector<8x32xf32>
    %cst_175 = arith.constant 5.000000e-01 : f32
    %845 = vector.broadcast %cst_175 : f32 to vector<8x32xf32>
    %846 = arith.mulf %845, %844 : vector<8x32xf32>
    %cst_176 = arith.constant 5.000000e-01 : f32
    %847 = vector.broadcast %cst_176 : f32 to vector<8x32xf32>
    %848 = arith.addf %846, %847 : vector<8x32xf32>
    %849 = vector.extract_strided_slice %848 {offsets = [0, 0], sizes = [8, 8], strides = [1, 1]} : vector<8x32xf32> to vector<8x8xf32>
    %850 = vector.extract_strided_slice %848 {offsets = [0, 8], sizes = [8, 8], strides = [1, 1]} : vector<8x32xf32> to vector<8x8xf32>
    %851 = vector.extract_strided_slice %844 {offsets = [0, 16], sizes = [8, 8], strides = [1, 1]} : vector<8x32xf32> to vector<8x8xf32>
    %852 = vector.extract_strided_slice %848 {offsets = [0, 24], sizes = [8, 8], strides = [1, 1]} : vector<8x32xf32> to vector<8x8xf32>
    %853 = arith.mulf %850, %675 : vector<8x8xf32>
    %854 = arith.mulf %849, %851 : vector<8x8xf32>
    %855 = arith.addf %853, %854 : vector<8x8xf32>
    %856 = math.tanh %855 : vector<8x8xf32>
    %857 = arith.mulf %852, %856 : vector<8x8xf32>
    %858 = tpu.concatenate %857, %695 in 1 : vector<8x8xf32>, vector<8x8xf32> -> vector<8x16xf32>
    %cst_177 = arith.constant dense<0.000000e+00> : vector<8x32xf32>
    %859 = tpu.matmul %858, %6, %cst_177 {dimension_numbers = #tpu.dot_dimension_numbers<[1], [0], [0], [1], [0, 0, 1, 1], [], []>} : vector<8x16xf32>, vector<16x32xf32>, vector<8x32xf32> -> vector<8x32xf32>
    %860 = vector.broadcast %17 : vector<1x32xf32> to vector<8x32xf32>
    %861 = arith.addf %859, %860 : vector<8x32xf32>
    %862 = math.tanh %861 : vector<8x32xf32>
    %cst_178 = arith.constant 5.000000e-01 : f32
    %863 = vector.broadcast %cst_178 : f32 to vector<8x32xf32>
    %864 = arith.mulf %863, %862 : vector<8x32xf32>
    %cst_179 = arith.constant 5.000000e-01 : f32
    %865 = vector.broadcast %cst_179 : f32 to vector<8x32xf32>
    %866 = arith.addf %864, %865 : vector<8x32xf32>
    %867 = vector.extract_strided_slice %866 {offsets = [0, 0], sizes = [8, 8], strides = [1, 1]} : vector<8x32xf32> to vector<8x8xf32>
    %868 = vector.extract_strided_slice %866 {offsets = [0, 8], sizes = [8, 8], strides = [1, 1]} : vector<8x32xf32> to vector<8x8xf32>
    %869 = vector.extract_strided_slice %862 {offsets = [0, 16], sizes = [8, 8], strides = [1, 1]} : vector<8x32xf32> to vector<8x8xf32>
    %870 = vector.extract_strided_slice %866 {offsets = [0, 24], sizes = [8, 8], strides = [1, 1]} : vector<8x32xf32> to vector<8x8xf32>
    %871 = arith.mulf %868, %693 : vector<8x8xf32>
    %872 = arith.mulf %867, %869 : vector<8x8xf32>
    %873 = arith.addf %871, %872 : vector<8x8xf32>
    %874 = math.tanh %873 : vector<8x8xf32>
    %875 = arith.mulf %870, %874 : vector<8x8xf32>
    %876 = tpu.concatenate %875, %713 in 1 : vector<8x8xf32>, vector<8x8xf32> -> vector<8x16xf32>
    %cst_180 = arith.constant dense<0.000000e+00> : vector<8x32xf32>
    %877 = tpu.matmul %876, %7, %cst_180 {dimension_numbers = #tpu.dot_dimension_numbers<[1], [0], [0], [1], [0, 0, 1, 1], [], []>} : vector<8x16xf32>, vector<16x32xf32>, vector<8x32xf32> -> vector<8x32xf32>
    %878 = vector.broadcast %18 : vector<1x32xf32> to vector<8x32xf32>
    %879 = arith.addf %877, %878 : vector<8x32xf32>
    %880 = math.tanh %879 : vector<8x32xf32>
    %cst_181 = arith.constant 5.000000e-01 : f32
    %881 = vector.broadcast %cst_181 : f32 to vector<8x32xf32>
    %882 = arith.mulf %881, %880 : vector<8x32xf32>
    %cst_182 = arith.constant 5.000000e-01 : f32
    %883 = vector.broadcast %cst_182 : f32 to vector<8x32xf32>
    %884 = arith.addf %882, %883 : vector<8x32xf32>
    %885 = vector.extract_strided_slice %884 {offsets = [0, 0], sizes = [8, 8], strides = [1, 1]} : vector<8x32xf32> to vector<8x8xf32>
    %886 = vector.extract_strided_slice %884 {offsets = [0, 8], sizes = [8, 8], strides = [1, 1]} : vector<8x32xf32> to vector<8x8xf32>
    %887 = vector.extract_strided_slice %880 {offsets = [0, 16], sizes = [8, 8], strides = [1, 1]} : vector<8x32xf32> to vector<8x8xf32>
    %888 = vector.extract_strided_slice %884 {offsets = [0, 24], sizes = [8, 8], strides = [1, 1]} : vector<8x32xf32> to vector<8x8xf32>
    %889 = arith.mulf %886, %711 : vector<8x8xf32>
    %890 = arith.mulf %885, %887 : vector<8x8xf32>
    %891 = arith.addf %889, %890 : vector<8x8xf32>
    %892 = math.tanh %891 : vector<8x8xf32>
    %893 = arith.mulf %888, %892 : vector<8x8xf32>
    %894 = tpu.concatenate %893, %731 in 1 : vector<8x8xf32>, vector<8x8xf32> -> vector<8x16xf32>
    %cst_183 = arith.constant dense<0.000000e+00> : vector<8x32xf32>
    %895 = tpu.matmul %894, %8, %cst_183 {dimension_numbers = #tpu.dot_dimension_numbers<[1], [0], [0], [1], [0, 0, 1, 1], [], []>} : vector<8x16xf32>, vector<16x32xf32>, vector<8x32xf32> -> vector<8x32xf32>
    %896 = vector.broadcast %19 : vector<1x32xf32> to vector<8x32xf32>
    %897 = arith.addf %895, %896 : vector<8x32xf32>
    %898 = math.tanh %897 : vector<8x32xf32>
    %cst_184 = arith.constant 5.000000e-01 : f32
    %899 = vector.broadcast %cst_184 : f32 to vector<8x32xf32>
    %900 = arith.mulf %899, %898 : vector<8x32xf32>
    %cst_185 = arith.constant 5.000000e-01 : f32
    %901 = vector.broadcast %cst_185 : f32 to vector<8x32xf32>
    %902 = arith.addf %900, %901 : vector<8x32xf32>
    %903 = vector.extract_strided_slice %902 {offsets = [0, 0], sizes = [8, 8], strides = [1, 1]} : vector<8x32xf32> to vector<8x8xf32>
    %904 = vector.extract_strided_slice %902 {offsets = [0, 8], sizes = [8, 8], strides = [1, 1]} : vector<8x32xf32> to vector<8x8xf32>
    %905 = vector.extract_strided_slice %898 {offsets = [0, 16], sizes = [8, 8], strides = [1, 1]} : vector<8x32xf32> to vector<8x8xf32>
    %906 = vector.extract_strided_slice %902 {offsets = [0, 24], sizes = [8, 8], strides = [1, 1]} : vector<8x32xf32> to vector<8x8xf32>
    %907 = arith.mulf %904, %729 : vector<8x8xf32>
    %908 = arith.mulf %903, %905 : vector<8x8xf32>
    %909 = arith.addf %907, %908 : vector<8x8xf32>
    %910 = math.tanh %909 : vector<8x8xf32>
    %911 = arith.mulf %906, %910 : vector<8x8xf32>
    %912 = tpu.concatenate %911, %749 in 1 : vector<8x8xf32>, vector<8x8xf32> -> vector<8x16xf32>
    %cst_186 = arith.constant dense<0.000000e+00> : vector<8x32xf32>
    %913 = tpu.matmul %912, %9, %cst_186 {dimension_numbers = #tpu.dot_dimension_numbers<[1], [0], [0], [1], [0, 0, 1, 1], [], []>} : vector<8x16xf32>, vector<16x32xf32>, vector<8x32xf32> -> vector<8x32xf32>
    %914 = vector.broadcast %20 : vector<1x32xf32> to vector<8x32xf32>
    %915 = arith.addf %913, %914 : vector<8x32xf32>
    %916 = math.tanh %915 : vector<8x32xf32>
    %cst_187 = arith.constant 5.000000e-01 : f32
    %917 = vector.broadcast %cst_187 : f32 to vector<8x32xf32>
    %918 = arith.mulf %917, %916 : vector<8x32xf32>
    %cst_188 = arith.constant 5.000000e-01 : f32
    %919 = vector.broadcast %cst_188 : f32 to vector<8x32xf32>
    %920 = arith.addf %918, %919 : vector<8x32xf32>
    %921 = vector.extract_strided_slice %920 {offsets = [0, 0], sizes = [8, 8], strides = [1, 1]} : vector<8x32xf32> to vector<8x8xf32>
    %922 = vector.extract_strided_slice %920 {offsets = [0, 8], sizes = [8, 8], strides = [1, 1]} : vector<8x32xf32> to vector<8x8xf32>
    %923 = vector.extract_strided_slice %916 {offsets = [0, 16], sizes = [8, 8], strides = [1, 1]} : vector<8x32xf32> to vector<8x8xf32>
    %924 = vector.extract_strided_slice %920 {offsets = [0, 24], sizes = [8, 8], strides = [1, 1]} : vector<8x32xf32> to vector<8x8xf32>
    %925 = arith.mulf %922, %747 : vector<8x8xf32>
    %926 = arith.mulf %921, %923 : vector<8x8xf32>
    %927 = arith.addf %925, %926 : vector<8x8xf32>
    %928 = math.tanh %927 : vector<8x8xf32>
    %929 = arith.mulf %924, %928 : vector<8x8xf32>
    %930 = tpu.concatenate %929, %767 in 1 : vector<8x8xf32>, vector<8x8xf32> -> vector<8x16xf32>
    %cst_189 = arith.constant dense<0.000000e+00> : vector<8x32xf32>
    %931 = tpu.matmul %930, %10, %cst_189 {dimension_numbers = #tpu.dot_dimension_numbers<[1], [0], [0], [1], [0, 0, 1, 1], [], []>} : vector<8x16xf32>, vector<16x32xf32>, vector<8x32xf32> -> vector<8x32xf32>
    %932 = vector.broadcast %21 : vector<1x32xf32> to vector<8x32xf32>
    %933 = arith.addf %931, %932 : vector<8x32xf32>
    %934 = math.tanh %933 : vector<8x32xf32>
    %cst_190 = arith.constant 5.000000e-01 : f32
    %935 = vector.broadcast %cst_190 : f32 to vector<8x32xf32>
    %936 = arith.mulf %935, %934 : vector<8x32xf32>
    %cst_191 = arith.constant 5.000000e-01 : f32
    %937 = vector.broadcast %cst_191 : f32 to vector<8x32xf32>
    %938 = arith.addf %936, %937 : vector<8x32xf32>
    %939 = vector.extract_strided_slice %938 {offsets = [0, 0], sizes = [8, 8], strides = [1, 1]} : vector<8x32xf32> to vector<8x8xf32>
    %940 = vector.extract_strided_slice %938 {offsets = [0, 8], sizes = [8, 8], strides = [1, 1]} : vector<8x32xf32> to vector<8x8xf32>
    %941 = vector.extract_strided_slice %934 {offsets = [0, 16], sizes = [8, 8], strides = [1, 1]} : vector<8x32xf32> to vector<8x8xf32>
    %942 = vector.extract_strided_slice %938 {offsets = [0, 24], sizes = [8, 8], strides = [1, 1]} : vector<8x32xf32> to vector<8x8xf32>
    %943 = arith.mulf %940, %765 : vector<8x8xf32>
    %944 = arith.mulf %939, %941 : vector<8x8xf32>
    %945 = arith.addf %943, %944 : vector<8x8xf32>
    %946 = math.tanh %945 : vector<8x8xf32>
    %947 = arith.mulf %942, %946 : vector<8x8xf32>
    %c32 = arith.constant 32 : index
    %c0_192 = arith.constant 0 : index
    %948 = vector.load %arg4[%c32, %c0_192] : memref<64x8xf32, #tpu.memory_space<vmem>>, vector<8x8xf32>
    tpu.vector_store %arg4[%c32, %c0_192], %947 {strides = array<i32>} : memref<64x8xf32, #tpu.memory_space<vmem>>, vector<8x8xf32>,
    %949 = vector.extract_strided_slice %28 {offsets = [40, 0], sizes = [8, 32], strides = [1, 1]} : vector<64x32xf32> to vector<8x32xf32>
    %cst_193 = arith.constant dense<0.000000e+00> : vector<8x32xf32>
    %950 = tpu.matmul %785, %1, %cst_193 {dimension_numbers = #tpu.dot_dimension_numbers<[1], [0], [0], [1], [0, 0, 1, 1], [], []>} : vector<8x8xf32>, vector<8x32xf32>, vector<8x32xf32> -> vector<8x32xf32>
    %951 = arith.addf %949, %950 : vector<8x32xf32>
    %952 = math.tanh %951 : vector<8x32xf32>
    %cst_194 = arith.constant 5.000000e-01 : f32
    %953 = vector.broadcast %cst_194 : f32 to vector<8x32xf32>
    %954 = arith.mulf %953, %952 : vector<8x32xf32>
    %cst_195 = arith.constant 5.000000e-01 : f32
    %955 = vector.broadcast %cst_195 : f32 to vector<8x32xf32>
    %956 = arith.addf %954, %955 : vector<8x32xf32>
    %957 = vector.extract_strided_slice %956 {offsets = [0, 0], sizes = [8, 8], strides = [1, 1]} : vector<8x32xf32> to vector<8x8xf32>
    %958 = vector.extract_strided_slice %956 {offsets = [0, 8], sizes = [8, 8], strides = [1, 1]} : vector<8x32xf32> to vector<8x8xf32>
    %959 = vector.extract_strided_slice %952 {offsets = [0, 16], sizes = [8, 8], strides = [1, 1]} : vector<8x32xf32> to vector<8x8xf32>
    %960 = vector.extract_strided_slice %956 {offsets = [0, 24], sizes = [8, 8], strides = [1, 1]} : vector<8x32xf32> to vector<8x8xf32>
    %961 = arith.mulf %958, %783 : vector<8x8xf32>
    %962 = arith.mulf %957, %959 : vector<8x8xf32>
    %963 = arith.addf %961, %962 : vector<8x8xf32>
    %964 = math.tanh %963 : vector<8x8xf32>
    %965 = arith.mulf %960, %964 : vector<8x8xf32>
    %966 = tpu.concatenate %965, %803 in 1 : vector<8x8xf32>, vector<8x8xf32> -> vector<8x16xf32>
    %cst_196 = arith.constant dense<0.000000e+00> : vector<8x32xf32>
    %967 = tpu.matmul %966, %2, %cst_196 {dimension_numbers = #tpu.dot_dimension_numbers<[1], [0], [0], [1], [0, 0, 1, 1], [], []>} : vector<8x16xf32>, vector<16x32xf32>, vector<8x32xf32> -> vector<8x32xf32>
    %968 = vector.broadcast %13 : vector<1x32xf32> to vector<8x32xf32>
    %969 = arith.addf %967, %968 : vector<8x32xf32>
    %970 = math.tanh %969 : vector<8x32xf32>
    %cst_197 = arith.constant 5.000000e-01 : f32
    %971 = vector.broadcast %cst_197 : f32 to vector<8x32xf32>
    %972 = arith.mulf %971, %970 : vector<8x32xf32>
    %cst_198 = arith.constant 5.000000e-01 : f32
    %973 = vector.broadcast %cst_198 : f32 to vector<8x32xf32>
    %974 = arith.addf %972, %973 : vector<8x32xf32>
    %975 = vector.extract_strided_slice %974 {offsets = [0, 0], sizes = [8, 8], strides = [1, 1]} : vector<8x32xf32> to vector<8x8xf32>
    %976 = vector.extract_strided_slice %974 {offsets = [0, 8], sizes = [8, 8], strides = [1, 1]} : vector<8x32xf32> to vector<8x8xf32>
    %977 = vector.extract_strided_slice %970 {offsets = [0, 16], sizes = [8, 8], strides = [1, 1]} : vector<8x32xf32> to vector<8x8xf32>
    %978 = vector.extract_strided_slice %974 {offsets = [0, 24], sizes = [8, 8], strides = [1, 1]} : vector<8x32xf32> to vector<8x8xf32>
    %979 = arith.mulf %976, %801 : vector<8x8xf32>
    %980 = arith.mulf %975, %977 : vector<8x8xf32>
    %981 = arith.addf %979, %980 : vector<8x8xf32>
    %982 = math.tanh %981 : vector<8x8xf32>
    %983 = arith.mulf %978, %982 : vector<8x8xf32>
    %984 = tpu.concatenate %983, %821 in 1 : vector<8x8xf32>, vector<8x8xf32> -> vector<8x16xf32>
    %cst_199 = arith.constant dense<0.000000e+00> : vector<8x32xf32>
    %985 = tpu.matmul %984, %3, %cst_199 {dimension_numbers = #tpu.dot_dimension_numbers<[1], [0], [0], [1], [0, 0, 1, 1], [], []>} : vector<8x16xf32>, vector<16x32xf32>, vector<8x32xf32> -> vector<8x32xf32>
    %986 = vector.broadcast %14 : vector<1x32xf32> to vector<8x32xf32>
    %987 = arith.addf %985, %986 : vector<8x32xf32>
    %988 = math.tanh %987 : vector<8x32xf32>
    %cst_200 = arith.constant 5.000000e-01 : f32
    %989 = vector.broadcast %cst_200 : f32 to vector<8x32xf32>
    %990 = arith.mulf %989, %988 : vector<8x32xf32>
    %cst_201 = arith.constant 5.000000e-01 : f32
    %991 = vector.broadcast %cst_201 : f32 to vector<8x32xf32>
    %992 = arith.addf %990, %991 : vector<8x32xf32>
    %993 = vector.extract_strided_slice %992 {offsets = [0, 0], sizes = [8, 8], strides = [1, 1]} : vector<8x32xf32> to vector<8x8xf32>
    %994 = vector.extract_strided_slice %992 {offsets = [0, 8], sizes = [8, 8], strides = [1, 1]} : vector<8x32xf32> to vector<8x8xf32>
    %995 = vector.extract_strided_slice %988 {offsets = [0, 16], sizes = [8, 8], strides = [1, 1]} : vector<8x32xf32> to vector<8x8xf32>
    %996 = vector.extract_strided_slice %992 {offsets = [0, 24], sizes = [8, 8], strides = [1, 1]} : vector<8x32xf32> to vector<8x8xf32>
    %997 = arith.mulf %994, %819 : vector<8x8xf32>
    %998 = arith.mulf %993, %995 : vector<8x8xf32>
    %999 = arith.addf %997, %998 : vector<8x8xf32>
    %1000 = math.tanh %999 : vector<8x8xf32>
    %1001 = arith.mulf %996, %1000 : vector<8x8xf32>
    %1002 = tpu.concatenate %1001, %839 in 1 : vector<8x8xf32>, vector<8x8xf32> -> vector<8x16xf32>
    %cst_202 = arith.constant dense<0.000000e+00> : vector<8x32xf32>
    %1003 = tpu.matmul %1002, %4, %cst_202 {dimension_numbers = #tpu.dot_dimension_numbers<[1], [0], [0], [1], [0, 0, 1, 1], [], []>} : vector<8x16xf32>, vector<16x32xf32>, vector<8x32xf32> -> vector<8x32xf32>
    %1004 = vector.broadcast %15 : vector<1x32xf32> to vector<8x32xf32>
    %1005 = arith.addf %1003, %1004 : vector<8x32xf32>
    %1006 = math.tanh %1005 : vector<8x32xf32>
    %cst_203 = arith.constant 5.000000e-01 : f32
    %1007 = vector.broadcast %cst_203 : f32 to vector<8x32xf32>
    %1008 = arith.mulf %1007, %1006 : vector<8x32xf32>
    %cst_204 = arith.constant 5.000000e-01 : f32
    %1009 = vector.broadcast %cst_204 : f32 to vector<8x32xf32>
    %1010 = arith.addf %1008, %1009 : vector<8x32xf32>
    %1011 = vector.extract_strided_slice %1010 {offsets = [0, 0], sizes = [8, 8], strides = [1, 1]} : vector<8x32xf32> to vector<8x8xf32>
    %1012 = vector.extract_strided_slice %1010 {offsets = [0, 8], sizes = [8, 8], strides = [1, 1]} : vector<8x32xf32> to vector<8x8xf32>
    %1013 = vector.extract_strided_slice %1006 {offsets = [0, 16], sizes = [8, 8], strides = [1, 1]} : vector<8x32xf32> to vector<8x8xf32>
    %1014 = vector.extract_strided_slice %1010 {offsets = [0, 24], sizes = [8, 8], strides = [1, 1]} : vector<8x32xf32> to vector<8x8xf32>
    %1015 = arith.mulf %1012, %837 : vector<8x8xf32>
    %1016 = arith.mulf %1011, %1013 : vector<8x8xf32>
    %1017 = arith.addf %1015, %1016 : vector<8x8xf32>
    %1018 = math.tanh %1017 : vector<8x8xf32>
    %1019 = arith.mulf %1014, %1018 : vector<8x8xf32>
    %1020 = tpu.concatenate %1019, %857 in 1 : vector<8x8xf32>, vector<8x8xf32> -> vector<8x16xf32>
    %cst_205 = arith.constant dense<0.000000e+00> : vector<8x32xf32>
    %1021 = tpu.matmul %1020, %5, %cst_205 {dimension_numbers = #tpu.dot_dimension_numbers<[1], [0], [0], [1], [0, 0, 1, 1], [], []>} : vector<8x16xf32>, vector<16x32xf32>, vector<8x32xf32> -> vector<8x32xf32>
    %1022 = vector.broadcast %16 : vector<1x32xf32> to vector<8x32xf32>
    %1023 = arith.addf %1021, %1022 : vector<8x32xf32>
    %1024 = math.tanh %1023 : vector<8x32xf32>
    %cst_206 = arith.constant 5.000000e-01 : f32
    %1025 = vector.broadcast %cst_206 : f32 to vector<8x32xf32>
    %1026 = arith.mulf %1025, %1024 : vector<8x32xf32>
    %cst_207 = arith.constant 5.000000e-01 : f32
    %1027 = vector.broadcast %cst_207 : f32 to vector<8x32xf32>
    %1028 = arith.addf %1026, %1027 : vector<8x32xf32>
    %1029 = vector.extract_strided_slice %1028 {offsets = [0, 0], sizes = [8, 8], strides = [1, 1]} : vector<8x32xf32> to vector<8x8xf32>
    %1030 = vector.extract_strided_slice %1028 {offsets = [0, 8], sizes = [8, 8], strides = [1, 1]} : vector<8x32xf32> to vector<8x8xf32>
    %1031 = vector.extract_strided_slice %1024 {offsets = [0, 16], sizes = [8, 8], strides = [1, 1]} : vector<8x32xf32> to vector<8x8xf32>
    %1032 = vector.extract_strided_slice %1028 {offsets = [0, 24], sizes = [8, 8], strides = [1, 1]} : vector<8x32xf32> to vector<8x8xf32>
    %1033 = arith.mulf %1030, %855 : vector<8x8xf32>
    %1034 = arith.mulf %1029, %1031 : vector<8x8xf32>
    %1035 = arith.addf %1033, %1034 : vector<8x8xf32>
    %1036 = math.tanh %1035 : vector<8x8xf32>
    %1037 = arith.mulf %1032, %1036 : vector<8x8xf32>
    %1038 = tpu.concatenate %1037, %875 in 1 : vector<8x8xf32>, vector<8x8xf32> -> vector<8x16xf32>
    %cst_208 = arith.constant dense<0.000000e+00> : vector<8x32xf32>
    %1039 = tpu.matmul %1038, %6, %cst_208 {dimension_numbers = #tpu.dot_dimension_numbers<[1], [0], [0], [1], [0, 0, 1, 1], [], []>} : vector<8x16xf32>, vector<16x32xf32>, vector<8x32xf32> -> vector<8x32xf32>
    %1040 = vector.broadcast %17 : vector<1x32xf32> to vector<8x32xf32>
    %1041 = arith.addf %1039, %1040 : vector<8x32xf32>
    %1042 = math.tanh %1041 : vector<8x32xf32>
    %cst_209 = arith.constant 5.000000e-01 : f32
    %1043 = vector.broadcast %cst_209 : f32 to vector<8x32xf32>
    %1044 = arith.mulf %1043, %1042 : vector<8x32xf32>
    %cst_210 = arith.constant 5.000000e-01 : f32
    %1045 = vector.broadcast %cst_210 : f32 to vector<8x32xf32>
    %1046 = arith.addf %1044, %1045 : vector<8x32xf32>
    %1047 = vector.extract_strided_slice %1046 {offsets = [0, 0], sizes = [8, 8], strides = [1, 1]} : vector<8x32xf32> to vector<8x8xf32>
    %1048 = vector.extract_strided_slice %1046 {offsets = [0, 8], sizes = [8, 8], strides = [1, 1]} : vector<8x32xf32> to vector<8x8xf32>
    %1049 = vector.extract_strided_slice %1042 {offsets = [0, 16], sizes = [8, 8], strides = [1, 1]} : vector<8x32xf32> to vector<8x8xf32>
    %1050 = vector.extract_strided_slice %1046 {offsets = [0, 24], sizes = [8, 8], strides = [1, 1]} : vector<8x32xf32> to vector<8x8xf32>
    %1051 = arith.mulf %1048, %873 : vector<8x8xf32>
    %1052 = arith.mulf %1047, %1049 : vector<8x8xf32>
    %1053 = arith.addf %1051, %1052 : vector<8x8xf32>
    %1054 = math.tanh %1053 : vector<8x8xf32>
    %1055 = arith.mulf %1050, %1054 : vector<8x8xf32>
    %1056 = tpu.concatenate %1055, %893 in 1 : vector<8x8xf32>, vector<8x8xf32> -> vector<8x16xf32>
    %cst_211 = arith.constant dense<0.000000e+00> : vector<8x32xf32>
    %1057 = tpu.matmul %1056, %7, %cst_211 {dimension_numbers = #tpu.dot_dimension_numbers<[1], [0], [0], [1], [0, 0, 1, 1], [], []>} : vector<8x16xf32>, vector<16x32xf32>, vector<8x32xf32> -> vector<8x32xf32>
    %1058 = vector.broadcast %18 : vector<1x32xf32> to vector<8x32xf32>
    %1059 = arith.addf %1057, %1058 : vector<8x32xf32>
    %1060 = math.tanh %1059 : vector<8x32xf32>
    %cst_212 = arith.constant 5.000000e-01 : f32
    %1061 = vector.broadcast %cst_212 : f32 to vector<8x32xf32>
    %1062 = arith.mulf %1061, %1060 : vector<8x32xf32>
    %cst_213 = arith.constant 5.000000e-01 : f32
    %1063 = vector.broadcast %cst_213 : f32 to vector<8x32xf32>
    %1064 = arith.addf %1062, %1063 : vector<8x32xf32>
    %1065 = vector.extract_strided_slice %1064 {offsets = [0, 0], sizes = [8, 8], strides = [1, 1]} : vector<8x32xf32> to vector<8x8xf32>
    %1066 = vector.extract_strided_slice %1064 {offsets = [0, 8], sizes = [8, 8], strides = [1, 1]} : vector<8x32xf32> to vector<8x8xf32>
    %1067 = vector.extract_strided_slice %1060 {offsets = [0, 16], sizes = [8, 8], strides = [1, 1]} : vector<8x32xf32> to vector<8x8xf32>
    %1068 = vector.extract_strided_slice %1064 {offsets = [0, 24], sizes = [8, 8], strides = [1, 1]} : vector<8x32xf32> to vector<8x8xf32>
    %1069 = arith.mulf %1066, %891 : vector<8x8xf32>
    %1070 = arith.mulf %1065, %1067 : vector<8x8xf32>
    %1071 = arith.addf %1069, %1070 : vector<8x8xf32>
    %1072 = math.tanh %1071 : vector<8x8xf32>
    %1073 = arith.mulf %1068, %1072 : vector<8x8xf32>
    %1074 = tpu.concatenate %1073, %911 in 1 : vector<8x8xf32>, vector<8x8xf32> -> vector<8x16xf32>
    %cst_214 = arith.constant dense<0.000000e+00> : vector<8x32xf32>
    %1075 = tpu.matmul %1074, %8, %cst_214 {dimension_numbers = #tpu.dot_dimension_numbers<[1], [0], [0], [1], [0, 0, 1, 1], [], []>} : vector<8x16xf32>, vector<16x32xf32>, vector<8x32xf32> -> vector<8x32xf32>
    %1076 = vector.broadcast %19 : vector<1x32xf32> to vector<8x32xf32>
    %1077 = arith.addf %1075, %1076 : vector<8x32xf32>
    %1078 = math.tanh %1077 : vector<8x32xf32>
    %cst_215 = arith.constant 5.000000e-01 : f32
    %1079 = vector.broadcast %cst_215 : f32 to vector<8x32xf32>
    %1080 = arith.mulf %1079, %1078 : vector<8x32xf32>
    %cst_216 = arith.constant 5.000000e-01 : f32
    %1081 = vector.broadcast %cst_216 : f32 to vector<8x32xf32>
    %1082 = arith.addf %1080, %1081 : vector<8x32xf32>
    %1083 = vector.extract_strided_slice %1082 {offsets = [0, 0], sizes = [8, 8], strides = [1, 1]} : vector<8x32xf32> to vector<8x8xf32>
    %1084 = vector.extract_strided_slice %1082 {offsets = [0, 8], sizes = [8, 8], strides = [1, 1]} : vector<8x32xf32> to vector<8x8xf32>
    %1085 = vector.extract_strided_slice %1078 {offsets = [0, 16], sizes = [8, 8], strides = [1, 1]} : vector<8x32xf32> to vector<8x8xf32>
    %1086 = vector.extract_strided_slice %1082 {offsets = [0, 24], sizes = [8, 8], strides = [1, 1]} : vector<8x32xf32> to vector<8x8xf32>
    %1087 = arith.mulf %1084, %909 : vector<8x8xf32>
    %1088 = arith.mulf %1083, %1085 : vector<8x8xf32>
    %1089 = arith.addf %1087, %1088 : vector<8x8xf32>
    %1090 = math.tanh %1089 : vector<8x8xf32>
    %1091 = arith.mulf %1086, %1090 : vector<8x8xf32>
    %1092 = tpu.concatenate %1091, %929 in 1 : vector<8x8xf32>, vector<8x8xf32> -> vector<8x16xf32>
    %cst_217 = arith.constant dense<0.000000e+00> : vector<8x32xf32>
    %1093 = tpu.matmul %1092, %9, %cst_217 {dimension_numbers = #tpu.dot_dimension_numbers<[1], [0], [0], [1], [0, 0, 1, 1], [], []>} : vector<8x16xf32>, vector<16x32xf32>, vector<8x32xf32> -> vector<8x32xf32>
    %1094 = vector.broadcast %20 : vector<1x32xf32> to vector<8x32xf32>
    %1095 = arith.addf %1093, %1094 : vector<8x32xf32>
    %1096 = math.tanh %1095 : vector<8x32xf32>
    %cst_218 = arith.constant 5.000000e-01 : f32
    %1097 = vector.broadcast %cst_218 : f32 to vector<8x32xf32>
    %1098 = arith.mulf %1097, %1096 : vector<8x32xf32>
    %cst_219 = arith.constant 5.000000e-01 : f32
    %1099 = vector.broadcast %cst_219 : f32 to vector<8x32xf32>
    %1100 = arith.addf %1098, %1099 : vector<8x32xf32>
    %1101 = vector.extract_strided_slice %1100 {offsets = [0, 0], sizes = [8, 8], strides = [1, 1]} : vector<8x32xf32> to vector<8x8xf32>
    %1102 = vector.extract_strided_slice %1100 {offsets = [0, 8], sizes = [8, 8], strides = [1, 1]} : vector<8x32xf32> to vector<8x8xf32>
    %1103 = vector.extract_strided_slice %1096 {offsets = [0, 16], sizes = [8, 8], strides = [1, 1]} : vector<8x32xf32> to vector<8x8xf32>
    %1104 = vector.extract_strided_slice %1100 {offsets = [0, 24], sizes = [8, 8], strides = [1, 1]} : vector<8x32xf32> to vector<8x8xf32>
    %1105 = arith.mulf %1102, %927 : vector<8x8xf32>
    %1106 = arith.mulf %1101, %1103 : vector<8x8xf32>
    %1107 = arith.addf %1105, %1106 : vector<8x8xf32>
    %1108 = math.tanh %1107 : vector<8x8xf32>
    %1109 = arith.mulf %1104, %1108 : vector<8x8xf32>
    %1110 = tpu.concatenate %1109, %947 in 1 : vector<8x8xf32>, vector<8x8xf32> -> vector<8x16xf32>
    %cst_220 = arith.constant dense<0.000000e+00> : vector<8x32xf32>
    %1111 = tpu.matmul %1110, %10, %cst_220 {dimension_numbers = #tpu.dot_dimension_numbers<[1], [0], [0], [1], [0, 0, 1, 1], [], []>} : vector<8x16xf32>, vector<16x32xf32>, vector<8x32xf32> -> vector<8x32xf32>
    %1112 = vector.broadcast %21 : vector<1x32xf32> to vector<8x32xf32>
    %1113 = arith.addf %1111, %1112 : vector<8x32xf32>
    %1114 = math.tanh %1113 : vector<8x32xf32>
    %cst_221 = arith.constant 5.000000e-01 : f32
    %1115 = vector.broadcast %cst_221 : f32 to vector<8x32xf32>
    %1116 = arith.mulf %1115, %1114 : vector<8x32xf32>
    %cst_222 = arith.constant 5.000000e-01 : f32
    %1117 = vector.broadcast %cst_222 : f32 to vector<8x32xf32>
    %1118 = arith.addf %1116, %1117 : vector<8x32xf32>
    %1119 = vector.extract_strided_slice %1118 {offsets = [0, 0], sizes = [8, 8], strides = [1, 1]} : vector<8x32xf32> to vector<8x8xf32>
    %1120 = vector.extract_strided_slice %1118 {offsets = [0, 8], sizes = [8, 8], strides = [1, 1]} : vector<8x32xf32> to vector<8x8xf32>
    %1121 = vector.extract_strided_slice %1114 {offsets = [0, 16], sizes = [8, 8], strides = [1, 1]} : vector<8x32xf32> to vector<8x8xf32>
    %1122 = vector.extract_strided_slice %1118 {offsets = [0, 24], sizes = [8, 8], strides = [1, 1]} : vector<8x32xf32> to vector<8x8xf32>
    %1123 = arith.mulf %1120, %945 : vector<8x8xf32>
    %1124 = arith.mulf %1119, %1121 : vector<8x8xf32>
    %1125 = arith.addf %1123, %1124 : vector<8x8xf32>
    %1126 = math.tanh %1125 : vector<8x8xf32>
    %1127 = arith.mulf %1122, %1126 : vector<8x8xf32>
    %c40 = arith.constant 40 : index
    %c0_223 = arith.constant 0 : index
    %1128 = vector.load %arg4[%c40, %c0_223] : memref<64x8xf32, #tpu.memory_space<vmem>>, vector<8x8xf32>
    tpu.vector_store %arg4[%c40, %c0_223], %1127 {strides = array<i32>} : memref<64x8xf32, #tpu.memory_space<vmem>>, vector<8x8xf32>,
    %1129 = vector.extract_strided_slice %28 {offsets = [48, 0], sizes = [8, 32], strides = [1, 1]} : vector<64x32xf32> to vector<8x32xf32>
    %cst_224 = arith.constant dense<0.000000e+00> : vector<8x32xf32>
    %1130 = tpu.matmul %965, %1, %cst_224 {dimension_numbers = #tpu.dot_dimension_numbers<[1], [0], [0], [1], [0, 0, 1, 1], [], []>} : vector<8x8xf32>, vector<8x32xf32>, vector<8x32xf32> -> vector<8x32xf32>
    %1131 = arith.addf %1129, %1130 : vector<8x32xf32>
    %1132 = math.tanh %1131 : vector<8x32xf32>
    %cst_225 = arith.constant 5.000000e-01 : f32
    %1133 = vector.broadcast %cst_225 : f32 to vector<8x32xf32>
    %1134 = arith.mulf %1133, %1132 : vector<8x32xf32>
    %cst_226 = arith.constant 5.000000e-01 : f32
    %1135 = vector.broadcast %cst_226 : f32 to vector<8x32xf32>
    %1136 = arith.addf %1134, %1135 : vector<8x32xf32>
    %1137 = vector.extract_strided_slice %1136 {offsets = [0, 0], sizes = [8, 8], strides = [1, 1]} : vector<8x32xf32> to vector<8x8xf32>
    %1138 = vector.extract_strided_slice %1136 {offsets = [0, 8], sizes = [8, 8], strides = [1, 1]} : vector<8x32xf32> to vector<8x8xf32>
    %1139 = vector.extract_strided_slice %1132 {offsets = [0, 16], sizes = [8, 8], strides = [1, 1]} : vector<8x32xf32> to vector<8x8xf32>
    %1140 = vector.extract_strided_slice %1136 {offsets = [0, 24], sizes = [8, 8], strides = [1, 1]} : vector<8x32xf32> to vector<8x8xf32>
    %1141 = arith.mulf %1138, %963 : vector<8x8xf32>
    %1142 = arith.mulf %1137, %1139 : vector<8x8xf32>
    %1143 = arith.addf %1141, %1142 : vector<8x8xf32>
    %1144 = math.tanh %1143 : vector<8x8xf32>
    %1145 = arith.mulf %1140, %1144 : vector<8x8xf32>
    %1146 = tpu.concatenate %1145, %983 in 1 : vector<8x8xf32>, vector<8x8xf32> -> vector<8x16xf32>
    %cst_227 = arith.constant dense<0.000000e+00> : vector<8x32xf32>
    %1147 = tpu.matmul %1146, %2, %cst_227 {dimension_numbers = #tpu.dot_dimension_numbers<[1], [0], [0], [1], [0, 0, 1, 1], [], []>} : vector<8x16xf32>, vector<16x32xf32>, vector<8x32xf32> -> vector<8x32xf32>
    %1148 = vector.broadcast %13 : vector<1x32xf32> to vector<8x32xf32>
    %1149 = arith.addf %1147, %1148 : vector<8x32xf32>
    %1150 = math.tanh %1149 : vector<8x32xf32>
    %cst_228 = arith.constant 5.000000e-01 : f32
    %1151 = vector.broadcast %cst_228 : f32 to vector<8x32xf32>
    %1152 = arith.mulf %1151, %1150 : vector<8x32xf32>
    %cst_229 = arith.constant 5.000000e-01 : f32
    %1153 = vector.broadcast %cst_229 : f32 to vector<8x32xf32>
    %1154 = arith.addf %1152, %1153 : vector<8x32xf32>
    %1155 = vector.extract_strided_slice %1154 {offsets = [0, 0], sizes = [8, 8], strides = [1, 1]} : vector<8x32xf32> to vector<8x8xf32>
    %1156 = vector.extract_strided_slice %1154 {offsets = [0, 8], sizes = [8, 8], strides = [1, 1]} : vector<8x32xf32> to vector<8x8xf32>
    %1157 = vector.extract_strided_slice %1150 {offsets = [0, 16], sizes = [8, 8], strides = [1, 1]} : vector<8x32xf32> to vector<8x8xf32>
    %1158 = vector.extract_strided_slice %1154 {offsets = [0, 24], sizes = [8, 8], strides = [1, 1]} : vector<8x32xf32> to vector<8x8xf32>
    %1159 = arith.mulf %1156, %981 : vector<8x8xf32>
    %1160 = arith.mulf %1155, %1157 : vector<8x8xf32>
    %1161 = arith.addf %1159, %1160 : vector<8x8xf32>
    %1162 = math.tanh %1161 : vector<8x8xf32>
    %1163 = arith.mulf %1158, %1162 : vector<8x8xf32>
    %1164 = tpu.concatenate %1163, %1001 in 1 : vector<8x8xf32>, vector<8x8xf32> -> vector<8x16xf32>
    %cst_230 = arith.constant dense<0.000000e+00> : vector<8x32xf32>
    %1165 = tpu.matmul %1164, %3, %cst_230 {dimension_numbers = #tpu.dot_dimension_numbers<[1], [0], [0], [1], [0, 0, 1, 1], [], []>} : vector<8x16xf32>, vector<16x32xf32>, vector<8x32xf32> -> vector<8x32xf32>
    %1166 = vector.broadcast %14 : vector<1x32xf32> to vector<8x32xf32>
    %1167 = arith.addf %1165, %1166 : vector<8x32xf32>
    %1168 = math.tanh %1167 : vector<8x32xf32>
    %cst_231 = arith.constant 5.000000e-01 : f32
    %1169 = vector.broadcast %cst_231 : f32 to vector<8x32xf32>
    %1170 = arith.mulf %1169, %1168 : vector<8x32xf32>
    %cst_232 = arith.constant 5.000000e-01 : f32
    %1171 = vector.broadcast %cst_232 : f32 to vector<8x32xf32>
    %1172 = arith.addf %1170, %1171 : vector<8x32xf32>
    %1173 = vector.extract_strided_slice %1172 {offsets = [0, 0], sizes = [8, 8], strides = [1, 1]} : vector<8x32xf32> to vector<8x8xf32>
    %1174 = vector.extract_strided_slice %1172 {offsets = [0, 8], sizes = [8, 8], strides = [1, 1]} : vector<8x32xf32> to vector<8x8xf32>
    %1175 = vector.extract_strided_slice %1168 {offsets = [0, 16], sizes = [8, 8], strides = [1, 1]} : vector<8x32xf32> to vector<8x8xf32>
    %1176 = vector.extract_strided_slice %1172 {offsets = [0, 24], sizes = [8, 8], strides = [1, 1]} : vector<8x32xf32> to vector<8x8xf32>
    %1177 = arith.mulf %1174, %999 : vector<8x8xf32>
    %1178 = arith.mulf %1173, %1175 : vector<8x8xf32>
    %1179 = arith.addf %1177, %1178 : vector<8x8xf32>
    %1180 = math.tanh %1179 : vector<8x8xf32>
    %1181 = arith.mulf %1176, %1180 : vector<8x8xf32>
    %1182 = tpu.concatenate %1181, %1019 in 1 : vector<8x8xf32>, vector<8x8xf32> -> vector<8x16xf32>
    %cst_233 = arith.constant dense<0.000000e+00> : vector<8x32xf32>
    %1183 = tpu.matmul %1182, %4, %cst_233 {dimension_numbers = #tpu.dot_dimension_numbers<[1], [0], [0], [1], [0, 0, 1, 1], [], []>} : vector<8x16xf32>, vector<16x32xf32>, vector<8x32xf32> -> vector<8x32xf32>
    %1184 = vector.broadcast %15 : vector<1x32xf32> to vector<8x32xf32>
    %1185 = arith.addf %1183, %1184 : vector<8x32xf32>
    %1186 = math.tanh %1185 : vector<8x32xf32>
    %cst_234 = arith.constant 5.000000e-01 : f32
    %1187 = vector.broadcast %cst_234 : f32 to vector<8x32xf32>
    %1188 = arith.mulf %1187, %1186 : vector<8x32xf32>
    %cst_235 = arith.constant 5.000000e-01 : f32
    %1189 = vector.broadcast %cst_235 : f32 to vector<8x32xf32>
    %1190 = arith.addf %1188, %1189 : vector<8x32xf32>
    %1191 = vector.extract_strided_slice %1190 {offsets = [0, 0], sizes = [8, 8], strides = [1, 1]} : vector<8x32xf32> to vector<8x8xf32>
    %1192 = vector.extract_strided_slice %1190 {offsets = [0, 8], sizes = [8, 8], strides = [1, 1]} : vector<8x32xf32> to vector<8x8xf32>
    %1193 = vector.extract_strided_slice %1186 {offsets = [0, 16], sizes = [8, 8], strides = [1, 1]} : vector<8x32xf32> to vector<8x8xf32>
    %1194 = vector.extract_strided_slice %1190 {offsets = [0, 24], sizes = [8, 8], strides = [1, 1]} : vector<8x32xf32> to vector<8x8xf32>
    %1195 = arith.mulf %1192, %1017 : vector<8x8xf32>
    %1196 = arith.mulf %1191, %1193 : vector<8x8xf32>
    %1197 = arith.addf %1195, %1196 : vector<8x8xf32>
    %1198 = math.tanh %1197 : vector<8x8xf32>
    %1199 = arith.mulf %1194, %1198 : vector<8x8xf32>
    %1200 = tpu.concatenate %1199, %1037 in 1 : vector<8x8xf32>, vector<8x8xf32> -> vector<8x16xf32>
    %cst_236 = arith.constant dense<0.000000e+00> : vector<8x32xf32>
    %1201 = tpu.matmul %1200, %5, %cst_236 {dimension_numbers = #tpu.dot_dimension_numbers<[1], [0], [0], [1], [0, 0, 1, 1], [], []>} : vector<8x16xf32>, vector<16x32xf32>, vector<8x32xf32> -> vector<8x32xf32>
    %1202 = vector.broadcast %16 : vector<1x32xf32> to vector<8x32xf32>
    %1203 = arith.addf %1201, %1202 : vector<8x32xf32>
    %1204 = math.tanh %1203 : vector<8x32xf32>
    %cst_237 = arith.constant 5.000000e-01 : f32
    %1205 = vector.broadcast %cst_237 : f32 to vector<8x32xf32>
    %1206 = arith.mulf %1205, %1204 : vector<8x32xf32>
    %cst_238 = arith.constant 5.000000e-01 : f32
    %1207 = vector.broadcast %cst_238 : f32 to vector<8x32xf32>
    %1208 = arith.addf %1206, %1207 : vector<8x32xf32>
    %1209 = vector.extract_strided_slice %1208 {offsets = [0, 0], sizes = [8, 8], strides = [1, 1]} : vector<8x32xf32> to vector<8x8xf32>
    %1210 = vector.extract_strided_slice %1208 {offsets = [0, 8], sizes = [8, 8], strides = [1, 1]} : vector<8x32xf32> to vector<8x8xf32>
    %1211 = vector.extract_strided_slice %1204 {offsets = [0, 16], sizes = [8, 8], strides = [1, 1]} : vector<8x32xf32> to vector<8x8xf32>
    %1212 = vector.extract_strided_slice %1208 {offsets = [0, 24], sizes = [8, 8], strides = [1, 1]} : vector<8x32xf32> to vector<8x8xf32>
    %1213 = arith.mulf %1210, %1035 : vector<8x8xf32>
    %1214 = arith.mulf %1209, %1211 : vector<8x8xf32>
    %1215 = arith.addf %1213, %1214 : vector<8x8xf32>
    %1216 = math.tanh %1215 : vector<8x8xf32>
    %1217 = arith.mulf %1212, %1216 : vector<8x8xf32>
    %1218 = tpu.concatenate %1217, %1055 in 1 : vector<8x8xf32>, vector<8x8xf32> -> vector<8x16xf32>
    %cst_239 = arith.constant dense<0.000000e+00> : vector<8x32xf32>
    %1219 = tpu.matmul %1218, %6, %cst_239 {dimension_numbers = #tpu.dot_dimension_numbers<[1], [0], [0], [1], [0, 0, 1, 1], [], []>} : vector<8x16xf32>, vector<16x32xf32>, vector<8x32xf32> -> vector<8x32xf32>
    %1220 = vector.broadcast %17 : vector<1x32xf32> to vector<8x32xf32>
    %1221 = arith.addf %1219, %1220 : vector<8x32xf32>
    %1222 = math.tanh %1221 : vector<8x32xf32>
    %cst_240 = arith.constant 5.000000e-01 : f32
    %1223 = vector.broadcast %cst_240 : f32 to vector<8x32xf32>
    %1224 = arith.mulf %1223, %1222 : vector<8x32xf32>
    %cst_241 = arith.constant 5.000000e-01 : f32
    %1225 = vector.broadcast %cst_241 : f32 to vector<8x32xf32>
    %1226 = arith.addf %1224, %1225 : vector<8x32xf32>
    %1227 = vector.extract_strided_slice %1226 {offsets = [0, 0], sizes = [8, 8], strides = [1, 1]} : vector<8x32xf32> to vector<8x8xf32>
    %1228 = vector.extract_strided_slice %1226 {offsets = [0, 8], sizes = [8, 8], strides = [1, 1]} : vector<8x32xf32> to vector<8x8xf32>
    %1229 = vector.extract_strided_slice %1222 {offsets = [0, 16], sizes = [8, 8], strides = [1, 1]} : vector<8x32xf32> to vector<8x8xf32>
    %1230 = vector.extract_strided_slice %1226 {offsets = [0, 24], sizes = [8, 8], strides = [1, 1]} : vector<8x32xf32> to vector<8x8xf32>
    %1231 = arith.mulf %1228, %1053 : vector<8x8xf32>
    %1232 = arith.mulf %1227, %1229 : vector<8x8xf32>
    %1233 = arith.addf %1231, %1232 : vector<8x8xf32>
    %1234 = math.tanh %1233 : vector<8x8xf32>
    %1235 = arith.mulf %1230, %1234 : vector<8x8xf32>
    %1236 = tpu.concatenate %1235, %1073 in 1 : vector<8x8xf32>, vector<8x8xf32> -> vector<8x16xf32>
    %cst_242 = arith.constant dense<0.000000e+00> : vector<8x32xf32>
    %1237 = tpu.matmul %1236, %7, %cst_242 {dimension_numbers = #tpu.dot_dimension_numbers<[1], [0], [0], [1], [0, 0, 1, 1], [], []>} : vector<8x16xf32>, vector<16x32xf32>, vector<8x32xf32> -> vector<8x32xf32>
    %1238 = vector.broadcast %18 : vector<1x32xf32> to vector<8x32xf32>
    %1239 = arith.addf %1237, %1238 : vector<8x32xf32>
    %1240 = math.tanh %1239 : vector<8x32xf32>
    %cst_243 = arith.constant 5.000000e-01 : f32
    %1241 = vector.broadcast %cst_243 : f32 to vector<8x32xf32>
    %1242 = arith.mulf %1241, %1240 : vector<8x32xf32>
    %cst_244 = arith.constant 5.000000e-01 : f32
    %1243 = vector.broadcast %cst_244 : f32 to vector<8x32xf32>
    %1244 = arith.addf %1242, %1243 : vector<8x32xf32>
    %1245 = vector.extract_strided_slice %1244 {offsets = [0, 0], sizes = [8, 8], strides = [1, 1]} : vector<8x32xf32> to vector<8x8xf32>
    %1246 = vector.extract_strided_slice %1244 {offsets = [0, 8], sizes = [8, 8], strides = [1, 1]} : vector<8x32xf32> to vector<8x8xf32>
    %1247 = vector.extract_strided_slice %1240 {offsets = [0, 16], sizes = [8, 8], strides = [1, 1]} : vector<8x32xf32> to vector<8x8xf32>
    %1248 = vector.extract_strided_slice %1244 {offsets = [0, 24], sizes = [8, 8], strides = [1, 1]} : vector<8x32xf32> to vector<8x8xf32>
    %1249 = arith.mulf %1246, %1071 : vector<8x8xf32>
    %1250 = arith.mulf %1245, %1247 : vector<8x8xf32>
    %1251 = arith.addf %1249, %1250 : vector<8x8xf32>
    %1252 = math.tanh %1251 : vector<8x8xf32>
    %1253 = arith.mulf %1248, %1252 : vector<8x8xf32>
    %1254 = tpu.concatenate %1253, %1091 in 1 : vector<8x8xf32>, vector<8x8xf32> -> vector<8x16xf32>
    %cst_245 = arith.constant dense<0.000000e+00> : vector<8x32xf32>
    %1255 = tpu.matmul %1254, %8, %cst_245 {dimension_numbers = #tpu.dot_dimension_numbers<[1], [0], [0], [1], [0, 0, 1, 1], [], []>} : vector<8x16xf32>, vector<16x32xf32>, vector<8x32xf32> -> vector<8x32xf32>
    %1256 = vector.broadcast %19 : vector<1x32xf32> to vector<8x32xf32>
    %1257 = arith.addf %1255, %1256 : vector<8x32xf32>
    %1258 = math.tanh %1257 : vector<8x32xf32>
    %cst_246 = arith.constant 5.000000e-01 : f32
    %1259 = vector.broadcast %cst_246 : f32 to vector<8x32xf32>
    %1260 = arith.mulf %1259, %1258 : vector<8x32xf32>
    %cst_247 = arith.constant 5.000000e-01 : f32
    %1261 = vector.broadcast %cst_247 : f32 to vector<8x32xf32>
    %1262 = arith.addf %1260, %1261 : vector<8x32xf32>
    %1263 = vector.extract_strided_slice %1262 {offsets = [0, 0], sizes = [8, 8], strides = [1, 1]} : vector<8x32xf32> to vector<8x8xf32>
    %1264 = vector.extract_strided_slice %1262 {offsets = [0, 8], sizes = [8, 8], strides = [1, 1]} : vector<8x32xf32> to vector<8x8xf32>
    %1265 = vector.extract_strided_slice %1258 {offsets = [0, 16], sizes = [8, 8], strides = [1, 1]} : vector<8x32xf32> to vector<8x8xf32>
    %1266 = vector.extract_strided_slice %1262 {offsets = [0, 24], sizes = [8, 8], strides = [1, 1]} : vector<8x32xf32> to vector<8x8xf32>
    %1267 = arith.mulf %1264, %1089 : vector<8x8xf32>
    %1268 = arith.mulf %1263, %1265 : vector<8x8xf32>
    %1269 = arith.addf %1267, %1268 : vector<8x8xf32>
    %1270 = math.tanh %1269 : vector<8x8xf32>
    %1271 = arith.mulf %1266, %1270 : vector<8x8xf32>
    %1272 = tpu.concatenate %1271, %1109 in 1 : vector<8x8xf32>, vector<8x8xf32> -> vector<8x16xf32>
    %cst_248 = arith.constant dense<0.000000e+00> : vector<8x32xf32>
    %1273 = tpu.matmul %1272, %9, %cst_248 {dimension_numbers = #tpu.dot_dimension_numbers<[1], [0], [0], [1], [0, 0, 1, 1], [], []>} : vector<8x16xf32>, vector<16x32xf32>, vector<8x32xf32> -> vector<8x32xf32>
    %1274 = vector.broadcast %20 : vector<1x32xf32> to vector<8x32xf32>
    %1275 = arith.addf %1273, %1274 : vector<8x32xf32>
    %1276 = math.tanh %1275 : vector<8x32xf32>
    %cst_249 = arith.constant 5.000000e-01 : f32
    %1277 = vector.broadcast %cst_249 : f32 to vector<8x32xf32>
    %1278 = arith.mulf %1277, %1276 : vector<8x32xf32>
    %cst_250 = arith.constant 5.000000e-01 : f32
    %1279 = vector.broadcast %cst_250 : f32 to vector<8x32xf32>
    %1280 = arith.addf %1278, %1279 : vector<8x32xf32>
    %1281 = vector.extract_strided_slice %1280 {offsets = [0, 0], sizes = [8, 8], strides = [1, 1]} : vector<8x32xf32> to vector<8x8xf32>
    %1282 = vector.extract_strided_slice %1280 {offsets = [0, 8], sizes = [8, 8], strides = [1, 1]} : vector<8x32xf32> to vector<8x8xf32>
    %1283 = vector.extract_strided_slice %1276 {offsets = [0, 16], sizes = [8, 8], strides = [1, 1]} : vector<8x32xf32> to vector<8x8xf32>
    %1284 = vector.extract_strided_slice %1280 {offsets = [0, 24], sizes = [8, 8], strides = [1, 1]} : vector<8x32xf32> to vector<8x8xf32>
    %1285 = arith.mulf %1282, %1107 : vector<8x8xf32>
    %1286 = arith.mulf %1281, %1283 : vector<8x8xf32>
    %1287 = arith.addf %1285, %1286 : vector<8x8xf32>
    %1288 = math.tanh %1287 : vector<8x8xf32>
    %1289 = arith.mulf %1284, %1288 : vector<8x8xf32>
    %1290 = tpu.concatenate %1289, %1127 in 1 : vector<8x8xf32>, vector<8x8xf32> -> vector<8x16xf32>
    %cst_251 = arith.constant dense<0.000000e+00> : vector<8x32xf32>
    %1291 = tpu.matmul %1290, %10, %cst_251 {dimension_numbers = #tpu.dot_dimension_numbers<[1], [0], [0], [1], [0, 0, 1, 1], [], []>} : vector<8x16xf32>, vector<16x32xf32>, vector<8x32xf32> -> vector<8x32xf32>
    %1292 = vector.broadcast %21 : vector<1x32xf32> to vector<8x32xf32>
    %1293 = arith.addf %1291, %1292 : vector<8x32xf32>
    %1294 = math.tanh %1293 : vector<8x32xf32>
    %cst_252 = arith.constant 5.000000e-01 : f32
    %1295 = vector.broadcast %cst_252 : f32 to vector<8x32xf32>
    %1296 = arith.mulf %1295, %1294 : vector<8x32xf32>
    %cst_253 = arith.constant 5.000000e-01 : f32
    %1297 = vector.broadcast %cst_253 : f32 to vector<8x32xf32>
    %1298 = arith.addf %1296, %1297 : vector<8x32xf32>
    %1299 = vector.extract_strided_slice %1298 {offsets = [0, 0], sizes = [8, 8], strides = [1, 1]} : vector<8x32xf32> to vector<8x8xf32>
    %1300 = vector.extract_strided_slice %1298 {offsets = [0, 8], sizes = [8, 8], strides = [1, 1]} : vector<8x32xf32> to vector<8x8xf32>
    %1301 = vector.extract_strided_slice %1294 {offsets = [0, 16], sizes = [8, 8], strides = [1, 1]} : vector<8x32xf32> to vector<8x8xf32>
    %1302 = vector.extract_strided_slice %1298 {offsets = [0, 24], sizes = [8, 8], strides = [1, 1]} : vector<8x32xf32> to vector<8x8xf32>
    %1303 = arith.mulf %1300, %1125 : vector<8x8xf32>
    %1304 = arith.mulf %1299, %1301 : vector<8x8xf32>
    %1305 = arith.addf %1303, %1304 : vector<8x8xf32>
    %1306 = math.tanh %1305 : vector<8x8xf32>
    %1307 = arith.mulf %1302, %1306 : vector<8x8xf32>
    %c48 = arith.constant 48 : index
    %c0_254 = arith.constant 0 : index
    %1308 = vector.load %arg4[%c48, %c0_254] : memref<64x8xf32, #tpu.memory_space<vmem>>, vector<8x8xf32>
    tpu.vector_store %arg4[%c48, %c0_254], %1307 {strides = array<i32>} : memref<64x8xf32, #tpu.memory_space<vmem>>, vector<8x8xf32>,
    %1309 = vector.extract_strided_slice %28 {offsets = [56, 0], sizes = [8, 32], strides = [1, 1]} : vector<64x32xf32> to vector<8x32xf32>
    %cst_255 = arith.constant dense<0.000000e+00> : vector<8x32xf32>
    %1310 = tpu.matmul %1145, %1, %cst_255 {dimension_numbers = #tpu.dot_dimension_numbers<[1], [0], [0], [1], [0, 0, 1, 1], [], []>} : vector<8x8xf32>, vector<8x32xf32>, vector<8x32xf32> -> vector<8x32xf32>
    %1311 = arith.addf %1309, %1310 : vector<8x32xf32>
    %1312 = math.tanh %1311 : vector<8x32xf32>
    %cst_256 = arith.constant 5.000000e-01 : f32
    %1313 = vector.broadcast %cst_256 : f32 to vector<8x32xf32>
    %1314 = arith.mulf %1313, %1312 : vector<8x32xf32>
    %cst_257 = arith.constant 5.000000e-01 : f32
    %1315 = vector.broadcast %cst_257 : f32 to vector<8x32xf32>
    %1316 = arith.addf %1314, %1315 : vector<8x32xf32>
    %1317 = vector.extract_strided_slice %1316 {offsets = [0, 0], sizes = [8, 8], strides = [1, 1]} : vector<8x32xf32> to vector<8x8xf32>
    %1318 = vector.extract_strided_slice %1316 {offsets = [0, 8], sizes = [8, 8], strides = [1, 1]} : vector<8x32xf32> to vector<8x8xf32>
    %1319 = vector.extract_strided_slice %1312 {offsets = [0, 16], sizes = [8, 8], strides = [1, 1]} : vector<8x32xf32> to vector<8x8xf32>
    %1320 = vector.extract_strided_slice %1316 {offsets = [0, 24], sizes = [8, 8], strides = [1, 1]} : vector<8x32xf32> to vector<8x8xf32>
    %1321 = arith.mulf %1318, %1143 : vector<8x8xf32>
    %1322 = arith.mulf %1317, %1319 : vector<8x8xf32>
    %1323 = arith.addf %1321, %1322 : vector<8x8xf32>
    %1324 = math.tanh %1323 : vector<8x8xf32>
    %1325 = arith.mulf %1320, %1324 : vector<8x8xf32>
    %1326 = tpu.concatenate %1325, %1163 in 1 : vector<8x8xf32>, vector<8x8xf32> -> vector<8x16xf32>
    %cst_258 = arith.constant dense<0.000000e+00> : vector<8x32xf32>
    %1327 = tpu.matmul %1326, %2, %cst_258 {dimension_numbers = #tpu.dot_dimension_numbers<[1], [0], [0], [1], [0, 0, 1, 1], [], []>} : vector<8x16xf32>, vector<16x32xf32>, vector<8x32xf32> -> vector<8x32xf32>
    %1328 = vector.broadcast %13 : vector<1x32xf32> to vector<8x32xf32>
    %1329 = arith.addf %1327, %1328 : vector<8x32xf32>
    %1330 = math.tanh %1329 : vector<8x32xf32>
    %cst_259 = arith.constant 5.000000e-01 : f32
    %1331 = vector.broadcast %cst_259 : f32 to vector<8x32xf32>
    %1332 = arith.mulf %1331, %1330 : vector<8x32xf32>
    %cst_260 = arith.constant 5.000000e-01 : f32
    %1333 = vector.broadcast %cst_260 : f32 to vector<8x32xf32>
    %1334 = arith.addf %1332, %1333 : vector<8x32xf32>
    %1335 = vector.extract_strided_slice %1334 {offsets = [0, 0], sizes = [8, 8], strides = [1, 1]} : vector<8x32xf32> to vector<8x8xf32>
    %1336 = vector.extract_strided_slice %1334 {offsets = [0, 8], sizes = [8, 8], strides = [1, 1]} : vector<8x32xf32> to vector<8x8xf32>
    %1337 = vector.extract_strided_slice %1330 {offsets = [0, 16], sizes = [8, 8], strides = [1, 1]} : vector<8x32xf32> to vector<8x8xf32>
    %1338 = vector.extract_strided_slice %1334 {offsets = [0, 24], sizes = [8, 8], strides = [1, 1]} : vector<8x32xf32> to vector<8x8xf32>
    %1339 = arith.mulf %1336, %1161 : vector<8x8xf32>
    %1340 = arith.mulf %1335, %1337 : vector<8x8xf32>
    %1341 = arith.addf %1339, %1340 : vector<8x8xf32>
    %1342 = math.tanh %1341 : vector<8x8xf32>
    %1343 = arith.mulf %1338, %1342 : vector<8x8xf32>
    %1344 = tpu.concatenate %1343, %1181 in 1 : vector<8x8xf32>, vector<8x8xf32> -> vector<8x16xf32>
    %cst_261 = arith.constant dense<0.000000e+00> : vector<8x32xf32>
    %1345 = tpu.matmul %1344, %3, %cst_261 {dimension_numbers = #tpu.dot_dimension_numbers<[1], [0], [0], [1], [0, 0, 1, 1], [], []>} : vector<8x16xf32>, vector<16x32xf32>, vector<8x32xf32> -> vector<8x32xf32>
    %1346 = vector.broadcast %14 : vector<1x32xf32> to vector<8x32xf32>
    %1347 = arith.addf %1345, %1346 : vector<8x32xf32>
    %1348 = math.tanh %1347 : vector<8x32xf32>
    %cst_262 = arith.constant 5.000000e-01 : f32
    %1349 = vector.broadcast %cst_262 : f32 to vector<8x32xf32>
    %1350 = arith.mulf %1349, %1348 : vector<8x32xf32>
    %cst_263 = arith.constant 5.000000e-01 : f32
    %1351 = vector.broadcast %cst_263 : f32 to vector<8x32xf32>
    %1352 = arith.addf %1350, %1351 : vector<8x32xf32>
    %1353 = vector.extract_strided_slice %1352 {offsets = [0, 0], sizes = [8, 8], strides = [1, 1]} : vector<8x32xf32> to vector<8x8xf32>
    %1354 = vector.extract_strided_slice %1352 {offsets = [0, 8], sizes = [8, 8], strides = [1, 1]} : vector<8x32xf32> to vector<8x8xf32>
    %1355 = vector.extract_strided_slice %1348 {offsets = [0, 16], sizes = [8, 8], strides = [1, 1]} : vector<8x32xf32> to vector<8x8xf32>
    %1356 = vector.extract_strided_slice %1352 {offsets = [0, 24], sizes = [8, 8], strides = [1, 1]} : vector<8x32xf32> to vector<8x8xf32>
    %1357 = arith.mulf %1354, %1179 : vector<8x8xf32>
    %1358 = arith.mulf %1353, %1355 : vector<8x8xf32>
    %1359 = arith.addf %1357, %1358 : vector<8x8xf32>
    %1360 = math.tanh %1359 : vector<8x8xf32>
    %1361 = arith.mulf %1356, %1360 : vector<8x8xf32>
    %1362 = tpu.concatenate %1361, %1199 in 1 : vector<8x8xf32>, vector<8x8xf32> -> vector<8x16xf32>
    %cst_264 = arith.constant dense<0.000000e+00> : vector<8x32xf32>
    %1363 = tpu.matmul %1362, %4, %cst_264 {dimension_numbers = #tpu.dot_dimension_numbers<[1], [0], [0], [1], [0, 0, 1, 1], [], []>} : vector<8x16xf32>, vector<16x32xf32>, vector<8x32xf32> -> vector<8x32xf32>
    %1364 = vector.broadcast %15 : vector<1x32xf32> to vector<8x32xf32>
    %1365 = arith.addf %1363, %1364 : vector<8x32xf32>
    %1366 = math.tanh %1365 : vector<8x32xf32>
    %cst_265 = arith.constant 5.000000e-01 : f32
    %1367 = vector.broadcast %cst_265 : f32 to vector<8x32xf32>
    %1368 = arith.mulf %1367, %1366 : vector<8x32xf32>
    %cst_266 = arith.constant 5.000000e-01 : f32
    %1369 = vector.broadcast %cst_266 : f32 to vector<8x32xf32>
    %1370 = arith.addf %1368, %1369 : vector<8x32xf32>
    %1371 = vector.extract_strided_slice %1370 {offsets = [0, 0], sizes = [8, 8], strides = [1, 1]} : vector<8x32xf32> to vector<8x8xf32>
    %1372 = vector.extract_strided_slice %1370 {offsets = [0, 8], sizes = [8, 8], strides = [1, 1]} : vector<8x32xf32> to vector<8x8xf32>
    %1373 = vector.extract_strided_slice %1366 {offsets = [0, 16], sizes = [8, 8], strides = [1, 1]} : vector<8x32xf32> to vector<8x8xf32>
    %1374 = vector.extract_strided_slice %1370 {offsets = [0, 24], sizes = [8, 8], strides = [1, 1]} : vector<8x32xf32> to vector<8x8xf32>
    %1375 = arith.mulf %1372, %1197 : vector<8x8xf32>
    %1376 = arith.mulf %1371, %1373 : vector<8x8xf32>
    %1377 = arith.addf %1375, %1376 : vector<8x8xf32>
    %1378 = math.tanh %1377 : vector<8x8xf32>
    %1379 = arith.mulf %1374, %1378 : vector<8x8xf32>
    %1380 = tpu.concatenate %1379, %1217 in 1 : vector<8x8xf32>, vector<8x8xf32> -> vector<8x16xf32>
    %cst_267 = arith.constant dense<0.000000e+00> : vector<8x32xf32>
    %1381 = tpu.matmul %1380, %5, %cst_267 {dimension_numbers = #tpu.dot_dimension_numbers<[1], [0], [0], [1], [0, 0, 1, 1], [], []>} : vector<8x16xf32>, vector<16x32xf32>, vector<8x32xf32> -> vector<8x32xf32>
    %1382 = vector.broadcast %16 : vector<1x32xf32> to vector<8x32xf32>
    %1383 = arith.addf %1381, %1382 : vector<8x32xf32>
    %1384 = math.tanh %1383 : vector<8x32xf32>
    %cst_268 = arith.constant 5.000000e-01 : f32
    %1385 = vector.broadcast %cst_268 : f32 to vector<8x32xf32>
    %1386 = arith.mulf %1385, %1384 : vector<8x32xf32>
    %cst_269 = arith.constant 5.000000e-01 : f32
    %1387 = vector.broadcast %cst_269 : f32 to vector<8x32xf32>
    %1388 = arith.addf %1386, %1387 : vector<8x32xf32>
    %1389 = vector.extract_strided_slice %1388 {offsets = [0, 0], sizes = [8, 8], strides = [1, 1]} : vector<8x32xf32> to vector<8x8xf32>
    %1390 = vector.extract_strided_slice %1388 {offsets = [0, 8], sizes = [8, 8], strides = [1, 1]} : vector<8x32xf32> to vector<8x8xf32>
    %1391 = vector.extract_strided_slice %1384 {offsets = [0, 16], sizes = [8, 8], strides = [1, 1]} : vector<8x32xf32> to vector<8x8xf32>
    %1392 = vector.extract_strided_slice %1388 {offsets = [0, 24], sizes = [8, 8], strides = [1, 1]} : vector<8x32xf32> to vector<8x8xf32>
    %1393 = arith.mulf %1390, %1215 : vector<8x8xf32>
    %1394 = arith.mulf %1389, %1391 : vector<8x8xf32>
    %1395 = arith.addf %1393, %1394 : vector<8x8xf32>
    %1396 = math.tanh %1395 : vector<8x8xf32>
    %1397 = arith.mulf %1392, %1396 : vector<8x8xf32>
    %1398 = tpu.concatenate %1397, %1235 in 1 : vector<8x8xf32>, vector<8x8xf32> -> vector<8x16xf32>
    %cst_270 = arith.constant dense<0.000000e+00> : vector<8x32xf32>
    %1399 = tpu.matmul %1398, %6, %cst_270 {dimension_numbers = #tpu.dot_dimension_numbers<[1], [0], [0], [1], [0, 0, 1, 1], [], []>} : vector<8x16xf32>, vector<16x32xf32>, vector<8x32xf32> -> vector<8x32xf32>
    %1400 = vector.broadcast %17 : vector<1x32xf32> to vector<8x32xf32>
    %1401 = arith.addf %1399, %1400 : vector<8x32xf32>
    %1402 = math.tanh %1401 : vector<8x32xf32>
    %cst_271 = arith.constant 5.000000e-01 : f32
    %1403 = vector.broadcast %cst_271 : f32 to vector<8x32xf32>
    %1404 = arith.mulf %1403, %1402 : vector<8x32xf32>
    %cst_272 = arith.constant 5.000000e-01 : f32
    %1405 = vector.broadcast %cst_272 : f32 to vector<8x32xf32>
    %1406 = arith.addf %1404, %1405 : vector<8x32xf32>
    %1407 = vector.extract_strided_slice %1406 {offsets = [0, 0], sizes = [8, 8], strides = [1, 1]} : vector<8x32xf32> to vector<8x8xf32>
    %1408 = vector.extract_strided_slice %1406 {offsets = [0, 8], sizes = [8, 8], strides = [1, 1]} : vector<8x32xf32> to vector<8x8xf32>
    %1409 = vector.extract_strided_slice %1402 {offsets = [0, 16], sizes = [8, 8], strides = [1, 1]} : vector<8x32xf32> to vector<8x8xf32>
    %1410 = vector.extract_strided_slice %1406 {offsets = [0, 24], sizes = [8, 8], strides = [1, 1]} : vector<8x32xf32> to vector<8x8xf32>
    %1411 = arith.mulf %1408, %1233 : vector<8x8xf32>
    %1412 = arith.mulf %1407, %1409 : vector<8x8xf32>
    %1413 = arith.addf %1411, %1412 : vector<8x8xf32>
    %1414 = math.tanh %1413 : vector<8x8xf32>
    %1415 = arith.mulf %1410, %1414 : vector<8x8xf32>
    %1416 = tpu.concatenate %1415, %1253 in 1 : vector<8x8xf32>, vector<8x8xf32> -> vector<8x16xf32>
    %cst_273 = arith.constant dense<0.000000e+00> : vector<8x32xf32>
    %1417 = tpu.matmul %1416, %7, %cst_273 {dimension_numbers = #tpu.dot_dimension_numbers<[1], [0], [0], [1], [0, 0, 1, 1], [], []>} : vector<8x16xf32>, vector<16x32xf32>, vector<8x32xf32> -> vector<8x32xf32>
    %1418 = vector.broadcast %18 : vector<1x32xf32> to vector<8x32xf32>
    %1419 = arith.addf %1417, %1418 : vector<8x32xf32>
    %1420 = math.tanh %1419 : vector<8x32xf32>
    %cst_274 = arith.constant 5.000000e-01 : f32
    %1421 = vector.broadcast %cst_274 : f32 to vector<8x32xf32>
    %1422 = arith.mulf %1421, %1420 : vector<8x32xf32>
    %cst_275 = arith.constant 5.000000e-01 : f32
    %1423 = vector.broadcast %cst_275 : f32 to vector<8x32xf32>
    %1424 = arith.addf %1422, %1423 : vector<8x32xf32>
    %1425 = vector.extract_strided_slice %1424 {offsets = [0, 0], sizes = [8, 8], strides = [1, 1]} : vector<8x32xf32> to vector<8x8xf32>
    %1426 = vector.extract_strided_slice %1424 {offsets = [0, 8], sizes = [8, 8], strides = [1, 1]} : vector<8x32xf32> to vector<8x8xf32>
    %1427 = vector.extract_strided_slice %1420 {offsets = [0, 16], sizes = [8, 8], strides = [1, 1]} : vector<8x32xf32> to vector<8x8xf32>
    %1428 = vector.extract_strided_slice %1424 {offsets = [0, 24], sizes = [8, 8], strides = [1, 1]} : vector<8x32xf32> to vector<8x8xf32>
    %1429 = arith.mulf %1426, %1251 : vector<8x8xf32>
    %1430 = arith.mulf %1425, %1427 : vector<8x8xf32>
    %1431 = arith.addf %1429, %1430 : vector<8x8xf32>
    %1432 = math.tanh %1431 : vector<8x8xf32>
    %1433 = arith.mulf %1428, %1432 : vector<8x8xf32>
    %1434 = tpu.concatenate %1433, %1271 in 1 : vector<8x8xf32>, vector<8x8xf32> -> vector<8x16xf32>
    %cst_276 = arith.constant dense<0.000000e+00> : vector<8x32xf32>
    %1435 = tpu.matmul %1434, %8, %cst_276 {dimension_numbers = #tpu.dot_dimension_numbers<[1], [0], [0], [1], [0, 0, 1, 1], [], []>} : vector<8x16xf32>, vector<16x32xf32>, vector<8x32xf32> -> vector<8x32xf32>
    %1436 = vector.broadcast %19 : vector<1x32xf32> to vector<8x32xf32>
    %1437 = arith.addf %1435, %1436 : vector<8x32xf32>
    %1438 = math.tanh %1437 : vector<8x32xf32>
    %cst_277 = arith.constant 5.000000e-01 : f32
    %1439 = vector.broadcast %cst_277 : f32 to vector<8x32xf32>
    %1440 = arith.mulf %1439, %1438 : vector<8x32xf32>
    %cst_278 = arith.constant 5.000000e-01 : f32
    %1441 = vector.broadcast %cst_278 : f32 to vector<8x32xf32>
    %1442 = arith.addf %1440, %1441 : vector<8x32xf32>
    %1443 = vector.extract_strided_slice %1442 {offsets = [0, 0], sizes = [8, 8], strides = [1, 1]} : vector<8x32xf32> to vector<8x8xf32>
    %1444 = vector.extract_strided_slice %1442 {offsets = [0, 8], sizes = [8, 8], strides = [1, 1]} : vector<8x32xf32> to vector<8x8xf32>
    %1445 = vector.extract_strided_slice %1438 {offsets = [0, 16], sizes = [8, 8], strides = [1, 1]} : vector<8x32xf32> to vector<8x8xf32>
    %1446 = vector.extract_strided_slice %1442 {offsets = [0, 24], sizes = [8, 8], strides = [1, 1]} : vector<8x32xf32> to vector<8x8xf32>
    %1447 = arith.mulf %1444, %1269 : vector<8x8xf32>
    %1448 = arith.mulf %1443, %1445 : vector<8x8xf32>
    %1449 = arith.addf %1447, %1448 : vector<8x8xf32>
    %1450 = math.tanh %1449 : vector<8x8xf32>
    %1451 = arith.mulf %1446, %1450 : vector<8x8xf32>
    %1452 = tpu.concatenate %1451, %1289 in 1 : vector<8x8xf32>, vector<8x8xf32> -> vector<8x16xf32>
    %cst_279 = arith.constant dense<0.000000e+00> : vector<8x32xf32>
    %1453 = tpu.matmul %1452, %9, %cst_279 {dimension_numbers = #tpu.dot_dimension_numbers<[1], [0], [0], [1], [0, 0, 1, 1], [], []>} : vector<8x16xf32>, vector<16x32xf32>, vector<8x32xf32> -> vector<8x32xf32>
    %1454 = vector.broadcast %20 : vector<1x32xf32> to vector<8x32xf32>
    %1455 = arith.addf %1453, %1454 : vector<8x32xf32>
    %1456 = math.tanh %1455 : vector<8x32xf32>
    %cst_280 = arith.constant 5.000000e-01 : f32
    %1457 = vector.broadcast %cst_280 : f32 to vector<8x32xf32>
    %1458 = arith.mulf %1457, %1456 : vector<8x32xf32>
    %cst_281 = arith.constant 5.000000e-01 : f32
    %1459 = vector.broadcast %cst_281 : f32 to vector<8x32xf32>
    %1460 = arith.addf %1458, %1459 : vector<8x32xf32>
    %1461 = vector.extract_strided_slice %1460 {offsets = [0, 0], sizes = [8, 8], strides = [1, 1]} : vector<8x32xf32> to vector<8x8xf32>
    %1462 = vector.extract_strided_slice %1460 {offsets = [0, 8], sizes = [8, 8], strides = [1, 1]} : vector<8x32xf32> to vector<8x8xf32>
    %1463 = vector.extract_strided_slice %1456 {offsets = [0, 16], sizes = [8, 8], strides = [1, 1]} : vector<8x32xf32> to vector<8x8xf32>
    %1464 = vector.extract_strided_slice %1460 {offsets = [0, 24], sizes = [8, 8], strides = [1, 1]} : vector<8x32xf32> to vector<8x8xf32>
    %1465 = arith.mulf %1462, %1287 : vector<8x8xf32>
    %1466 = arith.mulf %1461, %1463 : vector<8x8xf32>
    %1467 = arith.addf %1465, %1466 : vector<8x8xf32>
    %1468 = math.tanh %1467 : vector<8x8xf32>
    %1469 = arith.mulf %1464, %1468 : vector<8x8xf32>
    %1470 = tpu.concatenate %1469, %1307 in 1 : vector<8x8xf32>, vector<8x8xf32> -> vector<8x16xf32>
    %cst_282 = arith.constant dense<0.000000e+00> : vector<8x32xf32>
    %1471 = tpu.matmul %1470, %10, %cst_282 {dimension_numbers = #tpu.dot_dimension_numbers<[1], [0], [0], [1], [0, 0, 1, 1], [], []>} : vector<8x16xf32>, vector<16x32xf32>, vector<8x32xf32> -> vector<8x32xf32>
    %1472 = vector.broadcast %21 : vector<1x32xf32> to vector<8x32xf32>
    %1473 = arith.addf %1471, %1472 : vector<8x32xf32>
    %1474 = math.tanh %1473 : vector<8x32xf32>
    %cst_283 = arith.constant 5.000000e-01 : f32
    %1475 = vector.broadcast %cst_283 : f32 to vector<8x32xf32>
    %1476 = arith.mulf %1475, %1474 : vector<8x32xf32>
    %cst_284 = arith.constant 5.000000e-01 : f32
    %1477 = vector.broadcast %cst_284 : f32 to vector<8x32xf32>
    %1478 = arith.addf %1476, %1477 : vector<8x32xf32>
    %1479 = vector.extract_strided_slice %1478 {offsets = [0, 0], sizes = [8, 8], strides = [1, 1]} : vector<8x32xf32> to vector<8x8xf32>
    %1480 = vector.extract_strided_slice %1478 {offsets = [0, 8], sizes = [8, 8], strides = [1, 1]} : vector<8x32xf32> to vector<8x8xf32>
    %1481 = vector.extract_strided_slice %1474 {offsets = [0, 16], sizes = [8, 8], strides = [1, 1]} : vector<8x32xf32> to vector<8x8xf32>
    %1482 = vector.extract_strided_slice %1478 {offsets = [0, 24], sizes = [8, 8], strides = [1, 1]} : vector<8x32xf32> to vector<8x8xf32>
    %1483 = arith.mulf %1480, %1305 : vector<8x8xf32>
    %1484 = arith.mulf %1479, %1481 : vector<8x8xf32>
    %1485 = arith.addf %1483, %1484 : vector<8x8xf32>
    %1486 = math.tanh %1485 : vector<8x8xf32>
    %1487 = arith.mulf %1482, %1486 : vector<8x8xf32>
    %c56 = arith.constant 56 : index
    %c0_285 = arith.constant 0 : index
    %1488 = vector.load %arg4[%c56, %c0_285] : memref<64x8xf32, #tpu.memory_space<vmem>>, vector<8x8xf32>
    tpu.vector_store %arg4[%c56, %c0_285], %1487 {strides = array<i32>} : memref<64x8xf32, #tpu.memory_space<vmem>>, vector<8x8xf32>,
    %c0_286 = arith.constant 0 : index
    %c0_287 = arith.constant 0 : index
    %1489 = vector.load %arg4[%c0_286, %c0_287] : memref<64x8xf32, #tpu.memory_space<vmem>>, vector<64x8xf32>
    %cst_288 = arith.constant dense<0.000000e+00> : vector<64x1xf32>
    %1490 = tpu.matmul %1489, %22, %cst_288 {dimension_numbers = #tpu.dot_dimension_numbers<[1], [0], [0], [1], [0, 0, 1, 1], [], []>} : vector<64x8xf32>, vector<8x1xf32>, vector<64x1xf32> -> vector<64x1xf32>
    %1491 = vector.broadcast %23 : vector<1x1xf32> to vector<64x1xf32>
    %1492 = arith.addf %1490, %1491 : vector<64x1xf32>
    %1493 = arith.negf %1492 : vector<64x1xf32>
    %1494 = math.exp %1493 : vector<64x1xf32>
    %cst_289 = arith.constant 1.000000e+00 : f32
    %1495 = vector.broadcast %cst_289 : f32 to vector<64x1xf32>
    %1496 = arith.addf %1495, %1494 : vector<64x1xf32>
    %1497 = arith.divf %1495, %1496 : vector<64x1xf32>
    %c0_290 = arith.constant 0 : index
    %c0_291 = arith.constant 0 : index
    %c0_292 = arith.constant 0 : index
    %1498 = vector.load %arg3[%c0_290, %c0_291, %c0_292] : memref<1x64x1xf32, #tpu.memory_space<vmem>>, vector<1x64x1xf32>
    %1499 = vector.shape_cast %1498 : vector<1x64x1xf32> to vector<64x1xf32>
    %1500 = vector.shape_cast %1497 : vector<64x1xf32> to vector<1x64x1xf32>
    tpu.vector_store %arg3[%c0_290, %c0_291, %c0_292], %1500 {strides = array<i32>} : memref<1x64x1xf32, #tpu.memory_space<vmem>>, vector<1x64x1xf32>,
    return
  }
  func.func @transform_0(%arg0: i32) -> (i32, i32, i32) {
    %c0_i32 = arith.constant 0 : i32
    %c0_i32_0 = arith.constant 0 : i32
    %c0_i32_1 = arith.constant 0 : i32
    return %arg0, %c0_i32, %c0_i32_0 : i32, i32, i32
  }
  func.func @transform_1(%arg0: i32) -> (i32, i32) {
    %c0_i32 = arith.constant 0 : i32
    %c0_i32_0 = arith.constant 0 : i32
    %c0_i32_1 = arith.constant 0 : i32
    return %c0_i32, %c0_i32_0 : i32, i32
  }
  func.func @transform_2(%arg0: i32) -> (i32, i32, i32) {
    %c0_i32 = arith.constant 0 : i32
    %c0_i32_0 = arith.constant 0 : i32
    %c0_i32_1 = arith.constant 0 : i32
    return %arg0, %c0_i32, %c0_i32_0 : i32, i32, i32
  }
}

</mosaic_0001>

<bundles_post_ra>
// kernel: tpu_custom_call.1
= control target key start
LH: loop header
LB: loop body
LE: loop exit
PB: predicated region body
PF: predicated region fallthrough
CT: control target
= control target key end

     0   :  { %s10245_s9 = smov 0   ;;  %s12046_s0 = inlined_call_operand.vmem [shape: f32[2,64,128], index: 0, kind: input, shape index: {}]   ;;  %s12047_s1 = inlined_call_operand.vmem [shape: f32[312,32], index: 1, kind: input, shape index: {}]   ;;  %s12048_s2 = inlined_call_operand.vmem [shape: f32[2,64,1], index: 2, kind: output, shape index: {}]  }
   0x1 LB: > { %s8621_s10 = sadd.s32 4294967295, %s10221_s9   ;;  %p8625_p0 = scmp.ge.s32.totalorder %s10221_s9, 1  ;;  %s10221_s9 = sphi %s10245_s9, %s12_s9  }
   0x2   : > { %p112_p1 = scmp.lt.s32.totalorder %s10221_s9, 3 }
   0x4   : > { %p113_p2 = pnand %p8625_p0, %p112_p1 }
   0x5   : > { %v144_v0 = vld [vmem:[%s12047_s1] sm:$0xff] (!%p113_p2)  ;;  %v145_v1 = vld [vmem:[%s12047_s1 + $0x8] sm:$0xff] (!%p113_p2)  ;;  %v146_v2 = vld [vmem:[%s12047_s1 + $0x10] sm:$0xff] (!%p113_p2)  ;;  %p134_p3 = scmp.lt.s32.totalorder (!%p113_p2), %s8621_s10, 1  ;;  %v10223_v5 = vmov (!%p113_p2), 0.0   ;;  %vm10224_vm0 = vmmov (!%p113_p2), 0   ;;  %v191_v30 = vlaneseq (!%p113_p2) }
   0x6   : > { %116 = sbr.rel (%p113_p2) target bundleno = 47421 (0xb93d), region = 28  ;;  %v9597_v3 = vpack.c.bf16 (!%p113_p2), %v145_v1, %v144_v0  ;;  %v147_v4 = vld [vmem:[%s12047_s1 + $0x18] sm:$0xff] (!%p113_p2)  ;;  %9039 = vmatprep.subr.mxu1 (!%p113_p2), %v10223_v5  ;;  %9041 = vmatprep.mubr.msk.f32.mxu1 (!%p113_p2), %vm10224_vm0, %v10223_v5  ;;  %v148_v7 = vld [vmem:[%s12047_s1 + $0x20] sm:$0xff] (!%p113_p2)  ;;  %v149_v8 = vld [vmem:[%s12047_s1 + $0x28] sm:$0xff] (!%p113_p2)  ;;  %s10225_s27 = smov (!%p113_p2), 112   ;;  %v10227_v49 = vmov (!%p113_p2), 0.0|0.0  }
   0x7   : > { %v9601_v6 = vpack.c.bf16 (!%p113_p2), %v147_v4, %v146_v2  ;;  %v9605_v9 = vpack.c.bf16 (!%p113_p2), %v149_v8, %v148_v7  ;;  %v10287_v10 = vld [vmem:[%s12047_s1 + $0x80] sm:$0xff] (!%p113_p2)  ;;  %v150_v11 = vld [vmem:[%s12047_s1 + $0x30] sm:$0xff] (!%p113_p2)  ;;  %v151_v12 = vld [vmem:[%s12047_s1 + $0x38] sm:$0xff] (!%p113_p2)  ;;  %v10325_v31 = vshrl.u32 (!%p113_p2), %v191_v30, 7  ;;  %s10226_s28 = smov (!%p113_p2), 8   ;;  %s10228_s5 = smov (!%p113_p2), 16  }
   0x8   : > { %9598 = vmatprep.subr.bf16.mxu0 (!%p113_p2), %v9597_v3  ;;  %9040 = vmatpush3.msra.mxu1 (!%p113_p2), %v10287_v10  ;;  %v9609_v14 = vpack.c.bf16 (!%p113_p2), %v151_v12, %v150_v11  ;;  %v152_v15 = vld [vmem:[%s12047_s1 + $0x40] sm:$0xff] (!%p113_p2)  ;;  %v153_v16 = vld [vmem:[%s12047_s1 + $0x48] sm:$0xff] (!%p113_p2)  ;;  %v154_v18 = vld [vmem:[%s12047_s1 + $0x50] sm:$0xff] (!%p113_p2)  ;;  %s10229_s6 = smov (!%p113_p2), 104   ;;  %vm300_vm1 = vcmask (!%p113_p2), 64512   ;;  %vm404_vm2 = vcmask (!%p113_p2), 130048  }
   0x9   : > { %9600 = vmatpush3.bf16.msra.mxu0 (!%p113_p2), %v9597_v3  ;;  %9042 = vmatmul.mubr.f32.vlgmr.msra.gmra.mrb[0].mxu1 (!%p113_p2), %v10223_v5  ;;  %v9613_v17 = vpack.c.bf16 (!%p113_p2), %v153_v16, %v152_v15  ;;  %v155_v19 = vld [vmem:[%s12047_s1 + $0x58] sm:$0xff] (!%p113_p2)  ;;  %v156_v21 = vld [vmem:[%s12047_s1 + $0x60] sm:$0xff] (!%p113_p2)  ;;  %v157_v22 = vld [vmem:[%s12047_s1 + $0x68] sm:$0xff] (!%p113_p2)  ;;  %v193_v32 = vsub.s32 (!%p113_p2), 0, %v10325_v31  ;;  %v402_v56 = vsub.s32 (!%p113_p2), 1, %v10325_v31  ;;  %v505_v15 = vsub.s32 (!%p113_p2), 2, %v10325_v31 }
   0xa   : > { %9602 = vmatprep.subr.bf16.mxu0 (!%p113_p2), %v9601_v6  ;;  %9048 = vmatprep.mubr.msk.f32.mxu1 (!%p113_p2), %vm10224_vm0, %v10223_v5  ;;  %v9617_v20 = vpack.c.bf16 (!%p113_p2), %v155_v19, %v154_v18  ;;  %v9621_v23 = vpack.c.bf16 (!%p113_p2), %v157_v22, %v156_v21  ;;  %v158_v24 = vld [vmem:[%s12047_s1 + $0x70] sm:$0xff] (!%p113_p2)  ;;  %v159_v25 = vld [vmem:[%s12047_s1 + $0x78] sm:$0xff] (!%p113_p2)  ;;  %v161_v47 = vld [vmem:[%s12047_s1 + $0x88] sm:$0xff] (!%p113_p2)  ;;  %vm8557_vm3 = vcmask (!%p113_p2), 7168  }
   0xb   : > { %v9625_v26 = vpack.c.bf16 (!%p113_p2), %v159_v25, %v158_v24  ;;  %v10331_v33 = vld [vmem:[%s12047_s1 + $0x118] sm:$0xff] (!%p113_p2)  ;;  %v162_v48 = vld [vmem:[%s12047_s1 + $0x90] sm:$0xff] (!%p113_p2)  ;;  %9629 = vmatprep.subr.bf16.mxu1 (!%p113_p2), %v10227_v49  ;;  %v164_v7 = vld [vmem:[%s12047_s1 + $0xa0] sm:$0xff] (!%p113_p2) }
   0xc   : > { %v10336_v34 = vrot.slane (!%p113_p2), %v10331_v33, %v193_v32  ;;  %v10353_v50 = vpack.c.bf16 (!%p113_p2), %v162_v48, %v161_v47  ;;  %v10371_v57 = vrot.slane (!%p113_p2), %v10331_v33, %v402_v56  ;;  %v10400_v16 = vrot.slane (!%p113_p2), %v10331_v33, %v505_v15 }
   0xd   : > { %s12050_s10 = smov (!%p134_p3, %s8621_s10), 1  ;;  %9604 = vmatpush3.bf16.msra.mxu0 %v9601_v6  ;;  %v163_v6 = vld [vmem:[%s12047_s1 + $0x98] sm:$0xff] }
   0xe   : > { %s8728_s23 = sshll.u32 %s12050_s10, 6  ;;  %9606 = vmatprep.subr.bf16.mxu0 %v9605_v9  ;;  %9631 = vmatpush3.bf16.msra.mxu1 %v10353_v50  ;;  %v10385_v8 = vpack.c.bf16 %v164_v7, %v163_v6  ;;  %v709_v6 = vsub.s32 4, %v10325_v31 }
   0xf   : > { %s10282_s26 = scalar_lea.vmem %s12046_s0, %s8728_s23  ;;  %9632 = vmatprep.subr.bf16.mxu1 %v10227_v49  ;;  %s12025_s8 = scalar_lea.vmem %s12048_s2, %s8728_s23 }
  0x10   : > { %v183_v13 = vld [vmem:[%s10282_s26] sm:$0xff]  ;;  %v184_v27 = vld [vmem:[%s10282_s26 + $0x8] sm:$0xff]  ;;  %v10458_v7 = vrot.slane %v10331_v33, %v709_v6 }
  0x11   : > { %9027 = vmatprep.mubr.f32.mxu0 %v183_v13  ;;  %9608 = vmatpush3.bf16.msra.mxu0 %v9605_v9 }
  0x12   : > { %9610 = vmatprep.subr.bf16.mxu0 %v9609_v14 }
  0x15   : > { %9612 = vmatpush3.bf16.msra.mxu0 %v9609_v14 }
  0x16   : > { %9614 = vmatprep.subr.bf16.mxu0 %v9613_v17 }
  0x19   : > { %9616 = vmatpush3.bf16.msra.mxu0 %v9613_v17 }
  0x1a   : > { %9618 = vmatprep.subr.bf16.mxu0 %v9617_v20 }
  0x1d   : > { %9620 = vmatpush3.bf16.msra.mxu0 %v9617_v20 }
  0x1e   : > { %9622 = vmatprep.subr.bf16.mxu0 %v9621_v23 }
  0x21   : > { %9624 = vmatpush3.bf16.msra.mxu0 %v9621_v23 }
  0x22   : > { %9626 = vmatprep.subr.bf16.mxu0 %v9625_v26 }
  0x25   : > { %9628 = vmatpush3.bf16.msra.mxu0 %v9625_v26 }
  0x26   : > { %9671 = vmatprep.subr.bf16.mxu0 %v10227_v49 }
  0x28   : > { %9028 = vmatmul.mubr.f32.vlgmr.msra.gmra.mrb[0].mxu0 %v184_v27 }
  0xdc   : > { %v370_v28 = vpop.f32.mrb[0].mxu1 }
  0xdd   : > { %v9043_v29 = vpop.f32.mrb[1].mxu1 }
  0xde   : > { %v166_v29 = vld [vmem:[%s12047_s1 + $0xb0] sm:$0xff] }
  0xfb   : > { %v10338_v35 = vpop.f32.mrb[0].mxu0 }
  0xfc   : > { %v261_v36 = vpop.f32.mrb[1].mxu0 }
  0xfd   : > { %v262_v37 = vadd.f32 %v261_v36, %v10336_v34 }
  0xff   : > { %v374_v38 = vadd.f32 %v370_v28, %v262_v37  ;;  %v165_v28 = vld [vmem:[%s12047_s1 + $0xa8] sm:$0xff] }
 0x100   : > { %v10414_v30 = vpack.c.bf16 %v166_v29, %v165_v28 }
 0x101   : > { %9860 = vtanh.f32 %v374_v38 }
 0x10b   : > { %v9861_v39 = vpop.eup %9860 }
 0x10c   : > { %380 = vrot.lane.b32.xlu0 %v9861_v39, %s10225_s27  ;;  %v376_v40 = vmul.f32 0.5, %v9861_v39 }
 0x10e   : > { %v377_v41 = vadd.f32 0.5, %v376_v40 }
 0x110   : > { %v378_v44 = vmul.f32 0.0, %v377_v41 }
 0x17e   : > { %v381_v42 = vpop.permute.xlu0 %380 }
 0x17f   : > { %v383_v43 = vmul.f32 %v381_v42, %v377_v41 }
 0x181   : > { %385 = vrot.lane.b32.xlu0 %v383_v43, %s10226_s28 }
 0x1f3   : > { %v386_v45 = vpop.permute.xlu0 %385 }
 0x1f4   : > { %v10343_v46 = vadd.f32 %v386_v45, %v378_v44 }
 0x1f6   : > { %9862 = vtanh.f32 %v10343_v46 }
 0x200   : > { %v9863_v51 = vpop.eup %9862 }
 0x201   : > { %391 = vrot.lane.b32.xlu1 %v9863_v51, %s10228_s5 }
 0x273   : > { %v392_v52 = vpop.permute.xlu1 %391 }
 0x274   : > { %v394_v53 = vmul.f32 %v392_v52, %v377_v41  ;;  %v607_v41 = vsub.s32 3, %v10325_v31 }
 0x276   : > { %396 = vrot.lane.b32.xlu1 %v394_v53, %s10229_s6  ;;  %v10429_v42 = vrot.slane %v10331_v33, %v607_v41 }
 0x2e8   : > { %v10360_v54 = vpop.permute.xlu1 %396 }
 0x2e9   : > { %v399_v55 = vsel %vm300_vm1, %v10360_v54, 0.0 }
 0x2ea   : > { %9049 = vmatmul.mubr.msk.f32.vlgmr.msra.gmra.mrb[2].mxu1 %vm404_vm2, %v399_v55 }
 0x2eb   : > { %9055 = vmatprep.mubr.msk.f32.mxu1 %vm10224_vm0, %v10223_v5  ;;  %9634 = vmatpush3.bf16.msra.mxu1 %v10385_v8 }
 0x2ec   : > { %9635 = vmatprep.subr.bf16.mxu1 %v10227_v49 }
 0x3bd   : > { %v474_v58 = vpop.f32.mrb[2].mxu1 }
 0x3be   : > { %v475_v59 = vadd.f32 %v474_v58, %v10371_v57  ;;  %v9050_v60 = vpop.f32.mrb[3].mxu1 }
 0x3bf   : > { %v167_v60 = vld [vmem:[%s12047_s1 + $0xb8] sm:$0xff] }
 0x3c0   : > { %9864 = vtanh.f32 %v475_v59 }
 0x3ca   : > { %v9865_v61 = vpop.eup %9864 }
 0x3cb   : > { %483 = vrot.lane.b32.xlu0 %v9865_v61, %s10225_s27  ;;  %v479_v62 = vmul.f32 0.5, %v9865_v61  ;;  %v168_v61 = vld [vmem:[%s12047_s1 + $0xc0] sm:$0xff] }
 0x3cd   : > { %v480_v63 = vadd.f32 0.5, %v479_v62  ;;  %v10443_v62 = vpack.c.bf16 %v168_v61, %v167_v60  ;;  %v171_v60 = vld [vmem:[%s12047_s1 + $0xd8] sm:$0xff]  ;;  %v172_v61 = vld [vmem:[%s12047_s1 + $0xe0] sm:$0xff] }
 0x3cf   : > { %v481_v2 = vmul.f32 0.0, %v480_v63 }
 0x43d   : > { %v484_v0 = vpop.permute.xlu0 %483 }
 0x43e   : > { %v486_v1 = vmul.f32 %v484_v0, %v480_v63 }
 0x440   : > { %488 = vrot.lane.b32.xlu1 %v486_v1, %s10226_s28 }
 0x4b2   : > { %v489_v3 = vpop.permute.xlu1 %488 }
 0x4b3   : > { %v10376_v4 = vadd.f32 %v489_v3, %v481_v2 }
 0x4b5   : > { %9866 = vtanh.f32 %v10376_v4 }
 0x4bf   : > { %v9867_v9 = vpop.eup %9866 }
 0x4c0   : > { %494 = vrot.lane.b32.xlu0 %v9867_v9, %s10228_s5 }
 0x532   : > { %v495_v11 = vpop.permute.xlu0 %494 }
 0x533   : > { %v10390_v12 = vmul.f32 %v495_v11, %v480_v63 }
 0x535   : > { %499 = vrot.lane.b32.xlu1 %v10390_v12, %s10229_s6 }
 0x5a7   : > { %v500_v13 = vpop.permute.xlu1 %499 }
 0x5a8   : > { %v502_v14 = vsel %vm300_vm1, %v500_v13, 0.0 }
 0x5a9   : > { %9056 = vmatmul.mubr.msk.f32.vlgmr.msra.gmra.mrb[4].mxu1 %vm404_vm2, %v502_v14 }
 0x5aa   : > { %9062 = vmatprep.mubr.msk.f32.mxu1 %vm10224_vm0, %v10223_v5  ;;  %9637 = vmatpush3.bf16.msra.mxu1 %v10414_v30 }
 0x5ab   : > { %9638 = vmatprep.subr.bf16.mxu1 %v10227_v49 }
 0x67c   : > { %v576_v17 = vpop.f32.mrb[4].mxu1 }
 0x67d   : > { %v577_v18 = vadd.f32 %v576_v17, %v10400_v16  ;;  %v9057_v19 = vpop.f32.mrb[5].mxu1 }
 0x67f   : > { %9868 = vtanh.f32 %v577_v18 }
 0x689   : > { %v9869_v20 = vpop.eup %9868 }
 0x68a   : > { %585 = vrot.lane.b32.xlu0 %v9869_v20, %s10225_s27  ;;  %v581_v21 = vmul.f32 0.5, %v9869_v20 }
 0x68c   : > { %v582_v22 = vadd.f32 0.5, %v581_v21 }
 0x68e   : > { %v583_v25 = vmul.f32 0.0, %v582_v22 }
 0x6fc   : > { %v586_v23 = vpop.permute.xlu0 %585 }
 0x6fd   : > { %v588_v24 = vmul.f32 %v586_v23, %v582_v22  ;;  %v169_v23 = vld [vmem:[%s12047_s1 + $0xc8] sm:$0xff] }
 0x6ff   : > { %590 = vrot.lane.b32.xlu1 %v588_v24, %s10226_s28  ;;  %v170_v24 = vld [vmem:[%s12047_s1 + $0xd0] sm:$0xff] }
 0x771   : > { %v591_v26 = vpop.permute.xlu1 %590 }
 0x772   : > { %v10405_v27 = vadd.f32 %v591_v26, %v583_v25  ;;  %v10472_v25 = vpack.c.bf16 %v170_v24, %v169_v23 }
 0x774   : > { %9870 = vtanh.f32 %v10405_v27 }
 0x77e   : > { %v9871_v36 = vpop.eup %9870 }
 0x77f   : > { %596 = vrot.lane.b32.xlu0 %v9871_v36, %s10228_s5 }
 0x7f1   : > { %v597_v37 = vpop.permute.xlu0 %596 }
 0x7f2   : > { %v10419_v38 = vmul.f32 %v597_v37, %v582_v22 }
 0x7f4   : > { %601 = vrot.lane.b32.xlu1 %v10419_v38, %s10229_s6 }
 0x866   : > { %v602_v39 = vpop.permute.xlu1 %601 }
 0x867   : > { %v604_v40 = vsel %vm300_vm1, %v602_v39, 0.0  ;;  %v811_v39 = vsub.s32 5, %v10325_v31 }
 0x868   : > { %9063 = vmatmul.mubr.msk.f32.vlgmr.msra.gmra.mrb[6].mxu1 %vm404_vm2, %v604_v40 }
 0x869   : > { %9069 = vmatprep.mubr.msk.f32.mxu1 %vm10224_vm0, %v10223_v5  ;;  %9640 = vmatpush3.bf16.msra.mxu1 %v10443_v62  ;;  %v10487_v40 = vrot.slane %v10331_v33, %v811_v39 }
 0x86a   : > { %9641 = vmatprep.subr.bf16.mxu1 %v10227_v49 }
 0x93b   : > { %v678_v43 = vpop.f32.mrb[6].mxu1 }
 0x93c   : > { %v679_v44 = vadd.f32 %v678_v43, %v10429_v42  ;;  %v9064_v45 = vpop.f32.mrb[7].mxu1 }
 0x93e   : > { %9872 = vtanh.f32 %v679_v44 }
 0x948   : > { %v9873_v47 = vpop.eup %9872 }
 0x949   : > { %687 = vrot.lane.b32.xlu0 %v9873_v47, %s10225_s27  ;;  %v683_v48 = vmul.f32 0.5, %v9873_v47 }
 0x94b   : > { %v684_v51 = vadd.f32 0.5, %v683_v48 }
 0x94d   : > { %v685_v55 = vmul.f32 0.0, %v684_v51 }
 0x9bb   : > { %v688_v52 = vpop.permute.xlu0 %687 }
 0x9bc   : > { %v690_v53 = vmul.f32 %v688_v52, %v684_v51 }
 0x9be   : > { %692 = vrot.lane.b32.xlu1 %v690_v53, %s10226_s28 }
 0xa30   : > { %v693_v58 = vpop.permute.xlu1 %692 }
 0xa31   : > { %v10434_v59 = vadd.f32 %v693_v58, %v685_v55 }
 0xa33   : > { %9874 = vtanh.f32 %v10434_v59 }
 0xa3d   : > { %v9875_v63 = vpop.eup %9874 }
 0xa3e   : > { %698 = vrot.lane.b32.xlu0 %v9875_v63, %s10228_s5  ;;  %v10501_v63 = vpack.c.bf16 %v172_v61, %v171_v60 }
 0xa40   : > { %9673 = vmatpush3.bf16.msra.mxu0 %v10501_v63 }
 0xa41   : > { %9677 = vmatprep.subr.bf16.mxu0 %v10227_v49 }
 0xab0   : > { %v699_v0 = vpop.permute.xlu0 %698 }
 0xab1   : > { %v10448_v1 = vmul.f32 %v699_v0, %v684_v51 }
 0xab3   : > { %703 = vrot.lane.b32.xlu1 %v10448_v1, %s10229_s6 }
 0xb25   : > { %v704_v2 = vpop.permute.xlu1 %703 }
 0xb26   : > { %v706_v3 = vsel %vm300_vm1, %v704_v2, 0.0 }
 0xb27   : > { %9070 = vmatmul.mubr.msk.f32.vlgmr.msra.gmra.mrb[8].mxu1 %vm404_vm2, %v706_v3 }
 0xb28   : > { %9076 = vmatprep.mubr.msk.f32.mxu1 %vm10224_vm0, %v10223_v5  ;;  %9643 = vmatpush3.bf16.msra.mxu1 %v10472_v25 }
 0xb29   : > { %9644 = vmatprep.subr.bf16.mxu1 %v10227_v49 }
 0xbfa   : > { %v780_v9 = vpop.f32.mrb[8].mxu1 }
 0xbfb   : > { %v781_v11 = vadd.f32 %v780_v9, %v10458_v7  ;;  %v9071_v13 = vpop.f32.mrb[9].mxu1 }
 0xbfd   : > { %9876 = vtanh.f32 %v781_v11  ;;  %v913_v11 = vsub.s32 6, %v10325_v31 }
 0xbff   : > { %v10518_v13 = vrot.slane %v10331_v33, %v913_v11 }
 0xc07   : > { %v9877_v14 = vpop.eup %9876 }
 0xc08   : > { %789 = vrot.lane.b32.xlu0 %v9877_v14, %s10225_s27  ;;  %v785_v15 = vmul.f32 0.5, %v9877_v14 }
 0xc0a   : > { %v786_v17 = vadd.f32 0.5, %v785_v15 }
 0xc0c   : > { %v787_v20 = vmul.f32 0.0, %v786_v17 }
 0xc7a   : > { %v790_v18 = vpop.permute.xlu0 %789 }
 0xc7b   : > { %v792_v19 = vmul.f32 %v790_v18, %v786_v17 }
 0xc7d   : > { %794 = vrot.lane.b32.xlu1 %v792_v19, %s10226_s28 }
 0xcef   : > { %v795_v21 = vpop.permute.xlu1 %794 }
 0xcf0   : > { %v10463_v22 = vadd.f32 %v795_v21, %v787_v20 }
 0xcf2   : > { %9878 = vtanh.f32 %v10463_v22 }
 0xcfc   : > { %v9879_v26 = vpop.eup %9878 }
 0xcfd   : > { %800 = vrot.lane.b32.xlu0 %v9879_v26, %s10228_s5 }
 0xd6f   : > { %v801_v28 = vpop.permute.xlu0 %800 }
 0xd70   : > { %v10477_v29 = vmul.f32 %v801_v28, %v786_v17 }
 0xd72   : > { %805 = vrot.lane.b32.xlu1 %v10477_v29, %s10229_s6 }
 0xde4   : > { %v806_v36 = vpop.permute.xlu1 %805 }
 0xde5   : > { %v808_v37 = vsel %vm300_vm1, %v806_v36, 0.0  ;;  %v173_v36 = vld [vmem:[%s12047_s1 + $0xe8] sm:$0xff] }
 0xde6   : > { %9077 = vmatmul.mubr.msk.f32.vlgmr.msra.gmra.mrb[10].mxu1 %vm404_vm2, %v808_v37  ;;  %v174_v37 = vld [vmem:[%s12047_s1 + $0xf0] sm:$0xff] }
 0xde7   : > { %9083 = vmatprep.mubr.msk.f32.mxu1 %vm10224_vm0, %v10223_v5  ;;  %9646 = vmatpush3.bf16.msra.mxu1 %v10501_v63  ;;  %v10532_v39 = vpack.c.bf16 %v174_v37, %v173_v36 }
 0xde8   : > { %9647 = vmatprep.subr.bf16.mxu1 %v10227_v49 }
 0xeb9   : > { %v882_v41 = vpop.f32.mrb[10].mxu1 }
 0xeba   : > { %v883_v43 = vadd.f32 %v882_v41, %v10487_v40  ;;  %v9078_v44 = vpop.f32.mrb[11].mxu1 }
 0xebc   : > { %9880 = vtanh.f32 %v883_v43 }
 0xec6   : > { %v9881_v45 = vpop.eup %9880 }
 0xec7   : > { %891 = vrot.lane.b32.xlu0 %v9881_v45, %s10225_s27  ;;  %v887_v47 = vmul.f32 0.5, %v9881_v45 }
 0xec9   : > { %v888_v48 = vadd.f32 0.5, %v887_v47 }
 0xecb   : > { %v889_v53 = vmul.f32 0.0, %v888_v48 }
 0xf39   : > { %v892_v51 = vpop.permute.xlu0 %891 }
 0xf3a   : > { %v894_v52 = vmul.f32 %v892_v51, %v888_v48 }
 0xf3c   : > { %896 = vrot.lane.b32.xlu1 %v894_v52, %s10226_s28 }
 0xfae   : > { %v897_v55 = vpop.permute.xlu1 %896 }
 0xfaf   : > { %v10492_v58 = vadd.f32 %v897_v55, %v889_v53 }
 0xfb1   : > { %9882 = vtanh.f32 %v10492_v58 }
 0xfbb   : > { %v9883_v0 = vpop.eup %9882 }
 0xfbc   : > { %902 = vrot.lane.b32.xlu0 %v9883_v0, %s10228_s5 }
0x102e   : > { %v903_v2 = vpop.permute.xlu0 %902 }
0x102f   : > { %v10508_v3 = vmul.f32 %v903_v2, %v888_v48  ;;  %v1015_v48 = vsub.s32 7, %v10325_v31 }
0x1031   : > { %907 = vrot.lane.b32.xlu1 %v10508_v3, %s10229_s6  ;;  %v10547_v51 = vrot.slane %v10331_v33, %v1015_v48  ;;  %v175_v33 = vld [vmem:[%s12047_s1 + $0xf8] sm:$0xff] }
0x10a3   : > { %v908_v6 = vpop.permute.xlu1 %907 }
0x10a4   : > { %v910_v9 = vsel %vm300_vm1, %v908_v6, 0.0 }
0x10a5   : > { %9084 = vmatmul.mubr.msk.f32.vlgmr.msra.gmra.mrb[12].mxu1 %vm404_vm2, %v910_v9 }
0x10a6   : > { %9090 = vmatprep.mubr.msk.f32.mxu1 %vm10224_vm0, %v10223_v5  ;;  %9649 = vmatpush3.bf16.msra.mxu1 %v10532_v39 }
0x10a7   : > { %9650 = vmatprep.subr.bf16.mxu1 %v10227_v49 }
0x1178   : > { %v984_v14 = vpop.f32.mrb[12].mxu1 }
0x1179   : > { %v985_v15 = vadd.f32 %v984_v14, %v10518_v13  ;;  %v9085_v17 = vpop.f32.mrb[13].mxu1 }
0x117b   : > { %9884 = vtanh.f32 %v985_v15  ;;  %v176_v15 = vld [vmem:[%s12047_s1 + $0x100] sm:$0xff] }
0x117c   : > { %v10561_v17 = vpack.c.bf16 %v176_v15, %v175_v33 }
0x1185   : > { %v9885_v18 = vpop.eup %9884 }
0x1186   : > { %993 = vrot.lane.b32.xlu0 %v9885_v18, %s10225_s27  ;;  %v989_v19 = vmul.f32 0.5, %v9885_v18 }
0x1188   : > { %v990_v20 = vadd.f32 0.5, %v989_v19 }
0x118a   : > { %v991_v24 = vmul.f32 0.0, %v990_v20 }
0x11f8   : > { %v994_v21 = vpop.permute.xlu0 %993 }
0x11f9   : > { %v996_v23 = vmul.f32 %v994_v21, %v990_v20 }
0x11fb   : > { %998 = vrot.lane.b32.xlu1 %v996_v23, %s10226_s28 }
0x126d   : > { %v999_v26 = vpop.permute.xlu1 %998 }
0x126e   : > { %v10523_v28 = vadd.f32 %v999_v26, %v991_v24  ;;  %v10577_v24 = vld [vmem:[%s12047_s1 + $0x120] sm:$0x3] }
0x126f   : > { %v10582_v26 = vrot.slane %v10577_v24, %v193_v32  ;;  %v177_v32 = vld [vmem:[%s12047_s1 + $0x108] sm:$0xff] }
0x1270   : > { %9886 = vtanh.f32 %v10523_v28 }
0x127a   : > { %v9887_v41 = vpop.eup %9886 }
0x127b   : > { %1004 = vrot.lane.b32.xlu0 %v9887_v41, %s10228_s5 }
0x12ed   : > { %v1005_v43 = vpop.permute.xlu0 %1004 }
0x12ee   : > { %v10537_v44 = vmul.f32 %v1005_v43, %v990_v20 }
0x12f0   : > { %1009 = vrot.lane.b32.xlu1 %v10537_v44, %s10229_s6 }
0x1362   : > { %v1010_v45 = vpop.permute.xlu1 %1009 }
0x1363   : > { %v1012_v47 = vsel %vm300_vm1, %v1010_v45, 0.0 }
0x1364   : > { %9091 = vmatmul.mubr.msk.f32.vlgmr.msra.gmra.mrb[14].mxu1 %vm404_vm2, %v1012_v47 }
0x1365   : > { %9097 = vmatprep.mubr.msk.f32.mxu1 %vm10224_vm0, %v10223_v5  ;;  %9652 = vmatpush3.bf16.msra.mxu1 %v10561_v17 }
0x1366   : > { %9653 = vmatprep.subr.bf16.mxu1 %v10227_v49 }
0x1437   : > { %v1086_v52 = vpop.f32.mrb[14].mxu1 }
0x1438   : > { %v1087_v53 = vadd.f32 %v1086_v52, %v10547_v51  ;;  %v9092_v55 = vpop.f32.mrb[15].mxu1 }
0x143a   : > { %9888 = vtanh.f32 %v1087_v53 }
0x1444   : > { %v9889_v60 = vpop.eup %9888 }
0x1445   : > { %1095 = vrot.lane.b32.xlu0 %v9889_v60, %s10225_s27  ;;  %v1091_v61 = vmul.f32 0.5, %v9889_v60 }
0x1447   : > { %v1092_v0 = vadd.f32 0.5, %v1091_v61  ;;  %v178_v61 = vld [vmem:[%s12047_s1 + $0x110] sm:$0xff] }
0x1449   : > { %v1093_v9 = vmul.f32 0.0, %v1092_v0 }
0x14b7   : > { %v1096_v2 = vpop.permute.xlu0 %1095 }
0x14b8   : > { %v1098_v6 = vmul.f32 %v1096_v2, %v1092_v0 }
0x14ba   : > { %1100 = vrot.lane.b32.xlu1 %v1098_v6, %s10226_s28 }
0x152c   : > { %v1101_v11 = vpop.permute.xlu1 %1100 }
0x152d   : > { %v10552_v14 = vadd.f32 %v1101_v11, %v1093_v9 }
0x152f   : > { %9890 = vtanh.f32 %v10552_v14 }
0x1539   : > { %v9891_v18 = vpop.eup %9890 }
0x153a   : > { %1106 = vrot.lane.b32.xlu0 %v9891_v18, %s10228_s5 }
0x15ac   : > { %v1107_v19 = vpop.permute.xlu0 %1106 }
0x15ad   : > { %v10566_v20 = vmul.f32 %v1107_v19, %v1092_v0  ;;  %v10596_v0 = vpack.c.bf16 %v178_v61, %v177_v32 }
0x15af   : > { %1111 = vrot.lane.b32.xlu1 %v10566_v20, %s10229_s6 }
0x1621   : > { %v1112_v21 = vpop.permute.xlu1 %1111 }
0x1622   : > { %v1114_v23 = vsel %vm300_vm1, %v1112_v21, 0.0 }
0x1623   : > { %9098 = vmatmul.mubr.msk.f32.vlgmr.msra.gmra.mrb[16].mxu1 %vm404_vm2, %v1114_v23 }
0x1624   : > { %9104 = vmatprep.mubr.msk.f32.mxu1 %vm10224_vm0, %v10223_v5  ;;  %9655 = vmatpush3.bf16.msra.mxu1 %v10596_v0 }
0x1625   : > { %9107 = vmatprep.subr.mxu1 %v10223_v5 }
0x16f6   : > { %v1188_v36 = vpop.f32.mrb[16].mxu1 }
0x16f7   : > { %v1189_v37 = vadd.f32 %v1188_v36, %v10582_v26  ;;  %v9099_v41 = vpop.f32.mrb[17].mxu1 }
0x16f9   : > { %9892 = vtanh.f32 %v1189_v37 }
0x1703   : > { %v9893_v43 = vpop.eup %9892 }
0x1704   : > { %1197 = vrot.lane.b32.xlu0 %v9893_v43, %s10225_s27  ;;  %v1193_v45 = vmul.f32 0.5, %v9893_v43 }
0x1706   : > { %v1194_v47 = vadd.f32 0.5, %v1193_v45 }
0x1708   : > { %v1195_v53 = vmul.f32 0.0, %v1194_v47 }
0x1776   : > { %v1198_v48 = vpop.permute.xlu0 %1197 }
0x1777   : > { %v1200_v52 = vmul.f32 %v1198_v48, %v1194_v47 }
0x1779   : > { %1202 = vrot.lane.b32.xlu1 %v1200_v52, %s10226_s28 }
0x17eb   : > { %v1203_v55 = vpop.permute.xlu1 %1202 }
0x17ec   : > { %v10587_v60 = vadd.f32 %v1203_v55, %v1195_v53 }
0x17ee   : > { %9894 = vtanh.f32 %v10587_v60 }
0x17f8   : > { %v9895_v2 = vpop.eup %9894 }
0x17f9   : > { %1208 = vrot.lane.b32.xlu0 %v9895_v2, %s10228_s5 }
0x186b   : > { %v1209_v6 = vpop.permute.xlu0 %1208 }
0x186c   : > { %v10601_v9 = vmul.f32 %v1209_v6, %v1194_v47 }
0x186e   : > { %1213 = vrot.lane.b32.xlu1 %v10601_v9, %s10229_s6 }
0x18e0   : > { %v1214_v11 = vpop.permute.xlu1 %1213 }
0x18e1   : > { %v1216_v33 = vsel %vm300_vm1, %v1214_v11, 0.0 }
0x18e2   : > { %9105 = vmatmul.mubr.msk.f32.vlgmr.msra.gmra.mrb[18].mxu1 %vm404_vm2, %v1216_v33 }
0x18e3   : > { %9108 = vmatpush3.msra.mxu1 %v10287_v10  ;;  %9109 = vmatprep.mubr.msk.f32.mxu1 %vm10224_vm0, %v10223_v5  ;;  %v267_v10 = vadd.f32 %v10338_v35, %v10336_v34 }
0x18e4   : > { %9656 = vmatprep.subr.bf16.mxu1 %v10227_v49 }
0x18e6   : > { %9110 = vmatmul.mubr.msk.f32.vlgmr.msra.gmra.mrb[20].mxu1 %vm300_vm1, %v10360_v54 }
0x18e7   : > { %9658 = vmatpush3.bf16.msra.mxu1 %v10353_v50  ;;  %9116 = vmatprep.mubr.msk.f32.mxu1 %vm10224_vm0, %v10223_v5 }
0x18e8   : > { %9659 = vmatprep.subr.bf16.mxu1 %v10227_v49 }
0x19b5   : > { %v10617_v15 = vpop.f32.mrb[18].mxu1 }
0x19b6   : > { %v9106_v18 = vpop.f32.mrb[19].mxu1 }
0x19b9   : > { %v1387_v19 = vpop.f32.mrb[20].mxu1 }
0x19ba   : > { %v1391_v21 = vadd.f32 %v1387_v19, %v267_v10  ;;  %v9111_v23 = vpop.f32.mrb[21].mxu1 }
0x19bc   : > { %9896 = vtanh.f32 %v1391_v21 }
0x19c6   : > { %v9897_v36 = vpop.eup %9896 }
0x19c7   : > { %1397 = vrot.lane.b32.xlu0 %v9897_v36, %s10225_s27  ;;  %v1393_v54 = vmul.f32 0.5, %v9897_v36 }
0x19c9   : > { %v1394_v37 = vadd.f32 0.5, %v1393_v54 }
0x19cb   : > { %v1395_v45 = vmul.f32 %v1394_v37, %v10343_v46 }
0x1a39   : > { %v1398_v41 = vpop.permute.xlu0 %1397 }
0x1a3a   : > { %v1400_v43 = vmul.f32 %v1398_v41, %v1394_v37 }
0x1a3c   : > { %1402 = vrot.lane.b32.xlu1 %v1400_v43, %s10226_s28 }
0x1aae   : > { %v1403_v47 = vpop.permute.xlu1 %1402 }
0x1aaf   : > { %v10624_v48 = vadd.f32 %v1403_v47, %v1395_v45 }
0x1ab1   : > { %9898 = vtanh.f32 %v10624_v48 }
0x1abb   : > { %v9899_v35 = vpop.eup %9898 }
0x1abc   : > { %1408 = vrot.lane.b32.xlu0 %v9899_v35, %s10228_s5 }
0x1ac0   : > { %1416 = vrot.lane.b32.xlu0 %v10390_v12, %s10225_s27 }
0x1b2e   : > { %v1409_v52 = vpop.permute.xlu0 %1408 }
0x1b2f   : > { %v1411_v53 = vmul.f32 %v1409_v52, %v1394_v37 }
0x1b31   : > { %1413 = vrot.lane.b32.xlu1 %v1411_v53, %s10229_s6 }
0x1b32   : > { %v1417_v55 = vpop.permute.xlu0 %1416 }
0x1ba3   : > { %v10631_v32 = vpop.permute.xlu1 %1413 }
0x1ba4   : > { %v1419_v46 = vsel %vm300_vm1, %v10631_v32, %v1417_v55 }
0x1ba5   : > { %9117 = vmatmul.mubr.msk.f32.vlgmr.msra.gmra.mrb[22].mxu1 %vm404_vm2, %v1419_v46 }
0x1ba6   : > { %9661 = vmatpush3.bf16.msra.mxu1 %v10385_v8  ;;  %9123 = vmatprep.mubr.msk.f32.mxu1 %vm10224_vm0, %v10223_v5 }
0x1ba7   : > { %9662 = vmatprep.subr.bf16.mxu1 %v10227_v49 }
0x1c78   : > { %v1489_v12 = vpop.f32.mrb[22].mxu1 }
0x1c79   : > { %v1490_v61 = vadd.f32 %v1489_v12, %v10371_v57  ;;  %v9118_v2 = vpop.f32.mrb[23].mxu1 }
0x1c7b   : > { %9900 = vtanh.f32 %v1490_v61 }
0x1c85   : > { %v9901_v6 = vpop.eup %9900 }
0x1c86   : > { %1498 = vrot.lane.b32.xlu1 %v9901_v6, %s10225_s27  ;;  %v1494_v11 = vmul.f32 0.5, %v9901_v6 }
0x1c88   : > { %v1495_v33 = vadd.f32 0.5, %v1494_v11 }
0x1c8a   : > { %v1496_v19 = vmul.f32 %v1495_v33, %v10376_v4 }
0x1cf8   : > { %v1499_v18 = vpop.permute.xlu1 %1498 }
0x1cf9   : > { %v1501_v10 = vmul.f32 %v1499_v18, %v1495_v33 }
0x1cfb   : > { %1503 = vrot.lane.b32.xlu0 %v1501_v10, %s10226_s28 }
0x1d6d   : > { %v1504_v21 = vpop.permute.xlu0 %1503 }
0x1d6e   : > { %v10644_v23 = vadd.f32 %v1504_v21, %v1496_v19 }
0x1d70   : > { %9902 = vtanh.f32 %v10644_v23 }
0x1d7a   : > { %v9903_v36 = vpop.eup %9902 }
0x1d7b   : > { %1509 = vrot.lane.b32.xlu1 %v9903_v36, %s10228_s5 }
0x1d7f   : > { %1517 = vrot.lane.b32.xlu1 %v10419_v38, %s10225_s27 }
0x1ded   : > { %v1510_v54 = vpop.permute.xlu1 %1509 }
0x1dee   : > { %v10650_v37 = vmul.f32 %v1510_v54, %v1495_v33 }
0x1df0   : > { %1514 = vrot.lane.b32.xlu0 %v10650_v37, %s10229_s6 }
0x1df1   : > { %v1518_v41 = vpop.permute.xlu1 %1517 }
0x1e62   : > { %v1515_v43 = vpop.permute.xlu0 %1514 }
0x1e63   : > { %v1520_v4 = vsel %vm300_vm1, %v1515_v43, %v1518_v41 }
0x1e64   : > { %9124 = vmatmul.mubr.msk.f32.vlgmr.msra.gmra.mrb[24].mxu1 %vm404_vm2, %v1520_v4 }
0x1e65   : > { %9664 = vmatpush3.bf16.msra.mxu1 %v10414_v30  ;;  %9130 = vmatprep.mubr.msk.f32.mxu1 %vm10224_vm0, %v10223_v5 }
0x1e66   : > { %9665 = vmatprep.subr.bf16.mxu1 %v10227_v49 }
0x1f37   : > { %v1590_v38 = vpop.f32.mrb[24].mxu1 }
0x1f38   : > { %v1591_v45 = vadd.f32 %v1590_v38, %v10400_v16  ;;  %v9125_v47 = vpop.f32.mrb[25].mxu1 }
0x1f3a   : > { %9904 = vtanh.f32 %v1591_v45 }
0x1f44   : > { %v9905_v35 = vpop.eup %9904 }
0x1f45   : > { %1599 = vrot.lane.b32.xlu0 %v9905_v35, %s10225_s27  ;;  %v1595_v52 = vmul.f32 0.5, %v9905_v35 }
0x1f47   : > { %v1596_v53 = vadd.f32 0.5, %v1595_v52 }
0x1f49   : > { %v1597_v12 = vmul.f32 %v1596_v53, %v10405_v27 }
0x1fb7   : > { %v1600_v55 = vpop.permute.xlu0 %1599 }
0x1fb8   : > { %v1602_v46 = vmul.f32 %v1600_v55, %v1596_v53 }
0x1fba   : > { %1604 = vrot.lane.b32.xlu1 %v1602_v46, %s10226_s28 }
0x202c   : > { %v1605_v61 = vpop.permute.xlu1 %1604 }
0x202d   : > { %v10664_v2 = vadd.f32 %v1605_v61, %v1597_v12 }
0x202f   : > { %9906 = vtanh.f32 %v10664_v2 }
0x2039   : > { %v9907_v6 = vpop.eup %9906 }
0x203a   : > { %1610 = vrot.lane.b32.xlu0 %v9907_v6, %s10228_s5 }
0x203e   : > { %1618 = vrot.lane.b32.xlu0 %v10448_v1, %s10225_s27 }
0x20ac   : > { %v1611_v11 = vpop.permute.xlu0 %1610 }
0x20ad   : > { %v10670_v33 = vmul.f32 %v1611_v11, %v1596_v53 }
0x20af   : > { %1615 = vrot.lane.b32.xlu1 %v10670_v33, %s10229_s6 }
0x20b0   : > { %v1619_v18 = vpop.permute.xlu0 %1618 }
0x2121   : > { %v1616_v10 = vpop.permute.xlu1 %1615 }
0x2122   : > { %v1621_v27 = vsel %vm300_vm1, %v1616_v10, %v1619_v18 }
0x2123   : > { %9131 = vmatmul.mubr.msk.f32.vlgmr.msra.gmra.mrb[26].mxu1 %vm404_vm2, %v1621_v27 }
0x2124   : > { %9667 = vmatpush3.bf16.msra.mxu1 %v10443_v62  ;;  %9137 = vmatprep.mubr.msk.f32.mxu1 %vm10224_vm0, %v10223_v5 }
0x2125   : > { %9668 = vmatprep.subr.bf16.mxu1 %v10227_v49 }
0x21f6   : > { %v1691_v1 = vpop.f32.mrb[26].mxu1 }
0x21f7   : > { %v1692_v19 = vadd.f32 %v1691_v1, %v10429_v42  ;;  %v9132_v21 = vpop.f32.mrb[27].mxu1 }
0x21f9   : > { %9908 = vtanh.f32 %v1692_v19 }
0x2203   : > { %v9909_v36 = vpop.eup %9908 }
0x2204   : > { %1700 = vrot.lane.b32.xlu1 %v9909_v36, %s10225_s27  ;;  %v1696_v54 = vmul.f32 0.5, %v9909_v36 }
0x2206   : > { %v1697_v41 = vadd.f32 0.5, %v1696_v54 }
0x2208   : > { %v1698_v38 = vmul.f32 %v1697_v41, %v10434_v59 }
0x2276   : > { %v1701_v43 = vpop.permute.xlu1 %1700 }
0x2277   : > { %v1703_v4 = vmul.f32 %v1701_v43, %v1697_v41 }
0x2279   : > { %1705 = vrot.lane.b32.xlu0 %v1703_v4, %s10226_s28 }
0x22eb   : > { %v1706_v45 = vpop.permute.xlu0 %1705 }
0x22ec   : > { %v10684_v47 = vadd.f32 %v1706_v45, %v1698_v38 }
0x22ee   : > { %9910 = vtanh.f32 %v10684_v47 }
0x22f8   : > { %v9911_v35 = vpop.eup %9910 }
0x22f9   : > { %1711 = vrot.lane.b32.xlu1 %v9911_v35, %s10228_s5 }
0x22fd   : > { %1719 = vrot.lane.b32.xlu1 %v10477_v29, %s10225_s27 }
0x236b   : > { %v1712_v52 = vpop.permute.xlu1 %1711 }
0x236c   : > { %v10690_v53 = vmul.f32 %v1712_v52, %v1697_v41 }
0x236e   : > { %1716 = vrot.lane.b32.xlu0 %v10690_v53, %s10229_s6 }
0x236f   : > { %v1720_v55 = vpop.permute.xlu1 %1719 }
0x23e0   : > { %v1717_v46 = vpop.permute.xlu0 %1716 }
0x23e1   : > { %v1722_v59 = vsel %vm300_vm1, %v1717_v46, %v1720_v55 }
0x23e2   : > { %9138 = vmatmul.mubr.msk.f32.vlgmr.msra.gmra.mrb[28].mxu1 %vm404_vm2, %v1722_v59 }
0x23e3   : > { %9670 = vmatpush3.bf16.msra.mxu1 %v10472_v25  ;;  %9144 = vmatprep.mubr.msk.f32.mxu1 %vm10224_vm0, %v10223_v5 }
0x23e4   : > { %9674 = vmatprep.subr.bf16.mxu1 %v10227_v49 }
0x24b5   : > { %v1792_v29 = vpop.f32.mrb[28].mxu1 }
0x24b6   : > { %v1793_v12 = vadd.f32 %v1792_v29, %v10458_v7  ;;  %v9139_v61 = vpop.f32.mrb[29].mxu1 }
0x24b8   : > { %9912 = vtanh.f32 %v1793_v12 }
0x24c2   : > { %v9913_v6 = vpop.eup %9912 }
0x24c3   : > { %1801 = vrot.lane.b32.xlu0 %v9913_v6, %s10225_s27  ;;  %v1797_v11 = vmul.f32 0.5, %v9913_v6  ;;  %v185_v6 = vld [vmem:[%s10282_s26 + $0x10] sm:$0xff] }
0x24c4   : > { %9030 = vmatprep.mubr.f32.mxu0 %v185_v6 }
0x24c5   : > { %v1798_v18 = vadd.f32 0.5, %v1797_v11  ;;  %v186_v11 = vld [vmem:[%s10282_s26 + $0x18] sm:$0xff] }
0x24c6   : > { %9031 = vmatmul.mubr.f32.gmra.mrb[2].mxu0 %v186_v11 }
0x24c7   : > { %v1799_v1 = vmul.f32 %v1798_v18, %v10463_v22 }
0x2535   : > { %v1802_v10 = vpop.permute.xlu0 %1801 }
0x2536   : > { %v1804_v27 = vmul.f32 %v1802_v10, %v1798_v18  ;;  %v188_v10 = vld [vmem:[%s10282_s26 + $0x28] sm:$0xff] }
0x2538   : > { %1806 = vrot.lane.b32.xlu1 %v1804_v27, %s10226_s28  ;;  %v189_v27 = vld [vmem:[%s10282_s26 + $0x30] sm:$0xff] }
0x25aa   : > { %v1807_v19 = vpop.permute.xlu1 %1806 }
0x25ab   : > { %v10704_v21 = vadd.f32 %v1807_v19, %v1799_v1  ;;  %v190_v1 = vld [vmem:[%s10282_s26 + $0x38] sm:$0xff] }
0x25ad   : > { %9914 = vtanh.f32 %v10704_v21 }
0x25b7   : > { %v9915_v36 = vpop.eup %9914 }
0x25b8   : > { %1812 = vrot.lane.b32.xlu0 %v9915_v36, %s10228_s5 }
0x25bc   : > { %1820 = vrot.lane.b32.xlu0 %v10508_v3, %s10225_s27 }
0x262a   : > { %v1813_v54 = vpop.permute.xlu0 %1812 }
0x262b   : > { %v10710_v41 = vmul.f32 %v1813_v54, %v1798_v18  ;;  %v187_v18 = vld [vmem:[%s10282_s26 + $0x20] sm:$0xff]  ;;  %v10742_v54 = vpop.f32.mrb[2].mxu0 }
0x262c   : > { %9033 = vmatprep.mubr.f32.mxu0 %v187_v18 }
0x262d   : > { %1817 = vrot.lane.b32.xlu1 %v10710_v41, %s10229_s6  ;;  %9034 = vmatmul.mubr.f32.gmra.mrb[4].mxu0 %v188_v10 }
0x262e   : > { %v1821_v43 = vpop.permute.xlu0 %1820  ;;  %9036 = vmatprep.mubr.f32.mxu0 %v189_v27 }
0x2631   : > { %9037 = vmatmul.mubr.f32.gmra.mrb[6].mxu0 %v190_v1 }
0x2632   : > { %9151 = vmatprep.mubr.msk.f32.mxu0 %vm10224_vm0, %v10223_v5 }
0x269f   : > { %v1818_v4 = vpop.permute.xlu1 %1817 }
0x26a0   : > { %v1823_v22 = vsel %vm300_vm1, %v1818_v4, %v1821_v43  ;;  %v10744_v43 = vpop.f32.mrb[3].mxu0 }
0x26a1   : > { %9145 = vmatmul.mubr.msk.f32.vlgmr.msra.gmra.mrb[30].mxu1 %vm404_vm2, %v1823_v22 }
0x26a2   : > { %9676 = vmatpush3.bf16.msra.mxu1 %v10532_v39  ;;  %9158 = vmatprep.mubr.msk.f32.mxu1 %vm10224_vm0, %v10223_v5 }
0x26a3   : > { %9680 = vmatprep.subr.bf16.mxu1 %v10227_v49 }
0x2700   : > { %v10746_v4 = vpop.f32.mrb[4].mxu0 }
0x2701   : > { %v10748_v22 = vpop.f32.mrb[5].mxu0 }
0x2774   : > { %v1893_v3 = vpop.f32.mrb[30].mxu1 }
0x2775   : > { %v1894_v38 = vadd.f32 %v1893_v3, %v10487_v40  ;;  %v9146_v45 = vpop.f32.mrb[31].mxu1  ;;  %v10750_v3 = vpop.f32.mrb[6].mxu0 }
0x2777   : > { %9916 = vtanh.f32 %v1894_v38  ;;  %v10752_v38 = vpop.f32.mrb[7].mxu0 }
0x2781   : > { %v9917_v35 = vpop.eup %9916 }
0x2782   : > { %1902 = vrot.lane.b32.xlu1 %v9917_v35, %s10225_s27  ;;  %v1898_v52 = vmul.f32 0.5, %v9917_v35 }
0x2784   : > { %v1899_v55 = vadd.f32 0.5, %v1898_v52 }
0x2786   : > { %v1900_v29 = vmul.f32 %v1899_v55, %v10492_v58 }
0x27f4   : > { %v1903_v46 = vpop.permute.xlu1 %1902 }
0x27f5   : > { %v1905_v59 = vmul.f32 %v1903_v46, %v1899_v55 }
0x27f7   : > { %1907 = vrot.lane.b32.xlu0 %v1905_v59, %s10226_s28 }
0x2869   : > { %v1908_v12 = vpop.permute.xlu0 %1907 }
0x286a   : > { %v10724_v61 = vadd.f32 %v1908_v12, %v1900_v29 }
0x286c   : > { %9918 = vtanh.f32 %v10724_v61 }
0x2876   : > { %v9919_v19 = vpop.eup %9918 }
0x2877   : > { %1913 = vrot.lane.b32.xlu1 %v9919_v19, %s10228_s5 }
0x287b   : > { %1921 = vrot.lane.b32.xlu1 %v10537_v44, %s10225_s27 }
0x28e9   : > { %v1914_v58 = vpop.permute.xlu1 %1913 }
0x28ea   : > { %v10738_v36 = vmul.f32 %v1914_v58, %v1899_v55 }
0x28ec   : > { %1918 = vrot.lane.b32.xlu0 %v10738_v36, %s10229_s6 }
0x28ed   : > { %v1922_v45 = vpop.permute.xlu1 %1921 }
0x295e   : > { %v1919_v44 = vpop.permute.xlu0 %1918 }
0x295f   : > { %v1924_v35 = vsel %vm300_vm1, %v1919_v44, %v1922_v45 }
0x2960   : > { %9152 = vmatmul.mubr.msk.f32.vlgmr.msra.gmra.mrb[8].mxu0 %vm404_vm2, %v1924_v35 }
0x2961   : > { %9679 = vmatpush3.bf16.msra.mxu0 %v10561_v17  ;;  %9165 = vmatprep.mubr.msk.f32.mxu0 %vm10224_vm0, %v10223_v5 }
0x2962   : > { %9175 = vmatprep.subr.mxu0 %v10223_v5 }
0x2a33   : > { %v1994_v52 = vpop.f32.mrb[8].mxu0 }
0x2a34   : > { %v1995_v55 = vadd.f32 %v1994_v52, %v10518_v13  ;;  %v9153_v46 = vpop.f32.mrb[9].mxu0 }
0x2a36   : > { %9920 = vtanh.f32 %v1995_v55 }
0x2a40   : > { %v9921_v59 = vpop.eup %9920 }
0x2a41   : > { %2003 = vrot.lane.b32.xlu0 %v9921_v59, %s10225_s27  ;;  %v1999_v29 = vmul.f32 0.5, %v9921_v59 }
0x2a43   : > { %v2000_v12 = vadd.f32 0.5, %v1999_v29 }
0x2a45   : > { %v2001_v18 = vmul.f32 %v2000_v12, %v10523_v28 }
0x2ab3   : > { %v2004_v6 = vpop.permute.xlu0 %2003 }
0x2ab4   : > { %v2006_v11 = vmul.f32 %v2004_v6, %v2000_v12 }
0x2ab6   : > { %2008 = vrot.lane.b32.xlu1 %v2006_v11, %s10226_s28 }
0x2b28   : > { %v2009_v10 = vpop.permute.xlu1 %2008 }
0x2b29   : > { %v10764_v27 = vadd.f32 %v2009_v10, %v2001_v18 }
0x2b2b   : > { %9922 = vtanh.f32 %v10764_v27 }
0x2b35   : > { %v9923_v1 = vpop.eup %9922 }
0x2b36   : > { %2014 = vrot.lane.b32.xlu0 %v9923_v1, %s10228_s5  ;;  %v10793_v1 = vrot.slane %v10577_v24, %v402_v56  ;;  %v10807_v56 = vld [vmem:[%s12047_s1 + $0x80] sm:$0xff] }
0x2b3a   : > { %2022 = vrot.lane.b32.xlu0 %v10566_v20, %s10225_s27 }
0x2ba8   : > { %v2015_v19 = vpop.permute.xlu0 %2014 }
0x2ba9   : > { %v10770_v58 = vmul.f32 %v2015_v19, %v2000_v12  ;;  %v1291_v19 = vadd.f32 %v10617_v15, %v10793_v1 }
0x2bab   : > { %2019 = vrot.lane.b32.xlu1 %v10770_v58, %s10229_s6 }
0x2bac   : > { %v2023_v45 = vpop.permute.xlu0 %2022 }
0x2c1d   : > { %v2020_v44 = vpop.permute.xlu1 %2019 }
0x2c1e   : > { %v2025_v28 = vsel %vm300_vm1, %v2020_v44, %v2023_v45 }
0x2c1f   : > { %9159 = vmatmul.mubr.msk.f32.vlgmr.msra.gmra.mrb[32].mxu1 %vm404_vm2, %v2025_v28 }
0x2c20   : > { %9682 = vmatpush3.bf16.msra.mxu1 %v10596_v0  ;;  %9172 = vmatprep.mubr.msk.f32.mxu1 %vm10224_vm0, %v10223_v5 }
0x2c21   : > { %9683 = vmatprep.subr.bf16.mxu1 %v10227_v49 }
0x2cf2   : > { %v2095_v20 = vpop.f32.mrb[32].mxu1 }
0x2cf3   : > { %v2096_v35 = vadd.f32 %v2095_v20, %v10547_v51  ;;  %v9160_v52 = vpop.f32.mrb[33].mxu1 }
0x2cf5   : > { %9924 = vtanh.f32 %v2096_v35  ;;  %v272_v35 = vadd.f32 %v10744_v43, %v10336_v34 }
0x2cff   : > { %v9925_v55 = vpop.eup %9924 }
0x2d00   : > { %2104 = vrot.lane.b32.xlu1 %v9925_v55, %s10225_s27  ;;  %v2100_v46 = vmul.f32 0.5, %v9925_v55 }
0x2d02   : > { %v2101_v59 = vadd.f32 0.5, %v2100_v46 }
0x2d04   : > { %v2102_v6 = vmul.f32 %v2101_v59, %v10552_v14 }
0x2d72   : > { %v2105_v29 = vpop.permute.xlu1 %2104 }
0x2d73   : > { %v2107_v12 = vmul.f32 %v2105_v29, %v2101_v59 }
0x2d75   : > { %2109 = vrot.lane.b32.xlu0 %v2107_v12, %s10226_s28 }
0x2de7   : > { %v2110_v11 = vpop.permute.xlu0 %2109 }
0x2de8   : > { %v10784_v18 = vadd.f32 %v2110_v11, %v2102_v6 }
0x2dea   : > { %9926 = vtanh.f32 %v10784_v18 }
0x2deb   : > { %9928 = vtanh.f32 %v1291_v19 }
0x2df4   : > { %v9927_v10 = vpop.eup %9926 }
0x2df5   : > { %2115 = vrot.lane.b32.xlu1 %v9927_v10, %s10228_s5  ;;  %v9929_v44 = vpop.eup %9928 }
0x2df9   : > { %2123 = vrot.lane.b32.xlu1 %v10601_v9, %s10225_s27 }
0x2e67   : > { %v2116_v14 = vpop.permute.xlu1 %2115 }
0x2e68   : > { %v10797_v45 = vmul.f32 %v2116_v14, %v2101_v59 }
0x2e6a   : > { %2120 = vrot.lane.b32.xlu0 %v10797_v45, %s10229_s6 }
0x2e6b   : > { %v2124_v28 = vpop.permute.xlu1 %2123 }
0x2e6e   : > { %1299 = vrot.lane.b32.xlu0 %v9929_v44, %s10225_s27 }
0x2edc   : > { %v2121_v9 = vpop.permute.xlu0 %2120 }
0x2edd   : > { %v2126_v31 = vsel %vm300_vm1, %v2121_v9, %v2124_v28 }
0x2ede   : > { %9166 = vmatmul.mubr.msk.f32.vlgmr.msra.gmra.mrb[10].mxu0 %vm404_vm2, %v2126_v31 }
0x2edf   : > { %9176 = vmatpush3.msra.mxu0 %v10807_v56  ;;  %9177 = vmatprep.mubr.msk.f32.mxu0 %vm10224_vm0, %v10223_v5 }
0x2ee0   : > { %9686 = vmatprep.subr.bf16.mxu0 %v10227_v49  ;;  %v1300_v29 = vpop.permute.xlu0 %1299 }
0x2ee2   : > { %9178 = vmatmul.mubr.msk.f32.vlgmr.msra.gmra.mrb[12].mxu0 %vm300_vm1, %v10631_v32  ;;  %v1295_v32 = vmul.f32 0.5, %v9929_v44 }
0x2ee3   : > { %9688 = vmatpush3.bf16.msra.mxu0 %v10385_v8  ;;  %9191 = vmatprep.mubr.msk.f32.mxu0 %vm10224_vm0, %v10223_v5 }
0x2ee4   : > { %9692 = vmatprep.subr.bf16.mxu0 %v10227_v49  ;;  %v1296_v12 = vadd.f32 0.5, %v1295_v32 }
0x2ee6   : > { %v1302_v6 = vmul.f32 %v1300_v29, %v1296_v12  ;;  %v1297_v9 = vmul.f32 0.0, %v1296_v12 }
0x2fb1   : > { %v2196_v24 = vpop.f32.mrb[10].mxu0 }
0x2fb2   : > { %v2197_v15 = vadd.f32 %v2196_v24, %v10582_v26  ;;  %v9167_v20 = vpop.f32.mrb[11].mxu0 }
0x2fb4   : > { %9930 = vtanh.f32 %v2197_v15 }
0x2fb5   : > { %v2394_v52 = vpop.f32.mrb[12].mxu0 }
0x2fb6   : > { %v2398_v55 = vadd.f32 %v2394_v52, %v272_v35  ;;  %v9179_v46 = vpop.f32.mrb[13].mxu0 }
0x2fb8   : > { %9932 = vtanh.f32 %v2398_v55 }
0x2fbe   : > { %v9931_v59 = vpop.eup %9930 }
0x2fbf   : > { %2205 = vrot.lane.b32.xlu1 %v9931_v59, %s10225_s27  ;;  %v2201_v10 = vmul.f32 0.5, %v9931_v59 }
0x2fc1   : > { %v2202_v19 = vadd.f32 0.5, %v2201_v10 }
0x2fc2   : > { %v9933_v11 = vpop.eup %9932 }
0x2fc3   : > { %1304 = vrot.lane.b32.xlu1 %v1302_v6, %s10226_s28  ;;  %2404 = vrot.lane.b32.xlu0 %v9933_v11, %s10225_s27  ;;  %v2400_v43 = vmul.f32 0.5, %v9933_v11  ;;  %v2203_v52 = vmul.f32 %v2202_v19, %v10587_v60 }
0x2fc5   : > { %v2401_v44 = vadd.f32 0.5, %v2400_v43 }
0x2fc7   : > { %v2402_v32 = vmul.f32 %v2401_v44, %v10624_v48 }
0x3031   : > { %v2206_v14 = vpop.permute.xlu1 %2205 }
0x3032   : > { %v2208_v28 = vmul.f32 %v2206_v14, %v2202_v19 }
0x3034   : > { %2210 = vrot.lane.b32.xlu0 %v2208_v28, %s10226_s28 }
0x3035   : > { %v1305_v31 = vpop.permute.xlu1 %1304  ;;  %v2405_v24 = vpop.permute.xlu0 %2404 }
0x3036   : > { %v10826_v15 = vadd.f32 %v1305_v31, %v1297_v9  ;;  %v2407_v20 = vmul.f32 %v2405_v24, %v2401_v44 }
0x3038   : > { %9934 = vtanh.f32 %v10826_v15  ;;  %2409 = vrot.lane.b32.xlu1 %v2407_v20, %s10226_s28 }
0x3042   : > { %v9935_v35 = vpop.eup %9934 }
0x3043   : > { %1310 = vrot.lane.b32.xlu0 %v9935_v35, %s10228_s5 }
0x30a6   : > { %v2211_v55 = vpop.permute.xlu0 %2210 }
0x30a7   : > { %v10832_v46 = vadd.f32 %v2211_v55, %v2203_v52 }
0x30a9   : > { %9936 = vtanh.f32 %v10832_v46 }
0x30aa   : > { %v2410_v59 = vpop.permute.xlu1 %2409 }
0x30ab   : > { %v10836_v29 = vadd.f32 %v2410_v59, %v2402_v32 }
0x30ad   : > { %9938 = vtanh.f32 %v10836_v29 }
0x30b3   : > { %v9937_v6 = vpop.eup %9936 }
0x30b4   : > { %2216 = vrot.lane.b32.xlu1 %v9937_v6, %s10228_s5 }
0x30b5   : > { %v1311_v10 = vpop.permute.xlu0 %1310 }
0x30b6   : > { %v10841_v60 = vmul.f32 %v1311_v10, %v1296_v12 }
0x30b7   : > { %v9939_v11 = vpop.eup %9938 }
0x30b8   : > { %2415 = vrot.lane.b32.xlu0 %v9939_v11, %s10228_s5 }
0x30bc   : > { %2224 = vrot.lane.b32.xlu0 %v10841_v60, %s10225_s27 }
0x30c0   : > { %2423 = vrot.lane.b32.xlu0 %v10650_v37, %s10225_s27 }
0x3126   : > { %v2217_v48 = vpop.permute.xlu1 %2216 }
0x3127   : > { %v10847_v43 = vmul.f32 %v2217_v48, %v2202_v19 }
0x3129   : > { %2221 = vrot.lane.b32.xlu1 %v10847_v43, %s10229_s6 }
0x312a   : > { %v2416_v14 = vpop.permute.xlu0 %2415 }
0x312b   : > { %v2418_v28 = vmul.f32 %v2416_v14, %v2401_v44 }
0x312d   : > { %2420 = vrot.lane.b32.xlu1 %v2418_v28, %s10229_s6 }
0x312e   : > { %v2225_v9 = vpop.permute.xlu0 %2224 }
0x3132   : > { %v2424_v37 = vpop.permute.xlu0 %2423 }
0x319b   : > { %v2222_v31 = vpop.permute.xlu1 %2221 }
0x319c   : > { %v2227_v12 = vsel %vm300_vm1, %v2222_v31, %v2225_v9 }
0x319d   : > { %9173 = vmatmul.mubr.msk.f32.vlgmr.msra.gmra.mrb[34].mxu1 %vm404_vm2, %v2227_v12 }
0x319e   : > { %9685 = vmatpush3.bf16.msra.mxu1 %v10353_v50  ;;  %9184 = vmatprep.mubr.msk.f32.mxu1 %vm10224_vm0, %v10223_v5 }
0x319f   : > { %v10857_v19 = vpop.permute.xlu1 %2420  ;;  %9689 = vmatprep.subr.bf16.mxu1 %v10227_v49 }
0x31a0   : > { %v2426_v44 = vsel %vm300_vm1, %v10857_v19, %v2424_v37 }
0x31a1   : > { %9185 = vmatmul.mubr.msk.f32.vlgmr.msra.gmra.mrb[36].mxu1 %vm404_vm2, %v2426_v44 }
0x31a2   : > { %9691 = vmatpush3.bf16.msra.mxu1 %v10414_v30  ;;  %9198 = vmatprep.mubr.msk.f32.mxu1 %vm10224_vm0, %v10223_v5 }
0x31a3   : > { %9695 = vmatprep.subr.bf16.mxu1 %v10227_v49 }
0x3270   : > { %v10867_v24 = vpop.f32.mrb[34].mxu1 }
0x3271   : > { %v9174_v20 = vpop.f32.mrb[35].mxu1 }
0x3274   : > { %v2496_v35 = vpop.f32.mrb[36].mxu1 }
0x3275   : > { %v2497_v52 = vadd.f32 %v2496_v35, %v10371_v57  ;;  %v9186_v55 = vpop.f32.mrb[37].mxu1 }
0x3277   : > { %9940 = vtanh.f32 %v2497_v52 }
0x3281   : > { %v9941_v32 = vpop.eup %9940 }
0x3282   : > { %2505 = vrot.lane.b32.xlu1 %v9941_v32, %s10225_s27  ;;  %v2501_v59 = vmul.f32 0.5, %v9941_v32 }
0x3284   : > { %v2502_v6 = vadd.f32 0.5, %v2501_v59 }
0x3286   : > { %v2503_v48 = vmul.f32 %v2502_v6, %v10644_v23 }
0x32f4   : > { %v2506_v11 = vpop.permute.xlu1 %2505 }
0x32f5   : > { %v2508_v10 = vmul.f32 %v2506_v11, %v2502_v6 }
0x32f7   : > { %2510 = vrot.lane.b32.xlu0 %v2508_v10, %s10226_s28 }
0x3369   : > { %v2511_v14 = vpop.permute.xlu0 %2510 }
0x336a   : > { %v10873_v28 = vadd.f32 %v2511_v14, %v2503_v48 }
0x336c   : > { %9942 = vtanh.f32 %v10873_v28 }
0x3376   : > { %v9943_v9 = vpop.eup %9942 }
0x3377   : > { %2516 = vrot.lane.b32.xlu1 %v9943_v9, %s10228_s5 }
0x337b   : > { %2524 = vrot.lane.b32.xlu1 %v10670_v33, %s10225_s27 }
0x33e9   : > { %v2517_v31 = vpop.permute.xlu1 %2516 }
0x33ea   : > { %v10879_v12 = vmul.f32 %v2517_v31, %v2502_v6 }
0x33ec   : > { %2521 = vrot.lane.b32.xlu0 %v10879_v12, %s10229_s6 }
0x33ed   : > { %v2525_v37 = vpop.permute.xlu1 %2524 }
0x345e   : > { %v2522_v44 = vpop.permute.xlu0 %2521 }
0x345f   : > { %v2527_v23 = vsel %vm300_vm1, %v2522_v44, %v2525_v37 }
0x3460   : > { %9192 = vmatmul.mubr.msk.f32.vlgmr.msra.gmra.mrb[14].mxu0 %vm404_vm2, %v2527_v23 }
0x3461   : > { %9694 = vmatpush3.bf16.msra.mxu0 %v10443_v62  ;;  %9205 = vmatprep.mubr.msk.f32.mxu0 %vm10224_vm0, %v10223_v5 }
0x3462   : > { %9698 = vmatprep.subr.bf16.mxu0 %v10227_v49 }
0x3533   : > { %v2597_v33 = vpop.f32.mrb[14].mxu0 }
0x3534   : > { %v2598_v20 = vadd.f32 %v2597_v33, %v10400_v16  ;;  %v9193_v35 = vpop.f32.mrb[15].mxu0 }
0x3536   : > { %9944 = vtanh.f32 %v2598_v20 }
0x3540   : > { %v9945_v52 = vpop.eup %9944 }
0x3541   : > { %2606 = vrot.lane.b32.xlu0 %v9945_v52, %s10225_s27  ;;  %v2602_v55 = vmul.f32 0.5, %v9945_v52 }
0x3543   : > { %v2603_v32 = vadd.f32 0.5, %v2602_v55 }
0x3545   : > { %v2604_v11 = vmul.f32 %v2603_v32, %v10664_v2 }
0x35b3   : > { %v2607_v59 = vpop.permute.xlu0 %2606 }
0x35b4   : > { %v2609_v6 = vmul.f32 %v2607_v59, %v2603_v32 }
0x35b6   : > { %2611 = vrot.lane.b32.xlu1 %v2609_v6, %s10226_s28 }
0x3628   : > { %v2612_v10 = vpop.permute.xlu1 %2611 }
0x3629   : > { %v10893_v48 = vadd.f32 %v2612_v10, %v2604_v11 }
0x362b   : > { %9946 = vtanh.f32 %v10893_v48 }
0x3635   : > { %v9947_v14 = vpop.eup %9946 }
0x3636   : > { %2617 = vrot.lane.b32.xlu0 %v9947_v14, %s10228_s5 }
0x363a   : > { %2625 = vrot.lane.b32.xlu0 %v10690_v53, %s10225_s27 }
0x36a8   : > { %v2618_v9 = vpop.permute.xlu0 %2617 }
0x36a9   : > { %v10899_v31 = vmul.f32 %v2618_v9, %v2603_v32 }
0x36ab   : > { %2622 = vrot.lane.b32.xlu1 %v10899_v31, %s10229_s6 }
0x36ac   : > { %v2626_v37 = vpop.permute.xlu0 %2625 }
0x371d   : > { %v2623_v44 = vpop.permute.xlu1 %2622 }
0x371e   : > { %v2628_v2 = vsel %vm300_vm1, %v2623_v44, %v2626_v37 }
0x371f   : > { %9199 = vmatmul.mubr.msk.f32.vlgmr.msra.gmra.mrb[38].mxu1 %vm404_vm2, %v2628_v2 }
0x3720   : > { %9697 = vmatpush3.bf16.msra.mxu1 %v10472_v25  ;;  %9212 = vmatprep.mubr.msk.f32.mxu1 %vm10224_vm0, %v10223_v5 }
0x3721   : > { %9701 = vmatprep.subr.bf16.mxu1 %v10227_v49 }
0x37f2   : > { %v2698_v53 = vpop.f32.mrb[38].mxu1 }
0x37f3   : > { %v2699_v23 = vadd.f32 %v2698_v53, %v10429_v42  ;;  %v9200_v33 = vpop.f32.mrb[39].mxu1 }
0x37f5   : > { %9948 = vtanh.f32 %v2699_v23 }
0x37ff   : > { %v9949_v20 = vpop.eup %9948 }
0x3800   : > { %2707 = vrot.lane.b32.xlu1 %v9949_v20, %s10225_s27  ;;  %v2703_v35 = vmul.f32 0.5, %v9949_v20 }
0x3802   : > { %v2704_v52 = vadd.f32 0.5, %v2703_v35 }
0x3804   : > { %v2705_v59 = vmul.f32 %v2704_v52, %v10684_v47 }
0x3872   : > { %v2708_v55 = vpop.permute.xlu1 %2707 }
0x3873   : > { %v2710_v32 = vmul.f32 %v2708_v55, %v2704_v52 }
0x3875   : > { %2712 = vrot.lane.b32.xlu0 %v2710_v32, %s10226_s28 }
0x38e7   : > { %v2713_v6 = vpop.permute.xlu0 %2712 }
0x38e8   : > { %v10913_v11 = vadd.f32 %v2713_v6, %v2705_v59 }
0x38ea   : > { %9950 = vtanh.f32 %v10913_v11 }
0x38f4   : > { %v9951_v10 = vpop.eup %9950 }
0x38f5   : > { %2718 = vrot.lane.b32.xlu1 %v9951_v10, %s10228_s5 }
0x38f9   : > { %2726 = vrot.lane.b32.xlu1 %v10710_v41, %s10225_s27 }
0x3967   : > { %v2719_v14 = vpop.permute.xlu1 %2718 }
0x3968   : > { %v10919_v9 = vmul.f32 %v2719_v14, %v2704_v52 }
0x396a   : > { %2723 = vrot.lane.b32.xlu0 %v10919_v9, %s10229_s6 }
0x396b   : > { %v2727_v37 = vpop.permute.xlu1 %2726 }
0x39dc   : > { %v2724_v44 = vpop.permute.xlu0 %2723 }
0x39dd   : > { %v2729_v47 = vsel %vm300_vm1, %v2724_v44, %v2727_v37 }
0x39de   : > { %9206 = vmatmul.mubr.msk.f32.vlgmr.msra.gmra.mrb[16].mxu0 %vm404_vm2, %v2729_v47 }
0x39df   : > { %9700 = vmatpush3.bf16.msra.mxu0 %v10501_v63  ;;  %9219 = vmatprep.mubr.msk.f32.mxu0 %vm10224_vm0, %v10223_v5 }
0x39e0   : > { %9704 = vmatprep.subr.bf16.mxu0 %v10227_v49 }
0x3ab1   : > { %v2799_v41 = vpop.f32.mrb[16].mxu0 }
0x3ab2   : > { %v2800_v2 = vadd.f32 %v2799_v41, %v10458_v7  ;;  %v9207_v53 = vpop.f32.mrb[17].mxu0 }
0x3ab4   : > { %9952 = vtanh.f32 %v2800_v2 }
0x3abe   : > { %v9953_v23 = vpop.eup %9952 }
0x3abf   : > { %2808 = vrot.lane.b32.xlu0 %v9953_v23, %s10225_s27  ;;  %v2804_v33 = vmul.f32 0.5, %v9953_v23 }
0x3ac1   : > { %v2805_v20 = vadd.f32 0.5, %v2804_v33 }
0x3ac3   : > { %v2806_v55 = vmul.f32 %v2805_v20, %v10704_v21 }
0x3b31   : > { %v2809_v35 = vpop.permute.xlu0 %2808 }
0x3b32   : > { %v2811_v52 = vmul.f32 %v2809_v35, %v2805_v20 }
0x3b34   : > { %2813 = vrot.lane.b32.xlu1 %v2811_v52, %s10226_s28 }
0x3ba6   : > { %v2814_v32 = vpop.permute.xlu1 %2813 }
0x3ba7   : > { %v10933_v59 = vadd.f32 %v2814_v32, %v2806_v55 }
0x3ba9   : > { %9954 = vtanh.f32 %v10933_v59 }
0x3bb3   : > { %v9955_v6 = vpop.eup %9954 }
0x3bb4   : > { %2819 = vrot.lane.b32.xlu0 %v9955_v6, %s10228_s5 }
0x3bb8   : > { %2827 = vrot.lane.b32.xlu0 %v10738_v36, %s10225_s27 }
0x3c26   : > { %v2820_v10 = vpop.permute.xlu0 %2819 }
0x3c27   : > { %v10939_v14 = vmul.f32 %v2820_v10, %v2805_v20 }
0x3c29   : > { %2824 = vrot.lane.b32.xlu1 %v10939_v14, %s10229_s6 }
0x3c2a   : > { %v2828_v37 = vpop.permute.xlu0 %2827 }
0x3c9b   : > { %v2825_v44 = vpop.permute.xlu1 %2824 }
0x3c9c   : > { %v2830_v21 = vsel %vm300_vm1, %v2825_v44, %v2828_v37 }
0x3c9d   : > { %9213 = vmatmul.mubr.msk.f32.vlgmr.msra.gmra.mrb[40].mxu1 %vm404_vm2, %v2830_v21 }
0x3c9e   : > { %9703 = vmatpush3.bf16.msra.mxu1 %v10532_v39  ;;  %9226 = vmatprep.mubr.msk.f32.mxu1 %vm10224_vm0, %v10223_v5 }
0x3c9f   : > { %9707 = vmatprep.subr.bf16.mxu1 %v10227_v49 }
0x3d70   : > { %v2900_v36 = vpop.f32.mrb[40].mxu1 }
0x3d71   : > { %v2901_v47 = vadd.f32 %v2900_v36, %v10487_v40  ;;  %v9214_v41 = vpop.f32.mrb[41].mxu1 }
0x3d73   : > { %9956 = vtanh.f32 %v2901_v47 }
0x3d7d   : > { %v9957_v2 = vpop.eup %9956 }
0x3d7e   : > { %2909 = vrot.lane.b32.xlu1 %v9957_v2, %s10225_s27  ;;  %v2905_v53 = vmul.f32 0.5, %v9957_v2 }
0x3d80   : > { %v2906_v23 = vadd.f32 0.5, %v2905_v53 }
0x3d82   : > { %v2907_v35 = vmul.f32 %v2906_v23, %v10724_v61 }
0x3df0   : > { %v2910_v33 = vpop.permute.xlu1 %2909 }
0x3df1   : > { %v2912_v20 = vmul.f32 %v2910_v33, %v2906_v23 }
0x3df3   : > { %2914 = vrot.lane.b32.xlu0 %v2912_v20, %s10226_s28 }
0x3e65   : > { %v2915_v52 = vpop.permute.xlu0 %2914 }
0x3e66   : > { %v10953_v55 = vadd.f32 %v2915_v52, %v2907_v35 }
0x3e68   : > { %9958 = vtanh.f32 %v10953_v55 }
0x3e72   : > { %v9959_v32 = vpop.eup %9958 }
0x3e73   : > { %2920 = vrot.lane.b32.xlu1 %v9959_v32, %s10228_s5 }
0x3e77   : > { %2928 = vrot.lane.b32.xlu1 %v10770_v58, %s10225_s27 }
0x3ee5   : > { %v2921_v6 = vpop.permute.xlu1 %2920 }
0x3ee6   : > { %v10959_v10 = vmul.f32 %v2921_v6, %v2906_v23 }
0x3ee8   : > { %2925 = vrot.lane.b32.xlu0 %v10959_v10, %s10229_s6 }
0x3ee9   : > { %v2929_v37 = vpop.permute.xlu1 %2928 }
0x3f5a   : > { %v2926_v44 = vpop.permute.xlu0 %2925 }
0x3f5b   : > { %v2931_v61 = vsel %vm300_vm1, %v2926_v44, %v2929_v37 }
0x3f5c   : > { %9220 = vmatmul.mubr.msk.f32.vlgmr.msra.gmra.mrb[18].mxu0 %vm404_vm2, %v2931_v61 }
0x3f5d   : > { %9706 = vmatpush3.bf16.msra.mxu0 %v10561_v17  ;;  %9233 = vmatprep.mubr.msk.f32.mxu0 %vm10224_vm0, %v10223_v5 }
0x3f5e   : > { %9243 = vmatprep.subr.mxu0 %v10223_v5 }
0x402f   : > { %v3001_v58 = vpop.f32.mrb[18].mxu0 }
0x4030   : > { %v3002_v21 = vadd.f32 %v3001_v58, %v10518_v13  ;;  %v9221_v36 = vpop.f32.mrb[19].mxu0 }
0x4032   : > { %9960 = vtanh.f32 %v3002_v21 }
0x403c   : > { %v9961_v47 = vpop.eup %9960 }
0x403d   : > { %3010 = vrot.lane.b32.xlu0 %v9961_v47, %s10225_s27  ;;  %v3006_v41 = vmul.f32 0.5, %v9961_v47 }
0x403f   : > { %v3007_v2 = vadd.f32 0.5, %v3006_v41 }
0x4041   : > { %v3008_v33 = vmul.f32 %v3007_v2, %v10764_v27 }
0x40af   : > { %v3011_v53 = vpop.permute.xlu0 %3010 }
0x40b0   : > { %v3013_v23 = vmul.f32 %v3011_v53, %v3007_v2 }
0x40b2   : > { %3015 = vrot.lane.b32.xlu1 %v3013_v23, %s10226_s28 }
0x4124   : > { %v3016_v20 = vpop.permute.xlu1 %3015 }
0x4125   : > { %v10973_v35 = vadd.f32 %v3016_v20, %v3008_v33 }
0x4127   : > { %9962 = vtanh.f32 %v10973_v35 }
0x4131   : > { %v9963_v52 = vpop.eup %9962 }
0x4132   : > { %3021 = vrot.lane.b32.xlu0 %v9963_v52, %s10228_s5  ;;  %v2298_v52 = vadd.f32 %v10867_v24, %v10793_v1 }
0x4136   : > { %3029 = vrot.lane.b32.xlu0 %v10797_v45, %s10225_s27 }
0x41a4   : > { %v3022_v32 = vpop.permute.xlu0 %3021 }
0x41a5   : > { %v10979_v6 = vmul.f32 %v3022_v32, %v3007_v2 }
0x41a7   : > { %3026 = vrot.lane.b32.xlu1 %v10979_v6, %s10229_s6 }
0x41a8   : > { %v3030_v37 = vpop.permute.xlu0 %3029 }
0x4219   : > { %v3027_v44 = vpop.permute.xlu1 %3026 }
0x421a   : > { %v3032_v27 = vsel %vm300_vm1, %v3027_v44, %v3030_v37 }
0x421b   : > { %9227 = vmatmul.mubr.msk.f32.vlgmr.msra.gmra.mrb[42].mxu1 %vm404_vm2, %v3032_v27 }
0x421c   : > { %9709 = vmatpush3.bf16.msra.mxu1 %v10596_v0  ;;  %9240 = vmatprep.mubr.msk.f32.mxu1 %vm10224_vm0, %v10223_v5 }
0x421d   : > { %9710 = vmatprep.subr.bf16.mxu1 %v10227_v49 }
0x42ee   : > { %v3102_v45 = vpop.f32.mrb[42].mxu1 }
0x42ef   : > { %v3103_v61 = vadd.f32 %v3102_v45, %v10547_v51  ;;  %v9228_v58 = vpop.f32.mrb[43].mxu1 }
0x42f1   : > { %9964 = vtanh.f32 %v3103_v61 }
0x42fb   : > { %v9965_v21 = vpop.eup %9964 }
0x42fc   : > { %3111 = vrot.lane.b32.xlu1 %v9965_v21, %s10225_s27  ;;  %v3107_v36 = vmul.f32 0.5, %v9965_v21 }
0x42fe   : > { %v3108_v47 = vadd.f32 0.5, %v3107_v36 }
0x4300   : > { %v3109_v53 = vmul.f32 %v3108_v47, %v10784_v18 }
0x436e   : > { %v3112_v41 = vpop.permute.xlu1 %3111 }
0x436f   : > { %v3114_v2 = vmul.f32 %v3112_v41, %v3108_v47 }
0x4371   : > { %3116 = vrot.lane.b32.xlu0 %v3114_v2, %s10226_s28 }
0x43e3   : > { %v3117_v23 = vpop.permute.xlu0 %3116 }
0x43e4   : > { %v10993_v33 = vadd.f32 %v3117_v23, %v3109_v53 }
0x43e6   : > { %9966 = vtanh.f32 %v10993_v33 }
0x43e7   : > { %9968 = vtanh.f32 %v2298_v52 }
0x43f0   : > { %v9967_v20 = vpop.eup %9966 }
0x43f1   : > { %3122 = vrot.lane.b32.xlu1 %v9967_v20, %s10228_s5  ;;  %v9969_v18 = vpop.eup %9968 }
0x43f5   : > { %3130 = vrot.lane.b32.xlu1 %v10847_v43, %s10225_s27 }
0x4463   : > { %v3123_v32 = vpop.permute.xlu1 %3122 }
0x4464   : > { %v11001_v37 = vmul.f32 %v3123_v32, %v3108_v47 }
0x4466   : > { %3127 = vrot.lane.b32.xlu0 %v11001_v37, %s10229_s6 }
0x4467   : > { %v3131_v44 = vpop.permute.xlu1 %3130 }
0x446a   : > { %2306 = vrot.lane.b32.xlu0 %v9969_v18, %s10225_s27 }
0x44d8   : > { %v3128_v27 = vpop.permute.xlu0 %3127 }
0x44d9   : > { %v3133_v45 = vsel %vm300_vm1, %v3128_v27, %v3131_v44 }
0x44da   : > { %9234 = vmatmul.mubr.msk.f32.vlgmr.msra.gmra.mrb[20].mxu0 %vm404_vm2, %v3133_v45 }
0x44db   : > { %9244 = vmatpush3.msra.mxu0 %v10807_v56  ;;  %9245 = vmatprep.mubr.msk.f32.mxu0 %vm10224_vm0, %v10223_v5  ;;  %v277_v56 = vadd.f32 %v10742_v54, %v10336_v34 }
0x44dc   : > { %9713 = vmatprep.subr.bf16.mxu0 %v10227_v49  ;;  %v2307_v41 = vpop.permute.xlu0 %2306 }
0x44de   : > { %9246 = vmatmul.mubr.msk.f32.vlgmr.msra.gmra.mrb[22].mxu0 %vm300_vm1, %v10857_v19  ;;  %v2302_v19 = vmul.f32 0.5, %v9969_v18 }
0x44df   : > { %9715 = vmatpush3.bf16.msra.mxu0 %v10385_v8  ;;  %9259 = vmatprep.mubr.msk.f32.mxu0 %vm10224_vm0, %v10223_v5 }
0x44e0   : > { %9719 = vmatprep.subr.bf16.mxu0 %v10227_v49  ;;  %v2303_v2 = vadd.f32 0.5, %v2302_v19 }
0x44e2   : > { %v2309_v53 = vmul.f32 %v2307_v41, %v2303_v2  ;;  %v2304_v18 = vmul.f32 %v2303_v2, %v10826_v15 }
0x45ad   : > { %v3203_v43 = vpop.f32.mrb[20].mxu0 }
0x45ae   : > { %v3204_v24 = vadd.f32 %v3203_v43, %v10582_v26  ;;  %v9235_v61 = vpop.f32.mrb[21].mxu0 }
0x45b0   : > { %9970 = vtanh.f32 %v3204_v24 }
0x45b1   : > { %v3401_v58 = vpop.f32.mrb[22].mxu0 }
0x45b2   : > { %v3405_v21 = vadd.f32 %v3401_v58, %v277_v56  ;;  %v9247_v36 = vpop.f32.mrb[23].mxu0 }
0x45b4   : > { %9972 = vtanh.f32 %v3405_v21 }
0x45ba   : > { %v9971_v47 = vpop.eup %9970 }
0x45bb   : > { %3212 = vrot.lane.b32.xlu1 %v9971_v47, %s10225_s27  ;;  %v3208_v20 = vmul.f32 0.5, %v9971_v47 }
0x45bd   : > { %v3209_v52 = vadd.f32 0.5, %v3208_v20 }
0x45be   : > { %v9973_v23 = vpop.eup %9972 }
0x45bf   : > { %2311 = vrot.lane.b32.xlu1 %v2309_v53, %s10226_s28  ;;  %3411 = vrot.lane.b32.xlu0 %v9973_v23, %s10225_s27  ;;  %v3407_v54 = vmul.f32 0.5, %v9973_v23  ;;  %v3210_v58 = vmul.f32 %v3209_v52, %v10832_v46 }
0x45c1   : > { %v3408_v27 = vadd.f32 0.5, %v3407_v54 }
0x45c3   : > { %v3409_v15 = vmul.f32 %v3408_v27, %v10836_v29 }
0x462d   : > { %v3213_v32 = vpop.permute.xlu1 %3212 }
0x462e   : > { %v3215_v44 = vmul.f32 %v3213_v32, %v3209_v52 }
0x4630   : > { %3217 = vrot.lane.b32.xlu0 %v3215_v44, %s10226_s28 }
0x4631   : > { %v2312_v45 = vpop.permute.xlu1 %2311  ;;  %v3412_v43 = vpop.permute.xlu0 %3411 }
0x4632   : > { %v11026_v24 = vadd.f32 %v2312_v45, %v2304_v18  ;;  %v3414_v61 = vmul.f32 %v3412_v43, %v3408_v27 }
0x4634   : > { %9974 = vtanh.f32 %v11026_v24  ;;  %3416 = vrot.lane.b32.xlu1 %v3414_v61, %s10226_s28 }
0x463e   : > { %v9975_v56 = vpop.eup %9974 }
0x463f   : > { %2317 = vrot.lane.b32.xlu0 %v9975_v56, %s10228_s5 }
0x46a2   : > { %v3218_v21 = vpop.permute.xlu0 %3217 }
0x46a3   : > { %v11032_v36 = vadd.f32 %v3218_v21, %v3210_v58 }
0x46a5   : > { %9976 = vtanh.f32 %v11032_v36 }
0x46a6   : > { %v3417_v19 = vpop.permute.xlu1 %3416 }
0x46a7   : > { %v11036_v47 = vadd.f32 %v3417_v19, %v3409_v15 }
0x46a9   : > { %9978 = vtanh.f32 %v11036_v47 }
0x46af   : > { %v9977_v41 = vpop.eup %9976 }
0x46b0   : > { %3223 = vrot.lane.b32.xlu1 %v9977_v41, %s10228_s5 }
0x46b1   : > { %v2318_v23 = vpop.permute.xlu0 %2317 }
0x46b2   : > { %v11041_v46 = vmul.f32 %v2318_v23, %v2303_v2 }
0x46b3   : > { %v9979_v53 = vpop.eup %9978 }
0x46b4   : > { %3422 = vrot.lane.b32.xlu0 %v9979_v53, %s10228_s5 }
0x46b8   : > { %3231 = vrot.lane.b32.xlu0 %v11041_v46, %s10225_s27 }
0x46bc   : > { %3430 = vrot.lane.b32.xlu0 %v10879_v12, %s10225_s27 }
0x4722   : > { %v3224_v29 = vpop.permute.xlu1 %3223 }
0x4723   : > { %v11047_v20 = vmul.f32 %v3224_v29, %v3209_v52 }
0x4725   : > { %3228 = vrot.lane.b32.xlu1 %v11047_v20, %s10229_s6 }
0x4726   : > { %v3423_v54 = vpop.permute.xlu0 %3422 }
0x4727   : > { %v3425_v32 = vmul.f32 %v3423_v54, %v3408_v27 }
0x4729   : > { %3427 = vrot.lane.b32.xlu1 %v3425_v32, %s10229_s6 }
0x472a   : > { %v3232_v44 = vpop.permute.xlu0 %3231 }
0x472e   : > { %v3431_v12 = vpop.permute.xlu0 %3430 }
0x4797   : > { %v3229_v18 = vpop.permute.xlu1 %3228 }
0x4798   : > { %v3234_v2 = vsel %vm300_vm1, %v3229_v18, %v3232_v44 }
0x4799   : > { %9241 = vmatmul.mubr.msk.f32.vlgmr.msra.gmra.mrb[44].mxu1 %vm404_vm2, %v3234_v2 }
0x479a   : > { %9712 = vmatpush3.bf16.msra.mxu1 %v10353_v50  ;;  %9252 = vmatprep.mubr.msk.f32.mxu1 %vm10224_vm0, %v10223_v5 }
0x479b   : > { %v11057_v52 = vpop.permute.xlu1 %3427  ;;  %9716 = vmatprep.subr.bf16.mxu1 %v10227_v49 }
0x479c   : > { %v3433_v27 = vsel %vm300_vm1, %v11057_v52, %v3431_v12 }
0x479d   : > { %9253 = vmatmul.mubr.msk.f32.vlgmr.msra.gmra.mrb[46].mxu1 %vm404_vm2, %v3433_v27 }
0x479e   : > { %9718 = vmatpush3.bf16.msra.mxu1 %v10414_v30  ;;  %9266 = vmatprep.mubr.msk.f32.mxu1 %vm10224_vm0, %v10223_v5 }
0x479f   : > { %9722 = vmatprep.subr.bf16.mxu1 %v10227_v49 }
0x486c   : > { %v11067_v45 = vpop.f32.mrb[44].mxu1 }
0x486d   : > { %v9242_v43 = vpop.f32.mrb[45].mxu1 }
0x4870   : > { %v3503_v61 = vpop.f32.mrb[46].mxu1 }
0x4871   : > { %v3504_v56 = vadd.f32 %v3503_v61, %v10371_v57  ;;  %v9254_v58 = vpop.f32.mrb[47].mxu1 }
0x4873   : > { %9980 = vtanh.f32 %v3504_v56 }
0x487d   : > { %v9981_v21 = vpop.eup %9980 }
0x487e   : > { %3512 = vrot.lane.b32.xlu1 %v9981_v21, %s10225_s27  ;;  %v3508_v15 = vmul.f32 0.5, %v9981_v21 }
0x4880   : > { %v3509_v19 = vadd.f32 0.5, %v3508_v15 }
0x4882   : > { %v3510_v23 = vmul.f32 %v3509_v19, %v10873_v28 }
0x48f0   : > { %v3513_v41 = vpop.permute.xlu1 %3512 }
0x48f1   : > { %v3515_v53 = vmul.f32 %v3513_v41, %v3509_v19 }
0x48f3   : > { %3517 = vrot.lane.b32.xlu0 %v3515_v53, %s10226_s28 }
0x4965   : > { %v3518_v29 = vpop.permute.xlu0 %3517 }
0x4966   : > { %v11073_v54 = vadd.f32 %v3518_v29, %v3510_v23 }
0x4968   : > { %9982 = vtanh.f32 %v11073_v54 }
0x4972   : > { %v9983_v32 = vpop.eup %9982 }
0x4973   : > { %3523 = vrot.lane.b32.xlu1 %v9983_v32, %s10228_s5 }
0x4977   : > { %3531 = vrot.lane.b32.xlu1 %v10899_v31, %s10225_s27 }
0x49e5   : > { %v3524_v44 = vpop.permute.xlu1 %3523 }
0x49e6   : > { %v11079_v18 = vmul.f32 %v3524_v44, %v3509_v19 }
0x49e8   : > { %3528 = vrot.lane.b32.xlu0 %v11079_v18, %s10229_s6 }
0x49e9   : > { %v3532_v2 = vpop.permute.xlu1 %3531 }
0x4a5a   : > { %v3529_v12 = vpop.permute.xlu0 %3528 }
0x4a5b   : > { %v3534_v28 = vsel %vm300_vm1, %v3529_v12, %v3532_v2 }
0x4a5c   : > { %9260 = vmatmul.mubr.msk.f32.vlgmr.msra.gmra.mrb[24].mxu0 %vm404_vm2, %v3534_v28 }
0x4a5d   : > { %9721 = vmatpush3.bf16.msra.mxu0 %v10443_v62  ;;  %9273 = vmatprep.mubr.msk.f32.mxu0 %vm10224_vm0, %v10223_v5 }
0x4a5e   : > { %9725 = vmatprep.subr.bf16.mxu0 %v10227_v49 }
0x4b2f   : > { %v3604_v31 = vpop.f32.mrb[24].mxu0 }
0x4b30   : > { %v3605_v27 = vadd.f32 %v3604_v31, %v10400_v16  ;;  %v9261_v43 = vpop.f32.mrb[25].mxu0 }
0x4b32   : > { %9984 = vtanh.f32 %v3605_v27 }
0x4b3c   : > { %v9985_v61 = vpop.eup %9984 }
0x4b3d   : > { %3613 = vrot.lane.b32.xlu0 %v9985_v61, %s10225_s27  ;;  %v3609_v56 = vmul.f32 0.5, %v9985_v61 }
0x4b3f   : > { %v3610_v58 = vadd.f32 0.5, %v3609_v56 }
0x4b41   : > { %v3611_v19 = vmul.f32 %v3610_v58, %v10893_v48 }
0x4baf   : > { %v3614_v21 = vpop.permute.xlu0 %3613 }
0x4bb0   : > { %v3616_v15 = vmul.f32 %v3614_v21, %v3610_v58 }
0x4bb2   : > { %3618 = vrot.lane.b32.xlu1 %v3616_v15, %s10226_s28 }
0x4c24   : > { %v3619_v41 = vpop.permute.xlu1 %3618 }
0x4c25   : > { %v11093_v53 = vadd.f32 %v3619_v41, %v3611_v19 }
0x4c27   : > { %9986 = vtanh.f32 %v11093_v53 }
0x4c31   : > { %v9987_v23 = vpop.eup %9986 }
0x4c32   : > { %3624 = vrot.lane.b32.xlu0 %v9987_v23, %s10228_s5 }
0x4c36   : > { %3632 = vrot.lane.b32.xlu0 %v10919_v9, %s10225_s27 }
0x4ca4   : > { %v3625_v29 = vpop.permute.xlu0 %3624 }
0x4ca5   : > { %v11099_v32 = vmul.f32 %v3625_v29, %v3610_v58 }
0x4ca7   : > { %3629 = vrot.lane.b32.xlu1 %v11099_v32, %s10229_s6 }
0x4ca8   : > { %v3633_v44 = vpop.permute.xlu0 %3632 }
0x4d19   : > { %v3630_v2 = vpop.permute.xlu1 %3629 }
0x4d1a   : > { %v3635_v48 = vsel %vm300_vm1, %v3630_v2, %v3633_v44 }
0x4d1b   : > { %9267 = vmatmul.mubr.msk.f32.vlgmr.msra.gmra.mrb[48].mxu1 %vm404_vm2, %v3635_v48 }
0x4d1c   : > { %9724 = vmatpush3.bf16.msra.mxu1 %v10472_v25  ;;  %9280 = vmatprep.mubr.msk.f32.mxu1 %vm10224_vm0, %v10223_v5 }
0x4d1d   : > { %9728 = vmatprep.subr.bf16.mxu1 %v10227_v49 }
0x4dee   : > { %v3705_v9 = vpop.f32.mrb[48].mxu1 }
0x4def   : > { %v3706_v12 = vadd.f32 %v3705_v9, %v10429_v42  ;;  %v9268_v28 = vpop.f32.mrb[49].mxu1 }
0x4df1   : > { %9988 = vtanh.f32 %v3706_v12 }
0x4dfb   : > { %v9989_v31 = vpop.eup %9988 }
0x4dfc   : > { %3714 = vrot.lane.b32.xlu1 %v9989_v31, %s10225_s27  ;;  %v3710_v27 = vmul.f32 0.5, %v9989_v31 }
0x4dfe   : > { %v3711_v43 = vadd.f32 0.5, %v3710_v27 }
0x4e00   : > { %v3712_v58 = vmul.f32 %v3711_v43, %v10913_v11 }
0x4e6e   : > { %v3715_v61 = vpop.permute.xlu1 %3714 }
0x4e6f   : > { %v3717_v56 = vmul.f32 %v3715_v61, %v3711_v43 }
0x4e71   : > { %3719 = vrot.lane.b32.xlu0 %v3717_v56, %s10226_s28 }
0x4ee3   : > { %v3720_v21 = vpop.permute.xlu0 %3719 }
0x4ee4   : > { %v11113_v15 = vadd.f32 %v3720_v21, %v3712_v58 }
0x4ee6   : > { %9990 = vtanh.f32 %v11113_v15 }
0x4ef0   : > { %v9991_v19 = vpop.eup %9990 }
0x4ef1   : > { %3725 = vrot.lane.b32.xlu1 %v9991_v19, %s10228_s5 }
0x4ef5   : > { %3733 = vrot.lane.b32.xlu1 %v10939_v14, %s10225_s27 }
0x4f63   : > { %v3726_v41 = vpop.permute.xlu1 %3725 }
0x4f64   : > { %v11119_v23 = vmul.f32 %v3726_v41, %v3711_v43 }
0x4f66   : > { %3730 = vrot.lane.b32.xlu0 %v11119_v23, %s10229_s6 }
0x4f67   : > { %v3734_v29 = vpop.permute.xlu1 %3733 }
0x4fd8   : > { %v3731_v44 = vpop.permute.xlu0 %3730 }
0x4fd9   : > { %v3736_v11 = vsel %vm300_vm1, %v3731_v44, %v3734_v29 }
0x4fda   : > { %9274 = vmatmul.mubr.msk.f32.vlgmr.msra.gmra.mrb[26].mxu0 %vm404_vm2, %v3736_v11 }
0x4fdb   : > { %9727 = vmatpush3.bf16.msra.mxu0 %v10501_v63  ;;  %9287 = vmatprep.mubr.msk.f32.mxu0 %vm10224_vm0, %v10223_v5 }
0x4fdc   : > { %9731 = vmatprep.subr.bf16.mxu0 %v10227_v49 }
0x50ad   : > { %v3806_v14 = vpop.f32.mrb[26].mxu0 }
0x50ae   : > { %v3807_v2 = vadd.f32 %v3806_v14, %v10458_v7  ;;  %v9275_v48 = vpop.f32.mrb[27].mxu0 }
0x50b0   : > { %9992 = vtanh.f32 %v3807_v2 }
0x50ba   : > { %v9993_v9 = vpop.eup %9992 }
0x50bb   : > { %3815 = vrot.lane.b32.xlu0 %v9993_v9, %s10225_s27  ;;  %v3811_v12 = vmul.f32 0.5, %v9993_v9 }
0x50bd   : > { %v3812_v28 = vadd.f32 0.5, %v3811_v12 }
0x50bf   : > { %v3813_v43 = vmul.f32 %v3812_v28, %v10933_v59 }
0x512d   : > { %v3816_v31 = vpop.permute.xlu0 %3815 }
0x512e   : > { %v3818_v27 = vmul.f32 %v3816_v31, %v3812_v28 }
0x5130   : > { %3820 = vrot.lane.b32.xlu1 %v3818_v27, %s10226_s28 }
0x51a2   : > { %v3821_v61 = vpop.permute.xlu1 %3820 }
0x51a3   : > { %v11133_v56 = vadd.f32 %v3821_v61, %v3813_v43 }
0x51a5   : > { %9994 = vtanh.f32 %v11133_v56 }
0x51af   : > { %v9995_v58 = vpop.eup %9994 }
0x51b0   : > { %3826 = vrot.lane.b32.xlu0 %v9995_v58, %s10228_s5 }
0x51b4   : > { %3834 = vrot.lane.b32.xlu0 %v10959_v10, %s10225_s27 }
0x5222   : > { %v3827_v21 = vpop.permute.xlu0 %3826 }
0x5223   : > { %v11139_v19 = vmul.f32 %v3827_v21, %v3812_v28 }
0x5225   : > { %3831 = vrot.lane.b32.xlu1 %v11139_v19, %s10229_s6 }
0x5226   : > { %v3835_v41 = vpop.permute.xlu0 %3834 }
0x5297   : > { %v3832_v29 = vpop.permute.xlu1 %3831 }
0x5298   : > { %v3837_v59 = vsel %vm300_vm1, %v3832_v29, %v3835_v41 }
0x5299   : > { %9281 = vmatmul.mubr.msk.f32.vlgmr.msra.gmra.mrb[50].mxu1 %vm404_vm2, %v3837_v59 }
0x529a   : > { %9730 = vmatpush3.bf16.msra.mxu1 %v10532_v39  ;;  %9294 = vmatprep.mubr.msk.f32.mxu1 %vm10224_vm0, %v10223_v5 }
0x529b   : > { %9734 = vmatprep.subr.bf16.mxu1 %v10227_v49 }
0x536c   : > { %v3907_v10 = vpop.f32.mrb[50].mxu1 }
0x536d   : > { %v3908_v44 = vadd.f32 %v3907_v10, %v10487_v40  ;;  %v9282_v11 = vpop.f32.mrb[51].mxu1 }
0x536f   : > { %9996 = vtanh.f32 %v3908_v44 }
0x5379   : > { %v9997_v14 = vpop.eup %9996 }
0x537a   : > { %3916 = vrot.lane.b32.xlu1 %v9997_v14, %s10225_s27  ;;  %v3912_v2 = vmul.f32 0.5, %v9997_v14 }
0x537c   : > { %v3913_v48 = vadd.f32 0.5, %v3912_v2 }
0x537e   : > { %v3914_v28 = vmul.f32 %v3913_v48, %v10953_v55 }
0x53ec   : > { %v3917_v9 = vpop.permute.xlu1 %3916 }
0x53ed   : > { %v3919_v12 = vmul.f32 %v3917_v9, %v3913_v48 }
0x53ef   : > { %3921 = vrot.lane.b32.xlu0 %v3919_v12, %s10226_s28 }
0x5461   : > { %v3922_v31 = vpop.permute.xlu0 %3921 }
0x5462   : > { %v11153_v27 = vadd.f32 %v3922_v31, %v3914_v28 }
0x5464   : > { %9998 = vtanh.f32 %v11153_v27 }
0x546e   : > { %v9999_v43 = vpop.eup %9998 }
0x546f   : > { %3927 = vrot.lane.b32.xlu1 %v9999_v43, %s10228_s5 }
0x5473   : > { %3935 = vrot.lane.b32.xlu1 %v10979_v6, %s10225_s27 }
0x54e1   : > { %v3928_v61 = vpop.permute.xlu1 %3927 }
0x54e2   : > { %v11159_v58 = vmul.f32 %v3928_v61, %v3913_v48 }
0x54e4   : > { %3932 = vrot.lane.b32.xlu0 %v11159_v58, %s10229_s6 }
0x54e5   : > { %v3936_v21 = vpop.permute.xlu1 %3935 }
0x5556   : > { %v3933_v41 = vpop.permute.xlu0 %3932 }
0x5557   : > { %v3938_v55 = vsel %vm300_vm1, %v3933_v41, %v3936_v21 }
0x5558   : > { %9288 = vmatmul.mubr.msk.f32.vlgmr.msra.gmra.mrb[28].mxu0 %vm404_vm2, %v3938_v55 }
0x5559   : > { %9733 = vmatpush3.bf16.msra.mxu0 %v10561_v17  ;;  %9301 = vmatprep.mubr.msk.f32.mxu0 %vm10224_vm0, %v10223_v5 }
0x555a   : > { %9311 = vmatprep.subr.mxu0 %v10223_v5 }
0x562b   : > { %v4008_v6 = vpop.f32.mrb[28].mxu0 }
0x562c   : > { %v4009_v29 = vadd.f32 %v4008_v6, %v10518_v13  ;;  %v9289_v59 = vpop.f32.mrb[29].mxu0 }
0x562e   : > { %10000 = vtanh.f32 %v4009_v29 }
0x5638   : > { %v10001_v10 = vpop.eup %10000 }
0x5639   : > { %4017 = vrot.lane.b32.xlu0 %v10001_v10, %s10225_s27  ;;  %v4013_v44 = vmul.f32 0.5, %v10001_v10 }
0x563b   : > { %v4014_v11 = vadd.f32 0.5, %v4013_v44 }
0x563d   : > { %v4015_v48 = vmul.f32 %v4014_v11, %v10973_v35 }
0x56ab   : > { %v4018_v14 = vpop.permute.xlu0 %4017 }
0x56ac   : > { %v4020_v2 = vmul.f32 %v4018_v14, %v4014_v11 }
0x56ae   : > { %4022 = vrot.lane.b32.xlu1 %v4020_v2, %s10226_s28 }
0x5720   : > { %v4023_v9 = vpop.permute.xlu1 %4022 }
0x5721   : > { %v11173_v12 = vadd.f32 %v4023_v9, %v4015_v48  ;;  %v3305_v9 = vadd.f32 %v11067_v45, %v10793_v1 }
0x5723   : > { %10002 = vtanh.f32 %v11173_v12 }
0x572d   : > { %v10003_v28 = vpop.eup %10002 }
0x572e   : > { %4028 = vrot.lane.b32.xlu0 %v10003_v28, %s10228_s5 }
0x5732   : > { %4036 = vrot.lane.b32.xlu0 %v11001_v37, %s10225_s27 }
0x57a0   : > { %v4029_v31 = vpop.permute.xlu0 %4028 }
0x57a1   : > { %v11179_v43 = vmul.f32 %v4029_v31, %v4014_v11 }
0x57a3   : > { %4033 = vrot.lane.b32.xlu1 %v11179_v43, %s10229_s6 }
0x57a4   : > { %v4037_v61 = vpop.permute.xlu0 %4036 }
0x5815   : > { %v4034_v21 = vpop.permute.xlu1 %4033 }
0x5816   : > { %v4039_v35 = vsel %vm300_vm1, %v4034_v21, %v4037_v61 }
0x5817   : > { %9295 = vmatmul.mubr.msk.f32.vlgmr.msra.gmra.mrb[52].mxu1 %vm404_vm2, %v4039_v35 }
0x5818   : > { %9736 = vmatpush3.bf16.msra.mxu1 %v10596_v0  ;;  %9308 = vmatprep.mubr.msk.f32.mxu1 %vm10224_vm0, %v10223_v5 }
0x5819   : > { %9737 = vmatprep.subr.bf16.mxu1 %v10227_v49 }
0x58ea   : > { %v4109_v37 = vpop.f32.mrb[52].mxu1 }
0x58eb   : > { %v4110_v41 = vadd.f32 %v4109_v37, %v10547_v51  ;;  %v9296_v55 = vpop.f32.mrb[53].mxu1 }
0x58ec   : > { %v282_v55 = vadd.f32 %v10748_v22, %v10336_v34 }
0x58ed   : > { %10004 = vtanh.f32 %v4110_v41 }
0x58f7   : > { %v10005_v6 = vpop.eup %10004 }
0x58f8   : > { %4118 = vrot.lane.b32.xlu1 %v10005_v6, %s10225_s27  ;;  %v4114_v29 = vmul.f32 0.5, %v10005_v6 }
0x58fa   : > { %v4115_v59 = vadd.f32 0.5, %v4114_v29 }
0x58fc   : > { %v4116_v11 = vmul.f32 %v4115_v59, %v10993_v33 }
0x596a   : > { %v4119_v10 = vpop.permute.xlu1 %4118 }
0x596b   : > { %v4121_v44 = vmul.f32 %v4119_v10, %v4115_v59 }
0x596d   : > { %4123 = vrot.lane.b32.xlu0 %v4121_v44, %s10226_s28 }
0x59df   : > { %v4124_v14 = vpop.permute.xlu0 %4123 }
0x59e0   : > { %v11193_v2 = vadd.f32 %v4124_v14, %v4116_v11 }
0x59e2   : > { %10006 = vtanh.f32 %v11193_v2 }
0x59e3   : > { %10008 = vtanh.f32 %v3305_v9 }
0x59ec   : > { %v10007_v48 = vpop.eup %10006 }
0x59ed   : > { %4129 = vrot.lane.b32.xlu1 %v10007_v48, %s10228_s5  ;;  %v10009_v33 = vpop.eup %10008 }
0x59f1   : > { %4137 = vrot.lane.b32.xlu1 %v11047_v20, %s10225_s27  ;;  %v11211_v20 = vld [vmem:[%s12047_s1 + $0x80] sm:$0xff] }
0x5a5f   : > { %v4130_v28 = vpop.permute.xlu1 %4129 }
0x5a60   : > { %v11201_v31 = vmul.f32 %v4130_v28, %v4115_v59 }
0x5a62   : > { %4134 = vrot.lane.b32.xlu0 %v11201_v31, %s10229_s6 }
0x5a63   : > { %v4138_v61 = vpop.permute.xlu1 %4137 }
0x5a66   : > { %3313 = vrot.lane.b32.xlu0 %v10009_v33, %s10225_s27 }
0x5ad4   : > { %v4135_v21 = vpop.permute.xlu0 %4134 }
0x5ad5   : > { %v4140_v35 = vsel %vm300_vm1, %v4135_v21, %v4138_v61 }
0x5ad6   : > { %9302 = vmatmul.mubr.msk.f32.vlgmr.msra.gmra.mrb[30].mxu0 %vm404_vm2, %v4140_v35 }
0x5ad7   : > { %9312 = vmatpush3.msra.mxu0 %v11211_v20  ;;  %9313 = vmatprep.mubr.msk.f32.mxu0 %vm10224_vm0, %v10223_v5 }
0x5ad8   : > { %9740 = vmatprep.subr.bf16.mxu0 %v10227_v49  ;;  %v3314_v44 = vpop.permute.xlu0 %3313 }
0x5ada   : > { %9314 = vmatmul.mubr.msk.f32.vlgmr.msra.gmra.mrb[32].mxu0 %vm300_vm1, %v11057_v52  ;;  %v3309_v52 = vmul.f32 0.5, %v10009_v33 }
0x5adb   : > { %9742 = vmatpush3.bf16.msra.mxu0 %v10385_v8  ;;  %9327 = vmatprep.mubr.msk.f32.mxu0 %vm10224_vm0, %v10223_v5 }
0x5adc   : > { %9746 = vmatprep.subr.bf16.mxu0 %v10227_v49  ;;  %v3310_v11 = vadd.f32 0.5, %v3309_v52 }
0x5ade   : > { %v3316_v14 = vmul.f32 %v3314_v44, %v3310_v11  ;;  %v3311_v33 = vmul.f32 %v3310_v11, %v11026_v24 }
0x5ba9   : > { %v4210_v45 = vpop.f32.mrb[30].mxu0 }
0x5baa   : > { %v4211_v37 = vadd.f32 %v4210_v45, %v10582_v26  ;;  %v9303_v41 = vpop.f32.mrb[31].mxu0 }
0x5bac   : > { %10010 = vtanh.f32 %v4211_v37 }
0x5bad   : > { %v4408_v6 = vpop.f32.mrb[32].mxu0 }
0x5bae   : > { %v4412_v29 = vadd.f32 %v4408_v6, %v282_v55  ;;  %v9315_v59 = vpop.f32.mrb[33].mxu0 }
0x5bb0   : > { %10012 = vtanh.f32 %v4412_v29 }
0x5bb6   : > { %v10011_v10 = vpop.eup %10010 }
0x5bb7   : > { %4219 = vrot.lane.b32.xlu1 %v10011_v10, %s10225_s27  ;;  %v4215_v9 = vmul.f32 0.5, %v10011_v10 }
0x5bb9   : > { %v4216_v28 = vadd.f32 0.5, %v4215_v9 }
0x5bba   : > { %v10013_v48 = vpop.eup %10012 }
0x5bbb   : > { %3318 = vrot.lane.b32.xlu1 %v3316_v14, %s10226_s28  ;;  %4418 = vrot.lane.b32.xlu0 %v10013_v48, %s10225_s27  ;;  %v4414_v22 = vmul.f32 0.5, %v10013_v48  ;;  %v4217_v29 = vmul.f32 %v4216_v28, %v11032_v36 }
0x5bbd   : > { %v4415_v35 = vadd.f32 0.5, %v4414_v22 }
0x5bbf   : > { %v4416_v24 = vmul.f32 %v4415_v35, %v11036_v47 }
0x5c29   : > { %v4220_v61 = vpop.permute.xlu1 %4219 }
0x5c2a   : > { %v4222_v21 = vmul.f32 %v4220_v61, %v4216_v28 }
0x5c2c   : > { %4224 = vrot.lane.b32.xlu0 %v4222_v21, %s10226_s28 }
0x5c2d   : > { %v3319_v45 = vpop.permute.xlu1 %3318  ;;  %v4419_v37 = vpop.permute.xlu0 %4418 }
0x5c2e   : > { %v11231_v41 = vadd.f32 %v3319_v45, %v3311_v33  ;;  %v4421_v55 = vmul.f32 %v4419_v37, %v4415_v35 }
0x5c30   : > { %10014 = vtanh.f32 %v11231_v41  ;;  %4423 = vrot.lane.b32.xlu1 %v4421_v55, %s10226_s28 }
0x5c3a   : > { %v10015_v6 = vpop.eup %10014 }
0x5c3b   : > { %3324 = vrot.lane.b32.xlu0 %v10015_v6, %s10228_s5 }
0x5c9e   : > { %v4225_v59 = vpop.permute.xlu0 %4224 }
0x5c9f   : > { %v11237_v52 = vadd.f32 %v4225_v59, %v4217_v29 }
0x5ca1   : > { %10016 = vtanh.f32 %v11237_v52 }
0x5ca2   : > { %v4424_v10 = vpop.permute.xlu1 %4423 }
0x5ca3   : > { %v11241_v44 = vadd.f32 %v4424_v10, %v4416_v24 }
0x5ca5   : > { %10018 = vtanh.f32 %v11241_v44 }
0x5cab   : > { %v10017_v14 = vpop.eup %10016 }
0x5cac   : > { %4230 = vrot.lane.b32.xlu1 %v10017_v14, %s10228_s5 }
0x5cad   : > { %v3325_v9 = vpop.permute.xlu0 %3324 }
0x5cae   : > { %v11246_v36 = vmul.f32 %v3325_v9, %v3310_v11 }
0x5caf   : > { %v10019_v48 = vpop.eup %10018 }
0x5cb0   : > { %4429 = vrot.lane.b32.xlu0 %v10019_v48, %s10228_s5 }
0x5cb4   : > { %4238 = vrot.lane.b32.xlu0 %v11246_v36, %s10225_s27 }
0x5cb8   : > { %4437 = vrot.lane.b32.xlu0 %v11079_v18, %s10225_s27 }
0x5d1e   : > { %v4231_v47 = vpop.permute.xlu1 %4230 }
0x5d1f   : > { %v11252_v22 = vmul.f32 %v4231_v47, %v4216_v28 }
0x5d21   : > { %4235 = vrot.lane.b32.xlu1 %v11252_v22, %s10229_s6 }
0x5d22   : > { %v4430_v61 = vpop.permute.xlu0 %4429 }
0x5d23   : > { %v4432_v21 = vmul.f32 %v4430_v61, %v4415_v35 }
0x5d25   : > { %4434 = vrot.lane.b32.xlu1 %v4432_v21, %s10229_s6 }
0x5d26   : > { %v4239_v33 = vpop.permute.xlu0 %4238 }
0x5d2a   : > { %v4438_v18 = vpop.permute.xlu0 %4437 }
0x5d93   : > { %v4236_v45 = vpop.permute.xlu1 %4235 }
0x5d94   : > { %v4241_v11 = vsel %vm300_vm1, %v4236_v45, %v4239_v33 }
0x5d95   : > { %9309 = vmatmul.mubr.msk.f32.vlgmr.msra.gmra.mrb[54].mxu1 %vm404_vm2, %v4241_v11 }
0x5d96   : > { %9739 = vmatpush3.bf16.msra.mxu1 %v10353_v50  ;;  %9320 = vmatprep.mubr.msk.f32.mxu1 %vm10224_vm0, %v10223_v5 }
0x5d97   : > { %v11262_v28 = vpop.permute.xlu1 %4434  ;;  %9743 = vmatprep.subr.bf16.mxu1 %v10227_v49 }
0x5d98   : > { %v4440_v35 = vsel %vm300_vm1, %v11262_v28, %v4438_v18 }
0x5d99   : > { %9321 = vmatmul.mubr.msk.f32.vlgmr.msra.gmra.mrb[56].mxu1 %vm404_vm2, %v4440_v35 }
0x5d9a   : > { %9745 = vmatpush3.bf16.msra.mxu1 %v10414_v30  ;;  %9334 = vmatprep.mubr.msk.f32.mxu1 %vm10224_vm0, %v10223_v5 }
0x5d9b   : > { %9749 = vmatprep.subr.bf16.mxu1 %v10227_v49 }
0x5e68   : > { %v11272_v37 = vpop.f32.mrb[54].mxu1 }
0x5e69   : > { %v9310_v55 = vpop.f32.mrb[55].mxu1 }
0x5e6c   : > { %v4510_v6 = vpop.f32.mrb[56].mxu1 }
0x5e6d   : > { %v4511_v29 = vadd.f32 %v4510_v6, %v10371_v57  ;;  %v9322_v59 = vpop.f32.mrb[57].mxu1 }
0x5e6f   : > { %10020 = vtanh.f32 %v4511_v29 }
0x5e79   : > { %v10021_v24 = vpop.eup %10020 }
0x5e7a   : > { %4519 = vrot.lane.b32.xlu1 %v10021_v24, %s10225_s27  ;;  %v4515_v10 = vmul.f32 0.5, %v10021_v24 }
0x5e7c   : > { %v4516_v14 = vadd.f32 0.5, %v4515_v10 }
0x5e7e   : > { %v4517_v47 = vmul.f32 %v4516_v14, %v11073_v54 }
0x5eec   : > { %v4520_v48 = vpop.permute.xlu1 %4519 }
0x5eed   : > { %v4522_v9 = vmul.f32 %v4520_v48, %v4516_v14 }
0x5eef   : > { %4524 = vrot.lane.b32.xlu0 %v4522_v9, %s10226_s28 }
0x5f61   : > { %v4525_v61 = vpop.permute.xlu0 %4524 }
0x5f62   : > { %v11278_v21 = vadd.f32 %v4525_v61, %v4517_v47 }
0x5f64   : > { %10022 = vtanh.f32 %v11278_v21 }
0x5f6e   : > { %v10023_v33 = vpop.eup %10022 }
0x5f6f   : > { %4530 = vrot.lane.b32.xlu1 %v10023_v33, %s10228_s5 }
0x5f73   : > { %4538 = vrot.lane.b32.xlu1 %v11099_v32, %s10225_s27 }
0x5fe1   : > { %v4531_v45 = vpop.permute.xlu1 %4530 }
0x5fe2   : > { %v11284_v11 = vmul.f32 %v4531_v45, %v4516_v14 }
0x5fe4   : > { %4535 = vrot.lane.b32.xlu0 %v11284_v11, %s10229_s6 }
0x5fe5   : > { %v4539_v18 = vpop.permute.xlu1 %4538 }
0x6056   : > { %v4536_v35 = vpop.permute.xlu0 %4535 }
0x6057   : > { %v4541_v54 = vsel %vm300_vm1, %v4536_v35, %v4539_v18 }
0x6058   : > { %9328 = vmatmul.mubr.msk.f32.vlgmr.msra.gmra.mrb[34].mxu0 %vm404_vm2, %v4541_v54 }
0x6059   : > { %9748 = vmatpush3.bf16.msra.mxu0 %v10443_v62  ;;  %9341 = vmatprep.mubr.msk.f32.mxu0 %vm10224_vm0, %v10223_v5 }
0x605a   : > { %9752 = vmatprep.subr.bf16.mxu0 %v10227_v49 }
0x612b   : > { %v4611_v32 = vpop.f32.mrb[34].mxu0 }
0x612c   : > { %v4612_v55 = vadd.f32 %v4611_v32, %v10400_v16  ;;  %v9329_v6 = vpop.f32.mrb[35].mxu0 }
0x612e   : > { %10024 = vtanh.f32 %v4612_v55 }
0x6138   : > { %v10025_v29 = vpop.eup %10024 }
0x6139   : > { %4620 = vrot.lane.b32.xlu0 %v10025_v29, %s10225_s27  ;;  %v4616_v59 = vmul.f32 0.5, %v10025_v29 }
0x613b   : > { %v4617_v24 = vadd.f32 0.5, %v4616_v59 }
0x613d   : > { %v4618_v48 = vmul.f32 %v4617_v24, %v11093_v53 }
0x61ab   : > { %v4621_v10 = vpop.permute.xlu0 %4620 }
0x61ac   : > { %v4623_v14 = vmul.f32 %v4621_v10, %v4617_v24 }
0x61ae   : > { %4625 = vrot.lane.b32.xlu1 %v4623_v14, %s10226_s28 }
0x6220   : > { %v4626_v9 = vpop.permute.xlu1 %4625 }
0x6221   : > { %v11298_v47 = vadd.f32 %v4626_v9, %v4618_v48 }
0x6223   : > { %10026 = vtanh.f32 %v11298_v47 }
0x622d   : > { %v10027_v61 = vpop.eup %10026 }
0x622e   : > { %4631 = vrot.lane.b32.xlu0 %v10027_v61, %s10228_s5 }
0x6232   : > { %4639 = vrot.lane.b32.xlu0 %v11119_v23, %s10225_s27 }
0x62a0   : > { %v4632_v33 = vpop.permute.xlu0 %4631 }
0x62a1   : > { %v11304_v45 = vmul.f32 %v4632_v33, %v4617_v24 }
0x62a3   : > { %4636 = vrot.lane.b32.xlu1 %v11304_v45, %s10229_s6 }
0x62a4   : > { %v4640_v18 = vpop.permute.xlu0 %4639 }
0x6315   : > { %v4637_v35 = vpop.permute.xlu1 %4636 }
0x6316   : > { %v4642_v53 = vsel %vm300_vm1, %v4637_v35, %v4640_v18 }
0x6317   : > { %9335 = vmatmul.mubr.msk.f32.vlgmr.msra.gmra.mrb[58].mxu1 %vm404_vm2, %v4642_v53 }
0x6318   : > { %9751 = vmatpush3.bf16.msra.mxu1 %v10472_v25  ;;  %9348 = vmatprep.mubr.msk.f32.mxu1 %vm10224_vm0, %v10223_v5 }
0x6319   : > { %9755 = vmatprep.subr.bf16.mxu1 %v10227_v49 }
0x63ea   : > { %v4712_v23 = vpop.f32.mrb[58].mxu1 }
0x63eb   : > { %v4713_v54 = vadd.f32 %v4712_v23, %v10429_v42  ;;  %v9336_v32 = vpop.f32.mrb[59].mxu1 }
0x63ed   : > { %10028 = vtanh.f32 %v4713_v54 }
0x63f7   : > { %v10029_v55 = vpop.eup %10028 }
0x63f8   : > { %4721 = vrot.lane.b32.xlu1 %v10029_v55, %s10225_s27  ;;  %v4717_v6 = vmul.f32 0.5, %v10029_v55 }
0x63fa   : > { %v4718_v29 = vadd.f32 0.5, %v4717_v6 }
0x63fc   : > { %v4719_v10 = vmul.f32 %v4718_v29, %v11113_v15 }
0x646a   : > { %v4722_v59 = vpop.permute.xlu1 %4721 }
0x646b   : > { %v4724_v24 = vmul.f32 %v4722_v59, %v4718_v29 }
0x646d   : > { %4726 = vrot.lane.b32.xlu0 %v4724_v24, %s10226_s28 }
0x64df   : > { %v4727_v14 = vpop.permute.xlu0 %4726 }
0x64e0   : > { %v11318_v48 = vadd.f32 %v4727_v14, %v4719_v10 }
0x64e2   : > { %10030 = vtanh.f32 %v11318_v48 }
0x64ec   : > { %v10031_v9 = vpop.eup %10030 }
0x64ed   : > { %4732 = vrot.lane.b32.xlu1 %v10031_v9, %s10228_s5 }
0x64f1   : > { %4740 = vrot.lane.b32.xlu1 %v11139_v19, %s10225_s27 }
0x655f   : > { %v4733_v61 = vpop.permute.xlu1 %4732 }
0x6560   : > { %v11324_v33 = vmul.f32 %v4733_v61, %v4718_v29 }
0x6562   : > { %4737 = vrot.lane.b32.xlu0 %v11324_v33, %s10229_s6 }
0x6563   : > { %v4741_v18 = vpop.permute.xlu1 %4740 }
0x65d4   : > { %v4738_v35 = vpop.permute.xlu0 %4737 }
0x65d5   : > { %v4743_v15 = vsel %vm300_vm1, %v4738_v35, %v4741_v18 }
0x65d6   : > { %9342 = vmatmul.mubr.msk.f32.vlgmr.msra.gmra.mrb[36].mxu0 %vm404_vm2, %v4743_v15 }
0x65d7   : > { %9754 = vmatpush3.bf16.msra.mxu0 %v10501_v63  ;;  %9355 = vmatprep.mubr.msk.f32.mxu0 %vm10224_vm0, %v10223_v5 }
0x65d8   : > { %9758 = vmatprep.subr.bf16.mxu0 %v10227_v49 }
0x66a9   : > { %v4813_v19 = vpop.f32.mrb[36].mxu0 }
0x66aa   : > { %v4814_v53 = vadd.f32 %v4813_v19, %v10458_v7  ;;  %v9343_v23 = vpop.f32.mrb[37].mxu0 }
0x66ac   : > { %10032 = vtanh.f32 %v4814_v53 }
0x66b6   : > { %v10033_v54 = vpop.eup %10032 }
0x66b7   : > { %4822 = vrot.lane.b32.xlu0 %v10033_v54, %s10225_s27  ;;  %v4818_v32 = vmul.f32 0.5, %v10033_v54 }
0x66b9   : > { %v4819_v55 = vadd.f32 0.5, %v4818_v32 }
0x66bb   : > { %v4820_v59 = vmul.f32 %v4819_v55, %v11133_v56 }
0x6729   : > { %v4823_v6 = vpop.permute.xlu0 %4822 }
0x672a   : > { %v4825_v29 = vmul.f32 %v4823_v6, %v4819_v55 }
0x672c   : > { %4827 = vrot.lane.b32.xlu1 %v4825_v29, %s10226_s28 }
0x679e   : > { %v4828_v24 = vpop.permute.xlu1 %4827 }
0x679f   : > { %v11338_v10 = vadd.f32 %v4828_v24, %v4820_v59 }
0x67a1   : > { %10034 = vtanh.f32 %v11338_v10 }
0x67ab   : > { %v10035_v14 = vpop.eup %10034 }
0x67ac   : > { %4833 = vrot.lane.b32.xlu0 %v10035_v14, %s10228_s5 }
0x67b0   : > { %4841 = vrot.lane.b32.xlu0 %v11159_v58, %s10225_s27 }
0x681e   : > { %v4834_v9 = vpop.permute.xlu0 %4833 }
0x681f   : > { %v11344_v61 = vmul.f32 %v4834_v9, %v4819_v55 }
0x6821   : > { %4838 = vrot.lane.b32.xlu1 %v11344_v61, %s10229_s6 }
0x6822   : > { %v4842_v18 = vpop.permute.xlu0 %4841 }
0x6893   : > { %v4839_v35 = vpop.permute.xlu1 %4838 }
0x6894   : > { %v4844_v56 = vsel %vm300_vm1, %v4839_v35, %v4842_v18 }
0x6895   : > { %9349 = vmatmul.mubr.msk.f32.vlgmr.msra.gmra.mrb[60].mxu1 %vm404_vm2, %v4844_v56 }
0x6896   : > { %9757 = vmatpush3.bf16.msra.mxu1 %v10532_v39  ;;  %9362 = vmatprep.mubr.msk.f32.mxu1 %vm10224_vm0, %v10223_v5 }
0x6897   : > { %9761 = vmatprep.subr.bf16.mxu1 %v10227_v49 }
0x6968   : > { %v4914_v58 = vpop.f32.mrb[60].mxu1 }
0x6969   : > { %v4915_v15 = vadd.f32 %v4914_v58, %v10487_v40  ;;  %v9350_v19 = vpop.f32.mrb[61].mxu1 }
0x696b   : > { %10036 = vtanh.f32 %v4915_v15 }
0x6975   : > { %v10037_v53 = vpop.eup %10036 }
0x6976   : > { %4923 = vrot.lane.b32.xlu1 %v10037_v53, %s10225_s27  ;;  %v4919_v23 = vmul.f32 0.5, %v10037_v53 }
0x6978   : > { %v4920_v54 = vadd.f32 0.5, %v4919_v23 }
0x697a   : > { %v4921_v6 = vmul.f32 %v4920_v54, %v11153_v27 }
0x69e8   : > { %v4924_v32 = vpop.permute.xlu1 %4923 }
0x69e9   : > { %v4926_v55 = vmul.f32 %v4924_v32, %v4920_v54 }
0x69eb   : > { %4928 = vrot.lane.b32.xlu0 %v4926_v55, %s10226_s28 }
0x6a5d   : > { %v4929_v29 = vpop.permute.xlu0 %4928 }
0x6a5e   : > { %v11358_v59 = vadd.f32 %v4929_v29, %v4921_v6 }
0x6a60   : > { %10038 = vtanh.f32 %v11358_v59 }
0x6a6a   : > { %v10039_v24 = vpop.eup %10038 }
0x6a6b   : > { %4934 = vrot.lane.b32.xlu1 %v10039_v24, %s10228_s5 }
0x6a6f   : > { %4942 = vrot.lane.b32.xlu1 %v11179_v43, %s10225_s27 }
0x6add   : > { %v4935_v14 = vpop.permute.xlu1 %4934 }
0x6ade   : > { %v11364_v9 = vmul.f32 %v4935_v14, %v4920_v54 }
0x6ae0   : > { %4939 = vrot.lane.b32.xlu0 %v11364_v9, %s10229_s6 }
0x6ae1   : > { %v4943_v18 = vpop.permute.xlu1 %4942 }
0x6b52   : > { %v4940_v35 = vpop.permute.xlu0 %4939 }
0x6b53   : > { %v4945_v27 = vsel %vm300_vm1, %v4940_v35, %v4943_v18 }
0x6b54   : > { %9356 = vmatmul.mubr.msk.f32.vlgmr.msra.gmra.mrb[38].mxu0 %vm404_vm2, %v4945_v27 }
0x6b55   : > { %9760 = vmatpush3.bf16.msra.mxu0 %v10561_v17  ;;  %9369 = vmatprep.mubr.msk.f32.mxu0 %vm10224_vm0, %v10223_v5 }
0x6b56   : > { %9379 = vmatprep.subr.mxu0 %v10223_v5 }
0x6c27   : > { %v5015_v43 = vpop.f32.mrb[38].mxu0 }
0x6c28   : > { %v5016_v56 = vadd.f32 %v5015_v43, %v10518_v13  ;;  %v9357_v58 = vpop.f32.mrb[39].mxu0 }
0x6c2a   : > { %10040 = vtanh.f32 %v5016_v56 }
0x6c34   : > { %v10041_v15 = vpop.eup %10040 }
0x6c35   : > { %5024 = vrot.lane.b32.xlu0 %v10041_v15, %s10225_s27  ;;  %v5020_v19 = vmul.f32 0.5, %v10041_v15 }
0x6c37   : > { %v5021_v53 = vadd.f32 0.5, %v5020_v19 }
0x6c39   : > { %v5022_v32 = vmul.f32 %v5021_v53, %v11173_v12 }
0x6ca7   : > { %v5025_v23 = vpop.permute.xlu0 %5024 }
0x6ca8   : > { %v5027_v54 = vmul.f32 %v5025_v23, %v5021_v53 }
0x6caa   : > { %5029 = vrot.lane.b32.xlu1 %v5027_v54, %s10226_s28 }
0x6d1c   : > { %v5030_v55 = vpop.permute.xlu1 %5029 }
0x6d1d   : > { %v11378_v6 = vadd.f32 %v5030_v55, %v5022_v32 }
0x6d1f   : > { %10042 = vtanh.f32 %v11378_v6 }
0x6d29   : > { %v10043_v29 = vpop.eup %10042 }
0x6d2a   : > { %5035 = vrot.lane.b32.xlu0 %v10043_v29, %s10228_s5  ;;  %v4312_v29 = vadd.f32 %v11272_v37, %v10793_v1 }
0x6d2e   : > { %5043 = vrot.lane.b32.xlu0 %v11201_v31, %s10225_s27 }
0x6d9c   : > { %v5036_v24 = vpop.permute.xlu0 %5035 }
0x6d9d   : > { %v11384_v14 = vmul.f32 %v5036_v24, %v5021_v53 }
0x6d9f   : > { %5040 = vrot.lane.b32.xlu1 %v11384_v14, %s10229_s6 }
0x6da0   : > { %v5044_v18 = vpop.permute.xlu0 %5043 }
0x6e11   : > { %v5041_v35 = vpop.permute.xlu1 %5040 }
0x6e12   : > { %v5046_v12 = vsel %vm300_vm1, %v5041_v35, %v5044_v18 }
0x6e13   : > { %9363 = vmatmul.mubr.msk.f32.vlgmr.msra.gmra.mrb[62].mxu1 %vm404_vm2, %v5046_v12 }
0x6e14   : > { %9763 = vmatpush3.bf16.msra.mxu1 %v10596_v0  ;;  %9376 = vmatprep.mubr.msk.f32.mxu1 %vm10224_vm0, %v10223_v5 }
0x6e15   : > { %9764 = vmatprep.subr.bf16.mxu1 %v10227_v49 }
0x6ee6   : > { %v5116_v31 = vpop.f32.mrb[62].mxu1 }
0x6ee7   : > { %v5117_v27 = vadd.f32 %v5116_v31, %v10547_v51  ;;  %v9364_v43 = vpop.f32.mrb[63].mxu1 }
0x6ee9   : > { %10044 = vtanh.f32 %v5117_v27 }
0x6ef3   : > { %v10045_v56 = vpop.eup %10044 }
0x6ef4   : > { %5125 = vrot.lane.b32.xlu1 %v10045_v56, %s10225_s27  ;;  %v5121_v58 = vmul.f32 0.5, %v10045_v56 }
0x6ef6   : > { %v5122_v15 = vadd.f32 0.5, %v5121_v58 }
0x6ef8   : > { %v5123_v23 = vmul.f32 %v5122_v15, %v11193_v2 }
0x6f66   : > { %v5126_v19 = vpop.permute.xlu1 %5125 }
0x6f67   : > { %v5128_v53 = vmul.f32 %v5126_v19, %v5122_v15 }
0x6f69   : > { %5130 = vrot.lane.b32.xlu0 %v5128_v53, %s10226_s28 }
0x6fdb   : > { %v5131_v54 = vpop.permute.xlu0 %5130 }
0x6fdc   : > { %v11398_v32 = vadd.f32 %v5131_v54, %v5123_v23 }
0x6fde   : > { %10046 = vtanh.f32 %v11398_v32 }
0x6fdf   : > { %10048 = vtanh.f32 %v4312_v29 }
0x6fe8   : > { %v10047_v55 = vpop.eup %10046 }
0x6fe9   : > { %5136 = vrot.lane.b32.xlu1 %v10047_v55, %s10228_s5  ;;  %v10049_v2 = vpop.eup %10048 }
0x6fed   : > { %5144 = vrot.lane.b32.xlu1 %v11252_v22, %s10225_s27 }
0x705b   : > { %v5137_v24 = vpop.permute.xlu1 %5136 }
0x705c   : > { %v11406_v18 = vmul.f32 %v5137_v24, %v5122_v15 }
0x705e   : > { %5141 = vrot.lane.b32.xlu0 %v11406_v18, %s10229_s6 }
0x705f   : > { %v5145_v35 = vpop.permute.xlu1 %5144 }
0x7062   : > { %4320 = vrot.lane.b32.xlu0 %v10049_v2, %s10225_s27 }
0x70d0   : > { %v5142_v12 = vpop.permute.xlu0 %5141 }
0x70d1   : > { %v5147_v31 = vsel %vm300_vm1, %v5142_v12, %v5145_v35 }
0x70d2   : > { %9370 = vmatmul.mubr.msk.f32.vlgmr.msra.gmra.mrb[40].mxu0 %vm404_vm2, %v5147_v31 }
0x70d3   : > { %9380 = vmatpush3.msra.mxu0 %v11211_v20  ;;  %9381 = vmatprep.mubr.msk.f32.mxu0 %vm10224_vm0, %v10223_v5  ;;  %v287_v20 = vadd.f32 %v10746_v4, %v10336_v34 }
0x70d4   : > { %9767 = vmatprep.subr.bf16.mxu0 %v10227_v49  ;;  %v4321_v19 = vpop.permute.xlu0 %4320 }
0x70d6   : > { %9382 = vmatmul.mubr.msk.f32.vlgmr.msra.gmra.mrb[42].mxu0 %vm300_vm1, %v11262_v28  ;;  %v4316_v28 = vmul.f32 0.5, %v10049_v2 }
0x70d7   : > { %9769 = vmatpush3.bf16.msra.mxu0 %v10385_v8  ;;  %9395 = vmatprep.mubr.msk.f32.mxu0 %vm10224_vm0, %v10223_v5 }
0x70d8   : > { %9773 = vmatprep.subr.bf16.mxu0 %v10227_v49  ;;  %v4317_v53 = vadd.f32 0.5, %v4316_v28 }
0x70da   : > { %v4323_v23 = vmul.f32 %v4321_v19, %v4317_v53  ;;  %v4318_v2 = vmul.f32 %v4317_v53, %v11231_v41 }
0x71a5   : > { %v5217_v22 = vpop.f32.mrb[40].mxu0 }
0x71a6   : > { %v5218_v37 = vadd.f32 %v5217_v22, %v10582_v26  ;;  %v9371_v27 = vpop.f32.mrb[41].mxu0 }
0x71a8   : > { %10050 = vtanh.f32 %v5218_v37 }
0x71a9   : > { %v5415_v43 = vpop.f32.mrb[42].mxu0 }
0x71aa   : > { %v5419_v56 = vadd.f32 %v5415_v43, %v287_v20  ;;  %v9383_v58 = vpop.f32.mrb[43].mxu0 }
0x71ac   : > { %10052 = vtanh.f32 %v5419_v56 }
0x71b2   : > { %v10051_v15 = vpop.eup %10050 }
0x71b3   : > { %5226 = vrot.lane.b32.xlu1 %v10051_v15, %s10225_s27  ;;  %v5222_v55 = vmul.f32 0.5, %v10051_v15 }
0x71b5   : > { %v5223_v29 = vadd.f32 0.5, %v5222_v55 }
0x71b6   : > { %v10053_v54 = vpop.eup %10052 }
0x71b7   : > { %4325 = vrot.lane.b32.xlu1 %v4323_v23, %s10226_s28  ;;  %5425 = vrot.lane.b32.xlu0 %v10053_v54, %s10225_s27  ;;  %v5421_v4 = vmul.f32 0.5, %v10053_v54  ;;  %v5224_v43 = vmul.f32 %v5223_v29, %v11237_v52 }
0x71b9   : > { %v5422_v12 = vadd.f32 0.5, %v5421_v4 }
0x71bb   : > { %v5423_v41 = vmul.f32 %v5422_v12, %v11241_v44 }
0x7225   : > { %v5227_v24 = vpop.permute.xlu1 %5226 }
0x7226   : > { %v5229_v35 = vmul.f32 %v5227_v24, %v5223_v29 }
0x7228   : > { %5231 = vrot.lane.b32.xlu0 %v5229_v35, %s10226_s28 }
0x7229   : > { %v4326_v31 = vpop.permute.xlu1 %4325  ;;  %v5426_v22 = vpop.permute.xlu0 %5425 }
0x722a   : > { %v11431_v37 = vadd.f32 %v4326_v31, %v4318_v2  ;;  %v5428_v27 = vmul.f32 %v5426_v22, %v5422_v12 }
0x722c   : > { %10054 = vtanh.f32 %v11431_v37  ;;  %5430 = vrot.lane.b32.xlu1 %v5428_v27, %s10226_s28 }
0x7236   : > { %v10055_v20 = vpop.eup %10054 }
0x7237   : > { %4331 = vrot.lane.b32.xlu0 %v10055_v20, %s10228_s5 }
0x729a   : > { %v5232_v56 = vpop.permute.xlu0 %5231 }
0x729b   : > { %v11437_v58 = vadd.f32 %v5232_v56, %v5224_v43 }
0x729d   : > { %10056 = vtanh.f32 %v11437_v58 }
0x729e   : > { %v5431_v28 = vpop.permute.xlu1 %5430 }
0x729f   : > { %v11441_v15 = vadd.f32 %v5431_v28, %v5423_v41 }
0x72a1   : > { %10058 = vtanh.f32 %v11441_v15 }
0x72a7   : > { %v10057_v19 = vpop.eup %10056 }
0x72a8   : > { %5237 = vrot.lane.b32.xlu1 %v10057_v19, %s10228_s5 }
0x72a9   : > { %v4332_v54 = vpop.permute.xlu0 %4331 }
0x72aa   : > { %v11446_v52 = vmul.f32 %v4332_v54, %v4317_v53 }
0x72ab   : > { %v10059_v23 = vpop.eup %10058 }
0x72ac   : > { %5436 = vrot.lane.b32.xlu0 %v10059_v23, %s10228_s5 }
0x72b0   : > { %5245 = vrot.lane.b32.xlu0 %v11446_v52, %s10225_s27 }
0x72b4   : > { %5444 = vrot.lane.b32.xlu0 %v11284_v11, %s10225_s27 }
0x731a   : > { %v5238_v44 = vpop.permute.xlu1 %5237 }
0x731b   : > { %v11452_v55 = vmul.f32 %v5238_v44, %v5223_v29 }
0x731d   : > { %5242 = vrot.lane.b32.xlu1 %v11452_v55, %s10229_s6 }
0x731e   : > { %v5437_v4 = vpop.permute.xlu0 %5436 }
0x731f   : > { %v5439_v24 = vmul.f32 %v5437_v4, %v5422_v12 }
0x7321   : > { %5441 = vrot.lane.b32.xlu1 %v5439_v24, %s10229_s6 }
0x7322   : > { %v5246_v35 = vpop.permute.xlu0 %5245 }
0x7326   : > { %v5445_v11 = vpop.permute.xlu0 %5444 }
0x738f   : > { %v5243_v2 = vpop.permute.xlu1 %5242 }
0x7390   : > { %v5248_v53 = vsel %vm300_vm1, %v5243_v2, %v5246_v35 }
0x7391   : > { %9377 = vmatmul.mubr.msk.f32.vlgmr.msra.gmra.mrb[64].mxu1 %vm404_vm2, %v5248_v53 }
0x7392   : > { %9766 = vmatpush3.bf16.msra.mxu1 %v10353_v50  ;;  %9388 = vmatprep.mubr.msk.f32.mxu1 %vm10224_vm0, %v10223_v5 }
0x7393   : > { %v11462_v29 = vpop.permute.xlu1 %5441  ;;  %9770 = vmatprep.subr.bf16.mxu1 %v10227_v49 }
0x7394   : > { %v5447_v12 = vsel %vm300_vm1, %v11462_v29, %v5445_v11 }
0x7395   : > { %9389 = vmatmul.mubr.msk.f32.vlgmr.msra.gmra.mrb[66].mxu1 %vm404_vm2, %v5447_v12 }
0x7396   : > { %9772 = vmatpush3.bf16.msra.mxu1 %v10414_v30  ;;  %9402 = vmatprep.mubr.msk.f32.mxu1 %vm10224_vm0, %v10223_v5 }
0x7397   : > { %9776 = vmatprep.subr.bf16.mxu1 %v10227_v49 }
0x7464   : > { %v11472_v31 = vpop.f32.mrb[64].mxu1 }
0x7465   : > { %v9378_v22 = vpop.f32.mrb[65].mxu1 }
0x7468   : > { %v5517_v27 = vpop.f32.mrb[66].mxu1 }
0x7469   : > { %v5518_v20 = vadd.f32 %v5517_v27, %v10371_v57  ;;  %v9390_v43 = vpop.f32.mrb[67].mxu1 }
0x746b   : > { %10060 = vtanh.f32 %v5518_v20 }
0x7475   : > { %v10061_v56 = vpop.eup %10060 }
0x7476   : > { %5526 = vrot.lane.b32.xlu1 %v10061_v56, %s10225_s27  ;;  %v5522_v41 = vmul.f32 0.5, %v10061_v56 }
0x7478   : > { %v5523_v28 = vadd.f32 0.5, %v5522_v41 }
0x747a   : > { %v5524_v54 = vmul.f32 %v5523_v28, %v11278_v21 }
0x74e8   : > { %v5527_v19 = vpop.permute.xlu1 %5526 }
0x74e9   : > { %v5529_v23 = vmul.f32 %v5527_v19, %v5523_v28 }
0x74eb   : > { %5531 = vrot.lane.b32.xlu0 %v5529_v23, %s10226_s28 }
0x755d   : > { %v5532_v44 = vpop.permute.xlu0 %5531 }
0x755e   : > { %v11478_v4 = vadd.f32 %v5532_v44, %v5524_v54 }
0x7560   : > { %10062 = vtanh.f32 %v11478_v4 }
0x756a   : > { %v10063_v24 = vpop.eup %10062 }
0x756b   : > { %5537 = vrot.lane.b32.xlu1 %v10063_v24, %s10228_s5 }
0x756f   : > { %5545 = vrot.lane.b32.xlu1 %v11304_v45, %s10225_s27 }
0x75dd   : > { %v5538_v35 = vpop.permute.xlu1 %5537 }
0x75de   : > { %v11484_v2 = vmul.f32 %v5538_v35, %v5523_v28 }
0x75e0   : > { %5542 = vrot.lane.b32.xlu0 %v11484_v2, %s10229_s6 }
0x75e1   : > { %v5546_v53 = vpop.permute.xlu1 %5545 }
0x7652   : > { %v5543_v11 = vpop.permute.xlu0 %5542 }
0x7653   : > { %v5548_v21 = vsel %vm300_vm1, %v5543_v11, %v5546_v53 }
0x7654   : > { %9396 = vmatmul.mubr.msk.f32.vlgmr.msra.gmra.mrb[44].mxu0 %vm404_vm2, %v5548_v21 }
0x7655   : > { %9775 = vmatpush3.bf16.msra.mxu0 %v10443_v62  ;;  %9409 = vmatprep.mubr.msk.f32.mxu0 %vm10224_vm0, %v10223_v5 }
0x7656   : > { %9779 = vmatprep.subr.bf16.mxu0 %v10227_v49 }
0x7727   : > { %v5618_v45 = vpop.f32.mrb[44].mxu0 }
0x7728   : > { %v5619_v12 = vadd.f32 %v5618_v45, %v10400_v16  ;;  %v9397_v22 = vpop.f32.mrb[45].mxu0 }
0x772a   : > { %10064 = vtanh.f32 %v5619_v12 }
0x7734   : > { %v10065_v27 = vpop.eup %10064 }
0x7735   : > { %5627 = vrot.lane.b32.xlu0 %v10065_v27, %s10225_s27  ;;  %v5623_v20 = vmul.f32 0.5, %v10065_v27 }
0x7737   : > { %v5624_v43 = vadd.f32 0.5, %v5623_v20 }
0x7739   : > { %v5625_v28 = vmul.f32 %v5624_v43, %v11298_v47 }
0x77a7   : > { %v5628_v56 = vpop.permute.xlu0 %5627 }
0x77a8   : > { %v5630_v41 = vmul.f32 %v5628_v56, %v5624_v43 }
0x77aa   : > { %5632 = vrot.lane.b32.xlu1 %v5630_v41, %s10226_s28 }
0x781c   : > { %v5633_v19 = vpop.permute.xlu1 %5632 }
0x781d   : > { %v11498_v23 = vadd.f32 %v5633_v19, %v5625_v28 }
0x781f   : > { %10066 = vtanh.f32 %v11498_v23 }
0x7829   : > { %v10067_v54 = vpop.eup %10066 }
0x782a   : > { %5638 = vrot.lane.b32.xlu0 %v10067_v54, %s10228_s5 }
0x782e   : > { %5646 = vrot.lane.b32.xlu0 %v11324_v33, %s10225_s27 }
0x789c   : > { %v5639_v44 = vpop.permute.xlu0 %5638 }
0x789d   : > { %v11504_v24 = vmul.f32 %v5639_v44, %v5624_v43 }
0x789f   : > { %5643 = vrot.lane.b32.xlu1 %v11504_v24, %s10229_s6 }
0x78a0   : > { %v5647_v35 = vpop.permute.xlu0 %5646 }
0x7911   : > { %v5644_v53 = vpop.permute.xlu1 %5643 }
0x7912   : > { %v5649_v47 = vsel %vm300_vm1, %v5644_v53, %v5647_v35 }
0x7913   : > { %9403 = vmatmul.mubr.msk.f32.vlgmr.msra.gmra.mrb[68].mxu1 %vm404_vm2, %v5649_v47 }
0x7914   : > { %9778 = vmatpush3.bf16.msra.mxu1 %v10472_v25  ;;  %9416 = vmatprep.mubr.msk.f32.mxu1 %vm10224_vm0, %v10223_v5 }
0x7915   : > { %9782 = vmatprep.subr.bf16.mxu1 %v10227_v49 }
0x79e6   : > { %v5719_v33 = vpop.f32.mrb[68].mxu1 }
0x79e7   : > { %v5720_v11 = vadd.f32 %v5719_v33, %v10429_v42  ;;  %v9404_v21 = vpop.f32.mrb[69].mxu1 }
0x79e9   : > { %10068 = vtanh.f32 %v5720_v11 }
0x79f3   : > { %v10069_v45 = vpop.eup %10068 }
0x79f4   : > { %5728 = vrot.lane.b32.xlu1 %v10069_v45, %s10225_s27  ;;  %v5724_v12 = vmul.f32 0.5, %v10069_v45 }
0x79f6   : > { %v5725_v22 = vadd.f32 0.5, %v5724_v12 }
0x79f8   : > { %v5726_v43 = vmul.f32 %v5725_v22, %v11318_v48 }
0x7a66   : > { %v5729_v27 = vpop.permute.xlu1 %5728 }
0x7a67   : > { %v5731_v20 = vmul.f32 %v5729_v27, %v5725_v22 }
0x7a69   : > { %5733 = vrot.lane.b32.xlu0 %v5731_v20, %s10226_s28 }
0x7adb   : > { %v5734_v56 = vpop.permute.xlu0 %5733 }
0x7adc   : > { %v11518_v41 = vadd.f32 %v5734_v56, %v5726_v43 }
0x7ade   : > { %10070 = vtanh.f32 %v11518_v41 }
0x7ae8   : > { %v10071_v28 = vpop.eup %10070 }
0x7ae9   : > { %5739 = vrot.lane.b32.xlu1 %v10071_v28, %s10228_s5 }
0x7aed   : > { %5747 = vrot.lane.b32.xlu1 %v11344_v61, %s10225_s27 }
0x7b5b   : > { %v5740_v19 = vpop.permute.xlu1 %5739 }
0x7b5c   : > { %v11524_v54 = vmul.f32 %v5740_v19, %v5725_v22 }
0x7b5e   : > { %5744 = vrot.lane.b32.xlu0 %v11524_v54, %s10229_s6 }
0x7b5f   : > { %v5748_v44 = vpop.permute.xlu1 %5747 }
0x7bd0   : > { %v5745_v35 = vpop.permute.xlu0 %5744 }
0x7bd1   : > { %v5750_v48 = vsel %vm300_vm1, %v5745_v35, %v5748_v44 }
0x7bd2   : > { %9410 = vmatmul.mubr.msk.f32.vlgmr.msra.gmra.mrb[46].mxu0 %vm404_vm2, %v5750_v48 }
0x7bd3   : > { %9781 = vmatpush3.bf16.msra.mxu0 %v10501_v63  ;;  %9423 = vmatprep.mubr.msk.f32.mxu0 %vm10224_vm0, %v10223_v5 }
0x7bd4   : > { %9785 = vmatprep.subr.bf16.mxu0 %v10227_v49 }
0x7ca5   : > { %v5820_v61 = vpop.f32.mrb[46].mxu0 }
0x7ca6   : > { %v5821_v53 = vadd.f32 %v5820_v61, %v10458_v7  ;;  %v9411_v47 = vpop.f32.mrb[47].mxu0 }
0x7ca8   : > { %10072 = vtanh.f32 %v5821_v53 }
0x7cb2   : > { %v10073_v33 = vpop.eup %10072 }
0x7cb3   : > { %5829 = vrot.lane.b32.xlu0 %v10073_v33, %s10225_s27  ;;  %v5825_v11 = vmul.f32 0.5, %v10073_v33 }
0x7cb5   : > { %v5826_v21 = vadd.f32 0.5, %v5825_v11 }
0x7cb7   : > { %v5827_v22 = vmul.f32 %v5826_v21, %v11338_v10 }
0x7d25   : > { %v5830_v45 = vpop.permute.xlu0 %5829 }
0x7d26   : > { %v5832_v12 = vmul.f32 %v5830_v45, %v5826_v21 }
0x7d28   : > { %5834 = vrot.lane.b32.xlu1 %v5832_v12, %s10226_s28 }
0x7d9a   : > { %v5835_v27 = vpop.permute.xlu1 %5834 }
0x7d9b   : > { %v11538_v20 = vadd.f32 %v5835_v27, %v5827_v22 }
0x7d9d   : > { %10074 = vtanh.f32 %v11538_v20 }
0x7da7   : > { %v10075_v43 = vpop.eup %10074 }
0x7da8   : > { %5840 = vrot.lane.b32.xlu0 %v10075_v43, %s10228_s5 }
0x7dac   : > { %5848 = vrot.lane.b32.xlu0 %v11364_v9, %s10225_s27 }
0x7e1a   : > { %v5841_v56 = vpop.permute.xlu0 %5840 }
0x7e1b   : > { %v11544_v28 = vmul.f32 %v5841_v56, %v5826_v21 }
0x7e1d   : > { %5845 = vrot.lane.b32.xlu1 %v11544_v28, %s10229_s6 }
0x7e1e   : > { %v5849_v19 = vpop.permute.xlu0 %5848 }
0x7e8f   : > { %v5846_v44 = vpop.permute.xlu1 %5845 }
0x7e90   : > { %v5851_v10 = vsel %vm300_vm1, %v5846_v44, %v5849_v19 }
0x7e91   : > { %9417 = vmatmul.mubr.msk.f32.vlgmr.msra.gmra.mrb[70].mxu1 %vm404_vm2, %v5851_v10 }
0x7e92   : > { %9784 = vmatpush3.bf16.msra.mxu1 %v10532_v39  ;;  %9430 = vmatprep.mubr.msk.f32.mxu1 %vm10224_vm0, %v10223_v5 }
0x7e93   : > { %9788 = vmatprep.subr.bf16.mxu1 %v10227_v49 }
0x7f64   : > { %v5921_v9 = vpop.f32.mrb[70].mxu1 }
0x7f65   : > { %v5922_v35 = vadd.f32 %v5921_v9, %v10487_v40  ;;  %v9418_v48 = vpop.f32.mrb[71].mxu1 }
0x7f67   : > { %10076 = vtanh.f32 %v5922_v35 }
0x7f71   : > { %v10077_v61 = vpop.eup %10076 }
0x7f72   : > { %5930 = vrot.lane.b32.xlu1 %v10077_v61, %s10225_s27  ;;  %v5926_v53 = vmul.f32 0.5, %v10077_v61 }
0x7f74   : > { %v5927_v47 = vadd.f32 0.5, %v5926_v53 }
0x7f76   : > { %v5928_v21 = vmul.f32 %v5927_v47, %v11358_v59 }
0x7fe4   : > { %v5931_v33 = vpop.permute.xlu1 %5930 }
0x7fe5   : > { %v5933_v11 = vmul.f32 %v5931_v33, %v5927_v47 }
0x7fe7   : > { %5935 = vrot.lane.b32.xlu0 %v5933_v11, %s10226_s28 }
0x8059   : > { %v5936_v45 = vpop.permute.xlu0 %5935 }
0x805a   : > { %v11558_v12 = vadd.f32 %v5936_v45, %v5928_v21 }
0x805c   : > { %10078 = vtanh.f32 %v11558_v12 }
0x8066   : > { %v10079_v22 = vpop.eup %10078 }
0x8067   : > { %5941 = vrot.lane.b32.xlu1 %v10079_v22, %s10228_s5 }
0x806b   : > { %5949 = vrot.lane.b32.xlu1 %v11384_v14, %s10225_s27 }
0x80d9   : > { %v5942_v27 = vpop.permute.xlu1 %5941 }
0x80da   : > { %v11564_v43 = vmul.f32 %v5942_v27, %v5927_v47 }
0x80dc   : > { %5946 = vrot.lane.b32.xlu0 %v11564_v43, %s10229_s6 }
0x80dd   : > { %v5950_v56 = vpop.permute.xlu1 %5949 }
0x814e   : > { %v5947_v19 = vpop.permute.xlu0 %5946 }
0x814f   : > { %v5952_v59 = vsel %vm300_vm1, %v5947_v19, %v5950_v56 }
0x8150   : > { %9424 = vmatmul.mubr.msk.f32.vlgmr.msra.gmra.mrb[48].mxu0 %vm404_vm2, %v5952_v59 }
0x8151   : > { %9787 = vmatpush3.bf16.msra.mxu0 %v10561_v17  ;;  %9437 = vmatprep.mubr.msk.f32.mxu0 %vm10224_vm0, %v10223_v5 }
0x8152   : > { %9447 = vmatprep.subr.mxu0 %v10223_v5 }
0x8223   : > { %v6022_v14 = vpop.f32.mrb[48].mxu0 }
0x8224   : > { %v6023_v44 = vadd.f32 %v6022_v14, %v10518_v13  ;;  %v9425_v10 = vpop.f32.mrb[49].mxu0 }
0x8226   : > { %10080 = vtanh.f32 %v6023_v44 }
0x8230   : > { %v10081_v9 = vpop.eup %10080 }
0x8231   : > { %6031 = vrot.lane.b32.xlu0 %v10081_v9, %s10225_s27  ;;  %v6027_v35 = vmul.f32 0.5, %v10081_v9 }
0x8233   : > { %v6028_v48 = vadd.f32 0.5, %v6027_v35 }
0x8235   : > { %v6029_v47 = vmul.f32 %v6028_v48, %v11378_v6 }
0x82a3   : > { %v6032_v61 = vpop.permute.xlu0 %6031 }
0x82a4   : > { %v6034_v53 = vmul.f32 %v6032_v61, %v6028_v48 }
0x82a6   : > { %6036 = vrot.lane.b32.xlu1 %v6034_v53, %s10226_s28 }
0x8318   : > { %v6037_v33 = vpop.permute.xlu1 %6036 }
0x8319   : > { %v11578_v11 = vadd.f32 %v6037_v33, %v6029_v47  ;;  %v5319_v33 = vadd.f32 %v11472_v31, %v10793_v1 }
0x831b   : > { %10082 = vtanh.f32 %v11578_v11 }
0x8325   : > { %v10083_v21 = vpop.eup %10082 }
0x8326   : > { %6042 = vrot.lane.b32.xlu0 %v10083_v21, %s10228_s5 }
0x832a   : > { %6050 = vrot.lane.b32.xlu0 %v11406_v18, %s10225_s27 }
0x8398   : > { %v6043_v45 = vpop.permute.xlu0 %6042 }
0x8399   : > { %v11584_v22 = vmul.f32 %v6043_v45, %v6028_v48 }
0x839b   : > { %6047 = vrot.lane.b32.xlu1 %v11584_v22, %s10229_s6 }
0x839c   : > { %v6051_v27 = vpop.permute.xlu0 %6050 }
0x840d   : > { %v6048_v56 = vpop.permute.xlu1 %6047 }
0x840e   : > { %v6053_v6 = vsel %vm300_vm1, %v6048_v56, %v6051_v27 }
0x840f   : > { %9431 = vmatmul.mubr.msk.f32.vlgmr.msra.gmra.mrb[72].mxu1 %vm404_vm2, %v6053_v6 }
0x8410   : > { %9790 = vmatpush3.bf16.msra.mxu1 %v10596_v0  ;;  %9444 = vmatprep.mubr.msk.f32.mxu1 %vm10224_vm0, %v10223_v5 }
0x8411   : > { %9791 = vmatprep.subr.bf16.mxu1 %v10227_v49 }
0x84e2   : > { %v6123_v18 = vpop.f32.mrb[72].mxu1 }
0x84e3   : > { %v6124_v19 = vadd.f32 %v6123_v18, %v10547_v51  ;;  %v9432_v59 = vpop.f32.mrb[73].mxu1 }
0x84e4   : > { %v292_v59 = vadd.f32 %v10752_v38, %v10336_v34 }
0x84e5   : > { %10084 = vtanh.f32 %v6124_v19 }
0x84ef   : > { %v10085_v14 = vpop.eup %10084 }
0x84f0   : > { %6132 = vrot.lane.b32.xlu1 %v10085_v14, %s10225_s27  ;;  %v6128_v44 = vmul.f32 0.5, %v10085_v14 }
0x84f2   : > { %v6129_v10 = vadd.f32 0.5, %v6128_v44 }
0x84f4   : > { %v6130_v48 = vmul.f32 %v6129_v10, %v11398_v32 }
0x8562   : > { %v6133_v9 = vpop.permute.xlu1 %6132 }
0x8563   : > { %v6135_v35 = vmul.f32 %v6133_v9, %v6129_v10 }
0x8565   : > { %6137 = vrot.lane.b32.xlu0 %v6135_v35, %s10226_s28 }
0x85d7   : > { %v6138_v61 = vpop.permute.xlu0 %6137 }
0x85d8   : > { %v11598_v53 = vadd.f32 %v6138_v61, %v6130_v48 }
0x85da   : > { %10086 = vtanh.f32 %v11598_v53 }
0x85db   : > { %10088 = vtanh.f32 %v5319_v33 }
0x85e4   : > { %v10087_v47 = vpop.eup %10086 }
0x85e5   : > { %6143 = vrot.lane.b32.xlu1 %v10087_v47, %s10228_s5  ;;  %v10089_v32 = vpop.eup %10088 }
0x85e9   : > { %6151 = vrot.lane.b32.xlu1 %v11452_v55, %s10225_s27  ;;  %v11616_v55 = vld [vmem:[%s12047_s1 + $0x80] sm:$0xff] }
0x8657   : > { %v6144_v21 = vpop.permute.xlu1 %6143 }
0x8658   : > { %v11606_v45 = vmul.f32 %v6144_v21, %v6129_v10 }
0x865a   : > { %6148 = vrot.lane.b32.xlu0 %v11606_v45, %s10229_s6 }
0x865b   : > { %v6152_v27 = vpop.permute.xlu1 %6151 }
0x865e   : > { %5327 = vrot.lane.b32.xlu0 %v10089_v32, %s10225_s27 }
0x86cc   : > { %v6149_v56 = vpop.permute.xlu0 %6148 }
0x86cd   : > { %v6154_v6 = vsel %vm300_vm1, %v6149_v56, %v6152_v27 }
0x86ce   : > { %9438 = vmatmul.mubr.msk.f32.vlgmr.msra.gmra.mrb[50].mxu0 %vm404_vm2, %v6154_v6 }
0x86cf   : > { %9448 = vmatpush3.msra.mxu0 %v11616_v55  ;;  %9449 = vmatprep.mubr.msk.f32.mxu0 %vm10224_vm0, %v10223_v5 }
0x86d0   : > { %9794 = vmatprep.subr.bf16.mxu0 %v10227_v49  ;;  %v5328_v35 = vpop.permute.xlu0 %5327 }
0x86d2   : > { %9450 = vmatmul.mubr.msk.f32.vlgmr.msra.gmra.mrb[52].mxu0 %vm300_vm1, %v11462_v29  ;;  %v5323_v29 = vmul.f32 0.5, %v10089_v32 }
0x86d3   : > { %9796 = vmatpush3.bf16.msra.mxu0 %v10385_v8  ;;  %9463 = vmatprep.mubr.msk.f32.mxu0 %vm10224_vm0, %v10223_v5 }
0x86d4   : > { %9800 = vmatprep.subr.bf16.mxu0 %v10227_v49  ;;  %v5324_v48 = vadd.f32 0.5, %v5323_v29 }
0x86d6   : > { %v5330_v61 = vmul.f32 %v5328_v35, %v5324_v48  ;;  %v5325_v32 = vmul.f32 %v5324_v48, %v11431_v37 }
0x87a1   : > { %v6224_v31 = vpop.f32.mrb[50].mxu0 }
0x87a2   : > { %v6225_v18 = vadd.f32 %v6224_v31, %v10582_v26  ;;  %v9439_v19 = vpop.f32.mrb[51].mxu0 }
0x87a4   : > { %10090 = vtanh.f32 %v6225_v18 }
0x87a5   : > { %v6422_v14 = vpop.f32.mrb[52].mxu0 }
0x87a6   : > { %v6426_v44 = vadd.f32 %v6422_v14, %v292_v59  ;;  %v9451_v10 = vpop.f32.mrb[53].mxu0 }
0x87a8   : > { %10092 = vtanh.f32 %v6426_v44 }
0x87ae   : > { %v10091_v9 = vpop.eup %10090 }
0x87af   : > { %6233 = vrot.lane.b32.xlu1 %v10091_v9, %s10225_s27  ;;  %v6229_v33 = vmul.f32 0.5, %v10091_v9 }
0x87b1   : > { %v6230_v21 = vadd.f32 0.5, %v6229_v33 }
0x87b2   : > { %v10093_v47 = vpop.eup %10092 }
0x87b3   : > { %5332 = vrot.lane.b32.xlu1 %v5330_v61, %s10226_s28  ;;  %6432 = vrot.lane.b32.xlu0 %v10093_v47, %s10225_s27  ;;  %v6428_v38 = vmul.f32 0.5, %v10093_v47  ;;  %v6231_v44 = vmul.f32 %v6230_v21, %v11437_v58 }
0x87b5   : > { %v6429_v6 = vadd.f32 0.5, %v6428_v38 }
0x87b7   : > { %v6430_v37 = vmul.f32 %v6429_v6, %v11441_v15 }
0x8821   : > { %v6234_v27 = vpop.permute.xlu1 %6233 }
0x8822   : > { %v6236_v56 = vmul.f32 %v6234_v27, %v6230_v21 }
0x8824   : > { %6238 = vrot.lane.b32.xlu0 %v6236_v56, %s10226_s28 }
0x8825   : > { %v5333_v31 = vpop.permute.xlu1 %5332  ;;  %v6433_v18 = vpop.permute.xlu0 %6432 }
0x8826   : > { %v11636_v19 = vadd.f32 %v5333_v31, %v5325_v32  ;;  %v6435_v59 = vmul.f32 %v6433_v18, %v6429_v6 }
0x8828   : > { %10094 = vtanh.f32 %v11636_v19  ;;  %6437 = vrot.lane.b32.xlu1 %v6435_v59, %s10226_s28 }
0x8832   : > { %v10095_v14 = vpop.eup %10094 }
0x8833   : > { %5338 = vrot.lane.b32.xlu0 %v10095_v14, %s10228_s5 }
0x8896   : > { %v6239_v10 = vpop.permute.xlu0 %6238 }
0x8897   : > { %v11642_v29 = vadd.f32 %v6239_v10, %v6231_v44 }
0x8899   : > { %10096 = vtanh.f32 %v11642_v29 }
0x889a   : > { %v6438_v9 = vpop.permute.xlu1 %6437 }
0x889b   : > { %v11646_v35 = vadd.f32 %v6438_v9, %v6430_v37 }
0x889d   : > { %10098 = vtanh.f32 %v11646_v35 }
0x88a3   : > { %v10097_v61 = vpop.eup %10096 }
0x88a4   : > { %6244 = vrot.lane.b32.xlu1 %v10097_v61, %s10228_s5 }
0x88a5   : > { %v5339_v33 = vpop.permute.xlu0 %5338 }
0x88a6   : > { %v11651_v58 = vmul.f32 %v5339_v33, %v5324_v48 }
0x88a7   : > { %v10099_v47 = vpop.eup %10098 }
0x88a8   : > { %6443 = vrot.lane.b32.xlu0 %v10099_v47, %s10228_s5 }
0x88ac   : > { %6252 = vrot.lane.b32.xlu0 %v11651_v58, %s10225_s27 }
0x88b0   : > { %6451 = vrot.lane.b32.xlu0 %v11484_v2, %s10225_s27 }
0x8916   : > { %v6245_v15 = vpop.permute.xlu1 %6244 }
0x8917   : > { %v11657_v38 = vmul.f32 %v6245_v15, %v6230_v21 }
0x8919   : > { %6249 = vrot.lane.b32.xlu1 %v11657_v38, %s10229_s6 }
0x891a   : > { %v6444_v27 = vpop.permute.xlu0 %6443 }
0x891b   : > { %v6446_v56 = vmul.f32 %v6444_v27, %v6429_v6 }
0x891d   : > { %6448 = vrot.lane.b32.xlu1 %v6446_v56, %s10229_s6 }
0x891e   : > { %v6253_v32 = vpop.permute.xlu0 %6252 }
0x8922   : > { %v6452_v2 = vpop.permute.xlu0 %6451 }
0x898b   : > { %v6250_v31 = vpop.permute.xlu1 %6249 }
0x898c   : > { %v6255_v48 = vsel %vm300_vm1, %v6250_v31, %v6253_v32 }
0x898d   : > { %9445 = vmatmul.mubr.msk.f32.vlgmr.msra.gmra.mrb[74].mxu1 %vm404_vm2, %v6255_v48 }
0x898e   : > { %9793 = vmatpush3.bf16.msra.mxu1 %v10353_v50  ;;  %9456 = vmatprep.mubr.msk.f32.mxu1 %vm10224_vm0, %v10223_v5 }
0x898f   : > { %v11667_v21 = vpop.permute.xlu1 %6448  ;;  %9797 = vmatprep.subr.bf16.mxu1 %v10227_v49 }
0x8990   : > { %v6454_v6 = vsel %vm300_vm1, %v11667_v21, %v6452_v2 }
0x8991   : > { %9457 = vmatmul.mubr.msk.f32.vlgmr.msra.gmra.mrb[76].mxu1 %vm404_vm2, %v6454_v6 }
0x8992   : > { %9799 = vmatpush3.bf16.msra.mxu1 %v10414_v30  ;;  %9470 = vmatprep.mubr.msk.f32.mxu1 %vm10224_vm0, %v10223_v5 }
0x8993   : > { %9803 = vmatprep.subr.bf16.mxu1 %v10227_v49 }
0x8a60   : > { %v11677_v18 = vpop.f32.mrb[74].mxu1 }
0x8a61   : > { %v9446_v59 = vpop.f32.mrb[75].mxu1 }
0x8a64   : > { %v6524_v14 = vpop.f32.mrb[76].mxu1 }
0x8a65   : > { %v6525_v44 = vadd.f32 %v6524_v14, %v10371_v57  ;;  %v9458_v10 = vpop.f32.mrb[77].mxu1 }
0x8a67   : > { %10100 = vtanh.f32 %v6525_v44 }
0x8a71   : > { %v10101_v37 = vpop.eup %10100 }
0x8a72   : > { %6533 = vrot.lane.b32.xlu1 %v10101_v37, %s10225_s27  ;;  %v6529_v9 = vmul.f32 0.5, %v10101_v37 }
0x8a74   : > { %v6530_v61 = vadd.f32 0.5, %v6529_v9 }
0x8a76   : > { %v6531_v15 = vmul.f32 %v6530_v61, %v11478_v4 }
0x8ae4   : > { %v6534_v47 = vpop.permute.xlu1 %6533 }
0x8ae5   : > { %v6536_v33 = vmul.f32 %v6534_v47, %v6530_v61 }
0x8ae7   : > { %6538 = vrot.lane.b32.xlu0 %v6536_v33, %s10226_s28 }
0x8b59   : > { %v6539_v27 = vpop.permute.xlu0 %6538 }
0x8b5a   : > { %v11683_v56 = vadd.f32 %v6539_v27, %v6531_v15 }
0x8b5c   : > { %10102 = vtanh.f32 %v11683_v56 }
0x8b66   : > { %v10103_v32 = vpop.eup %10102 }
0x8b67   : > { %6544 = vrot.lane.b32.xlu1 %v10103_v32, %s10228_s5 }
0x8b6b   : > { %6552 = vrot.lane.b32.xlu1 %v11504_v24, %s10225_s27 }
0x8bd9   : > { %v6545_v31 = vpop.permute.xlu1 %6544 }
0x8bda   : > { %v11689_v48 = vmul.f32 %v6545_v31, %v6530_v61 }
0x8bdc   : > { %6549 = vrot.lane.b32.xlu0 %v11689_v48, %s10229_s6 }
0x8bdd   : > { %v6553_v2 = vpop.permute.xlu1 %6552 }
0x8c4e   : > { %v6550_v6 = vpop.permute.xlu0 %6549 }
0x8c4f   : > { %v6555_v4 = vsel %vm300_vm1, %v6550_v6, %v6553_v2 }
0x8c50   : > { %9464 = vmatmul.mubr.msk.f32.vlgmr.msra.gmra.mrb[54].mxu0 %vm404_vm2, %v6555_v4 }
0x8c51   : > { %9802 = vmatpush3.bf16.msra.mxu0 %v10443_v62  ;;  %9477 = vmatprep.mubr.msk.f32.mxu0 %vm10224_vm0, %v10223_v5 }
0x8c52   : > { %9806 = vmatprep.subr.bf16.mxu0 %v10227_v49 }
0x8d23   : > { %v6625_v24 = vpop.f32.mrb[54].mxu0 }
0x8d24   : > { %v6626_v59 = vadd.f32 %v6625_v24, %v10400_v16  ;;  %v9465_v14 = vpop.f32.mrb[55].mxu0 }
0x8d26   : > { %10104 = vtanh.f32 %v6626_v59 }
0x8d30   : > { %v10105_v44 = vpop.eup %10104 }
0x8d31   : > { %6634 = vrot.lane.b32.xlu0 %v10105_v44, %s10225_s27  ;;  %v6630_v10 = vmul.f32 0.5, %v10105_v44 }
0x8d33   : > { %v6631_v37 = vadd.f32 0.5, %v6630_v10 }
0x8d35   : > { %v6632_v47 = vmul.f32 %v6631_v37, %v11498_v23 }
0x8da3   : > { %v6635_v9 = vpop.permute.xlu0 %6634 }
0x8da4   : > { %v6637_v61 = vmul.f32 %v6635_v9, %v6631_v37 }
0x8da6   : > { %6639 = vrot.lane.b32.xlu1 %v6637_v61, %s10226_s28 }
0x8e18   : > { %v6640_v33 = vpop.permute.xlu1 %6639 }
0x8e19   : > { %v11703_v15 = vadd.f32 %v6640_v33, %v6632_v47 }
0x8e1b   : > { %10106 = vtanh.f32 %v11703_v15 }
0x8e25   : > { %v10107_v27 = vpop.eup %10106 }
0x8e26   : > { %6645 = vrot.lane.b32.xlu0 %v10107_v27, %s10228_s5 }
0x8e2a   : > { %6653 = vrot.lane.b32.xlu0 %v11524_v54, %s10225_s27 }
0x8e98   : > { %v6646_v32 = vpop.permute.xlu0 %6645 }
0x8e99   : > { %v11709_v31 = vmul.f32 %v6646_v32, %v6631_v37 }
0x8e9b   : > { %6650 = vrot.lane.b32.xlu1 %v11709_v31, %s10229_s6 }
0x8e9c   : > { %v6654_v2 = vpop.permute.xlu0 %6653 }
0x8f0d   : > { %v6651_v6 = vpop.permute.xlu1 %6650 }
0x8f0e   : > { %v6656_v23 = vsel %vm300_vm1, %v6651_v6, %v6654_v2 }
0x8f0f   : > { %9471 = vmatmul.mubr.msk.f32.vlgmr.msra.gmra.mrb[78].mxu1 %vm404_vm2, %v6656_v23 }
0x8f10   : > { %9805 = vmatpush3.bf16.msra.mxu1 %v10472_v25  ;;  %9484 = vmatprep.mubr.msk.f32.mxu1 %vm10224_vm0, %v10223_v5 }
0x8f11   : > { %9809 = vmatprep.subr.bf16.mxu1 %v10227_v49 }
0x8fe2   : > { %v6726_v54 = vpop.f32.mrb[78].mxu1 }
0x8fe3   : > { %v6727_v4 = vadd.f32 %v6726_v54, %v10429_v42  ;;  %v9472_v24 = vpop.f32.mrb[79].mxu1 }
0x8fe5   : > { %10108 = vtanh.f32 %v6727_v4 }
0x8fef   : > { %v10109_v59 = vpop.eup %10108 }
0x8ff0   : > { %6735 = vrot.lane.b32.xlu1 %v10109_v59, %s10225_s27  ;;  %v6731_v14 = vmul.f32 0.5, %v10109_v59 }
0x8ff2   : > { %v6732_v44 = vadd.f32 0.5, %v6731_v14 }
0x8ff4   : > { %v6733_v9 = vmul.f32 %v6732_v44, %v11518_v41 }
0x9062   : > { %v6736_v10 = vpop.permute.xlu1 %6735 }
0x9063   : > { %v6738_v37 = vmul.f32 %v6736_v10, %v6732_v44 }
0x9065   : > { %6740 = vrot.lane.b32.xlu0 %v6738_v37, %s10226_s28 }
0x90d7   : > { %v6741_v61 = vpop.permute.xlu0 %6740 }
0x90d8   : > { %v11723_v47 = vadd.f32 %v6741_v61, %v6733_v9 }
0x90da   : > { %10110 = vtanh.f32 %v11723_v47 }
0x90e4   : > { %v10111_v33 = vpop.eup %10110 }
0x90e5   : > { %6746 = vrot.lane.b32.xlu1 %v10111_v33, %s10228_s5 }
0x90e9   : > { %6754 = vrot.lane.b32.xlu1 %v11544_v28, %s10225_s27 }
0x9157   : > { %v6747_v27 = vpop.permute.xlu1 %6746 }
0x9158   : > { %v11729_v32 = vmul.f32 %v6747_v27, %v6732_v44 }
0x915a   : > { %6751 = vrot.lane.b32.xlu0 %v11729_v32, %s10229_s6 }
0x915b   : > { %v6755_v2 = vpop.permute.xlu1 %6754 }
0x91cc   : > { %v6752_v6 = vpop.permute.xlu0 %6751 }
0x91cd   : > { %v6757_v41 = vsel %vm300_vm1, %v6752_v6, %v6755_v2 }
0x91ce   : > { %9478 = vmatmul.mubr.msk.f32.vlgmr.msra.gmra.mrb[56].mxu0 %vm404_vm2, %v6757_v41 }
0x91cf   : > { %9808 = vmatpush3.bf16.msra.mxu0 %v10501_v63  ;;  %9491 = vmatprep.mubr.msk.f32.mxu0 %vm10224_vm0, %v10223_v5 }
0x91d0   : > { %9812 = vmatprep.subr.bf16.mxu0 %v10227_v49 }
0x92a1   : > { %v6827_v28 = vpop.f32.mrb[56].mxu0 }
0x92a2   : > { %v6828_v23 = vadd.f32 %v6827_v28, %v10458_v7  ;;  %v9479_v54 = vpop.f32.mrb[57].mxu0 }
0x92a4   : > { %10112 = vtanh.f32 %v6828_v23 }
0x92ae   : > { %v10113_v4 = vpop.eup %10112 }
0x92af   : > { %6836 = vrot.lane.b32.xlu0 %v10113_v4, %s10225_s27  ;;  %v6832_v24 = vmul.f32 0.5, %v10113_v4 }
0x92b1   : > { %v6833_v59 = vadd.f32 0.5, %v6832_v24 }
0x92b3   : > { %v6834_v10 = vmul.f32 %v6833_v59, %v11538_v20 }
0x9321   : > { %v6837_v14 = vpop.permute.xlu0 %6836 }
0x9322   : > { %v6839_v44 = vmul.f32 %v6837_v14, %v6833_v59 }
0x9324   : > { %6841 = vrot.lane.b32.xlu1 %v6839_v44, %s10226_s28 }
0x9396   : > { %v6842_v37 = vpop.permute.xlu1 %6841 }
0x9397   : > { %v11743_v9 = vadd.f32 %v6842_v37, %v6834_v10 }
0x9399   : > { %10114 = vtanh.f32 %v11743_v9 }
0x93a3   : > { %v10115_v61 = vpop.eup %10114 }
0x93a4   : > { %6847 = vrot.lane.b32.xlu0 %v10115_v61, %s10228_s5 }
0x93a8   : > { %6855 = vrot.lane.b32.xlu0 %v11564_v43, %s10225_s27 }
0x9416   : > { %v6848_v33 = vpop.permute.xlu0 %6847 }
0x9417   : > { %v11749_v27 = vmul.f32 %v6848_v33, %v6833_v59 }
0x9419   : > { %6852 = vrot.lane.b32.xlu1 %v11749_v27, %s10229_s6 }
0x941a   : > { %v6856_v2 = vpop.permute.xlu0 %6855 }
0x948b   : > { %v6853_v6 = vpop.permute.xlu1 %6852 }
0x948c   : > { %v6858_v20 = vsel %vm300_vm1, %v6853_v6, %v6856_v2 }
0x948d   : > { %9485 = vmatmul.mubr.msk.f32.vlgmr.msra.gmra.mrb[80].mxu1 %vm404_vm2, %v6858_v20 }
0x948e   : > { %9811 = vmatpush3.bf16.msra.mxu1 %v10532_v39  ;;  %9498 = vmatprep.mubr.msk.f32.mxu1 %vm10224_vm0, %v10223_v5 }
0x948f   : > { %9815 = vmatprep.subr.bf16.mxu1 %v10227_v49 }
0x9560   : > { %v6928_v43 = vpop.f32.mrb[80].mxu1 }
0x9561   : > { %v6929_v41 = vadd.f32 %v6928_v43, %v10487_v40  ;;  %v9486_v28 = vpop.f32.mrb[81].mxu1 }
0x9563   : > { %10116 = vtanh.f32 %v6929_v41 }
0x956d   : > { %v10117_v23 = vpop.eup %10116 }
0x956e   : > { %6937 = vrot.lane.b32.xlu1 %v10117_v23, %s10225_s27  ;;  %v6933_v54 = vmul.f32 0.5, %v10117_v23 }
0x9570   : > { %v6934_v4 = vadd.f32 0.5, %v6933_v54 }
0x9572   : > { %v6935_v14 = vmul.f32 %v6934_v4, %v11558_v12 }
0x95e0   : > { %v6938_v24 = vpop.permute.xlu1 %6937 }
0x95e1   : > { %v6940_v59 = vmul.f32 %v6938_v24, %v6934_v4 }
0x95e3   : > { %6942 = vrot.lane.b32.xlu0 %v6940_v59, %s10226_s28 }
0x9655   : > { %v6943_v44 = vpop.permute.xlu0 %6942 }
0x9656   : > { %v11763_v10 = vadd.f32 %v6943_v44, %v6935_v14 }
0x9658   : > { %10118 = vtanh.f32 %v11763_v10 }
0x9662   : > { %v10119_v37 = vpop.eup %10118 }
0x9663   : > { %6948 = vrot.lane.b32.xlu1 %v10119_v37, %s10228_s5 }
0x9667   : > { %6956 = vrot.lane.b32.xlu1 %v11584_v22, %s10225_s27 }
0x96d5   : > { %v6949_v61 = vpop.permute.xlu1 %6948 }
0x96d6   : > { %v11769_v33 = vmul.f32 %v6949_v61, %v6934_v4 }
0x96d8   : > { %6953 = vrot.lane.b32.xlu0 %v11769_v33, %s10229_s6 }
0x96d9   : > { %v6957_v2 = vpop.permute.xlu1 %6956 }
0x974a   : > { %v6954_v6 = vpop.permute.xlu0 %6953 }
0x974b   : > { %v6959_v12 = vsel %vm300_vm1, %v6954_v6, %v6957_v2 }
0x974c   : > { %9492 = vmatmul.mubr.msk.f32.vlgmr.msra.gmra.mrb[58].mxu0 %vm404_vm2, %v6959_v12 }
0x974d   : > { %9814 = vmatpush3.bf16.msra.mxu0 %v10561_v17  ;;  %9505 = vmatprep.mubr.msk.f32.mxu0 %vm10224_vm0, %v10223_v5 }
0x974e   : > { %9515 = vmatprep.subr.mxu0 %v10223_v5 }
0x981f   : > { %v7029_v22 = vpop.f32.mrb[58].mxu0 }
0x9820   : > { %v7030_v20 = vadd.f32 %v7029_v22, %v10518_v13  ;;  %v9493_v43 = vpop.f32.mrb[59].mxu0 }
0x9822   : > { %10120 = vtanh.f32 %v7030_v20 }
0x982c   : > { %v10121_v41 = vpop.eup %10120 }
0x982d   : > { %7038 = vrot.lane.b32.xlu0 %v10121_v41, %s10225_s27  ;;  %v7034_v28 = vmul.f32 0.5, %v10121_v41 }
0x982f   : > { %v7035_v23 = vadd.f32 0.5, %v7034_v28 }
0x9831   : > { %v7036_v24 = vmul.f32 %v7035_v23, %v11578_v11 }
0x989f   : > { %v7039_v54 = vpop.permute.xlu0 %7038 }
0x98a0   : > { %v7041_v4 = vmul.f32 %v7039_v54, %v7035_v23 }
0x98a2   : > { %7043 = vrot.lane.b32.xlu1 %v7041_v4, %s10226_s28 }
0x9914   : > { %v7044_v59 = vpop.permute.xlu1 %7043 }
0x9915   : > { %v11783_v14 = vadd.f32 %v7044_v59, %v7036_v24 }
0x9917   : > { %10122 = vtanh.f32 %v11783_v14 }
0x9921   : > { %v10123_v44 = vpop.eup %10122 }
0x9922   : > { %7049 = vrot.lane.b32.xlu0 %v10123_v44, %s10228_s5  ;;  %v6326_v44 = vadd.f32 %v11677_v18, %v10793_v1 }
0x9926   : > { %7057 = vrot.lane.b32.xlu0 %v11606_v45, %s10225_s27 }
0x9994   : > { %v7050_v37 = vpop.permute.xlu0 %7049 }
0x9995   : > { %v11789_v61 = vmul.f32 %v7050_v37, %v7035_v23 }
0x9997   : > { %7054 = vrot.lane.b32.xlu1 %v11789_v61, %s10229_s6 }
0x9998   : > { %v7058_v2 = vpop.permute.xlu0 %7057 }
0x9a09   : > { %v7055_v6 = vpop.permute.xlu1 %7054 }
0x9a0a   : > { %v7060_v11 = vsel %vm300_vm1, %v7055_v6, %v7058_v2 }
0x9a0b   : > { %9499 = vmatmul.mubr.msk.f32.vlgmr.msra.gmra.mrb[82].mxu1 %vm404_vm2, %v7060_v11 }
0x9a0c   : > { %9817 = vmatpush3.bf16.msra.mxu1 %v10596_v0  ;;  %9512 = vmatprep.mubr.msk.f32.mxu1 %vm10224_vm0, %v10223_v5 }
0x9a0d   : > { %9818 = vmatprep.subr.bf16.mxu1 %v10227_v49 }
0x9ade   : > { %v7130_v45 = vpop.f32.mrb[82].mxu1 }
0x9adf   : > { %v7131_v12 = vadd.f32 %v7130_v45, %v10547_v51  ;;  %v9500_v22 = vpop.f32.mrb[83].mxu1 }
0x9ae1   : > { %10124 = vtanh.f32 %v7131_v12 }
0x9aeb   : > { %v10125_v20 = vpop.eup %10124 }
0x9aec   : > { %7139 = vrot.lane.b32.xlu1 %v10125_v20, %s10225_s27  ;;  %v7135_v43 = vmul.f32 0.5, %v10125_v20 }
0x9aee   : > { %v7136_v41 = vadd.f32 0.5, %v7135_v43 }
0x9af0   : > { %v7137_v54 = vmul.f32 %v7136_v41, %v11598_v53 }
0x9b5e   : > { %v7140_v28 = vpop.permute.xlu1 %7139 }
0x9b5f   : > { %v7142_v23 = vmul.f32 %v7140_v28, %v7136_v41 }
0x9b61   : > { %7144 = vrot.lane.b32.xlu0 %v7142_v23, %s10226_s28 }
0x9bd3   : > { %v7145_v4 = vpop.permute.xlu0 %7144 }
0x9bd4   : > { %v11803_v24 = vadd.f32 %v7145_v4, %v7137_v54 }
0x9bd6   : > { %10126 = vtanh.f32 %v11803_v24 }
0x9bd7   : > { %10128 = vtanh.f32 %v6326_v44 }
0x9be0   : > { %v10127_v59 = vpop.eup %10126 }
0x9be1   : > { %7150 = vrot.lane.b32.xlu1 %v10127_v59, %s10228_s5  ;;  %v10129_v53 = vpop.eup %10128 }
0x9be5   : > { %7158 = vrot.lane.b32.xlu1 %v11657_v38, %s10225_s27 }
0x9c53   : > { %v7151_v37 = vpop.permute.xlu1 %7150 }
0x9c54   : > { %v11811_v2 = vmul.f32 %v7151_v37, %v7136_v41 }
0x9c56   : > { %7155 = vrot.lane.b32.xlu0 %v11811_v2, %s10229_s6 }
0x9c57   : > { %v7159_v6 = vpop.permute.xlu1 %7158 }
0x9c5a   : > { %6334 = vrot.lane.b32.xlu0 %v10129_v53, %s10225_s27 }
0x9cc8   : > { %v7156_v11 = vpop.permute.xlu0 %7155 }
0x9cc9   : > { %v7161_v45 = vsel %vm300_vm1, %v7156_v11, %v7159_v6 }
0x9cca   : > { %9506 = vmatmul.mubr.msk.f32.vlgmr.msra.gmra.mrb[60].mxu0 %vm404_vm2, %v7161_v45 }
0x9ccb   : > { %9516 = vmatpush3.msra.mxu0 %v11616_v55  ;;  %9517 = vmatprep.mubr.msk.f32.mxu0 %vm10224_vm0, %v10223_v5  ;;  %v297_v55 = vadd.f32 %v10750_v3, %v10336_v34 }
0x9ccc   : > { %9821 = vmatprep.subr.bf16.mxu0 %v10227_v49 }
0x9cce   : > { %9518 = vmatmul.mubr.msk.f32.vlgmr.msra.gmra.mrb[62].mxu0 %vm300_vm1, %v11667_v21  ;;  %v6330_v21 = vmul.f32 0.5, %v10129_v53 }
0x9ccf   : > { %9823 = vmatpush3.bf16.msra.mxu0 %v10385_v8  ;;  %9531 = vmatprep.mubr.msk.f32.mxu0 %vm10224_vm0, %v10223_v5  ;;  %v6335_v8 = vpop.permute.xlu0 %6334 }
0x9cd0   : > { %9827 = vmatprep.subr.bf16.mxu0 %v10227_v49  ;;  %v6331_v28 = vadd.f32 0.5, %v6330_v21 }
0x9cd2   : > { %v6337_v23 = vmul.f32 %v6335_v8, %v6331_v28  ;;  %v6332_v37 = vmul.f32 %v6331_v28, %v11636_v19 }
0x9d9d   : > { %v7231_v38 = vpop.f32.mrb[60].mxu0 }
0x9d9e   : > { %v7232_v18 = vadd.f32 %v7231_v38, %v10582_v26  ;;  %v9507_v12 = vpop.f32.mrb[61].mxu0 }
0x9da0   : > { %10130 = vtanh.f32 %v7232_v18 }
0x9da1   : > { %v7429_v22 = vpop.f32.mrb[62].mxu0 }
0x9da2   : > { %v7433_v20 = vadd.f32 %v7429_v22, %v297_v55  ;;  %v9519_v43 = vpop.f32.mrb[63].mxu0 }
0x9da4   : > { %10132 = vtanh.f32 %v7433_v20 }
0x9daa   : > { %v10131_v41 = vpop.eup %10130 }
0x9dab   : > { %7240 = vrot.lane.b32.xlu1 %v10131_v41, %s10225_s27  ;;  %v7236_v4 = vmul.f32 0.5, %v10131_v41 }
0x9dad   : > { %v7237_v59 = vadd.f32 0.5, %v7236_v4 }
0x9dae   : > { %v10133_v54 = vpop.eup %10132 }
0x9daf   : > { %6339 = vrot.lane.b32.xlu1 %v6337_v23, %s10226_s28  ;;  %7439 = vrot.lane.b32.xlu0 %v10133_v54, %s10225_s27  ;;  %v7435_v34 = vmul.f32 0.5, %v10133_v54  ;;  %v7238_v12 = vmul.f32 %v7237_v59, %v11642_v29 }
0x9db1   : > { %v7436_v53 = vadd.f32 0.5, %v7435_v34 }
0x9db3   : > { %v7437_v19 = vmul.f32 %v7436_v53, %v11646_v35 }
0x9e1d   : > { %v7241_v3 = vpop.permute.xlu1 %7240 }
0x9e1e   : > { %v7243_v44 = vmul.f32 %v7241_v3, %v7237_v59 }
0x9e20   : > { %7245 = vrot.lane.b32.xlu0 %v7243_v44, %s10226_s28 }
0x9e21   : > { %v6340_v6 = vpop.permute.xlu1 %6339  ;;  %v7440_v11 = vpop.permute.xlu0 %7439 }
0x9e22   : > { %v11836_v45 = vadd.f32 %v6340_v6, %v6332_v37  ;;  %v7442_v38 = vmul.f32 %v7440_v11, %v7436_v53 }
0x9e24   : > { %10134 = vtanh.f32 %v11836_v45  ;;  %7444 = vrot.lane.b32.xlu1 %v7442_v38, %s10226_s28 }
0x9e2e   : > { %v10135_v18 = vpop.eup %10134 }
0x9e2f   : > { %6345 = vrot.lane.b32.xlu0 %v10135_v18, %s10228_s5 }
0x9e92   : > { %v7246_v55 = vpop.permute.xlu0 %7245 }
0x9e93   : > { %v11842_v22 = vadd.f32 %v7246_v55, %v7238_v12 }
0x9e95   : > { %10136 = vtanh.f32 %v11842_v22 }
0x9e96   : > { %v7445_v20 = vpop.permute.xlu1 %7444 }
0x9e97   : > { %v7447_v43 = vadd.f32 %v7445_v20, %v7437_v19 }
0x9e99   : > { %10138 = vtanh.f32 %v7447_v43 }
0x9e9f   : > { %v10137_v21 = vpop.eup %10136 }
0x9ea0   : > { %7251 = vrot.lane.b32.xlu1 %v10137_v21, %s10228_s5 }
0x9ea1   : > { %v6346_v8 = vpop.permute.xlu0 %6345 }
0x9ea2   : > { %v11848_v23 = vmul.f32 %v6346_v8, %v6331_v28 }
0x9ea3   : > { %v10139_v41 = vpop.eup %10138 }
0x9ea4   : > { %7450 = vrot.lane.b32.xlu0 %v10139_v41, %s10228_s5 }
0x9ea8   : > { %7259 = vrot.lane.b32.xlu0 %v11848_v23, %s10225_s27 }
0x9eac   : > { %7458 = vrot.lane.b32.xlu0 %v11689_v48, %s10225_s27 }
0x9f12   : > { %v7252_v29 = vpop.permute.xlu1 %7251 }
0x9f13   : > { %v11854_v35 = vmul.f32 %v7252_v29, %v7237_v59 }
0x9f15   : > { %7256 = vrot.lane.b32.xlu1 %v11854_v35, %s10229_s6 }
0x9f16   : > { %v7451_v54 = vpop.permute.xlu0 %7450 }
0x9f17   : > { %v7453_v4 = vmul.f32 %v7451_v54, %v7436_v53 }
0x9f19   : > { %7455 = vrot.lane.b32.xlu1 %v7453_v4, %s10229_s6 }
0x9f1a   : > { %v7260_v34 = vpop.permute.xlu0 %7259 }
0x9f1e   : > { %v7459_v48 = vpop.permute.xlu0 %7458 }
0x9f87   : > { %v7257_v3 = vpop.permute.xlu1 %7256 }
0x9f88   : > { %v7262_v28 = vsel %vm300_vm1, %v7257_v3, %v7260_v34 }
0x9f89   : > { %9513 = vmatmul.mubr.msk.f32.vlgmr.msra.gmra.mrb[84].mxu1 %vm404_vm2, %v7262_v28 }
0x9f8a   : > { %9820 = vmatpush3.bf16.msra.mxu1 %v10353_v50  ;;  %9524 = vmatprep.mubr.msk.f32.mxu1 %vm10224_vm0, %v10223_v5 }
0x9f8b   : > { %v7456_v59 = vpop.permute.xlu1 %7455  ;;  %9824 = vmatprep.subr.bf16.mxu1 %v10227_v49 }
0x9f8c   : > { %v7461_v44 = vsel %vm300_vm1, %v7456_v59, %v7459_v48 }
0x9f8d   : > { %9525 = vmatmul.mubr.msk.f32.vlgmr.msra.gmra.mrb[86].mxu1 %vm404_vm2, %v7461_v44 }
0x9f8e   : > { %9826 = vmatpush3.bf16.msra.mxu1 %v10414_v30  ;;  %9538 = vmatprep.mubr.msk.f32.mxu1 %vm10224_vm0, %v10223_v5 }
0x9f8f   : > { %9830 = vmatprep.subr.bf16.mxu1 %v10227_v49 }
0xa05c   : > { %v11871_v37 = vpop.f32.mrb[84].mxu1 }
0xa05d   : > { %v9514_v50 = vpop.f32.mrb[85].mxu1 }
0xa060   : > { %v7531_v53 = vpop.f32.mrb[86].mxu1 }
0xa061   : > { %v7532_v6 = vadd.f32 %v7531_v53, %v10371_v57  ;;  %v9526_v11 = vpop.f32.mrb[87].mxu1 }
0xa063   : > { %10140 = vtanh.f32 %v7532_v6 }
0xa06d   : > { %v10141_v38 = vpop.eup %10140 }
0xa06e   : > { %7540 = vrot.lane.b32.xlu1 %v10141_v38, %s10225_s27  ;;  %v7536_v18 = vmul.f32 0.5, %v10141_v38 }
0xa070   : > { %v7537_v12 = vadd.f32 0.5, %v7536_v18 }
0xa072   : > { %v7538_v19 = vmul.f32 %v7537_v12, %v11683_v56 }
0xa0e0   : > { %v7541_v55 = vpop.permute.xlu1 %7540 }
0xa0e1   : > { %v7543_v30 = vmul.f32 %v7541_v55, %v7537_v12 }
0xa0e3   : > { %7545 = vrot.lane.b32.xlu0 %v7543_v30, %s10226_s28 }
0xa155   : > { %v7546_v20 = vpop.permute.xlu0 %7545 }
0xa156   : > { %v7548_v43 = vadd.f32 %v7546_v20, %v7538_v19 }
0xa158   : > { %10142 = vtanh.f32 %v7548_v43 }
0xa162   : > { %v10143_v21 = vpop.eup %10142 }
0xa163   : > { %7551 = vrot.lane.b32.xlu1 %v10143_v21, %s10228_s5 }
0xa167   : > { %7559 = vrot.lane.b32.xlu1 %v11709_v31, %s10225_s27 }
0xa1d5   : > { %v7552_v57 = vpop.permute.xlu1 %7551 }
0xa1d6   : > { %v7554_v41 = vmul.f32 %v7552_v57, %v7537_v12 }
0xa1d8   : > { %7556 = vrot.lane.b32.xlu0 %v7554_v41, %s10229_s6 }
0xa1d9   : > { %v7560_v8 = vpop.permute.xlu1 %7559 }
0xa24a   : > { %v7557_v29 = vpop.permute.xlu0 %7556 }
0xa24b   : > { %v7562_v54 = vsel %vm300_vm1, %v7557_v29, %v7560_v8 }
0xa24c   : > { %9532 = vmatmul.mubr.msk.f32.vlgmr.msra.gmra.mrb[64].mxu0 %vm404_vm2, %v7562_v54 }
0xa24d   : > { %9829 = vmatpush3.bf16.msra.mxu0 %v10443_v62  ;;  %9545 = vmatprep.mubr.msk.f32.mxu0 %vm10224_vm0, %v10223_v5 }
0xa24e   : > { %9833 = vmatprep.subr.bf16.mxu0 %v10227_v49 }
0xa31f   : > { %v7632_v56 = vpop.f32.mrb[64].mxu0 }
0xa320   : > { %v7633_v31 = vadd.f32 %v7632_v56, %v10400_v16  ;;  %v9533_v4 = vpop.f32.mrb[65].mxu0 }
0xa322   : > { %10144 = vtanh.f32 %v7633_v31 }
0xa32c   : > { %v10145_v34 = vpop.eup %10144 }
0xa32d   : > { %7641 = vrot.lane.b32.xlu0 %v10145_v34, %s10225_s27  ;;  %v7637_v3 = vmul.f32 0.5, %v10145_v34 }
0xa32f   : > { %v7638_v28 = vadd.f32 0.5, %v7637_v3 }
0xa331   : > { %v7639_v62 = vmul.f32 %v7638_v28, %v11703_v15 }
0xa39f   : > { %v7642_v48 = vpop.permute.xlu0 %7641 }
0xa3a0   : > { %v7644_v59 = vmul.f32 %v7642_v48, %v7638_v28 }
0xa3a2   : > { %7646 = vrot.lane.b32.xlu1 %v7644_v59, %s10226_s28 }
0xa414   : > { %v7647_v44 = vpop.permute.xlu1 %7646 }
0xa415   : > { %v7649_v50 = vadd.f32 %v7647_v44, %v7639_v62 }
0xa417   : > { %10146 = vtanh.f32 %v7649_v50 }
0xa421   : > { %v10147_v53 = vpop.eup %10146 }
0xa422   : > { %7652 = vrot.lane.b32.xlu0 %v10147_v53, %s10228_s5 }
0xa426   : > { %7660 = vrot.lane.b32.xlu0 %v11729_v32, %s10225_s27 }
0xa494   : > { %v7653_v16 = vpop.permute.xlu0 %7652 }
0xa495   : > { %v7655_v6 = vmul.f32 %v7653_v16, %v7638_v28 }
0xa497   : > { %7657 = vrot.lane.b32.xlu1 %v7655_v6, %s10229_s6 }
0xa498   : > { %v7661_v11 = vpop.permute.xlu0 %7660 }
0xa509   : > { %v7658_v38 = vpop.permute.xlu1 %7657 }
0xa50a   : > { %v7663_v18 = vsel %vm300_vm1, %v7658_v38, %v7661_v11 }
0xa50b   : > { %9539 = vmatmul.mubr.msk.f32.vlgmr.msra.gmra.mrb[88].mxu1 %vm404_vm2, %v7663_v18 }
0xa50c   : > { %9832 = vmatpush3.bf16.msra.mxu1 %v10472_v25  ;;  %9552 = vmatprep.mubr.msk.f32.mxu1 %vm10224_vm0, %v10223_v5 }
0xa50d   : > { %9836 = vmatprep.subr.bf16.mxu1 %v10227_v49 }
0xa5de   : > { %v7733_v15 = vpop.f32.mrb[88].mxu1 }
0xa5df   : > { %v7734_v32 = vadd.f32 %v7733_v15, %v10429_v42  ;;  %v9540_v12 = vpop.f32.mrb[89].mxu1 }
0xa5e1   : > { %10148 = vtanh.f32 %v7734_v32 }
0xa5eb   : > { %v10149_v55 = vpop.eup %10148 }
0xa5ec   : > { %7742 = vrot.lane.b32.xlu1 %v10149_v55, %s10225_s27  ;;  %v7738_v30 = vmul.f32 0.5, %v10149_v55 }
0xa5ee   : > { %v7739_v19 = vadd.f32 0.5, %v7738_v30 }
0xa5f0   : > { %v7740_v25 = vmul.f32 %v7739_v19, %v11723_v47 }
0xa65e   : > { %v7743_v20 = vpop.permute.xlu1 %7742 }
0xa65f   : > { %v7745_v43 = vmul.f32 %v7743_v20, %v7739_v19 }
0xa661   : > { %7747 = vrot.lane.b32.xlu0 %v7745_v43, %s10226_s28 }
0xa6d3   : > { %v7748_v21 = vpop.permute.xlu0 %7747 }
0xa6d4   : > { %v7750_v57 = vadd.f32 %v7748_v21, %v7740_v25 }
0xa6d6   : > { %10150 = vtanh.f32 %v7750_v57 }
0xa6e0   : > { %v10151_v41 = vpop.eup %10150 }
0xa6e1   : > { %7753 = vrot.lane.b32.xlu1 %v10151_v41, %s10228_s5 }
0xa6e5   : > { %7761 = vrot.lane.b32.xlu1 %v11749_v27, %s10225_s27 }
0xa753   : > { %v7754_v42 = vpop.permute.xlu1 %7753 }
0xa754   : > { %v7756_v8 = vmul.f32 %v7754_v42, %v7739_v19 }
0xa756   : > { %7758 = vrot.lane.b32.xlu0 %v7756_v8, %s10229_s6 }
0xa757   : > { %v7762_v29 = vpop.permute.xlu1 %7761 }
0xa7c8   : > { %v7759_v54 = vpop.permute.xlu0 %7758 }
0xa7c9   : > { %v7764_v56 = vsel %vm300_vm1, %v7759_v54, %v7762_v29 }
0xa7ca   : > { %9546 = vmatmul.mubr.msk.f32.vlgmr.msra.gmra.mrb[66].mxu0 %vm404_vm2, %v7764_v56 }
0xa7cb   : > { %9835 = vmatpush3.bf16.msra.mxu0 %v10501_v63  ;;  %9559 = vmatprep.mubr.msk.f32.mxu0 %vm10224_vm0, %v10223_v5 }
0xa7cc   : > { %9839 = vmatprep.subr.bf16.mxu0 %v10227_v49 }
0xa89d   : > { %v7834_v47 = vpop.f32.mrb[66].mxu0 }
0xa89e   : > { %v7835_v27 = vadd.f32 %v7834_v47, %v10458_v7  ;;  %v9547_v31 = vpop.f32.mrb[67].mxu0 }
0xa8a0   : > { %10152 = vtanh.f32 %v7835_v27 }
0xa8aa   : > { %v10153_v4 = vpop.eup %10152 }
0xa8ab   : > { %7843 = vrot.lane.b32.xlu0 %v10153_v4, %s10225_s27  ;;  %v7839_v34 = vmul.f32 0.5, %v10153_v4 }
0xa8ad   : > { %v7840_v3 = vadd.f32 0.5, %v7839_v34 }
0xa8af   : > { %v7841_v63 = vmul.f32 %v7840_v3, %v11743_v9 }
0xa91d   : > { %v7844_v28 = vpop.permute.xlu0 %7843 }
0xa91e   : > { %v7846_v48 = vmul.f32 %v7844_v28, %v7840_v3 }
0xa920   : > { %7848 = vrot.lane.b32.xlu1 %v7846_v48, %s10226_s28 }
0xa992   : > { %v7849_v59 = vpop.permute.xlu1 %7848 }
0xa993   : > { %v7851_v62 = vadd.f32 %v7849_v59, %v7841_v63 }
0xa995   : > { %10154 = vtanh.f32 %v7851_v62 }
0xa99f   : > { %v10155_v44 = vpop.eup %10154 }
0xa9a0   : > { %7854 = vrot.lane.b32.xlu0 %v10155_v44, %s10228_s5 }
0xa9a4   : > { %7862 = vrot.lane.b32.xlu0 %v11769_v33, %s10225_s27 }
0xaa12   : > { %v7855_v7 = vpop.permute.xlu0 %7854 }
0xaa13   : > { %v7857_v50 = vmul.f32 %v7855_v7, %v7840_v3 }
0xaa15   : > { %7859 = vrot.lane.b32.xlu1 %v7857_v50, %s10229_s6 }
0xaa16   : > { %v7863_v53 = vpop.permute.xlu0 %7862 }
0xaa87   : > { %v7860_v16 = vpop.permute.xlu1 %7859 }
0xaa88   : > { %v7865_v6 = vsel %vm300_vm1, %v7860_v16, %v7863_v53 }
0xaa89   : > { %9553 = vmatmul.mubr.msk.f32.vlgmr.msra.gmra.mrb[90].mxu1 %vm404_vm2, %v7865_v6 }
0xaa8a   : > { %9838 = vmatpush3.bf16.msra.mxu1 %v10532_v39  ;;  %9566 = vmatprep.mubr.msk.f32.mxu1 %vm10224_vm0, %v10223_v5 }
0xaa8b   : > { %9842 = vmatprep.subr.bf16.mxu1 %v10227_v49 }
0xab5c   : > { %v7935_v9 = vpop.f32.mrb[90].mxu1 }
0xab5d   : > { %v7936_v33 = vadd.f32 %v7935_v9, %v10487_v40  ;;  %v9554_v11 = vpop.f32.mrb[91].mxu1 }
0xab5f   : > { %10156 = vtanh.f32 %v7936_v33 }
0xab69   : > { %v10157_v38 = vpop.eup %10156 }
0xab6a   : > { %7944 = vrot.lane.b32.xlu1 %v10157_v38, %s10225_s27  ;;  %v7940_v18 = vmul.f32 0.5, %v10157_v38 }
0xab6c   : > { %v7941_v15 = vadd.f32 0.5, %v7940_v18 }
0xab6e   : > { %v7942_v39 = vmul.f32 %v7941_v15, %v11763_v10 }
0xabdc   : > { %v7945_v32 = vpop.permute.xlu1 %7944 }
0xabdd   : > { %v7947_v12 = vmul.f32 %v7945_v32, %v7941_v15 }
0xabdf   : > { %7949 = vrot.lane.b32.xlu0 %v7947_v12, %s10226_s28 }
0xac51   : > { %v7950_v55 = vpop.permute.xlu0 %7949 }
0xac52   : > { %v7952_v30 = vadd.f32 %v7950_v55, %v7942_v39 }
0xac54   : > { %10158 = vtanh.f32 %v7952_v30 }
0xac5e   : > { %v10159_v49 = vpop.eup %10158 }
0xac5f   : > { %7955 = vrot.lane.b32.xlu1 %v10159_v49, %s10228_s5 }
0xac63   : > { %7963 = vrot.lane.b32.xlu1 %v11789_v61, %s10225_s27 }
0xacd1   : > { %v7956_v40 = vpop.permute.xlu1 %7955 }
0xacd2   : > { %v7958_v19 = vmul.f32 %v7956_v40, %v7941_v15 }
0xacd4   : > { %7960 = vrot.lane.b32.xlu0 %v7958_v19, %s10229_s6 }
0xacd5   : > { %v7964_v20 = vpop.permute.xlu1 %7963 }
0xad46   : > { %v7961_v43 = vpop.permute.xlu0 %7960 }
0xad47   : > { %v7966_v25 = vsel %vm300_vm1, %v7961_v43, %v7964_v20 }
0xad48   : > { %9560 = vmatmul.mubr.msk.f32.vlgmr.msra.gmra.mrb[68].mxu0 %vm404_vm2, %v7966_v25 }
0xad49   : > { %9841 = vmatpush3.bf16.msra.mxu0 %v10561_v17  ;;  %9573 = vmatprep.mubr.msk.f32.mxu0 %vm10224_vm0, %v10223_v5 }
0xae1b   : > { %v8036_v10 = vpop.f32.mrb[68].mxu0 }
0xae1c   : > { %v8037_v21 = vadd.f32 %v8036_v10, %v10518_v13  ;;  %v9561_v57 = vpop.f32.mrb[69].mxu0 }
0xae1e   : > { %10160 = vtanh.f32 %v8037_v21 }
0xae28   : > { %v10161_v61 = vpop.eup %10160 }
0xae29   : > { %8045 = vrot.lane.b32.xlu0 %v10161_v61, %s10225_s27  ;;  %v8041_v41 = vmul.f32 0.5, %v10161_v61 }
0xae2b   : > { %v8042_v42 = vadd.f32 0.5, %v8041_v41 }
0xae2d   : > { %v8043_v54 = vmul.f32 %v8042_v42, %v11783_v14 }
0xae9b   : > { %v8046_v8 = vpop.permute.xlu0 %8045 }
0xae9c   : > { %v8048_v29 = vmul.f32 %v8046_v8, %v8042_v42 }
0xae9e   : > { %8050 = vrot.lane.b32.xlu1 %v8048_v29, %s10226_s28 }
0xaf10   : > { %v8051_v17 = vpop.permute.xlu1 %8050 }
0xaf11   : > { %v8053_v56 = vadd.f32 %v8051_v17, %v8043_v54 }
0xaf13   : > { %10162 = vtanh.f32 %v8053_v56 }
0xaf1d   : > { %v10163_v47 = vpop.eup %10162 }
0xaf1e   : > { %8056 = vrot.lane.b32.xlu0 %v10163_v47, %s10228_s5 }
0xaf22   : > { %8064 = vrot.lane.b32.xlu0 %v11811_v2, %s10225_s27 }
0xaf90   : > { %v8057_v13 = vpop.permute.xlu0 %8056 }
0xaf91   : > { %v8059_v27 = vmul.f32 %v8057_v13, %v8042_v42 }
0xaf93   : > { %8061 = vrot.lane.b32.xlu1 %v8059_v27, %s10229_s6 }
0xaf94   : > { %v8065_v31 = vpop.permute.xlu0 %8064 }
0xb005   : > { %v8062_v4 = vpop.permute.xlu1 %8061 }
0xb006   : > { %v8067_v34 = vsel %vm300_vm1, %v8062_v4, %v8065_v31 }
0xb007   : > { %9567 = vmatmul.mubr.msk.f32.vlgmr.msra.gmra.mrb[92].mxu1 %vm404_vm2, %v8067_v34 }
0xb008   : > { %9844 = vmatpush3.bf16.msra.mxu1 %v10596_v0  ;;  %9580 = vmatprep.mubr.msk.f32.mxu1 %vm10224_vm0, %v10223_v5 }
0xb0da   : > { %v8137_v14 = vpop.f32.mrb[92].mxu1 }
0xb0db   : > { %v8138_v3 = vadd.f32 %v8137_v14, %v10547_v51  ;;  %v9568_v28 = vpop.f32.mrb[93].mxu1  ;;  %v7333_v51 = vadd.f32 %v11871_v37, %v10793_v1 }
0xb0dd   : > { %10164 = vtanh.f32 %v8138_v3 }
0xb0e7   : > { %v10165_v2 = vpop.eup %10164 }
0xb0e8   : > { %8146 = vrot.lane.b32.xlu1 %v10165_v2, %s10225_s27  ;;  %v8142_v48 = vmul.f32 0.5, %v10165_v2 }
0xb0ea   : > { %v8143_v63 = vadd.f32 0.5, %v8142_v48 }
0xb0ec   : > { %v8144_v44 = vmul.f32 %v8143_v63, %v11803_v24 }
0xb15a   : > { %v8147_v59 = vpop.permute.xlu1 %8146 }
0xb15b   : > { %v8149_v62 = vmul.f32 %v8147_v59, %v8143_v63 }
0xb15d   : > { %8151 = vrot.lane.b32.xlu0 %v8149_v62, %s10226_s28 }
0xb1cf   : > { %v8152_v0 = vpop.permute.xlu0 %8151 }
0xb1d0   : > { %v8154_v7 = vadd.f32 %v8152_v0, %v8144_v44 }
0xb1d2   : > { %10166 = vtanh.f32 %v8154_v7 }
0xb1d3   : > { %10168 = vtanh.f32 %v7333_v51 }
0xb1dc   : > { %v10167_v5 = vpop.eup %10166 }
0xb1dd   : > { %8157 = vrot.lane.b32.xlu1 %v10167_v5, %s10228_s5  ;;  %v10169_v16 = vpop.eup %10168 }
0xb1de   : > { %v7337_v24 = vmul.f32 0.5, %v10169_v16 }
0xb1e0   : > { %v7338_v11 = vadd.f32 0.5, %v7337_v24 }
0xb1e1   : > { %8165 = vrot.lane.b32.xlu1 %v11854_v35, %s10225_s27 }
0xb1e2   : > { %v7339_v37 = vmul.f32 %v7338_v11, %v11836_v45 }
0xb24f   : > { %v8158_v50 = vpop.permute.xlu1 %8157 }
0xb250   : > { %v8160_v53 = vmul.f32 %v8158_v50, %v8143_v63  ;;  %v8709_v50 = vld [vmem:[%s12047_s1 + $0x130] ss:$0 sm:$0xff] }
0xb252   : > { %8162 = vrot.lane.b32.xlu0 %v8160_v53, %s10229_s6 }
0xb253   : > { %v8166_v6 = vpop.permute.xlu1 %8165 }
0xb256   : > { %7341 = vrot.lane.b32.xlu0 %v10169_v16, %s10225_s27 }
0xb2c4   : > { %v8163_v9 = vpop.permute.xlu0 %8162 }
0xb2c5   : > { %v8168_v33 = vsel %vm300_vm1, %v8163_v9, %v8166_v6 }
0xb2c6   : > { %9574 = vmatmul.mubr.msk.f32.vlgmr.msra.gmra.mrb[70].mxu0 %vm404_vm2, %v8168_v33 }
0xb2c8   : > { %v7342_v35 = vpop.permute.xlu0 %7341 }
0xb2c9   : > { %v7344_v38 = vmul.f32 %v7342_v35, %v7338_v11 }
0xb2cb   : > { %7346 = vrot.lane.b32.xlu0 %v7344_v38, %s10226_s28 }
0xb33d   : > { %v7347_v18 = vpop.permute.xlu0 %7346 }
0xb33e   : > { %v7349_v15 = vadd.f32 %v7347_v18, %v7339_v37 }
0xb340   : > { %10170 = vtanh.f32 %v7349_v15 }
0xb34a   : > { %v10171_v32 = vpop.eup %10170 }
0xb34b   : > { %7352 = vrot.lane.b32.xlu0 %v10171_v32, %s10228_s5 }
0xb399   : > { %v8238_v12 = vpop.f32.mrb[70].mxu0 }
0xb39a   : > { %v8239_v39 = vadd.f32 %v8238_v12, %v10582_v26  ;;  %v9575_v55 = vpop.f32.mrb[71].mxu0 }
0xb39c   : > { %10172 = vtanh.f32 %v8239_v39 }
0xb3a6   : > { %v10173_v30 = vpop.eup %10172 }
0xb3a7   : > { %8247 = vrot.lane.b32.xlu1 %v10173_v30, %s10225_s27  ;;  %v8243_v49 = vmul.f32 0.5, %v10173_v30 }
0xb3a9   : > { %v8244_v40 = vadd.f32 0.5, %v8243_v49 }
0xb3ab   : > { %v8245_v45 = vmul.f32 %v8244_v40, %v11842_v22 }
0xb3bd   : > { %v7353_v21 = vpop.permute.xlu0 %7352 }
0xb3be   : > { %v7355_v26 = vmul.f32 %v7353_v21, %v7338_v11 }
0xb419   : > { %v8248_v19 = vpop.permute.xlu1 %8247 }
0xb41a   : > { %v8250_v20 = vmul.f32 %v8248_v19, %v8244_v40 }
0xb41c   : > { %8252 = vrot.lane.b32.xlu1 %v8250_v20, %s10226_s28 }
0xb48e   : > { %v8253_v43 = vpop.permute.xlu1 %8252 }
0xb48f   : > { %v8255_v25 = vadd.f32 %v8253_v43, %v8245_v45 }
0xb491   : > { %10174 = vtanh.f32 %v8255_v25 }
0xb49b   : > { %v10175_v10 = vpop.eup %10174 }
0xb49c   : > { %8258 = vrot.lane.b32.xlu1 %v10175_v10, %s10228_s5 }
0xb4a0   : > { %8266 = vrot.lane.b32.xlu1 %v7355_v26, %s10225_s27 }
0xb50e   : > { %v8259_v57 = vpop.permute.xlu1 %8258 }
0xb50f   : > { %v8261_v61 = vmul.f32 %v8259_v57, %v8244_v40 }
0xb511   : > { %8263 = vrot.lane.b32.xlu0 %v8261_v61, %s10229_s6 }
0xb512   : > { %v8267_v41 = vpop.permute.xlu1 %8266 }
0xb583   : > { %v8264_v42 = vpop.permute.xlu0 %8263 }
0xb584   : > { %v8269_v8 = vsel %vm300_vm1, %v8264_v42, %v8267_v41 }
0xb585   : > { %9581 = vmatmul.mubr.msk.f32.vlgmr.msra.gmra.mrb[94].mxu1 %vm404_vm2, %v8269_v8 }
0xb658   : > { %v8339_v22 = vpop.f32.mrb[94].mxu1 }
0xb659   : > { %v8340_v29 = vadd.f32 %v8339_v22, %v10793_v1  ;;  %v9582_v54 = vpop.f32.mrb[95].mxu1 }
0xb65b   : > { %10176 = vtanh.f32 %v8340_v29 }
0xb665   : > { %v10177_v17 = vpop.eup %10176 }
0xb666   : > { %8348 = vrot.lane.b32.xlu0 %v10177_v17, %s10225_s27  ;;  %v8344_v56 = vmul.f32 0.5, %v10177_v17 }
0xb668   : > { %v8345_v47 = vadd.f32 0.5, %v8344_v56 }
0xb66a   : > { %v8346_v1 = vmul.f32 %v8345_v47, %v7349_v15 }
0xb6d8   : > { %v8349_v13 = vpop.permute.xlu0 %8348 }
0xb6d9   : > { %v8351_v27 = vmul.f32 %v8349_v13, %v8345_v47 }
0xb6db   : > { %8353 = vrot.lane.b32.xlu1 %v8351_v27, %s10226_s28 }
0xb6df   : > { %1315 = vrot.lane.b32.xlu1 %v10841_v60, %s10229_s6  ;;  %v181_v60 = vld [vmem:[%s12047_s1 + $0x128] sm:$0xff] }
0xb6e0   : > { %9583 = vmatprep.subr.mxu0 %v181_v60 }
0xb6e1   : > { %9584 = vmatpush3.msra.mxu0 %v181_v60 }
0xb6e3   : > { %3329 = vrot.lane.b32.xlu1 %v11246_v36, %s10229_s6 }
0xb6e7   : > { %5343 = vrot.lane.b32.xlu1 %v11651_v58, %s10229_s6 }
0xb6eb   : > { %7357 = vrot.lane.b32.xlu1 %v7355_v26, %s10229_s6 }
0xb74d   : > { %v8354_v31 = vpop.permute.xlu1 %8353 }
0xb74e   : > { %v8356_v4 = vadd.f32 %v8354_v31, %v8346_v1 }
0xb750   : > { %10178 = vtanh.f32 %v8356_v4 }
0xb751   : > { %v1316_v34 = vpop.permute.xlu1 %1315 }
0xb752   : > { %1318 = vst.msk [vmem:[#allocation2] sm:$0xff] %vm300_vm1, %v1316_v34 }
0xb755   : > { %v3330_v14 = vpop.permute.xlu1 %3329 }
0xb756   : > { %3332 = vst.msk [vmem:[#allocation2 + $0x10] sm:$0xff] %vm300_vm1, %v3330_v14 }
0xb759   : > { %v5344_v36 = vpop.permute.xlu1 %5343  ;;  %v8368_v58 = vld [vmem:[#allocation2] sm:$0xff] }
0xb75a   : > { %v10179_v3 = vpop.eup %10178  ;;  %5346 = vst.msk [vmem:[#allocation2 + $0x20] sm:$0xff] %vm300_vm1, %v5344_v36  ;;  %9585 = vmatprep.mubr.msk.f32.mxu0 %vm300_vm1, %v8368_v58 }
0xb75b   : > { %8359 = vrot.lane.b32.xlu0 %v10179_v3, %s10228_s5 }
0xb75d   : > { %v7358_v28 = vpop.permute.xlu1 %7357 }
0xb75e   : > { %7360 = vst.msk [vmem:[#allocation2 + $0x30] sm:$0xff] %vm300_vm1, %v7358_v28 }
0xb75f   : > { %2322 = vrot.lane.b32.xlu0 %v11041_v46, %s10229_s6  ;;  %v8370_v46 = vld [vmem:[#allocation2 + $0x10] sm:$0xff] }
0xb763   : > { %4336 = vrot.lane.b32.xlu0 %v11446_v52, %s10229_s6 }
0xb765   : > { %v8374_v7 = vld [vmem:[#allocation2 + $0x30] sm:$0xff] }
0xb767   : > { %6350 = vrot.lane.b32.xlu0 %v11848_v23, %s10229_s6  ;;  %v8372_v23 = vld [vmem:[#allocation2 + $0x20] sm:$0xff] }
0xb7cd   : > { %v8360_v2 = vpop.permute.xlu0 %8359 }
0xb7ce   : > { %v8362_v48 = vmul.f32 %v8360_v2, %v8345_v47 }
0xb7d0   : > { %8364 = vrot.lane.b32.xlu0 %v8362_v48, %s10229_s6 }
0xb7d1   : > { %v2323_v63 = vpop.permute.xlu0 %2322 }
0xb7d2   : > { %2325 = vst.msk [vmem:[#allocation2 + $0x8] sm:$0xff] %vm300_vm1, %v2323_v63 }
0xb7d5   : > { %v4337_v59 = vpop.permute.xlu0 %4336 }
0xb7d6   : > { %4339 = vst.msk [vmem:[#allocation2 + $0x18] sm:$0xff] %vm300_vm1, %v4337_v59 }
0xb7d9   : > { %v6351_v62 = vpop.permute.xlu0 %6350  ;;  %v8369_v44 = vld [vmem:[#allocation2 + $0x8] sm:$0xff] }
0xb7da   : > { %6353 = vst.msk [vmem:[#allocation2 + $0x28] sm:$0xff] %vm300_vm1, %v6351_v62  ;;  %9586 = vmatmul.mubr.msk.f32.vlgmr.msra.gmra.mrb[72].mxu0 %vm300_vm1, %v8369_v44 }
0xb7db   : > { %9588 = vmatprep.mubr.msk.f32.mxu0 %vm300_vm1, %v8370_v46 }
0xb7dd   : > { %v8371_v52 = vld [vmem:[#allocation2 + $0x18] sm:$0xff] }
0xb7de   : > { %9589 = vmatmul.mubr.msk.f32.gmra.mrb[74].mxu0 %vm300_vm1, %v8371_v52 }
0xb7df   : > { %9591 = vmatprep.mubr.msk.f32.mxu0 %vm300_vm1, %v8372_v23 }
0xb7e1   : > { %v8373_v0 = vld [vmem:[#allocation2 + $0x28] sm:$0xff] }
0xb7e2   : > { %9592 = vmatmul.mubr.msk.f32.gmra.mrb[76].mxu0 %vm300_vm1, %v8373_v0 }
0xb7e3   : > { %9594 = vmatprep.mubr.msk.f32.mxu0 %vm300_vm1, %v8374_v7 }
0xb842   : > { %v8365_v5 = vpop.permute.xlu0 %8364 }
0xb843   : > { %8367 = vst.msk [vmem:[#allocation2 + $0x38] sm:$0xff] %vm300_vm1, %v8365_v5 }
0xb84a   : > { %v8375_v51 = vld [vmem:[#allocation2 + $0x38] sm:$0xff] }
0xb84b   : > { %9595 = vmatmul.mubr.msk.f32.gmra.mrb[78].mxu0 %vm300_vm1, %v8375_v51 }
0xb8ad   : > { %v9587_v53 = vpop.f32.mrb[72].mxu0 }
0xb8ae   : > { %v8476_v16 = vadd.f32 %v9587_v53, %v8709_v50  ;;  %v8470_v24 = vpop.f32.mrb[73].mxu0 }
0xb8af   : > { %v8471_v6 = vadd.f32 %v8709_v50, %v8470_v24 }
0xb8b0   : > { %v8719_v9 = vmul.f32 -1.442695, %v8476_v16 }
0xb8b1   : > { %v8718_v33 = vmul.f32 -1.442695, %v8471_v6  ;;  %v9590_v11 = vpop.f32.mrb[74].mxu0 }
0xb8b2   : > { %10180 = vpow2.f32 %v8719_v9  ;;  %v8486_v35 = vadd.f32 %v9590_v11, %v8709_v50  ;;  %v8480_v38 = vpop.f32.mrb[75].mxu0 }
0xb8b3   : > { %10182 = vpow2.f32 %v8718_v33  ;;  %v8481_v37 = vadd.f32 %v8709_v50, %v8480_v38 }
0xb8b4   : > { %v8721_v18 = vmul.f32 -1.442695, %v8486_v35 }
0xb8b5   : > { %v8720_v15 = vmul.f32 -1.442695, %v8481_v37  ;;  %v9593_v32 = vpop.f32.mrb[76].mxu0 }
0xb8b6   : > { %10184 = vpow2.f32 %v8721_v18  ;;  %v8496_v12 = vadd.f32 %v9593_v32, %v8709_v50  ;;  %v8490_v39 = vpop.f32.mrb[77].mxu0 }
0xb8b7   : > { %10186 = vpow2.f32 %v8720_v15  ;;  %v8491_v55 = vadd.f32 %v8709_v50, %v8490_v39 }
0xb8b8   : > { %v8723_v30 = vmul.f32 -1.442695, %v8496_v12 }
0xb8b9   : > { %v8722_v49 = vmul.f32 -1.442695, %v8491_v55 }
0xb8ba   : > { %10188 = vpow2.f32 %v8723_v30 }
0xb8bb   : > { %10190 = vpow2.f32 %v8722_v49 }
0xb8bc   : > { %v10181_v40 = vpop.eup %10180 }
0xb8bd   : > { %v10183_v19 = vpop.eup %10182  ;;  %v8534_v20 = vadd.f32 1.0, %v10181_v40 }
0xb8be   : > { %v8533_v45 = vadd.f32 1.0, %v10183_v19 }
0xb8bf   : > { %10192 = vrcp.f32 %v8534_v20 }
0xb8c0   : > { %v10185_v43 = vpop.eup %10184  ;;  %10194 = vrcp.f32 %v8533_v45 }
0xb8c1   : > { %v10187_v25 = vpop.eup %10186  ;;  %v8536_v10 = vadd.f32 1.0, %v10185_v43 }
0xb8c2   : > { %v8535_v21 = vadd.f32 1.0, %v10187_v25 }
0xb8c3   : > { %10196 = vrcp.f32 %v8536_v10 }
0xb8c4   : > { %v10189_v26 = vpop.eup %10188  ;;  %10198 = vrcp.f32 %v8535_v21 }
0xb8c5   : > { %v10191_v57 = vpop.eup %10190  ;;  %v8538_v61 = vadd.f32 1.0, %v10189_v26 }
0xb8c6   : > { %v8537_v41 = vadd.f32 1.0, %v10191_v57 }
0xb8c7   : > { %10200 = vrcp.f32 %v8538_v61 }
0xb8c8   : > { %10202 = vrcp.f32 %v8537_v41 }
0xb8c9   : > { %v10193_v42 = vpop.eup %10192 }
0xb8ca   : > { %v10195_v8 = vpop.eup %10194  ;;  %8559 = vst.msk [vmem:[%s12025_s8 + $0x8] sm:$0xff] %vm8557_vm3, %v10193_v42 }
0xb8cb   : > { %8558 = vst.msk [vmem:[%s12025_s8] sm:$0xff] %vm8557_vm3, %v10195_v8 }
0xb8cd   : > { %v10197_v22 = vpop.eup %10196 }
0xb8ce   : > { %v10199_v29 = vpop.eup %10198  ;;  %8561 = vst.msk [vmem:[%s12025_s8 + $0x18] sm:$0xff] %vm8557_vm3, %v10197_v22 }
0xb8cf   : > { %8560 = vst.msk [vmem:[%s12025_s8 + $0x10] sm:$0xff] %vm8557_vm3, %v10199_v29 }
0xb8d1   : > { %v10201_v54 = vpop.eup %10200 }
0xb8d2   : > { %v10203_v17 = vpop.eup %10202  ;;  %8563 = vst.msk [vmem:[%s12025_s8 + $0x28] sm:$0xff] %vm8557_vm3, %v10201_v54 }
0xb8d3   : > { %8562 = vst.msk [vmem:[%s12025_s8 + $0x20] sm:$0xff] %vm8557_vm3, %v10203_v17 }
0xb91e   : > { %v9596_v56 = vpop.f32.mrb[78].mxu0 }
0xb91f   : > { %v8506_v47 = vadd.f32 %v9596_v56, %v8709_v50  ;;  %v8500_v13 = vpop.f32.mrb[79].mxu0 }
0xb920   : > { %v8501_v27 = vadd.f32 %v8709_v50, %v8500_v13 }
0xb921   : > { %v8725_v1 = vmul.f32 -1.442695, %v8506_v47 }
0xb922   : > { %v8724_v31 = vmul.f32 -1.442695, %v8501_v27 }
0xb923   : > { %10204 = vpow2.f32 %v8725_v1 }
0xb924   : > { %10206 = vpow2.f32 %v8724_v31 }
0xb92d   : > { %v10205_v4 = vpop.eup %10204 }
0xb92e   : > { %v10207_v34 = vpop.eup %10206  ;;  %v8540_v14 = vadd.f32 1.0, %v10205_v4 }
0xb92f   : > { %v8539_v60 = vadd.f32 1.0, %v10207_v34 }
0xb930   : > { %10208 = vrcp.f32 %v8540_v14 }
0xb931   : > { %10210 = vrcp.f32 %v8539_v60 }
0xb93a   : > { %v10209_v36 = vpop.eup %10208 }
0xb93b   : > { %v10211_v58 = vpop.eup %10210  ;;  %8565 = vst.msk [vmem:[%s12025_s8 + $0x38] sm:$0xff] %vm8557_vm3, %v10209_v36 }
0xb93c   : > { %8564 = vst.msk [vmem:[%s12025_s8 + $0x30] sm:$0xff] %vm8557_vm3, %v10211_v58 }
0xb93d PF: > { %s12_s9 = sadd.s32 1, %s10221_s9  }
0xb93e   : > { %p9_p4 = scmp.ge.s32.totalorder %s12_s9, 4  }
0xb940   :  { %11 = sbr.rel (!%p9_p4) target bundleno = 1 (0x1), region = 58 }

</bundles_post_ra>
